<compile_context>
chip_gen: v6e
topology: v6e:2x2x1
jax: 0.10.0
libtpu: 0.0.40
codegen_flags: <defaults>
</compile_context>

<pallas_src>
import functools

import jax
import jax.numpy as jnp
from jax.experimental import pallas as pl
from jax.experimental.pallas import tpu as pltpu


def _lstm_kernel(x_ref, wih0_ref, whh0_ref, b0_ref, w1_ref, b1_ref,
                 fcw_ref, fcb_ref, out_ref, xp_ref, *, T, Bp):
    H = whh0_ref.shape[0]

    # Prologue: layer-0 input projection for ALL timesteps at once (no recurrent
    # dependency), plus the combined i/f/g/o bias.  Result kept in VMEM scratch.
    xp_ref[...] = (jnp.dot(x_ref[...], wih0_ref[...],
                           preferred_element_type=jnp.float32)
                   + b0_ref[...])

    whh0 = whh0_ref[...]
    w1 = w1_ref[...]
    b1 = b1_ref[...]

    def gates_to_hc(gates, c):
        # PyTorch gate order: i, f, g, o.  H is a multiple of 128 so each slice
        # is 128-lane aligned (no XLU lane shuffles).
        i = jax.nn.sigmoid(gates[:, 0 * H:1 * H])
        f = jax.nn.sigmoid(gates[:, 1 * H:2 * H])
        g = jnp.tanh(gates[:, 2 * H:3 * H])
        o = jax.nn.sigmoid(gates[:, 3 * H:4 * H])
        c_new = f * c + i * g
        h_new = o * jnp.tanh(c_new)
        return h_new, c_new

    zeros = jnp.zeros((Bp, H), jnp.float32)   # h0 = c0 = 0, as in the nn.Module
    h0, c0, h1, c1 = zeros, zeros, zeros, zeros

    # Statically unrolled recurrence (T is small and known at trace time).
    for t in range(T):
        # Layer 0: only the recurrent matmul remains in the loop.
        g0 = xp_ref[t * Bp:(t + 1) * Bp, :] + jnp.dot(
            h0, whh0, preferred_element_type=jnp.float32)
        h0, c0 = gates_to_hc(g0, c0)

        # Layer 1: single fused matmul [h0, h1] @ [W_ih1; W_hh1].
        g1 = jnp.dot(jnp.concatenate([h0, h1], axis=-1), w1,
                     preferred_element_type=jnp.float32) + b1
        h1, c1 = gates_to_hc(g1, c1)

    # Fused, lane-dense output head: columns [0:O) = fc1, [O] = fc2, rest zero.
    out_ref[...] = (jnp.dot(h1, fcw_ref[...],
                            preferred_element_type=jnp.float32)
                    + fcb_ref[...]).astype(out_ref.dtype)


def lstm_model_forward(x, params):
    """x: (B, T, D) batch_first, float32.  Returns (y_a, y_t) like the nn.Module."""
    B, T, D = x.shape
    H = params["whh0"].shape[0]          # (H, 4H)
    O = params["fc1w"].shape[1]          # (H, O)

    Bp = -(-B // 8) * 8                  # pad batch to sublane width (>= 8)
    OUT = -(-(O + 1) // 128) * 128       # lane-dense fused-head width

    # Pad batch, go time-major, flatten to (T*Bp, D) rows grouped by timestep.
    x_p = jnp.zeros((Bp, T, D), jnp.float32).at[:B].set(x)
    x_tm = jnp.transpose(x_p, (1, 0, 2)).reshape(T * Bp, D)

    # Combined biases and fused layer-1 / head weights (built once, outside).
    b0 = (params["bih0"] + params["bhh0"]).reshape(1, 4 * H)
    b1 = (params["bih1"] + params["bhh1"]).reshape(1, 4 * H)
    w1 = jnp.concatenate([params["wih1"], params["whh1"]], axis=0)   # (2H, 4H)

    fcw = jnp.zeros((H, OUT), jnp.float32)
    fcw = fcw.at[:, :O].set(params["fc1w"]).at[:, O:O + 1].set(params["fc2w"])
    fcb = jnp.zeros((1, OUT), jnp.float32)
    fcb = fcb.at[:, :O].set(params["fc1b"]).at[:, O:O + 1].set(params["fc2b"])

    vmem = pl.BlockSpec(memory_space=pltpu.MemorySpace.VMEM)

    out = pl.pallas_call(
        functools.partial(_lstm_kernel, T=T, Bp=Bp),
        out_shape=jax.ShapeDtypeStruct((Bp, OUT), jnp.float32),
        in_specs=[vmem] * 8,
        out_specs=vmem,
        scratch_shapes=[pltpu.VMEM((T * Bp, 4 * H), jnp.float32)],
    )(x_tm, params["wih0"], params["whh0"], b0, w1, b1, fcw, fcb)

    # TODO(synk): if B ever grows large, split the (padded) batch across v7x's
    # two TensorCores via a leading parallel grid axis; the time axis stays serial.
    return out[:B, :O], out[:B, O:O + 1]


def _reference_forward(x, params):
    """Pure-JAX reference matching nn.LSTM(batch_first, 2 layers) + fc heads."""
    B, T, D = x.shape
    H = params["whh0"].shape[0]

    def cell(x_in, h, c, wih, whh, b):
        gates = x_in @ wih + h @ whh + b
        i = jax.nn.sigmoid(gates[:, 0 * H:1 * H])
        f = jax.nn.sigmoid(gates[:, 1 * H:2 * H])
        g = jnp.tanh(gates[:, 2 * H:3 * H])
        o = jax.nn.sigmoid(gates[:, 3 * H:4 * H])
        c_new = f * c + i * g
        return o * jnp.tanh(c_new), c_new

    b0 = (params["bih0"] + params["bhh0"])[None, :]
    b1 = (params["bih1"] + params["bhh1"])[None, :]

    def step(carry, x_t):
        h0, c0, h1, c1 = carry
        h0, c0 = cell(x_t, h0, c0, params["wih0"], params["whh0"], b0)
        h1, c1 = cell(h0, h1, c1, params["wih1"], params["whh1"], b1)
        return (h0, c0, h1, c1), None

    init = tuple(jnp.zeros((B, H), jnp.float32) for _ in range(4))
    (h0, c0, h1, c1), _ = jax.lax.scan(step, init, jnp.transpose(x, (1, 0, 2)))
    y_a = h1 @ params["fc1w"] + params["fc1b"]
    y_t = h1 @ params["fc2w"] + params["fc2b"]
    return y_a, y_t


def init_params(key, input_dim, hidden_dim, output_dim):
    """Deterministic synthetic init (uniform +-1/sqrt(H), like PyTorch's default)."""
    H = hidden_dim
    k = 1.0 / jnp.sqrt(jnp.float32(H))
    keys = jax.random.split(key, 12)
    u = lambda kk, shape: jax.random.uniform(kk, shape, jnp.float32, -k, k)
    return {
        # LSTM layer 0 (stored pre-transposed: (in, 4H) / (H, 4H))
        "wih0": u(keys[0], (input_dim, 4 * H)),
        "whh0": u(keys[1], (H, 4 * H)),
        "bih0": u(keys[2], (4 * H,)),
        "bhh0": u(keys[3], (4 * H,)),
        # LSTM layer 1
        "wih1": u(keys[4], (H, 4 * H)),
        "whh1": u(keys[5], (H, 4 * H)),
        "bih1": u(keys[6], (4 * H,)),
        "bhh1": u(keys[7], (4 * H,)),
        # fc1: hidden -> output_dim ; fc2: hidden -> 1 (pre-transposed, bias 2-D)
        "fc1w": u(keys[8], (H, output_dim)),
        "fc1b": u(keys[9], (1, output_dim)),
        "fc2w": u(keys[10], (H, 1)),
        "fc2b": u(keys[11], (1, 1)),
    }


if __name__ == "__main__":
    # Shapes consistent with the module: batch=2, seq=8,
    # input_dim = len(chars)+5 -> 32, hidden_dim = 128 (as in the spec),
    # output_dim = len(chars) -> 27, num_layers = 2.
    B, T, D, H, O = 2, 8, 32, 128, 27

    key = jax.random.PRNGKey(0)
    kx, kp = jax.random.split(key)
    x = jax.random.normal(kx, (B, T, D), jnp.float32)
    params = init_params(kp, D, H, O)

    fwd = jax.jit(lstm_model_forward)
    y_a, y_t = jax.block_until_ready(fwd(x, params))

    ra, rt = _reference_forward(x, params)
    assert y_a.shape == (B, O) and y_t.shape == (B, 1)
    assert jnp.allclose(y_a, ra, atol=1e-4), "fc1 head mismatch vs reference"
    assert jnp.allclose(y_t, rt, atol=1e-4), "fc2 head mismatch vs reference"

    print("KERNEL_OK")
</pallas_src>

<mosaic_0001>
module attributes {stable_mosaic.version = 11 : i64} {
  func.func @_lstm_kernel(%arg0: memref<64x32xf32, #tpu.memory_space<vmem>>, %arg1: memref<32x512xf32, #tpu.memory_space<vmem>>, %arg2: memref<128x512xf32, #tpu.memory_space<vmem>>, %arg3: memref<1x512xf32, #tpu.memory_space<vmem>>, %arg4: memref<256x512xf32, #tpu.memory_space<vmem>>, %arg5: memref<1x512xf32, #tpu.memory_space<vmem>>, %arg6: memref<128x128xf32, #tpu.memory_space<vmem>>, %arg7: memref<1x128xf32, #tpu.memory_space<vmem>>, %arg8: memref<8x128xf32, #tpu.memory_space<vmem>>, %arg9: memref<64x512xf32, #tpu.memory_space<vmem>>) attributes {dimension_semantics = [], scalar_prefetch = 0 : i64, scratch_operands = 1 : i64, tpu.core_type = #tpu.core_type<tc>} {
    %c0 = arith.constant 0 : index
    %c0_0 = arith.constant 0 : index
    %0 = vector.load %arg0[%c0, %c0_0] : memref<64x32xf32, #tpu.memory_space<vmem>>, vector<64x32xf32>
    %c0_1 = arith.constant 0 : index
    %c0_2 = arith.constant 0 : index
    %1 = vector.load %arg1[%c0_1, %c0_2] : memref<32x512xf32, #tpu.memory_space<vmem>>, vector<32x512xf32>
    %cst = arith.constant dense<0.000000e+00> : vector<64x512xf32>
    %2 = tpu.matmul %0, %1, %cst {dimension_numbers = #tpu.dot_dimension_numbers<[1], [0], [0], [1], [0, 0, 1, 1], [], []>} : vector<64x32xf32>, vector<32x512xf32>, vector<64x512xf32> -> vector<64x512xf32>
    %c0_3 = arith.constant 0 : index
    %c0_4 = arith.constant 0 : index
    %3 = vector.load %arg3[%c0_3, %c0_4] : memref<1x512xf32, #tpu.memory_space<vmem>>, vector<1x512xf32>
    %4 = vector.broadcast %3 : vector<1x512xf32> to vector<64x512xf32>
    %5 = arith.addf %2, %4 : vector<64x512xf32>
    %c0_5 = arith.constant 0 : index
    %c0_6 = arith.constant 0 : index
    %6 = vector.load %arg9[%c0_5, %c0_6] : memref<64x512xf32, #tpu.memory_space<vmem>>, vector<64x512xf32>
    tpu.vector_store %arg9[%c0_5, %c0_6], %5 {strides = array<i32>} : memref<64x512xf32, #tpu.memory_space<vmem>>, vector<64x512xf32>,
    %c0_7 = arith.constant 0 : index
    %c0_8 = arith.constant 0 : index
    %7 = vector.load %arg2[%c0_7, %c0_8] : memref<128x512xf32, #tpu.memory_space<vmem>>, vector<128x512xf32>
    %c0_9 = arith.constant 0 : index
    %c0_10 = arith.constant 0 : index
    %8 = vector.load %arg4[%c0_9, %c0_10] : memref<256x512xf32, #tpu.memory_space<vmem>>, vector<256x512xf32>
    %c0_11 = arith.constant 0 : index
    %c0_12 = arith.constant 0 : index
    %9 = vector.load %arg5[%c0_11, %c0_12] : memref<1x512xf32, #tpu.memory_space<vmem>>, vector<1x512xf32>
    %cst_13 = arith.constant 0.000000e+00 : f32
    %10 = vector.broadcast %cst_13 : f32 to vector<8x128xf32>
    %c0_14 = arith.constant 0 : index
    %c0_15 = arith.constant 0 : index
    %11 = vector.load %arg9[%c0_14, %c0_15] : memref<64x512xf32, #tpu.memory_space<vmem>>, vector<8x512xf32>
    %cst_16 = arith.constant dense<0.000000e+00> : vector<8x512xf32>
    %12 = tpu.matmul %10, %7, %cst_16 {dimension_numbers = #tpu.dot_dimension_numbers<[1], [0], [0], [1], [0, 0, 1, 1], [], []>} : vector<8x128xf32>, vector<128x512xf32>, vector<8x512xf32> -> vector<8x512xf32>
    %13 = arith.addf %11, %12 : vector<8x512xf32>
    %14 = vector.extract_strided_slice %13 {offsets = [0, 0], sizes = [8, 128], strides = [1, 1]} : vector<8x512xf32> to vector<8x128xf32>
    %15 = arith.negf %14 : vector<8x128xf32>
    %16 = math.exp %15 : vector<8x128xf32>
    %cst_17 = arith.constant 1.000000e+00 : f32
    %17 = vector.broadcast %cst_17 : f32 to vector<8x128xf32>
    %18 = arith.addf %17, %16 : vector<8x128xf32>
    %19 = arith.divf %17, %18 : vector<8x128xf32>
    %20 = vector.extract_strided_slice %13 {offsets = [0, 128], sizes = [8, 128], strides = [1, 1]} : vector<8x512xf32> to vector<8x128xf32>
    %21 = arith.negf %20 : vector<8x128xf32>
    %22 = math.exp %21 : vector<8x128xf32>
    %cst_18 = arith.constant 1.000000e+00 : f32
    %23 = vector.broadcast %cst_18 : f32 to vector<8x128xf32>
    %24 = arith.addf %23, %22 : vector<8x128xf32>
    %25 = arith.divf %23, %24 : vector<8x128xf32>
    %26 = vector.extract_strided_slice %13 {offsets = [0, 256], sizes = [8, 128], strides = [1, 1]} : vector<8x512xf32> to vector<8x128xf32>
    %27 = math.tanh %26 : vector<8x128xf32>
    %28 = vector.extract_strided_slice %13 {offsets = [0, 384], sizes = [8, 128], strides = [1, 1]} : vector<8x512xf32> to vector<8x128xf32>
    %29 = arith.negf %28 : vector<8x128xf32>
    %30 = math.exp %29 : vector<8x128xf32>
    %cst_19 = arith.constant 1.000000e+00 : f32
    %31 = vector.broadcast %cst_19 : f32 to vector<8x128xf32>
    %32 = arith.addf %31, %30 : vector<8x128xf32>
    %33 = arith.divf %31, %32 : vector<8x128xf32>
    %34 = arith.mulf %25, %10 : vector<8x128xf32>
    %35 = arith.mulf %19, %27 : vector<8x128xf32>
    %36 = arith.addf %34, %35 : vector<8x128xf32>
    %37 = math.tanh %36 : vector<8x128xf32>
    %38 = arith.mulf %33, %37 : vector<8x128xf32>
    %39 = tpu.concatenate %38, %10 in 1 : vector<8x128xf32>, vector<8x128xf32> -> vector<8x256xf32>
    %cst_20 = arith.constant dense<0.000000e+00> : vector<8x512xf32>
    %40 = tpu.matmul %39, %8, %cst_20 {dimension_numbers = #tpu.dot_dimension_numbers<[1], [0], [0], [1], [0, 0, 1, 1], [], []>} : vector<8x256xf32>, vector<256x512xf32>, vector<8x512xf32> -> vector<8x512xf32>
    %41 = vector.broadcast %9 : vector<1x512xf32> to vector<8x512xf32>
    %42 = arith.addf %40, %41 : vector<8x512xf32>
    %43 = vector.extract_strided_slice %42 {offsets = [0, 0], sizes = [8, 128], strides = [1, 1]} : vector<8x512xf32> to vector<8x128xf32>
    %44 = arith.negf %43 : vector<8x128xf32>
    %45 = math.exp %44 : vector<8x128xf32>
    %cst_21 = arith.constant 1.000000e+00 : f32
    %46 = vector.broadcast %cst_21 : f32 to vector<8x128xf32>
    %47 = arith.addf %46, %45 : vector<8x128xf32>
    %48 = arith.divf %46, %47 : vector<8x128xf32>
    %49 = vector.extract_strided_slice %42 {offsets = [0, 128], sizes = [8, 128], strides = [1, 1]} : vector<8x512xf32> to vector<8x128xf32>
    %50 = arith.negf %49 : vector<8x128xf32>
    %51 = math.exp %50 : vector<8x128xf32>
    %cst_22 = arith.constant 1.000000e+00 : f32
    %52 = vector.broadcast %cst_22 : f32 to vector<8x128xf32>
    %53 = arith.addf %52, %51 : vector<8x128xf32>
    %54 = arith.divf %52, %53 : vector<8x128xf32>
    %55 = vector.extract_strided_slice %42 {offsets = [0, 256], sizes = [8, 128], strides = [1, 1]} : vector<8x512xf32> to vector<8x128xf32>
    %56 = math.tanh %55 : vector<8x128xf32>
    %57 = vector.extract_strided_slice %42 {offsets = [0, 384], sizes = [8, 128], strides = [1, 1]} : vector<8x512xf32> to vector<8x128xf32>
    %58 = arith.negf %57 : vector<8x128xf32>
    %59 = math.exp %58 : vector<8x128xf32>
    %cst_23 = arith.constant 1.000000e+00 : f32
    %60 = vector.broadcast %cst_23 : f32 to vector<8x128xf32>
    %61 = arith.addf %60, %59 : vector<8x128xf32>
    %62 = arith.divf %60, %61 : vector<8x128xf32>
    %63 = arith.mulf %54, %10 : vector<8x128xf32>
    %64 = arith.mulf %48, %56 : vector<8x128xf32>
    %65 = arith.addf %63, %64 : vector<8x128xf32>
    %66 = math.tanh %65 : vector<8x128xf32>
    %67 = arith.mulf %62, %66 : vector<8x128xf32>
    %c8 = arith.constant 8 : index
    %c0_24 = arith.constant 0 : index
    %68 = vector.load %arg9[%c8, %c0_24] : memref<64x512xf32, #tpu.memory_space<vmem>>, vector<8x512xf32>
    %cst_25 = arith.constant dense<0.000000e+00> : vector<8x512xf32>
    %69 = tpu.matmul %38, %7, %cst_25 {dimension_numbers = #tpu.dot_dimension_numbers<[1], [0], [0], [1], [0, 0, 1, 1], [], []>} : vector<8x128xf32>, vector<128x512xf32>, vector<8x512xf32> -> vector<8x512xf32>
    %70 = arith.addf %68, %69 : vector<8x512xf32>
    %71 = vector.extract_strided_slice %70 {offsets = [0, 0], sizes = [8, 128], strides = [1, 1]} : vector<8x512xf32> to vector<8x128xf32>
    %72 = arith.negf %71 : vector<8x128xf32>
    %73 = math.exp %72 : vector<8x128xf32>
    %cst_26 = arith.constant 1.000000e+00 : f32
    %74 = vector.broadcast %cst_26 : f32 to vector<8x128xf32>
    %75 = arith.addf %74, %73 : vector<8x128xf32>
    %76 = arith.divf %74, %75 : vector<8x128xf32>
    %77 = vector.extract_strided_slice %70 {offsets = [0, 128], sizes = [8, 128], strides = [1, 1]} : vector<8x512xf32> to vector<8x128xf32>
    %78 = arith.negf %77 : vector<8x128xf32>
    %79 = math.exp %78 : vector<8x128xf32>
    %cst_27 = arith.constant 1.000000e+00 : f32
    %80 = vector.broadcast %cst_27 : f32 to vector<8x128xf32>
    %81 = arith.addf %80, %79 : vector<8x128xf32>
    %82 = arith.divf %80, %81 : vector<8x128xf32>
    %83 = vector.extract_strided_slice %70 {offsets = [0, 256], sizes = [8, 128], strides = [1, 1]} : vector<8x512xf32> to vector<8x128xf32>
    %84 = math.tanh %83 : vector<8x128xf32>
    %85 = vector.extract_strided_slice %70 {offsets = [0, 384], sizes = [8, 128], strides = [1, 1]} : vector<8x512xf32> to vector<8x128xf32>
    %86 = arith.negf %85 : vector<8x128xf32>
    %87 = math.exp %86 : vector<8x128xf32>
    %cst_28 = arith.constant 1.000000e+00 : f32
    %88 = vector.broadcast %cst_28 : f32 to vector<8x128xf32>
    %89 = arith.addf %88, %87 : vector<8x128xf32>
    %90 = arith.divf %88, %89 : vector<8x128xf32>
    %91 = arith.mulf %82, %36 : vector<8x128xf32>
    %92 = arith.mulf %76, %84 : vector<8x128xf32>
    %93 = arith.addf %91, %92 : vector<8x128xf32>
    %94 = math.tanh %93 : vector<8x128xf32>
    %95 = arith.mulf %90, %94 : vector<8x128xf32>
    %96 = tpu.concatenate %95, %67 in 1 : vector<8x128xf32>, vector<8x128xf32> -> vector<8x256xf32>
    %cst_29 = arith.constant dense<0.000000e+00> : vector<8x512xf32>
    %97 = tpu.matmul %96, %8, %cst_29 {dimension_numbers = #tpu.dot_dimension_numbers<[1], [0], [0], [1], [0, 0, 1, 1], [], []>} : vector<8x256xf32>, vector<256x512xf32>, vector<8x512xf32> -> vector<8x512xf32>
    %98 = vector.broadcast %9 : vector<1x512xf32> to vector<8x512xf32>
    %99 = arith.addf %97, %98 : vector<8x512xf32>
    %100 = vector.extract_strided_slice %99 {offsets = [0, 0], sizes = [8, 128], strides = [1, 1]} : vector<8x512xf32> to vector<8x128xf32>
    %101 = arith.negf %100 : vector<8x128xf32>
    %102 = math.exp %101 : vector<8x128xf32>
    %cst_30 = arith.constant 1.000000e+00 : f32
    %103 = vector.broadcast %cst_30 : f32 to vector<8x128xf32>
    %104 = arith.addf %103, %102 : vector<8x128xf32>
    %105 = arith.divf %103, %104 : vector<8x128xf32>
    %106 = vector.extract_strided_slice %99 {offsets = [0, 128], sizes = [8, 128], strides = [1, 1]} : vector<8x512xf32> to vector<8x128xf32>
    %107 = arith.negf %106 : vector<8x128xf32>
    %108 = math.exp %107 : vector<8x128xf32>
    %cst_31 = arith.constant 1.000000e+00 : f32
    %109 = vector.broadcast %cst_31 : f32 to vector<8x128xf32>
    %110 = arith.addf %109, %108 : vector<8x128xf32>
    %111 = arith.divf %109, %110 : vector<8x128xf32>
    %112 = vector.extract_strided_slice %99 {offsets = [0, 256], sizes = [8, 128], strides = [1, 1]} : vector<8x512xf32> to vector<8x128xf32>
    %113 = math.tanh %112 : vector<8x128xf32>
    %114 = vector.extract_strided_slice %99 {offsets = [0, 384], sizes = [8, 128], strides = [1, 1]} : vector<8x512xf32> to vector<8x128xf32>
    %115 = arith.negf %114 : vector<8x128xf32>
    %116 = math.exp %115 : vector<8x128xf32>
    %cst_32 = arith.constant 1.000000e+00 : f32
    %117 = vector.broadcast %cst_32 : f32 to vector<8x128xf32>
    %118 = arith.addf %117, %116 : vector<8x128xf32>
    %119 = arith.divf %117, %118 : vector<8x128xf32>
    %120 = arith.mulf %111, %65 : vector<8x128xf32>
    %121 = arith.mulf %105, %113 : vector<8x128xf32>
    %122 = arith.addf %120, %121 : vector<8x128xf32>
    %123 = math.tanh %122 : vector<8x128xf32>
    %124 = arith.mulf %119, %123 : vector<8x128xf32>
    %c16 = arith.constant 16 : index
    %c0_33 = arith.constant 0 : index
    %125 = vector.load %arg9[%c16, %c0_33] : memref<64x512xf32, #tpu.memory_space<vmem>>, vector<8x512xf32>
    %cst_34 = arith.constant dense<0.000000e+00> : vector<8x512xf32>
    %126 = tpu.matmul %95, %7, %cst_34 {dimension_numbers = #tpu.dot_dimension_numbers<[1], [0], [0], [1], [0, 0, 1, 1], [], []>} : vector<8x128xf32>, vector<128x512xf32>, vector<8x512xf32> -> vector<8x512xf32>
    %127 = arith.addf %125, %126 : vector<8x512xf32>
    %128 = vector.extract_strided_slice %127 {offsets = [0, 0], sizes = [8, 128], strides = [1, 1]} : vector<8x512xf32> to vector<8x128xf32>
    %129 = arith.negf %128 : vector<8x128xf32>
    %130 = math.exp %129 : vector<8x128xf32>
    %cst_35 = arith.constant 1.000000e+00 : f32
    %131 = vector.broadcast %cst_35 : f32 to vector<8x128xf32>
    %132 = arith.addf %131, %130 : vector<8x128xf32>
    %133 = arith.divf %131, %132 : vector<8x128xf32>
    %134 = vector.extract_strided_slice %127 {offsets = [0, 128], sizes = [8, 128], strides = [1, 1]} : vector<8x512xf32> to vector<8x128xf32>
    %135 = arith.negf %134 : vector<8x128xf32>
    %136 = math.exp %135 : vector<8x128xf32>
    %cst_36 = arith.constant 1.000000e+00 : f32
    %137 = vector.broadcast %cst_36 : f32 to vector<8x128xf32>
    %138 = arith.addf %137, %136 : vector<8x128xf32>
    %139 = arith.divf %137, %138 : vector<8x128xf32>
    %140 = vector.extract_strided_slice %127 {offsets = [0, 256], sizes = [8, 128], strides = [1, 1]} : vector<8x512xf32> to vector<8x128xf32>
    %141 = math.tanh %140 : vector<8x128xf32>
    %142 = vector.extract_strided_slice %127 {offsets = [0, 384], sizes = [8, 128], strides = [1, 1]} : vector<8x512xf32> to vector<8x128xf32>
    %143 = arith.negf %142 : vector<8x128xf32>
    %144 = math.exp %143 : vector<8x128xf32>
    %cst_37 = arith.constant 1.000000e+00 : f32
    %145 = vector.broadcast %cst_37 : f32 to vector<8x128xf32>
    %146 = arith.addf %145, %144 : vector<8x128xf32>
    %147 = arith.divf %145, %146 : vector<8x128xf32>
    %148 = arith.mulf %139, %93 : vector<8x128xf32>
    %149 = arith.mulf %133, %141 : vector<8x128xf32>
    %150 = arith.addf %148, %149 : vector<8x128xf32>
    %151 = math.tanh %150 : vector<8x128xf32>
    %152 = arith.mulf %147, %151 : vector<8x128xf32>
    %153 = tpu.concatenate %152, %124 in 1 : vector<8x128xf32>, vector<8x128xf32> -> vector<8x256xf32>
    %cst_38 = arith.constant dense<0.000000e+00> : vector<8x512xf32>
    %154 = tpu.matmul %153, %8, %cst_38 {dimension_numbers = #tpu.dot_dimension_numbers<[1], [0], [0], [1], [0, 0, 1, 1], [], []>} : vector<8x256xf32>, vector<256x512xf32>, vector<8x512xf32> -> vector<8x512xf32>
    %155 = vector.broadcast %9 : vector<1x512xf32> to vector<8x512xf32>
    %156 = arith.addf %154, %155 : vector<8x512xf32>
    %157 = vector.extract_strided_slice %156 {offsets = [0, 0], sizes = [8, 128], strides = [1, 1]} : vector<8x512xf32> to vector<8x128xf32>
    %158 = arith.negf %157 : vector<8x128xf32>
    %159 = math.exp %158 : vector<8x128xf32>
    %cst_39 = arith.constant 1.000000e+00 : f32
    %160 = vector.broadcast %cst_39 : f32 to vector<8x128xf32>
    %161 = arith.addf %160, %159 : vector<8x128xf32>
    %162 = arith.divf %160, %161 : vector<8x128xf32>
    %163 = vector.extract_strided_slice %156 {offsets = [0, 128], sizes = [8, 128], strides = [1, 1]} : vector<8x512xf32> to vector<8x128xf32>
    %164 = arith.negf %163 : vector<8x128xf32>
    %165 = math.exp %164 : vector<8x128xf32>
    %cst_40 = arith.constant 1.000000e+00 : f32
    %166 = vector.broadcast %cst_40 : f32 to vector<8x128xf32>
    %167 = arith.addf %166, %165 : vector<8x128xf32>
    %168 = arith.divf %166, %167 : vector<8x128xf32>
    %169 = vector.extract_strided_slice %156 {offsets = [0, 256], sizes = [8, 128], strides = [1, 1]} : vector<8x512xf32> to vector<8x128xf32>
    %170 = math.tanh %169 : vector<8x128xf32>
    %171 = vector.extract_strided_slice %156 {offsets = [0, 384], sizes = [8, 128], strides = [1, 1]} : vector<8x512xf32> to vector<8x128xf32>
    %172 = arith.negf %171 : vector<8x128xf32>
    %173 = math.exp %172 : vector<8x128xf32>
    %cst_41 = arith.constant 1.000000e+00 : f32
    %174 = vector.broadcast %cst_41 : f32 to vector<8x128xf32>
    %175 = arith.addf %174, %173 : vector<8x128xf32>
    %176 = arith.divf %174, %175 : vector<8x128xf32>
    %177 = arith.mulf %168, %122 : vector<8x128xf32>
    %178 = arith.mulf %162, %170 : vector<8x128xf32>
    %179 = arith.addf %177, %178 : vector<8x128xf32>
    %180 = math.tanh %179 : vector<8x128xf32>
    %181 = arith.mulf %176, %180 : vector<8x128xf32>
    %c24 = arith.constant 24 : index
    %c0_42 = arith.constant 0 : index
    %182 = vector.load %arg9[%c24, %c0_42] : memref<64x512xf32, #tpu.memory_space<vmem>>, vector<8x512xf32>
    %cst_43 = arith.constant dense<0.000000e+00> : vector<8x512xf32>
    %183 = tpu.matmul %152, %7, %cst_43 {dimension_numbers = #tpu.dot_dimension_numbers<[1], [0], [0], [1], [0, 0, 1, 1], [], []>} : vector<8x128xf32>, vector<128x512xf32>, vector<8x512xf32> -> vector<8x512xf32>
    %184 = arith.addf %182, %183 : vector<8x512xf32>
    %185 = vector.extract_strided_slice %184 {offsets = [0, 0], sizes = [8, 128], strides = [1, 1]} : vector<8x512xf32> to vector<8x128xf32>
    %186 = arith.negf %185 : vector<8x128xf32>
    %187 = math.exp %186 : vector<8x128xf32>
    %cst_44 = arith.constant 1.000000e+00 : f32
    %188 = vector.broadcast %cst_44 : f32 to vector<8x128xf32>
    %189 = arith.addf %188, %187 : vector<8x128xf32>
    %190 = arith.divf %188, %189 : vector<8x128xf32>
    %191 = vector.extract_strided_slice %184 {offsets = [0, 128], sizes = [8, 128], strides = [1, 1]} : vector<8x512xf32> to vector<8x128xf32>
    %192 = arith.negf %191 : vector<8x128xf32>
    %193 = math.exp %192 : vector<8x128xf32>
    %cst_45 = arith.constant 1.000000e+00 : f32
    %194 = vector.broadcast %cst_45 : f32 to vector<8x128xf32>
    %195 = arith.addf %194, %193 : vector<8x128xf32>
    %196 = arith.divf %194, %195 : vector<8x128xf32>
    %197 = vector.extract_strided_slice %184 {offsets = [0, 256], sizes = [8, 128], strides = [1, 1]} : vector<8x512xf32> to vector<8x128xf32>
    %198 = math.tanh %197 : vector<8x128xf32>
    %199 = vector.extract_strided_slice %184 {offsets = [0, 384], sizes = [8, 128], strides = [1, 1]} : vector<8x512xf32> to vector<8x128xf32>
    %200 = arith.negf %199 : vector<8x128xf32>
    %201 = math.exp %200 : vector<8x128xf32>
    %cst_46 = arith.constant 1.000000e+00 : f32
    %202 = vector.broadcast %cst_46 : f32 to vector<8x128xf32>
    %203 = arith.addf %202, %201 : vector<8x128xf32>
    %204 = arith.divf %202, %203 : vector<8x128xf32>
    %205 = arith.mulf %196, %150 : vector<8x128xf32>
    %206 = arith.mulf %190, %198 : vector<8x128xf32>
    %207 = arith.addf %205, %206 : vector<8x128xf32>
    %208 = math.tanh %207 : vector<8x128xf32>
    %209 = arith.mulf %204, %208 : vector<8x128xf32>
    %210 = tpu.concatenate %209, %181 in 1 : vector<8x128xf32>, vector<8x128xf32> -> vector<8x256xf32>
    %cst_47 = arith.constant dense<0.000000e+00> : vector<8x512xf32>
    %211 = tpu.matmul %210, %8, %cst_47 {dimension_numbers = #tpu.dot_dimension_numbers<[1], [0], [0], [1], [0, 0, 1, 1], [], []>} : vector<8x256xf32>, vector<256x512xf32>, vector<8x512xf32> -> vector<8x512xf32>
    %212 = vector.broadcast %9 : vector<1x512xf32> to vector<8x512xf32>
    %213 = arith.addf %211, %212 : vector<8x512xf32>
    %214 = vector.extract_strided_slice %213 {offsets = [0, 0], sizes = [8, 128], strides = [1, 1]} : vector<8x512xf32> to vector<8x128xf32>
    %215 = arith.negf %214 : vector<8x128xf32>
    %216 = math.exp %215 : vector<8x128xf32>
    %cst_48 = arith.constant 1.000000e+00 : f32
    %217 = vector.broadcast %cst_48 : f32 to vector<8x128xf32>
    %218 = arith.addf %217, %216 : vector<8x128xf32>
    %219 = arith.divf %217, %218 : vector<8x128xf32>
    %220 = vector.extract_strided_slice %213 {offsets = [0, 128], sizes = [8, 128], strides = [1, 1]} : vector<8x512xf32> to vector<8x128xf32>
    %221 = arith.negf %220 : vector<8x128xf32>
    %222 = math.exp %221 : vector<8x128xf32>
    %cst_49 = arith.constant 1.000000e+00 : f32
    %223 = vector.broadcast %cst_49 : f32 to vector<8x128xf32>
    %224 = arith.addf %223, %222 : vector<8x128xf32>
    %225 = arith.divf %223, %224 : vector<8x128xf32>
    %226 = vector.extract_strided_slice %213 {offsets = [0, 256], sizes = [8, 128], strides = [1, 1]} : vector<8x512xf32> to vector<8x128xf32>
    %227 = math.tanh %226 : vector<8x128xf32>
    %228 = vector.extract_strided_slice %213 {offsets = [0, 384], sizes = [8, 128], strides = [1, 1]} : vector<8x512xf32> to vector<8x128xf32>
    %229 = arith.negf %228 : vector<8x128xf32>
    %230 = math.exp %229 : vector<8x128xf32>
    %cst_50 = arith.constant 1.000000e+00 : f32
    %231 = vector.broadcast %cst_50 : f32 to vector<8x128xf32>
    %232 = arith.addf %231, %230 : vector<8x128xf32>
    %233 = arith.divf %231, %232 : vector<8x128xf32>
    %234 = arith.mulf %225, %179 : vector<8x128xf32>
    %235 = arith.mulf %219, %227 : vector<8x128xf32>
    %236 = arith.addf %234, %235 : vector<8x128xf32>
    %237 = math.tanh %236 : vector<8x128xf32>
    %238 = arith.mulf %233, %237 : vector<8x128xf32>
    %c32 = arith.constant 32 : index
    %c0_51 = arith.constant 0 : index
    %239 = vector.load %arg9[%c32, %c0_51] : memref<64x512xf32, #tpu.memory_space<vmem>>, vector<8x512xf32>
    %cst_52 = arith.constant dense<0.000000e+00> : vector<8x512xf32>
    %240 = tpu.matmul %209, %7, %cst_52 {dimension_numbers = #tpu.dot_dimension_numbers<[1], [0], [0], [1], [0, 0, 1, 1], [], []>} : vector<8x128xf32>, vector<128x512xf32>, vector<8x512xf32> -> vector<8x512xf32>
    %241 = arith.addf %239, %240 : vector<8x512xf32>
    %242 = vector.extract_strided_slice %241 {offsets = [0, 0], sizes = [8, 128], strides = [1, 1]} : vector<8x512xf32> to vector<8x128xf32>
    %243 = arith.negf %242 : vector<8x128xf32>
    %244 = math.exp %243 : vector<8x128xf32>
    %cst_53 = arith.constant 1.000000e+00 : f32
    %245 = vector.broadcast %cst_53 : f32 to vector<8x128xf32>
    %246 = arith.addf %245, %244 : vector<8x128xf32>
    %247 = arith.divf %245, %246 : vector<8x128xf32>
    %248 = vector.extract_strided_slice %241 {offsets = [0, 128], sizes = [8, 128], strides = [1, 1]} : vector<8x512xf32> to vector<8x128xf32>
    %249 = arith.negf %248 : vector<8x128xf32>
    %250 = math.exp %249 : vector<8x128xf32>
    %cst_54 = arith.constant 1.000000e+00 : f32
    %251 = vector.broadcast %cst_54 : f32 to vector<8x128xf32>
    %252 = arith.addf %251, %250 : vector<8x128xf32>
    %253 = arith.divf %251, %252 : vector<8x128xf32>
    %254 = vector.extract_strided_slice %241 {offsets = [0, 256], sizes = [8, 128], strides = [1, 1]} : vector<8x512xf32> to vector<8x128xf32>
    %255 = math.tanh %254 : vector<8x128xf32>
    %256 = vector.extract_strided_slice %241 {offsets = [0, 384], sizes = [8, 128], strides = [1, 1]} : vector<8x512xf32> to vector<8x128xf32>
    %257 = arith.negf %256 : vector<8x128xf32>
    %258 = math.exp %257 : vector<8x128xf32>
    %cst_55 = arith.constant 1.000000e+00 : f32
    %259 = vector.broadcast %cst_55 : f32 to vector<8x128xf32>
    %260 = arith.addf %259, %258 : vector<8x128xf32>
    %261 = arith.divf %259, %260 : vector<8x128xf32>
    %262 = arith.mulf %253, %207 : vector<8x128xf32>
    %263 = arith.mulf %247, %255 : vector<8x128xf32>
    %264 = arith.addf %262, %263 : vector<8x128xf32>
    %265 = math.tanh %264 : vector<8x128xf32>
    %266 = arith.mulf %261, %265 : vector<8x128xf32>
    %267 = tpu.concatenate %266, %238 in 1 : vector<8x128xf32>, vector<8x128xf32> -> vector<8x256xf32>
    %cst_56 = arith.constant dense<0.000000e+00> : vector<8x512xf32>
    %268 = tpu.matmul %267, %8, %cst_56 {dimension_numbers = #tpu.dot_dimension_numbers<[1], [0], [0], [1], [0, 0, 1, 1], [], []>} : vector<8x256xf32>, vector<256x512xf32>, vector<8x512xf32> -> vector<8x512xf32>
    %269 = vector.broadcast %9 : vector<1x512xf32> to vector<8x512xf32>
    %270 = arith.addf %268, %269 : vector<8x512xf32>
    %271 = vector.extract_strided_slice %270 {offsets = [0, 0], sizes = [8, 128], strides = [1, 1]} : vector<8x512xf32> to vector<8x128xf32>
    %272 = arith.negf %271 : vector<8x128xf32>
    %273 = math.exp %272 : vector<8x128xf32>
    %cst_57 = arith.constant 1.000000e+00 : f32
    %274 = vector.broadcast %cst_57 : f32 to vector<8x128xf32>
    %275 = arith.addf %274, %273 : vector<8x128xf32>
    %276 = arith.divf %274, %275 : vector<8x128xf32>
    %277 = vector.extract_strided_slice %270 {offsets = [0, 128], sizes = [8, 128], strides = [1, 1]} : vector<8x512xf32> to vector<8x128xf32>
    %278 = arith.negf %277 : vector<8x128xf32>
    %279 = math.exp %278 : vector<8x128xf32>
    %cst_58 = arith.constant 1.000000e+00 : f32
    %280 = vector.broadcast %cst_58 : f32 to vector<8x128xf32>
    %281 = arith.addf %280, %279 : vector<8x128xf32>
    %282 = arith.divf %280, %281 : vector<8x128xf32>
    %283 = vector.extract_strided_slice %270 {offsets = [0, 256], sizes = [8, 128], strides = [1, 1]} : vector<8x512xf32> to vector<8x128xf32>
    %284 = math.tanh %283 : vector<8x128xf32>
    %285 = vector.extract_strided_slice %270 {offsets = [0, 384], sizes = [8, 128], strides = [1, 1]} : vector<8x512xf32> to vector<8x128xf32>
    %286 = arith.negf %285 : vector<8x128xf32>
    %287 = math.exp %286 : vector<8x128xf32>
    %cst_59 = arith.constant 1.000000e+00 : f32
    %288 = vector.broadcast %cst_59 : f32 to vector<8x128xf32>
    %289 = arith.addf %288, %287 : vector<8x128xf32>
    %290 = arith.divf %288, %289 : vector<8x128xf32>
    %291 = arith.mulf %282, %236 : vector<8x128xf32>
    %292 = arith.mulf %276, %284 : vector<8x128xf32>
    %293 = arith.addf %291, %292 : vector<8x128xf32>
    %294 = math.tanh %293 : vector<8x128xf32>
    %295 = arith.mulf %290, %294 : vector<8x128xf32>
    %c40 = arith.constant 40 : index
    %c0_60 = arith.constant 0 : index
    %296 = vector.load %arg9[%c40, %c0_60] : memref<64x512xf32, #tpu.memory_space<vmem>>, vector<8x512xf32>
    %cst_61 = arith.constant dense<0.000000e+00> : vector<8x512xf32>
    %297 = tpu.matmul %266, %7, %cst_61 {dimension_numbers = #tpu.dot_dimension_numbers<[1], [0], [0], [1], [0, 0, 1, 1], [], []>} : vector<8x128xf32>, vector<128x512xf32>, vector<8x512xf32> -> vector<8x512xf32>
    %298 = arith.addf %296, %297 : vector<8x512xf32>
    %299 = vector.extract_strided_slice %298 {offsets = [0, 0], sizes = [8, 128], strides = [1, 1]} : vector<8x512xf32> to vector<8x128xf32>
    %300 = arith.negf %299 : vector<8x128xf32>
    %301 = math.exp %300 : vector<8x128xf32>
    %cst_62 = arith.constant 1.000000e+00 : f32
    %302 = vector.broadcast %cst_62 : f32 to vector<8x128xf32>
    %303 = arith.addf %302, %301 : vector<8x128xf32>
    %304 = arith.divf %302, %303 : vector<8x128xf32>
    %305 = vector.extract_strided_slice %298 {offsets = [0, 128], sizes = [8, 128], strides = [1, 1]} : vector<8x512xf32> to vector<8x128xf32>
    %306 = arith.negf %305 : vector<8x128xf32>
    %307 = math.exp %306 : vector<8x128xf32>
    %cst_63 = arith.constant 1.000000e+00 : f32
    %308 = vector.broadcast %cst_63 : f32 to vector<8x128xf32>
    %309 = arith.addf %308, %307 : vector<8x128xf32>
    %310 = arith.divf %308, %309 : vector<8x128xf32>
    %311 = vector.extract_strided_slice %298 {offsets = [0, 256], sizes = [8, 128], strides = [1, 1]} : vector<8x512xf32> to vector<8x128xf32>
    %312 = math.tanh %311 : vector<8x128xf32>
    %313 = vector.extract_strided_slice %298 {offsets = [0, 384], sizes = [8, 128], strides = [1, 1]} : vector<8x512xf32> to vector<8x128xf32>
    %314 = arith.negf %313 : vector<8x128xf32>
    %315 = math.exp %314 : vector<8x128xf32>
    %cst_64 = arith.constant 1.000000e+00 : f32
    %316 = vector.broadcast %cst_64 : f32 to vector<8x128xf32>
    %317 = arith.addf %316, %315 : vector<8x128xf32>
    %318 = arith.divf %316, %317 : vector<8x128xf32>
    %319 = arith.mulf %310, %264 : vector<8x128xf32>
    %320 = arith.mulf %304, %312 : vector<8x128xf32>
    %321 = arith.addf %319, %320 : vector<8x128xf32>
    %322 = math.tanh %321 : vector<8x128xf32>
    %323 = arith.mulf %318, %322 : vector<8x128xf32>
    %324 = tpu.concatenate %323, %295 in 1 : vector<8x128xf32>, vector<8x128xf32> -> vector<8x256xf32>
    %cst_65 = arith.constant dense<0.000000e+00> : vector<8x512xf32>
    %325 = tpu.matmul %324, %8, %cst_65 {dimension_numbers = #tpu.dot_dimension_numbers<[1], [0], [0], [1], [0, 0, 1, 1], [], []>} : vector<8x256xf32>, vector<256x512xf32>, vector<8x512xf32> -> vector<8x512xf32>
    %326 = vector.broadcast %9 : vector<1x512xf32> to vector<8x512xf32>
    %327 = arith.addf %325, %326 : vector<8x512xf32>
    %328 = vector.extract_strided_slice %327 {offsets = [0, 0], sizes = [8, 128], strides = [1, 1]} : vector<8x512xf32> to vector<8x128xf32>
    %329 = arith.negf %328 : vector<8x128xf32>
    %330 = math.exp %329 : vector<8x128xf32>
    %cst_66 = arith.constant 1.000000e+00 : f32
    %331 = vector.broadcast %cst_66 : f32 to vector<8x128xf32>
    %332 = arith.addf %331, %330 : vector<8x128xf32>
    %333 = arith.divf %331, %332 : vector<8x128xf32>
    %334 = vector.extract_strided_slice %327 {offsets = [0, 128], sizes = [8, 128], strides = [1, 1]} : vector<8x512xf32> to vector<8x128xf32>
    %335 = arith.negf %334 : vector<8x128xf32>
    %336 = math.exp %335 : vector<8x128xf32>
    %cst_67 = arith.constant 1.000000e+00 : f32
    %337 = vector.broadcast %cst_67 : f32 to vector<8x128xf32>
    %338 = arith.addf %337, %336 : vector<8x128xf32>
    %339 = arith.divf %337, %338 : vector<8x128xf32>
    %340 = vector.extract_strided_slice %327 {offsets = [0, 256], sizes = [8, 128], strides = [1, 1]} : vector<8x512xf32> to vector<8x128xf32>
    %341 = math.tanh %340 : vector<8x128xf32>
    %342 = vector.extract_strided_slice %327 {offsets = [0, 384], sizes = [8, 128], strides = [1, 1]} : vector<8x512xf32> to vector<8x128xf32>
    %343 = arith.negf %342 : vector<8x128xf32>
    %344 = math.exp %343 : vector<8x128xf32>
    %cst_68 = arith.constant 1.000000e+00 : f32
    %345 = vector.broadcast %cst_68 : f32 to vector<8x128xf32>
    %346 = arith.addf %345, %344 : vector<8x128xf32>
    %347 = arith.divf %345, %346 : vector<8x128xf32>
    %348 = arith.mulf %339, %293 : vector<8x128xf32>
    %349 = arith.mulf %333, %341 : vector<8x128xf32>
    %350 = arith.addf %348, %349 : vector<8x128xf32>
    %351 = math.tanh %350 : vector<8x128xf32>
    %352 = arith.mulf %347, %351 : vector<8x128xf32>
    %c48 = arith.constant 48 : index
    %c0_69 = arith.constant 0 : index
    %353 = vector.load %arg9[%c48, %c0_69] : memref<64x512xf32, #tpu.memory_space<vmem>>, vector<8x512xf32>
    %cst_70 = arith.constant dense<0.000000e+00> : vector<8x512xf32>
    %354 = tpu.matmul %323, %7, %cst_70 {dimension_numbers = #tpu.dot_dimension_numbers<[1], [0], [0], [1], [0, 0, 1, 1], [], []>} : vector<8x128xf32>, vector<128x512xf32>, vector<8x512xf32> -> vector<8x512xf32>
    %355 = arith.addf %353, %354 : vector<8x512xf32>
    %356 = vector.extract_strided_slice %355 {offsets = [0, 0], sizes = [8, 128], strides = [1, 1]} : vector<8x512xf32> to vector<8x128xf32>
    %357 = arith.negf %356 : vector<8x128xf32>
    %358 = math.exp %357 : vector<8x128xf32>
    %cst_71 = arith.constant 1.000000e+00 : f32
    %359 = vector.broadcast %cst_71 : f32 to vector<8x128xf32>
    %360 = arith.addf %359, %358 : vector<8x128xf32>
    %361 = arith.divf %359, %360 : vector<8x128xf32>
    %362 = vector.extract_strided_slice %355 {offsets = [0, 128], sizes = [8, 128], strides = [1, 1]} : vector<8x512xf32> to vector<8x128xf32>
    %363 = arith.negf %362 : vector<8x128xf32>
    %364 = math.exp %363 : vector<8x128xf32>
    %cst_72 = arith.constant 1.000000e+00 : f32
    %365 = vector.broadcast %cst_72 : f32 to vector<8x128xf32>
    %366 = arith.addf %365, %364 : vector<8x128xf32>
    %367 = arith.divf %365, %366 : vector<8x128xf32>
    %368 = vector.extract_strided_slice %355 {offsets = [0, 256], sizes = [8, 128], strides = [1, 1]} : vector<8x512xf32> to vector<8x128xf32>
    %369 = math.tanh %368 : vector<8x128xf32>
    %370 = vector.extract_strided_slice %355 {offsets = [0, 384], sizes = [8, 128], strides = [1, 1]} : vector<8x512xf32> to vector<8x128xf32>
    %371 = arith.negf %370 : vector<8x128xf32>
    %372 = math.exp %371 : vector<8x128xf32>
    %cst_73 = arith.constant 1.000000e+00 : f32
    %373 = vector.broadcast %cst_73 : f32 to vector<8x128xf32>
    %374 = arith.addf %373, %372 : vector<8x128xf32>
    %375 = arith.divf %373, %374 : vector<8x128xf32>
    %376 = arith.mulf %367, %321 : vector<8x128xf32>
    %377 = arith.mulf %361, %369 : vector<8x128xf32>
    %378 = arith.addf %376, %377 : vector<8x128xf32>
    %379 = math.tanh %378 : vector<8x128xf32>
    %380 = arith.mulf %375, %379 : vector<8x128xf32>
    %381 = tpu.concatenate %380, %352 in 1 : vector<8x128xf32>, vector<8x128xf32> -> vector<8x256xf32>
    %cst_74 = arith.constant dense<0.000000e+00> : vector<8x512xf32>
    %382 = tpu.matmul %381, %8, %cst_74 {dimension_numbers = #tpu.dot_dimension_numbers<[1], [0], [0], [1], [0, 0, 1, 1], [], []>} : vector<8x256xf32>, vector<256x512xf32>, vector<8x512xf32> -> vector<8x512xf32>
    %383 = vector.broadcast %9 : vector<1x512xf32> to vector<8x512xf32>
    %384 = arith.addf %382, %383 : vector<8x512xf32>
    %385 = vector.extract_strided_slice %384 {offsets = [0, 0], sizes = [8, 128], strides = [1, 1]} : vector<8x512xf32> to vector<8x128xf32>
    %386 = arith.negf %385 : vector<8x128xf32>
    %387 = math.exp %386 : vector<8x128xf32>
    %cst_75 = arith.constant 1.000000e+00 : f32
    %388 = vector.broadcast %cst_75 : f32 to vector<8x128xf32>
    %389 = arith.addf %388, %387 : vector<8x128xf32>
    %390 = arith.divf %388, %389 : vector<8x128xf32>
    %391 = vector.extract_strided_slice %384 {offsets = [0, 128], sizes = [8, 128], strides = [1, 1]} : vector<8x512xf32> to vector<8x128xf32>
    %392 = arith.negf %391 : vector<8x128xf32>
    %393 = math.exp %392 : vector<8x128xf32>
    %cst_76 = arith.constant 1.000000e+00 : f32
    %394 = vector.broadcast %cst_76 : f32 to vector<8x128xf32>
    %395 = arith.addf %394, %393 : vector<8x128xf32>
    %396 = arith.divf %394, %395 : vector<8x128xf32>
    %397 = vector.extract_strided_slice %384 {offsets = [0, 256], sizes = [8, 128], strides = [1, 1]} : vector<8x512xf32> to vector<8x128xf32>
    %398 = math.tanh %397 : vector<8x128xf32>
    %399 = vector.extract_strided_slice %384 {offsets = [0, 384], sizes = [8, 128], strides = [1, 1]} : vector<8x512xf32> to vector<8x128xf32>
    %400 = arith.negf %399 : vector<8x128xf32>
    %401 = math.exp %400 : vector<8x128xf32>
    %cst_77 = arith.constant 1.000000e+00 : f32
    %402 = vector.broadcast %cst_77 : f32 to vector<8x128xf32>
    %403 = arith.addf %402, %401 : vector<8x128xf32>
    %404 = arith.divf %402, %403 : vector<8x128xf32>
    %405 = arith.mulf %396, %350 : vector<8x128xf32>
    %406 = arith.mulf %390, %398 : vector<8x128xf32>
    %407 = arith.addf %405, %406 : vector<8x128xf32>
    %408 = math.tanh %407 : vector<8x128xf32>
    %409 = arith.mulf %404, %408 : vector<8x128xf32>
    %c56 = arith.constant 56 : index
    %c0_78 = arith.constant 0 : index
    %410 = vector.load %arg9[%c56, %c0_78] : memref<64x512xf32, #tpu.memory_space<vmem>>, vector<8x512xf32>
    %cst_79 = arith.constant dense<0.000000e+00> : vector<8x512xf32>
    %411 = tpu.matmul %380, %7, %cst_79 {dimension_numbers = #tpu.dot_dimension_numbers<[1], [0], [0], [1], [0, 0, 1, 1], [], []>} : vector<8x128xf32>, vector<128x512xf32>, vector<8x512xf32> -> vector<8x512xf32>
    %412 = arith.addf %410, %411 : vector<8x512xf32>
    %413 = vector.extract_strided_slice %412 {offsets = [0, 0], sizes = [8, 128], strides = [1, 1]} : vector<8x512xf32> to vector<8x128xf32>
    %414 = arith.negf %413 : vector<8x128xf32>
    %415 = math.exp %414 : vector<8x128xf32>
    %cst_80 = arith.constant 1.000000e+00 : f32
    %416 = vector.broadcast %cst_80 : f32 to vector<8x128xf32>
    %417 = arith.addf %416, %415 : vector<8x128xf32>
    %418 = arith.divf %416, %417 : vector<8x128xf32>
    %419 = vector.extract_strided_slice %412 {offsets = [0, 128], sizes = [8, 128], strides = [1, 1]} : vector<8x512xf32> to vector<8x128xf32>
    %420 = arith.negf %419 : vector<8x128xf32>
    %421 = math.exp %420 : vector<8x128xf32>
    %cst_81 = arith.constant 1.000000e+00 : f32
    %422 = vector.broadcast %cst_81 : f32 to vector<8x128xf32>
    %423 = arith.addf %422, %421 : vector<8x128xf32>
    %424 = arith.divf %422, %423 : vector<8x128xf32>
    %425 = vector.extract_strided_slice %412 {offsets = [0, 256], sizes = [8, 128], strides = [1, 1]} : vector<8x512xf32> to vector<8x128xf32>
    %426 = math.tanh %425 : vector<8x128xf32>
    %427 = vector.extract_strided_slice %412 {offsets = [0, 384], sizes = [8, 128], strides = [1, 1]} : vector<8x512xf32> to vector<8x128xf32>
    %428 = arith.negf %427 : vector<8x128xf32>
    %429 = math.exp %428 : vector<8x128xf32>
    %cst_82 = arith.constant 1.000000e+00 : f32
    %430 = vector.broadcast %cst_82 : f32 to vector<8x128xf32>
    %431 = arith.addf %430, %429 : vector<8x128xf32>
    %432 = arith.divf %430, %431 : vector<8x128xf32>
    %433 = arith.mulf %424, %378 : vector<8x128xf32>
    %434 = arith.mulf %418, %426 : vector<8x128xf32>
    %435 = arith.addf %433, %434 : vector<8x128xf32>
    %436 = math.tanh %435 : vector<8x128xf32>
    %437 = arith.mulf %432, %436 : vector<8x128xf32>
    %438 = tpu.concatenate %437, %409 in 1 : vector<8x128xf32>, vector<8x128xf32> -> vector<8x256xf32>
    %cst_83 = arith.constant dense<0.000000e+00> : vector<8x512xf32>
    %439 = tpu.matmul %438, %8, %cst_83 {dimension_numbers = #tpu.dot_dimension_numbers<[1], [0], [0], [1], [0, 0, 1, 1], [], []>} : vector<8x256xf32>, vector<256x512xf32>, vector<8x512xf32> -> vector<8x512xf32>
    %440 = vector.broadcast %9 : vector<1x512xf32> to vector<8x512xf32>
    %441 = arith.addf %439, %440 : vector<8x512xf32>
    %442 = vector.extract_strided_slice %441 {offsets = [0, 0], sizes = [8, 128], strides = [1, 1]} : vector<8x512xf32> to vector<8x128xf32>
    %443 = arith.negf %442 : vector<8x128xf32>
    %444 = math.exp %443 : vector<8x128xf32>
    %cst_84 = arith.constant 1.000000e+00 : f32
    %445 = vector.broadcast %cst_84 : f32 to vector<8x128xf32>
    %446 = arith.addf %445, %444 : vector<8x128xf32>
    %447 = arith.divf %445, %446 : vector<8x128xf32>
    %448 = vector.extract_strided_slice %441 {offsets = [0, 128], sizes = [8, 128], strides = [1, 1]} : vector<8x512xf32> to vector<8x128xf32>
    %449 = arith.negf %448 : vector<8x128xf32>
    %450 = math.exp %449 : vector<8x128xf32>
    %cst_85 = arith.constant 1.000000e+00 : f32
    %451 = vector.broadcast %cst_85 : f32 to vector<8x128xf32>
    %452 = arith.addf %451, %450 : vector<8x128xf32>
    %453 = arith.divf %451, %452 : vector<8x128xf32>
    %454 = vector.extract_strided_slice %441 {offsets = [0, 256], sizes = [8, 128], strides = [1, 1]} : vector<8x512xf32> to vector<8x128xf32>
    %455 = math.tanh %454 : vector<8x128xf32>
    %456 = vector.extract_strided_slice %441 {offsets = [0, 384], sizes = [8, 128], strides = [1, 1]} : vector<8x512xf32> to vector<8x128xf32>
    %457 = arith.negf %456 : vector<8x128xf32>
    %458 = math.exp %457 : vector<8x128xf32>
    %cst_86 = arith.constant 1.000000e+00 : f32
    %459 = vector.broadcast %cst_86 : f32 to vector<8x128xf32>
    %460 = arith.addf %459, %458 : vector<8x128xf32>
    %461 = arith.divf %459, %460 : vector<8x128xf32>
    %462 = arith.mulf %453, %407 : vector<8x128xf32>
    %463 = arith.mulf %447, %455 : vector<8x128xf32>
    %464 = arith.addf %462, %463 : vector<8x128xf32>
    %465 = math.tanh %464 : vector<8x128xf32>
    %466 = arith.mulf %461, %465 : vector<8x128xf32>
    %c0_87 = arith.constant 0 : index
    %c0_88 = arith.constant 0 : index
    %467 = vector.load %arg6[%c0_87, %c0_88] : memref<128x128xf32, #tpu.memory_space<vmem>>, vector<128x128xf32>
    %cst_89 = arith.constant dense<0.000000e+00> : vector<8x128xf32>
    %468 = tpu.matmul %466, %467, %cst_89 {dimension_numbers = #tpu.dot_dimension_numbers<[1], [0], [0], [1], [0, 0, 1, 1], [], []>} : vector<8x128xf32>, vector<128x128xf32>, vector<8x128xf32> -> vector<8x128xf32>
    %c0_90 = arith.constant 0 : index
    %c0_91 = arith.constant 0 : index
    %469 = vector.load %arg7[%c0_90, %c0_91] : memref<1x128xf32, #tpu.memory_space<vmem>>, vector<1x128xf32>
    %470 = vector.broadcast %469 : vector<1x128xf32> to vector<8x128xf32>
    %471 = arith.addf %468, %470 : vector<8x128xf32>
    %c0_92 = arith.constant 0 : index
    %c0_93 = arith.constant 0 : index
    %472 = vector.load %arg8[%c0_92, %c0_93] : memref<8x128xf32, #tpu.memory_space<vmem>>, vector<8x128xf32>
    tpu.vector_store %arg8[%c0_92, %c0_93], %471 {strides = array<i32>} : memref<8x128xf32, #tpu.memory_space<vmem>>, vector<8x128xf32>,
    return
  }
}

</mosaic_0001>

<bundles_post_ra>
// kernel: lstm_model_forward.1
= control target key start
LH: loop header
LB: loop body
LE: loop exit
PB: predicated region body
PF: predicated region fallthrough
CT: control target
= control target key end

     0   :  { %v10250_v3 = vmov 0.0   ;;  %vm75_vm0 = vcmask 261120   ;;  %vm4362_vm1 = vmmov 0   ;;  %s10241_s1 = inlined_call_operand.vmem [shape: f32[32,512], index: 1, kind: input, shape index: {}]   ;;  %s10242_s0 = inlined_call_operand.vmem [shape: f32[64,32], index: 0, kind: input, shape index: {}]   ;;  %s10243_s2 = inlined_call_operand.vmem [shape: f32[128,512], index: 2, kind: input, shape index: {}]   ;;  %s10244_s4 = inlined_call_operand.vmem [shape: f32[256,512], index: 4, kind: input, shape index: {}]   ;;  %s10245_s3 = inlined_call_operand.vmem [shape: f32[1,512], index: 3, kind: input, shape index: {}]   ;;  %s10246_s5 = inlined_call_operand.vmem [shape: f32[1,512], index: 5, kind: input, shape index: {}]   ;;  %s10247_s6 = inlined_call_operand.vmem [shape: f32[128,128], index: 6, kind: input, shape index: {}]   ;;  %s10248_s7 = inlined_call_operand.vmem [shape: f32[1,128], index: 7, kind: input, shape index: {}]   ;;  %s10249_s8 = inlined_call_operand.vmem [shape: f32[8,128], index: 8, kind: output, shape index: {}]  }
   0x1   :  { %v50_v0 = vld [vmem:[%s10241_s1 + $0x68] sm:$0xff]  ;;  %v52_v1 = vld [vmem:[%s10241_s1 + $0x78] sm:$0xff]  ;;  %v49_v2 = vld [vmem:[%s10241_s1 + $0x60] sm:$0xff]  ;;  %164 = vmatprep.mubr.f32.mxu0 %v10250_v3  ;;  %277 = vmatprep.mubr.f32.mxu1 %v10250_v3 }
   0x2   :  { %124 = vmatprep.subr.mxu0 %v50_v0  ;;  %237 = vmatprep.subr.mxu1 %v52_v1  ;;  %v51_v4 = vld [vmem:[%s10241_s1 + $0x70] sm:$0xff]  ;;  %v46_v5 = vld [vmem:[%s10241_s1 + $0x48] sm:$0xff]  ;;  %v48_v6 = vld [vmem:[%s10241_s1 + $0x58] sm:$0xff] }
   0x3   :  { %125 = vmatpush1.msra.mxu0 %v49_v2  ;;  %238 = vmatpush1.msra.mxu1 %v51_v4  ;;  %v45_v7 = vld [vmem:[%s10241_s1 + $0x40] sm:$0xff]  ;;  %v47_v8 = vld [vmem:[%s10241_s1 + $0x50] sm:$0xff]  ;;  %v42_v9 = vld [vmem:[%s10241_s1 + $0x28] sm:$0xff] }
   0x4   :  { %126 = vmatprep.subr.mxu0 %v46_v5  ;;  %239 = vmatprep.subr.mxu1 %v48_v6  ;;  %v44_v10 = vld [vmem:[%s10241_s1 + $0x38] sm:$0xff]  ;;  %v41_v11 = vld [vmem:[%s10241_s1 + $0x20] sm:$0xff]  ;;  %v43_v12 = vld [vmem:[%s10241_s1 + $0x30] sm:$0xff] }
   0x5   :  { %127 = vmatpush1.msra.mxu0 %v45_v7  ;;  %240 = vmatpush1.msra.mxu1 %v47_v8  ;;  %v38_v13 = vld [vmem:[%s10241_s1 + $0x8] sm:$0xff]  ;;  %v40_v14 = vld [vmem:[%s10241_s1 + $0x18] sm:$0xff]  ;;  %v37_v15 = vld [vmem:[%s10241_s1] sm:$0xff] }
   0x6   :  { %128 = vmatprep.subr.mxu0 %v42_v9  ;;  %241 = vmatprep.subr.mxu1 %v44_v10  ;;  %v39_v16 = vld [vmem:[%s10241_s1 + $0x10] sm:$0xff]  ;;  %v29_v17 = vld [vmem:[%s10242_s0] sm:$0xff]  ;;  %v4464_v18 = vld [vmem:[%s10243_s2 + $0x1e8] sm:$0xff] }
   0x7   :  { %129 = vmatpush1.msra.mxu0 %v41_v11  ;;  %242 = vmatpush1.msra.mxu1 %v43_v12  ;;  %v4469_v19 = vld [vmem:[%s10243_s2 + $0x1f8] sm:$0xff]  ;;  %v418_v20 = vld [vmem:[%s10243_s2 + $0x1e0] sm:$0xff]  ;;  %v420_v21 = vld [vmem:[%s10243_s2 + $0x1f0] sm:$0xff] }
   0x8   :  { %130 = vmatprep.subr.mxu0 %v38_v13  ;;  %243 = vmatprep.subr.mxu1 %v40_v14  ;;  %v415_v22 = vld [vmem:[%s10243_s2 + $0x1c8] sm:$0xff]  ;;  %v417_v23 = vld [vmem:[%s10243_s2 + $0x1d8] sm:$0xff]  ;;  %v414_v24 = vld [vmem:[%s10243_s2 + $0x1c0] sm:$0xff] }
   0x9   :  { %131 = vmatpush1.msra.mxu0 %v37_v15  ;;  %244 = vmatpush1.msra.mxu1 %v39_v16  ;;  %v416_v25 = vld [vmem:[%s10243_s2 + $0x1d0] sm:$0xff]  ;;  %v30_v26 = vld [vmem:[%s10242_s0 + $0x8] sm:$0xff]  ;;  %v413_v28 = vld [vmem:[%s10243_s2 + $0x1b8] sm:$0xff] }
   0xa   :  { %3390 = vmatmul.mubr.msk.f32.vlgmr.msra.gmra.mxu0 %vm75_vm0, %v29_v17  ;;  %3398 = vmatmul.mubr.msk.f32.vlgmr.msra.gmra.mxu1 %vm75_vm0, %v29_v17  ;;  %v411_v27 = vld [vmem:[%s10243_s2 + $0x1a8] sm:$0xff]  ;;  %v410_v29 = vld [vmem:[%s10243_s2 + $0x1a0] sm:$0xff]  ;;  %v412_v30 = vld [vmem:[%s10243_s2 + $0x1b0] sm:$0xff] }
   0xb   :  { %555 = vmatprep.subr.mxu0 %v4464_v18  ;;  %626 = vmatprep.subr.mxu1 %v4469_v19  ;;  %v407_v31 = vld [vmem:[%s10243_s2 + $0x188] sm:$0xff]  ;;  %v409_v32 = vld [vmem:[%s10243_s2 + $0x198] sm:$0xff]  ;;  %v406_v33 = vld [vmem:[%s10243_s2 + $0x180] sm:$0xff] }
   0xc   :  { %556 = vmatpush1.msra.mxu0 %v418_v20  ;;  %627 = vmatpush1.msra.mxu1 %v420_v21  ;;  %v408_v34 = vld [vmem:[%s10243_s2 + $0x190] sm:$0xff]  ;;  %v403_v36 = vld [vmem:[%s10243_s2 + $0x168] sm:$0xff]  ;;  %v405_v37 = vld [vmem:[%s10243_s2 + $0x178] sm:$0xff] }
   0xd   :  { %557 = vmatprep.subr.mxu0 %v415_v22  ;;  %628 = vmatprep.subr.mxu1 %v417_v23  ;;  %v31_v35 = vld [vmem:[%s10242_s0 + $0x10] sm:$0xff]  ;;  %v402_v38 = vld [vmem:[%s10243_s2 + $0x160] sm:$0xff]  ;;  %v399_v40 = vld [vmem:[%s10243_s2 + $0x148] sm:$0xff] }
   0xe   :  { %170 = vmatprep.mubr.f32.mxu0 %v10250_v3  ;;  %283 = vmatprep.mubr.f32.mxu1 %v10250_v3  ;;  %v404_v39 = vld [vmem:[%s10243_s2 + $0x170] sm:$0xff]  ;;  %v401_v41 = vld [vmem:[%s10243_s2 + $0x158] sm:$0xff]  ;;  %v4552_v42 = vld [vmem:[%s10243_s2 + $0x140] sm:$0xff] }
   0xf   :  { %558 = vmatpush1.msra.mxu0 %v414_v24  ;;  %629 = vmatpush1.msra.mxu1 %v416_v25  ;;  %v4557_v43 = vld [vmem:[%s10243_s2 + $0x150] sm:$0xff]  ;;  %v32_v44 = vld [vmem:[%s10242_s0 + $0x18] sm:$0xff]  ;;  %v4567_v45 = vld [vmem:[%s10243_s2 + $0x128] sm:$0xff] }
  0x10   :  { %3391 = vmatmul.mubr.msk.f32.gmra.mxu0 %vm75_vm0, %v30_v26  ;;  %3399 = vmatmul.mubr.msk.f32.gmra.mxu1 %vm75_vm0, %v30_v26  ;;  %v4572_v46 = vld [vmem:[%s10243_s2 + $0x138] sm:$0xff]  ;;  %v4579_v47 = vld [vmem:[%s10243_s2 + $0x120] sm:$0xff]  ;;  %v4584_v48 = vld [vmem:[%s10243_s2 + $0x130] sm:$0xff] }
  0x11   :  { %559 = vmatprep.subr.mxu0 %v411_v27  ;;  %630 = vmatprep.subr.mxu1 %v413_v28  ;;  %v4591_v49 = vld [vmem:[%s10243_s2 + $0x108] sm:$0xff]  ;;  %v4596_v50 = vld [vmem:[%s10243_s2 + $0x118] sm:$0xff]  ;;  %v4605_v51 = vld [vmem:[%s10243_s2 + $0x100] sm:$0xff] }
  0x12   :  { %560 = vmatpush1.msra.mxu0 %v410_v29  ;;  %631 = vmatpush1.msra.mxu1 %v412_v30  ;;  %v4610_v52 = vld [vmem:[%s10243_s2 + $0x110] sm:$0xff]  ;;  %v33_v53 = vld [vmem:[%s10242_s0 + $0x20] sm:$0xff]  ;;  %v4622_v54 = vld [vmem:[%s10243_s2 + $0xe8] sm:$0xff] }
  0x13   :  { %561 = vmatprep.subr.mxu0 %v407_v31  ;;  %632 = vmatprep.subr.mxu1 %v409_v32  ;;  %v4627_v55 = vld [vmem:[%s10243_s2 + $0xf8] sm:$0xff]  ;;  %v4634_v56 = vld [vmem:[%s10243_s2 + $0xe0] sm:$0xff]  ;;  %v4639_v57 = vld [vmem:[%s10243_s2 + $0xf0] sm:$0xff] }
  0x14   :  { %176 = vmatprep.mubr.f32.mxu0 %v10250_v3  ;;  %289 = vmatprep.mubr.f32.mxu1 %v10250_v3  ;;  %v4646_v58 = vld [vmem:[%s10243_s2 + $0xc8] sm:$0xff]  ;;  %v4651_v59 = vld [vmem:[%s10243_s2 + $0xd8] sm:$0xff]  ;;  %v4660_v60 = vld [vmem:[%s10243_s2 + $0xc0] sm:$0xff] }
  0x15   :  { %562 = vmatpush1.msra.mxu0 %v406_v33  ;;  %633 = vmatpush1.msra.mxu1 %v408_v34  ;;  %v4665_v61 = vld [vmem:[%s10243_s2 + $0xd0] sm:$0xff]  ;;  %v34_v62 = vld [vmem:[%s10242_s0 + $0x28] sm:$0xff]  ;;  %v4682_v0 = vld [vmem:[%s10243_s2 + $0xb8] sm:$0xff] }
  0x16   :  { %3392 = vmatmul.mubr.msk.f32.gmra.mxu0 %vm75_vm0, %v31_v35  ;;  %3400 = vmatmul.mubr.msk.f32.gmra.mxu1 %vm75_vm0, %v31_v35  ;;  %v4677_v63 = vld [vmem:[%s10243_s2 + $0xa8] sm:$0xff]  ;;  %v4689_v1 = vld [vmem:[%s10243_s2 + $0xa0] sm:$0xff]  ;;  %v4694_v2 = vld [vmem:[%s10243_s2 + $0xb0] sm:$0xff] }
  0x17   :  { %563 = vmatprep.subr.mxu0 %v403_v36  ;;  %634 = vmatprep.subr.mxu1 %v405_v37  ;;  %v4701_v4 = vld [vmem:[%s10243_s2 + $0x88] sm:$0xff]  ;;  %v4706_v5 = vld [vmem:[%s10243_s2 + $0x98] sm:$0xff]  ;;  %v4715_v6 = vld [vmem:[%s10243_s2 + $0x80] sm:$0xff] }
  0x18   :  { %564 = vmatpush1.msra.mxu0 %v402_v38  ;;  %635 = vmatpush1.msra.mxu1 %v404_v39  ;;  %v4720_v7 = vld [vmem:[%s10243_s2 + $0x90] sm:$0xff]  ;;  %v4732_v9 = vld [vmem:[%s10243_s2 + $0x68] sm:$0xff]  ;;  %v4737_v10 = vld [vmem:[%s10243_s2 + $0x78] sm:$0xff] }
  0x19   :  { %565 = vmatprep.subr.mxu0 %v399_v40  ;;  %636 = vmatprep.subr.mxu1 %v401_v41  ;;  %v35_v8 = vld [vmem:[%s10242_s0 + $0x30] sm:$0xff]  ;;  %v4744_v11 = vld [vmem:[%s10243_s2 + $0x60] sm:$0xff]  ;;  %v4756_v13 = vld [vmem:[%s10243_s2 + $0x48] sm:$0xff] }
  0x1a   :  { %182 = vmatprep.mubr.f32.mxu0 %v10250_v3  ;;  %295 = vmatprep.mubr.f32.mxu1 %v10250_v3  ;;  %v4749_v12 = vld [vmem:[%s10243_s2 + $0x70] sm:$0xff]  ;;  %v4761_v14 = vld [vmem:[%s10243_s2 + $0x58] sm:$0xff]  ;;  %v4770_v15 = vld [vmem:[%s10243_s2 + $0x40] sm:$0xff] }
  0x1b   :  { %566 = vmatpush1.msra.mxu0 %v4552_v42  ;;  %637 = vmatpush1.msra.mxu1 %v4557_v43  ;;  %v4775_v16 = vld [vmem:[%s10243_s2 + $0x50] sm:$0xff]  ;;  %v36_v17 = vld [vmem:[%s10242_s0 + $0x38] sm:$0xff]  ;;  %v4787_v20 = vld [vmem:[%s10243_s2 + $0x28] sm:$0xff] }
  0x1c   :  { %3393 = vmatmul.mubr.msk.f32.gmra.mxu0 %vm75_vm0, %v32_v44  ;;  %3401 = vmatmul.mubr.msk.f32.gmra.mxu1 %vm75_vm0, %v32_v44  ;;  %v4792_v21 = vld [vmem:[%s10243_s2 + $0x38] sm:$0xff]  ;;  %v4799_v22 = vld [vmem:[%s10243_s2 + $0x20] sm:$0xff]  ;;  %v4804_v23 = vld [vmem:[%s10243_s2 + $0x30] sm:$0xff] }
  0x1d   :  { %567 = vmatprep.subr.mxu0 %v4567_v45  ;;  %638 = vmatprep.subr.mxu1 %v4572_v46  ;;  %v4811_v24 = vld [vmem:[%s10243_s2 + $0x8] sm:$0xff]  ;;  %v4816_v25 = vld [vmem:[%s10243_s2 + $0x18] sm:$0xff]  ;;  %v4823_v26 = vld [vmem:[%s10243_s2] sm:$0xff] }
  0x1e   :  { %568 = vmatpush1.msra.mxu0 %v4579_v47  ;;  %639 = vmatpush1.msra.mxu1 %v4584_v48  ;;  %v4830_v27 = vld [vmem:[%s10243_s2 + $0x10] sm:$0xff]  ;;  %v4845_v28 = vld [vmem:[%s10244_s4 + $0x1e8] sm:$0xff]  ;;  %v4850_v29 = vld [vmem:[%s10244_s4 + $0x1f8] sm:$0xff] }
  0x1f   :  { %569 = vmatprep.subr.mxu0 %v4591_v49  ;;  %640 = vmatprep.subr.mxu1 %v4596_v50  ;;  %10790 = vst [vmem:[#allocation3_spill] sm:$0xff] %v4830_v27  ;;  %10791 = vst [vmem:[#allocation4_spill] sm:$0xff] %v4845_v28  ;;  %v4855_v30 = vld [vmem:[%s10244_s4 + $0x1e0] sm:$0xff]  ;;  %v4862_v31 = vld [vmem:[%s10244_s4 + $0x1f0] sm:$0xff] }
  0x20   :  { %188 = vmatprep.mubr.f32.mxu0 %v10250_v3  ;;  %301 = vmatprep.mubr.f32.mxu1 %v10250_v3  ;;  %10792 = vst [vmem:[#allocation5_spill] sm:$0xff] %v4850_v29  ;;  %10793 = vst [vmem:[#allocation6_spill] sm:$0xff] %v4855_v30  ;;  %v4867_v32 = vld [vmem:[%s10244_s4 + $0x1c8] sm:$0xff]  ;;  %v4872_v33 = vld [vmem:[%s10244_s4 + $0x1d8] sm:$0xff] }
  0x21   :  { %570 = vmatpush1.msra.mxu0 %v4605_v51  ;;  %641 = vmatpush1.msra.mxu1 %v4610_v52  ;;  %10794 = vst [vmem:[#allocation7_spill] sm:$0xff] %v4862_v31  ;;  %10795 = vst [vmem:[#allocation8_spill] sm:$0xff] %v4867_v32  ;;  %v4879_v34 = vld [vmem:[%s10244_s4 + $0x1c0] sm:$0xff]  ;;  %v4884_v35 = vld [vmem:[%s10244_s4 + $0x1d0] sm:$0xff] }
  0x22   :  { %3394 = vmatmul.mubr.msk.f32.gmra.mxu0 %vm75_vm0, %v33_v53  ;;  %3402 = vmatmul.mubr.msk.f32.gmra.mxu1 %vm75_vm0, %v33_v53  ;;  %10796 = vst [vmem:[#allocation9_spill] sm:$0xff] %v4872_v33  ;;  %10797 = vst [vmem:[#allocation10_spill] sm:$0xff] %v4879_v34  ;;  %v4893_v36 = vld [vmem:[%s10244_s4 + $0x1a8] sm:$0xff]  ;;  %v4898_v37 = vld [vmem:[%s10244_s4 + $0x1b8] sm:$0xff] }
  0x23   :  { %571 = vmatprep.subr.mxu0 %v4622_v54  ;;  %642 = vmatprep.subr.mxu1 %v4627_v55  ;;  %10798 = vst [vmem:[#allocation11_spill] sm:$0xff] %v4884_v35  ;;  %10799 = vst [vmem:[#allocation12_spill] sm:$0xff] %v4893_v36  ;;  %v4903_v38 = vld [vmem:[%s10244_s4 + $0x1a0] sm:$0xff]  ;;  %v4910_v39 = vld [vmem:[%s10244_s4 + $0x1b0] sm:$0xff] }
  0x24   :  { %572 = vmatpush1.msra.mxu0 %v4634_v56  ;;  %643 = vmatpush1.msra.mxu1 %v4639_v57  ;;  %10800 = vst [vmem:[#allocation13_spill] sm:$0xff] %v4898_v37  ;;  %10801 = vst [vmem:[#allocation14_spill] sm:$0xff] %v4903_v38  ;;  %v4917_v40 = vld [vmem:[%s10244_s4 + $0x188] sm:$0xff]  ;;  %v4922_v41 = vld [vmem:[%s10244_s4 + $0x198] sm:$0xff] }
  0x25   :  { %573 = vmatprep.subr.mxu0 %v4646_v58  ;;  %644 = vmatprep.subr.mxu1 %v4651_v59  ;;  %10802 = vst [vmem:[#allocation15_spill] sm:$0xff] %v4910_v39  ;;  %10803 = vst [vmem:[#allocation16_spill] sm:$0xff] %v4917_v40  ;;  %v4927_v44 = vld [vmem:[%s10244_s4 + $0x180] sm:$0xff]  ;;  %v4934_v53 = vld [vmem:[%s10244_s4 + $0x190] sm:$0xff] }
  0x26   :  { %194 = vmatprep.mubr.f32.mxu0 %v10250_v3  ;;  %307 = vmatprep.mubr.f32.mxu1 %v10250_v3  ;;  %10804 = vst [vmem:[#allocation17_spill] sm:$0xff] %v4922_v41  ;;  %10805 = vst [vmem:[#allocation18_spill] sm:$0xff] %v4927_v44 }
  0x27   :  { %574 = vmatpush1.msra.mxu0 %v4660_v60  ;;  %645 = vmatpush1.msra.mxu1 %v4665_v61  ;;  %10806 = vst [vmem:[#allocation19_spill] sm:$0xff] %v4934_v53 }
  0x28   :  { %3395 = vmatmul.mubr.msk.f32.gmra.mxu0 %vm75_vm0, %v34_v62  ;;  %3403 = vmatmul.mubr.msk.f32.gmra.mxu1 %vm75_vm0, %v34_v62  ;;  %v4941_v62 = vld [vmem:[%s10244_s4 + $0x168] sm:$0xff] }
  0x29   :  { %575 = vmatprep.subr.mxu0 %v4677_v63  ;;  %646 = vmatprep.subr.mxu1 %v4682_v0  ;;  %10807 = vst [vmem:[#allocation20_spill] sm:$0xff] %v4941_v62 }
  0x2a   :  { %576 = vmatpush1.msra.mxu0 %v4689_v1  ;;  %647 = vmatpush1.msra.mxu1 %v4694_v2 }
  0x2b   :  { %577 = vmatprep.subr.mxu0 %v4701_v4  ;;  %648 = vmatprep.subr.mxu1 %v4706_v5 }
  0x2c   :  { %200 = vmatprep.mubr.f32.mxu0 %v10250_v3  ;;  %313 = vmatprep.mubr.f32.mxu1 %v10250_v3 }
  0x2d   :  { %578 = vmatpush1.msra.mxu0 %v4715_v6  ;;  %649 = vmatpush1.msra.mxu1 %v4720_v7 }
  0x2e   :  { %3396 = vmatmul.mubr.msk.f32.gmra.mxu0 %vm75_vm0, %v35_v8  ;;  %3404 = vmatmul.mubr.msk.f32.gmra.mxu1 %vm75_vm0, %v35_v8  ;;  %v4946_v8 = vld [vmem:[%s10244_s4 + $0x178] sm:$0xff] }
  0x2f   :  { %579 = vmatprep.subr.mxu0 %v4732_v9  ;;  %650 = vmatprep.subr.mxu1 %v4737_v10  ;;  %10808 = vst [vmem:[#allocation21_spill] sm:$0xff] %v4946_v8 }
  0x30   :  { %580 = vmatpush1.msra.mxu0 %v4744_v11  ;;  %651 = vmatpush1.msra.mxu1 %v4749_v12 }
  0x31   :  { %581 = vmatprep.subr.mxu0 %v4756_v13  ;;  %652 = vmatprep.subr.mxu1 %v4761_v14 }
  0x32   :  { %206 = vmatprep.mubr.f32.mxu0 %v10250_v3  ;;  %319 = vmatprep.mubr.f32.mxu1 %v10250_v3 }
  0x33   :  { %582 = vmatpush1.msra.mxu0 %v4770_v15  ;;  %653 = vmatpush1.msra.mxu1 %v4775_v16 }
  0x34   :  { %3397 = vmatmul.mubr.msk.f32.gmra.mxu0 %vm75_vm0, %v36_v17  ;;  %3405 = vmatmul.mubr.msk.f32.gmra.mxu1 %vm75_vm0, %v36_v17  ;;  %v4953_v17 = vld [vmem:[%s10244_s4 + $0x160] sm:$0xff] }
  0x35   :  { %583 = vmatprep.subr.mxu0 %v4787_v20  ;;  %654 = vmatprep.subr.mxu1 %v4792_v21  ;;  %10809 = vst [vmem:[#allocation22_spill] sm:$0xff] %v4953_v17 }
  0x36   :  { %584 = vmatpush1.msra.mxu0 %v4799_v22  ;;  %655 = vmatpush1.msra.mxu1 %v4804_v23 }
  0x37   :  { %585 = vmatprep.subr.mxu0 %v4811_v24  ;;  %656 = vmatprep.subr.mxu1 %v4816_v25 }
  0x38   :  { %586 = vmatpush1.msra.mxu0 %v4823_v26  ;;  %619 = vmatprep.mubr.f32.mxu0 %v10250_v3 }
  0x39   :  { %657 = vmatpush1.msra.mxu1 %v4830_v27  ;;  %690 = vmatprep.mubr.f32.mxu1 %v10250_v3 }
  0x3a   :  { %620 = vmatmul.mubr.f32.vlgmr.msra.gmra.mxu0 %v10250_v3  ;;  %691 = vmatmul.mubr.f32.vlgmr.msra.gmra.mxu1 %v10250_v3 }
  0x3b   :  { %810 = vmatprep.mubr.f32.mxu0 %v10250_v3  ;;  %881 = vmatprep.mubr.f32.mxu1 %v10250_v3  ;;  %v4958_v3 = vld [vmem:[%s10244_s4 + $0x170] sm:$0xff] }
  0x3c   :  { %746 = vmatprep.subr.mxu0 %v4845_v28  ;;  %817 = vmatprep.subr.mxu1 %v4850_v29  ;;  %10810 = vst [vmem:[#allocation23_spill] sm:$0xff] %v4958_v3 }
  0x3d   :  { %747 = vmatpush1.msra.mxu0 %v4855_v30  ;;  %818 = vmatpush1.msra.mxu1 %v4862_v31 }
  0x3e   :  { %748 = vmatprep.subr.mxu0 %v4867_v32  ;;  %819 = vmatprep.subr.mxu1 %v4872_v33 }
  0x3f   :  { %749 = vmatpush1.msra.mxu0 %v4879_v34  ;;  %820 = vmatpush1.msra.mxu1 %v4884_v35 }
  0x40   :  { %750 = vmatprep.subr.mxu0 %v4893_v36  ;;  %821 = vmatprep.subr.mxu1 %v4898_v37 }
  0x41   :  { %751 = vmatpush1.msra.mxu0 %v4903_v38  ;;  %822 = vmatpush1.msra.mxu1 %v4910_v39 }
  0x42   :  { %752 = vmatprep.subr.mxu0 %v4917_v40  ;;  %823 = vmatprep.subr.mxu1 %v4922_v41  ;;  %v5477_v41 = vld [vmem:[%s10244_s4 + $0x2a0] sm:$0xff]  ;;  %v5494_v40 = vld [vmem:[%s10244_s4 + $0x298] sm:$0xff] }
  0x43   :  { %753 = vmatpush1.msra.mxu0 %v4927_v44  ;;  %824 = vmatpush1.msra.mxu1 %v4934_v53  ;;  %v5443_v53 = vld [vmem:[%s10244_s4 + $0x2c8] sm:$0xff]  ;;  %v5460_v44 = vld [vmem:[%s10244_s4 + $0x2d0] sm:$0xff]  ;;  %10897 = vst [vmem:[#allocation110_spill] sm:$0xff] %v5477_v41  ;;  %10900 = vst [vmem:[#allocation113_spill] sm:$0xff] %v5494_v40 }
  0x44   :  { %754 = vmatprep.subr.mxu0 %v4941_v62  ;;  %825 = vmatprep.subr.mxu1 %v4946_v8  ;;  %v4965_v62 = vld [vmem:[%s10244_s4 + $0x148] sm:$0xff]  ;;  %v4970_v8 = vld [vmem:[%s10244_s4 + $0x158] sm:$0xff]  ;;  %10891 = vst [vmem:[#allocation104_spill] sm:$0xff] %v5443_v53  ;;  %10894 = vst [vmem:[#allocation107_spill] sm:$0xff] %v5460_v44 }
  0x45   :  { %755 = vmatpush1.msra.mxu0 %v4953_v17  ;;  %826 = vmatpush1.msra.mxu1 %v4958_v3  ;;  %10811 = vst [vmem:[#allocation24_spill] sm:$0xff] %v4965_v62  ;;  %10812 = vst [vmem:[#allocation25_spill] sm:$0xff] %v4970_v8  ;;  %v4977_v17 = vld [vmem:[%s10244_s4 + $0x140] sm:$0xff]  ;;  %v4982_v3 = vld [vmem:[%s10244_s4 + $0x150] sm:$0xff] }
  0x46   :  { %756 = vmatprep.subr.mxu0 %v4965_v62  ;;  %827 = vmatprep.subr.mxu1 %v4970_v8  ;;  %10813 = vst [vmem:[#allocation26_spill] sm:$0xff] %v4977_v17  ;;  %10814 = vst [vmem:[#allocation27_spill] sm:$0xff] %v4982_v3  ;;  %v4989_v62 = vld [vmem:[%s10244_s4 + $0x128] sm:$0xff]  ;;  %v4994_v8 = vld [vmem:[%s10244_s4 + $0x138] sm:$0xff] }
  0x47   :  { %757 = vmatpush1.msra.mxu0 %v4977_v17  ;;  %828 = vmatpush1.msra.mxu1 %v4982_v3  ;;  %10815 = vst [vmem:[#allocation28_spill] sm:$0xff] %v4989_v62  ;;  %10816 = vst [vmem:[#allocation29_spill] sm:$0xff] %v4994_v8  ;;  %v5001_v17 = vld [vmem:[%s10244_s4 + $0x120] sm:$0xff]  ;;  %v5006_v3 = vld [vmem:[%s10244_s4 + $0x130] sm:$0xff] }
  0x48   :  { %758 = vmatprep.subr.mxu0 %v4989_v62  ;;  %829 = vmatprep.subr.mxu1 %v4994_v8  ;;  %10817 = vst [vmem:[#allocation30_spill] sm:$0xff] %v5001_v17  ;;  %10818 = vst [vmem:[#allocation31_spill] sm:$0xff] %v5006_v3  ;;  %v5013_v62 = vld [vmem:[%s10244_s4 + $0x108] sm:$0xff]  ;;  %v5018_v8 = vld [vmem:[%s10244_s4 + $0x118] sm:$0xff] }
  0x49   :  { %759 = vmatpush1.msra.mxu0 %v5001_v17  ;;  %830 = vmatpush1.msra.mxu1 %v5006_v3  ;;  %10819 = vst [vmem:[#allocation32_spill] sm:$0xff] %v5013_v62  ;;  %10820 = vst [vmem:[#allocation33_spill] sm:$0xff] %v5018_v8  ;;  %v5025_v17 = vld [vmem:[%s10244_s4 + $0x100] sm:$0xff]  ;;  %v5030_v3 = vld [vmem:[%s10244_s4 + $0x110] sm:$0xff] }
  0x4a   :  { %760 = vmatprep.subr.mxu0 %v5013_v62  ;;  %831 = vmatprep.subr.mxu1 %v5018_v8  ;;  %10821 = vst [vmem:[#allocation34_spill] sm:$0xff] %v5025_v17  ;;  %10822 = vst [vmem:[#allocation35_spill] sm:$0xff] %v5030_v3  ;;  %v5037_v62 = vld [vmem:[%s10244_s4 + $0xe8] sm:$0xff]  ;;  %v5042_v8 = vld [vmem:[%s10244_s4 + $0xf8] sm:$0xff] }
  0x4b   :  { %761 = vmatpush1.msra.mxu0 %v5025_v17  ;;  %832 = vmatpush1.msra.mxu1 %v5030_v3  ;;  %10823 = vst [vmem:[#allocation36_spill] sm:$0xff] %v5037_v62  ;;  %10824 = vst [vmem:[#allocation37_spill] sm:$0xff] %v5042_v8  ;;  %v5049_v17 = vld [vmem:[%s10244_s4 + $0xe0] sm:$0xff]  ;;  %v5054_v3 = vld [vmem:[%s10244_s4 + $0xf0] sm:$0xff] }
  0x4c   :  { %762 = vmatprep.subr.mxu0 %v5037_v62  ;;  %833 = vmatprep.subr.mxu1 %v5042_v8  ;;  %10825 = vst [vmem:[#allocation38_spill] sm:$0xff] %v5049_v17  ;;  %10826 = vst [vmem:[#allocation39_spill] sm:$0xff] %v5054_v3  ;;  %v5061_v62 = vld [vmem:[%s10244_s4 + $0xc8] sm:$0xff]  ;;  %v5066_v8 = vld [vmem:[%s10244_s4 + $0xd8] sm:$0xff] }
  0x4d   :  { %763 = vmatpush1.msra.mxu0 %v5049_v17  ;;  %834 = vmatpush1.msra.mxu1 %v5054_v3  ;;  %10827 = vst [vmem:[#allocation40_spill] sm:$0xff] %v5061_v62  ;;  %10828 = vst [vmem:[#allocation41_spill] sm:$0xff] %v5066_v8  ;;  %v5073_v17 = vld [vmem:[%s10244_s4 + $0xc0] sm:$0xff]  ;;  %v5078_v3 = vld [vmem:[%s10244_s4 + $0xd0] sm:$0xff] }
  0x4e   :  { %764 = vmatprep.subr.mxu0 %v5061_v62  ;;  %835 = vmatprep.subr.mxu1 %v5066_v8  ;;  %10829 = vst [vmem:[#allocation42_spill] sm:$0xff] %v5073_v17  ;;  %10830 = vst [vmem:[#allocation43_spill] sm:$0xff] %v5078_v3  ;;  %v5085_v62 = vld [vmem:[%s10244_s4 + $0xa8] sm:$0xff]  ;;  %v5090_v8 = vld [vmem:[%s10244_s4 + $0xb8] sm:$0xff] }
  0x4f   :  { %765 = vmatpush1.msra.mxu0 %v5073_v17  ;;  %836 = vmatpush1.msra.mxu1 %v5078_v3  ;;  %10831 = vst [vmem:[#allocation44_spill] sm:$0xff] %v5085_v62  ;;  %10832 = vst [vmem:[#allocation45_spill] sm:$0xff] %v5090_v8  ;;  %v5097_v17 = vld [vmem:[%s10244_s4 + $0xa0] sm:$0xff]  ;;  %v5102_v3 = vld [vmem:[%s10244_s4 + $0xb0] sm:$0xff] }
  0x50   :  { %766 = vmatprep.subr.mxu0 %v5085_v62  ;;  %837 = vmatprep.subr.mxu1 %v5090_v8  ;;  %10833 = vst [vmem:[#allocation46_spill] sm:$0xff] %v5097_v17  ;;  %10834 = vst [vmem:[#allocation47_spill] sm:$0xff] %v5102_v3  ;;  %v5109_v62 = vld [vmem:[%s10244_s4 + $0x88] sm:$0xff]  ;;  %v5114_v8 = vld [vmem:[%s10244_s4 + $0x98] sm:$0xff] }
  0x51   :  { %767 = vmatpush1.msra.mxu0 %v5097_v17  ;;  %838 = vmatpush1.msra.mxu1 %v5102_v3  ;;  %10835 = vst [vmem:[#allocation48_spill] sm:$0xff] %v5109_v62  ;;  %10836 = vst [vmem:[#allocation49_spill] sm:$0xff] %v5114_v8  ;;  %v5121_v17 = vld [vmem:[%s10244_s4 + $0x80] sm:$0xff]  ;;  %v5126_v3 = vld [vmem:[%s10244_s4 + $0x90] sm:$0xff] }
  0x52   :  { %768 = vmatprep.subr.mxu0 %v5109_v62  ;;  %839 = vmatprep.subr.mxu1 %v5114_v8  ;;  %10837 = vst [vmem:[#allocation50_spill] sm:$0xff] %v5121_v17  ;;  %10838 = vst [vmem:[#allocation51_spill] sm:$0xff] %v5126_v3  ;;  %v5133_v62 = vld [vmem:[%s10244_s4 + $0x68] sm:$0xff]  ;;  %v5138_v8 = vld [vmem:[%s10244_s4 + $0x78] sm:$0xff] }
  0x53   :  { %769 = vmatpush1.msra.mxu0 %v5121_v17  ;;  %840 = vmatpush1.msra.mxu1 %v5126_v3  ;;  %10839 = vst [vmem:[#allocation52_spill] sm:$0xff] %v5133_v62  ;;  %10840 = vst [vmem:[#allocation53_spill] sm:$0xff] %v5138_v8  ;;  %v5145_v17 = vld [vmem:[%s10244_s4 + $0x60] sm:$0xff]  ;;  %v5150_v3 = vld [vmem:[%s10244_s4 + $0x70] sm:$0xff] }
  0x54   :  { %770 = vmatprep.subr.mxu0 %v5133_v62  ;;  %841 = vmatprep.subr.mxu1 %v5138_v8  ;;  %10841 = vst [vmem:[#allocation54_spill] sm:$0xff] %v5145_v17  ;;  %10842 = vst [vmem:[#allocation55_spill] sm:$0xff] %v5150_v3  ;;  %v5157_v62 = vld [vmem:[%s10244_s4 + $0x48] sm:$0xff]  ;;  %v5162_v8 = vld [vmem:[%s10244_s4 + $0x58] sm:$0xff] }
  0x55   :  { %771 = vmatpush1.msra.mxu0 %v5145_v17  ;;  %842 = vmatpush1.msra.mxu1 %v5150_v3  ;;  %10843 = vst [vmem:[#allocation56_spill] sm:$0xff] %v5157_v62  ;;  %10844 = vst [vmem:[#allocation57_spill] sm:$0xff] %v5162_v8  ;;  %v5169_v17 = vld [vmem:[%s10244_s4 + $0x40] sm:$0xff]  ;;  %v5174_v3 = vld [vmem:[%s10244_s4 + $0x50] sm:$0xff] }
  0x56   :  { %772 = vmatprep.subr.mxu0 %v5157_v62  ;;  %843 = vmatprep.subr.mxu1 %v5162_v8  ;;  %10845 = vst [vmem:[#allocation58_spill] sm:$0xff] %v5169_v17  ;;  %10846 = vst [vmem:[#allocation59_spill] sm:$0xff] %v5174_v3  ;;  %v5181_v62 = vld [vmem:[%s10244_s4 + $0x28] sm:$0xff]  ;;  %v5186_v8 = vld [vmem:[%s10244_s4 + $0x38] sm:$0xff] }
  0x57   :  { %773 = vmatpush1.msra.mxu0 %v5169_v17  ;;  %844 = vmatpush1.msra.mxu1 %v5174_v3  ;;  %10847 = vst [vmem:[#allocation60_spill] sm:$0xff] %v5181_v62  ;;  %10848 = vst [vmem:[#allocation61_spill] sm:$0xff] %v5186_v8  ;;  %v5193_v17 = vld [vmem:[%s10244_s4 + $0x20] sm:$0xff]  ;;  %v5198_v3 = vld [vmem:[%s10244_s4 + $0x30] sm:$0xff] }
  0x58   :  { %774 = vmatprep.subr.mxu0 %v5181_v62  ;;  %845 = vmatprep.subr.mxu1 %v5186_v8  ;;  %10849 = vst [vmem:[#allocation62_spill] sm:$0xff] %v5193_v17  ;;  %10850 = vst [vmem:[#allocation63_spill] sm:$0xff] %v5198_v3  ;;  %v5205_v62 = vld [vmem:[%s10244_s4 + $0x8] sm:$0xff]  ;;  %v5210_v8 = vld [vmem:[%s10244_s4 + $0x18] sm:$0xff] }
  0x59   :  { %775 = vmatpush1.msra.mxu0 %v5193_v17  ;;  %846 = vmatpush1.msra.mxu1 %v5198_v3  ;;  %10851 = vst [vmem:[#allocation64_spill] sm:$0xff] %v5205_v62  ;;  %10852 = vst [vmem:[#allocation65_spill] sm:$0xff] %v5210_v8  ;;  %v5217_v17 = vld [vmem:[%s10244_s4] sm:$0xff]  ;;  %v5222_v3 = vld [vmem:[%s10244_s4 + $0x10] sm:$0xff] }
  0x5a   :  { %776 = vmatprep.subr.mxu0 %v5205_v62  ;;  %847 = vmatprep.subr.mxu1 %v5210_v8  ;;  %10853 = vst [vmem:[#allocation66_spill] sm:$0xff] %v5217_v17  ;;  %10854 = vst [vmem:[#allocation67_spill] sm:$0xff] %v5222_v3  ;;  %v5229_v62 = vld [vmem:[%s10244_s4 + $0x3e8] sm:$0xff]  ;;  %v5234_v8 = vld [vmem:[%s10244_s4 + $0x3f8] sm:$0xff] }
  0x5b   :  { %777 = vmatpush1.msra.mxu0 %v5217_v17  ;;  %848 = vmatpush1.msra.mxu1 %v5222_v3  ;;  %10855 = vst [vmem:[#allocation68_spill] sm:$0xff] %v5229_v62  ;;  %10856 = vst [vmem:[#allocation69_spill] sm:$0xff] %v5234_v8  ;;  %v5241_v17 = vld [vmem:[%s10244_s4 + $0x3e0] sm:$0xff]  ;;  %v5246_v3 = vld [vmem:[%s10244_s4 + $0x3f0] sm:$0xff] }
  0x5c   :  { %778 = vmatprep.subr.mxu0 %v5229_v62  ;;  %849 = vmatprep.subr.mxu1 %v5234_v8  ;;  %10857 = vst [vmem:[#allocation70_spill] sm:$0xff] %v5241_v17  ;;  %10858 = vst [vmem:[#allocation71_spill] sm:$0xff] %v5246_v3  ;;  %v5253_v62 = vld [vmem:[%s10244_s4 + $0x3c8] sm:$0xff]  ;;  %v5258_v8 = vld [vmem:[%s10244_s4 + $0x3d8] sm:$0xff] }
  0x5d   :  { %779 = vmatpush2.msra.mxu0 %v5241_v17  ;;  %850 = vmatpush2.msra.mxu1 %v5246_v3  ;;  %10859 = vst [vmem:[#allocation72_spill] sm:$0xff] %v5253_v62  ;;  %10860 = vst [vmem:[#allocation73_spill] sm:$0xff] %v5258_v8  ;;  %v5265_v17 = vld [vmem:[%s10244_s4 + $0x3c0] sm:$0xff]  ;;  %v5270_v3 = vld [vmem:[%s10244_s4 + $0x3d0] sm:$0xff] }
  0x5e   :  { %780 = vmatprep.subr.mxu0 %v5253_v62  ;;  %851 = vmatprep.subr.mxu1 %v5258_v8  ;;  %10861 = vst [vmem:[#allocation74_spill] sm:$0xff] %v5265_v17  ;;  %10862 = vst [vmem:[#allocation75_spill] sm:$0xff] %v5270_v3  ;;  %v5277_v62 = vld [vmem:[%s10244_s4 + $0x3a8] sm:$0xff]  ;;  %v5282_v8 = vld [vmem:[%s10244_s4 + $0x3b8] sm:$0xff] }
  0x5f   :  { %781 = vmatpush2.msra.mxu0 %v5265_v17  ;;  %852 = vmatpush2.msra.mxu1 %v5270_v3  ;;  %10863 = vst [vmem:[#allocation76_spill] sm:$0xff] %v5277_v62  ;;  %10864 = vst [vmem:[#allocation77_spill] sm:$0xff] %v5282_v8  ;;  %v5289_v17 = vld [vmem:[%s10244_s4 + $0x3a0] sm:$0xff]  ;;  %v5294_v3 = vld [vmem:[%s10244_s4 + $0x3b0] sm:$0xff] }
  0x60   :  { %782 = vmatprep.subr.mxu0 %v5277_v62  ;;  %853 = vmatprep.subr.mxu1 %v5282_v8  ;;  %10865 = vst [vmem:[#allocation78_spill] sm:$0xff] %v5289_v17  ;;  %10866 = vst [vmem:[#allocation79_spill] sm:$0xff] %v5294_v3  ;;  %v5301_v62 = vld [vmem:[%s10244_s4 + $0x388] sm:$0xff]  ;;  %v5306_v8 = vld [vmem:[%s10244_s4 + $0x398] sm:$0xff] }
  0x61   :  { %783 = vmatpush2.msra.mxu0 %v5289_v17  ;;  %854 = vmatpush2.msra.mxu1 %v5294_v3  ;;  %10867 = vst [vmem:[#allocation80_spill] sm:$0xff] %v5301_v62  ;;  %10868 = vst [vmem:[#allocation81_spill] sm:$0xff] %v5306_v8  ;;  %v5313_v17 = vld [vmem:[%s10244_s4 + $0x380] sm:$0xff]  ;;  %v5318_v3 = vld [vmem:[%s10244_s4 + $0x390] sm:$0xff] }
  0x62   :  { %784 = vmatprep.subr.mxu0 %v5301_v62  ;;  %855 = vmatprep.subr.mxu1 %v5306_v8  ;;  %10869 = vst [vmem:[#allocation82_spill] sm:$0xff] %v5313_v17  ;;  %10870 = vst [vmem:[#allocation83_spill] sm:$0xff] %v5318_v3  ;;  %v5325_v62 = vld [vmem:[%s10244_s4 + $0x368] sm:$0xff]  ;;  %v5330_v8 = vld [vmem:[%s10244_s4 + $0x378] sm:$0xff] }
  0x63   :  { %785 = vmatpush2.msra.mxu0 %v5313_v17  ;;  %856 = vmatpush2.msra.mxu1 %v5318_v3  ;;  %10871 = vst [vmem:[#allocation84_spill] sm:$0xff] %v5325_v62  ;;  %10872 = vst [vmem:[#allocation85_spill] sm:$0xff] %v5330_v8  ;;  %v5337_v17 = vld [vmem:[%s10244_s4 + $0x360] sm:$0xff]  ;;  %v5342_v3 = vld [vmem:[%s10244_s4 + $0x370] sm:$0xff] }
  0x64   :  { %786 = vmatprep.subr.mxu0 %v5325_v62  ;;  %857 = vmatprep.subr.mxu1 %v5330_v8  ;;  %10873 = vst [vmem:[#allocation86_spill] sm:$0xff] %v5337_v17  ;;  %10874 = vst [vmem:[#allocation87_spill] sm:$0xff] %v5342_v3  ;;  %v5349_v62 = vld [vmem:[%s10244_s4 + $0x348] sm:$0xff]  ;;  %v5354_v8 = vld [vmem:[%s10244_s4 + $0x358] sm:$0xff] }
  0x65   :  { %787 = vmatpush2.msra.mxu0 %v5337_v17  ;;  %858 = vmatpush2.msra.mxu1 %v5342_v3  ;;  %10875 = vst [vmem:[#allocation88_spill] sm:$0xff] %v5349_v62  ;;  %10876 = vst [vmem:[#allocation89_spill] sm:$0xff] %v5354_v8  ;;  %v5361_v17 = vld [vmem:[%s10244_s4 + $0x340] sm:$0xff]  ;;  %v5366_v3 = vld [vmem:[%s10244_s4 + $0x350] sm:$0xff] }
  0x66   :  { %788 = vmatprep.subr.mxu0 %v5349_v62  ;;  %859 = vmatprep.subr.mxu1 %v5354_v8  ;;  %10877 = vst [vmem:[#allocation90_spill] sm:$0xff] %v5361_v17  ;;  %10878 = vst [vmem:[#allocation91_spill] sm:$0xff] %v5366_v3  ;;  %v5373_v62 = vld [vmem:[%s10244_s4 + $0x328] sm:$0xff]  ;;  %v5378_v8 = vld [vmem:[%s10244_s4 + $0x338] sm:$0xff] }
  0x67   :  { %789 = vmatpush2.msra.mxu0 %v5361_v17  ;;  %860 = vmatpush2.msra.mxu1 %v5366_v3  ;;  %10879 = vst [vmem:[#allocation92_spill] sm:$0xff] %v5373_v62  ;;  %10880 = vst [vmem:[#allocation93_spill] sm:$0xff] %v5378_v8  ;;  %v5385_v17 = vld [vmem:[%s10244_s4 + $0x320] sm:$0xff]  ;;  %v5390_v3 = vld [vmem:[%s10244_s4 + $0x330] sm:$0xff] }
  0x68   :  { %790 = vmatprep.subr.mxu0 %v5373_v62  ;;  %861 = vmatprep.subr.mxu1 %v5378_v8  ;;  %10881 = vst [vmem:[#allocation94_spill] sm:$0xff] %v5385_v17  ;;  %10882 = vst [vmem:[#allocation95_spill] sm:$0xff] %v5390_v3  ;;  %v5397_v62 = vld [vmem:[%s10244_s4 + $0x308] sm:$0xff]  ;;  %v5402_v8 = vld [vmem:[%s10244_s4 + $0x318] sm:$0xff] }
  0x69   :  { %791 = vmatpush2.msra.mxu0 %v5385_v17  ;;  %862 = vmatpush2.msra.mxu1 %v5390_v3  ;;  %10883 = vst [vmem:[#allocation96_spill] sm:$0xff] %v5397_v62  ;;  %10884 = vst [vmem:[#allocation97_spill] sm:$0xff] %v5402_v8  ;;  %v5409_v17 = vld [vmem:[%s10244_s4 + $0x300] sm:$0xff]  ;;  %v5414_v3 = vld [vmem:[%s10244_s4 + $0x310] sm:$0xff] }
  0x6a   :  { %792 = vmatprep.subr.mxu0 %v5397_v62  ;;  %863 = vmatprep.subr.mxu1 %v5402_v8  ;;  %10885 = vst [vmem:[#allocation98_spill] sm:$0xff] %v5409_v17  ;;  %10886 = vst [vmem:[#allocation99_spill] sm:$0xff] %v5414_v3  ;;  %v5421_v62 = vld [vmem:[%s10244_s4 + $0x2e8] sm:$0xff]  ;;  %v5426_v8 = vld [vmem:[%s10244_s4 + $0x2f8] sm:$0xff] }
  0x6b   :  { %793 = vmatpush2.msra.mxu0 %v5409_v17  ;;  %864 = vmatpush2.msra.mxu1 %v5414_v3  ;;  %10887 = vst [vmem:[#allocation100_spill] sm:$0xff] %v5421_v62  ;;  %10888 = vst [vmem:[#allocation101_spill] sm:$0xff] %v5426_v8  ;;  %v5433_v17 = vld [vmem:[%s10244_s4 + $0x2e0] sm:$0xff]  ;;  %v5438_v3 = vld [vmem:[%s10244_s4 + $0x2f0] sm:$0xff] }
  0x6c   :  { %794 = vmatprep.subr.mxu0 %v5421_v62  ;;  %865 = vmatprep.subr.mxu1 %v5426_v8  ;;  %10889 = vst [vmem:[#allocation102_spill] sm:$0xff] %v5433_v17  ;;  %10890 = vst [vmem:[#allocation103_spill] sm:$0xff] %v5438_v3  ;;  %v5450_v8 = vld [vmem:[%s10244_s4 + $0x2d8] sm:$0xff]  ;;  %v5455_v62 = vld [vmem:[%s10244_s4 + $0x2c0] sm:$0xff] }
  0x6d   :  { %795 = vmatpush2.msra.mxu0 %v5433_v17  ;;  %866 = vmatpush2.msra.mxu1 %v5438_v3  ;;  %10892 = vst [vmem:[#allocation105_spill] sm:$0xff] %v5450_v8  ;;  %10893 = vst [vmem:[#allocation106_spill] sm:$0xff] %v5455_v62  ;;  %v5467_v3 = vld [vmem:[%s10244_s4 + $0x2a8] sm:$0xff]  ;;  %v5472_v17 = vld [vmem:[%s10244_s4 + $0x2b8] sm:$0xff] }
  0x6e   :  { %796 = vmatprep.subr.mxu0 %v5443_v53  ;;  %867 = vmatprep.subr.mxu1 %v5450_v8  ;;  %10895 = vst [vmem:[#allocation108_spill] sm:$0xff] %v5467_v3  ;;  %10896 = vst [vmem:[#allocation109_spill] sm:$0xff] %v5472_v17  ;;  %v5484_v8 = vld [vmem:[%s10244_s4 + $0x2b0] sm:$0xff]  ;;  %v5489_v53 = vld [vmem:[%s10244_s4 + $0x288] sm:$0xff] }
  0x6f   :  { %797 = vmatpush2.msra.mxu0 %v5455_v62  ;;  %868 = vmatpush2.msra.mxu1 %v5460_v44  ;;  %10898 = vst [vmem:[#allocation111_spill] sm:$0xff] %v5484_v8  ;;  %10899 = vst [vmem:[#allocation112_spill] sm:$0xff] %v5489_v53  ;;  %v5501_v44 = vld [vmem:[%s10244_s4 + $0x280] sm:$0xff]  ;;  %v5506_v62 = vld [vmem:[%s10244_s4 + $0x290] sm:$0xff] }
  0x70   :  { %798 = vmatprep.subr.mxu0 %v5467_v3  ;;  %869 = vmatprep.subr.mxu1 %v5472_v17  ;;  %10901 = vst [vmem:[#allocation114_spill] sm:$0xff] %v5501_v44  ;;  %10902 = vst [vmem:[#allocation115_spill] sm:$0xff] %v5506_v62  ;;  %v5513_v3 = vld [vmem:[%s10244_s4 + $0x268] sm:$0xff]  ;;  %v5518_v17 = vld [vmem:[%s10244_s4 + $0x278] sm:$0xff] }
  0x71   :  { %799 = vmatpush2.msra.mxu0 %v5477_v41  ;;  %870 = vmatpush2.msra.mxu1 %v5484_v8  ;;  %10903 = vst [vmem:[#allocation116_spill] sm:$0xff] %v5513_v3  ;;  %10904 = vst [vmem:[#allocation117_spill] sm:$0xff] %v5518_v17  ;;  %v5525_v41 = vld [vmem:[%s10244_s4 + $0x260] sm:$0xff]  ;;  %v5530_v8 = vld [vmem:[%s10244_s4 + $0x270] sm:$0xff] }
  0x72   :  { %800 = vmatprep.subr.mxu0 %v5489_v53  ;;  %871 = vmatprep.subr.mxu1 %v5494_v40  ;;  %10905 = vst [vmem:[#allocation118_spill] sm:$0xff] %v5525_v41  ;;  %10906 = vst [vmem:[#allocation119_spill] sm:$0xff] %v5530_v8  ;;  %v5537_v53 = vld [vmem:[%s10244_s4 + $0x248] sm:$0xff]  ;;  %v5542_v40 = vld [vmem:[%s10244_s4 + $0x258] sm:$0xff] }
  0x73   :  { %801 = vmatpush2.msra.mxu0 %v5501_v44  ;;  %872 = vmatpush2.msra.mxu1 %v5506_v62  ;;  %10907 = vst [vmem:[#allocation120_spill] sm:$0xff] %v5537_v53  ;;  %10908 = vst [vmem:[#allocation121_spill] sm:$0xff] %v5542_v40  ;;  %v5549_v44 = vld [vmem:[%s10244_s4 + $0x240] sm:$0xff]  ;;  %v5554_v62 = vld [vmem:[%s10244_s4 + $0x250] sm:$0xff] }
  0x74   :  { %802 = vmatprep.subr.mxu0 %v5513_v3  ;;  %873 = vmatprep.subr.mxu1 %v5518_v17  ;;  %10909 = vst [vmem:[#allocation122_spill] sm:$0xff] %v5549_v44  ;;  %10910 = vst [vmem:[#allocation123_spill] sm:$0xff] %v5554_v62  ;;  %v5561_v3 = vld [vmem:[%s10244_s4 + $0x228] sm:$0xff]  ;;  %v5566_v17 = vld [vmem:[%s10244_s4 + $0x238] sm:$0xff] }
  0x75   :  { %803 = vmatpush2.msra.mxu0 %v5525_v41  ;;  %874 = vmatpush2.msra.mxu1 %v5530_v8  ;;  %10911 = vst [vmem:[#allocation124_spill] sm:$0xff] %v5561_v3  ;;  %10912 = vst [vmem:[#allocation125_spill] sm:$0xff] %v5566_v17  ;;  %v5573_v41 = vld [vmem:[%s10244_s4 + $0x220] sm:$0xff]  ;;  %v5578_v8 = vld [vmem:[%s10244_s4 + $0x230] sm:$0xff] }
  0x76   :  { %804 = vmatprep.subr.mxu0 %v5537_v53  ;;  %875 = vmatprep.subr.mxu1 %v5542_v40  ;;  %10913 = vst [vmem:[#allocation126_spill] sm:$0xff] %v5573_v41  ;;  %10914 = vst [vmem:[#allocation127_spill] sm:$0xff] %v5578_v8  ;;  %v5585_v53 = vld [vmem:[%s10244_s4 + $0x208] sm:$0xff]  ;;  %v5590_v40 = vld [vmem:[%s10244_s4 + $0x218] sm:$0xff] }
  0x77   :  { %805 = vmatpush2.msra.mxu0 %v5549_v44  ;;  %876 = vmatpush2.msra.mxu1 %v5554_v62  ;;  %10915 = vst [vmem:[#allocation128_spill] sm:$0xff] %v5585_v53  ;;  %10916 = vst [vmem:[#allocation129_spill] sm:$0xff] %v5590_v40  ;;  %v5597_v44 = vld [vmem:[%s10244_s4 + $0x200] sm:$0xff]  ;;  %v5602_v62 = vld [vmem:[%s10244_s4 + $0x210] sm:$0xff] }
  0x78   :  { %806 = vmatprep.subr.mxu0 %v5561_v3  ;;  %877 = vmatprep.subr.mxu1 %v5566_v17  ;;  %10917 = vst [vmem:[#allocation130_spill] sm:$0xff] %v5597_v44  ;;  %10918 = vst [vmem:[#allocation131_spill] sm:$0xff] %v5602_v62  ;;  %v55_v17 = vlaneseq }
  0x79   :  { %807 = vmatpush2.msra.mxu0 %v5573_v41  ;;  %878 = vmatpush2.msra.mxu1 %v5578_v8 }
  0x7a   :  { %808 = vmatprep.subr.mxu0 %v5585_v53  ;;  %879 = vmatprep.subr.mxu1 %v5590_v40  ;;  %v5612_v3 = vshrl.u32 %v55_v17, 7 }
  0x7b   :  { %809 = vmatpush2.msra.mxu0 %v5597_v44  ;;  %880 = vmatpush2.msra.mxu1 %v5602_v62  ;;  %v53_v44 = vld [vmem:[%s10245_s3] sm:$0xf] }
  0x7c   :  { %916 = vmatprep.subr.mxu0 %v4464_v18  ;;  %987 = vmatprep.subr.mxu1 %v4469_v19  ;;  %v10377_v8 = vsub.s32 0, %v5612_v3  ;;  %v10379_v53 = vsub.s32 2, %v5612_v3  ;;  %v10383_v19 = vsub.s32 1, %v5612_v3  ;;  %v10384_v17 = vsub.s32 3, %v5612_v3 }
  0x7e   :  { %v58_v40 = vrot.slane %v53_v44, %v10377_v8  ;;  %v5633_v38 = vrot.slane %v53_v44, %v10379_v53  ;;  %v62_v35 = vrot.slane %v53_v44, %v10383_v19  ;;  %v5639_v34 = vrot.slane %v53_v44, %v10384_v17 }
  0xca   :  { %v5614_v39 = vpop.f32.mrf.mxu0  ;;  %v5616_v41 = vpop.f32.mrf.mxu1 }
  0xcc   :  { %v5623_v62 = vpop.f32.mrf.mxu0  ;;  %v5625_v18 = vpop.f32.mrf.mxu1 }
  0xd0   :  { %v172_v37 = vpop.f32.mrf.mxu0  ;;  %v285_v36 = vpop.f32.mrf.mxu1 }
  0xd1   :  { %v5641_v33 = vadd.f32 %v172_v37, %v58_v40  ;;  %v5644_v32 = vadd.f32 %v285_v36, %v5633_v38 }
  0xd2   :  { %v174_v31 = vpop.f32.mrf.mxu0  ;;  %v287_v8 = vpop.f32.mrf.mxu1 }
  0xd3   :  { %10919 = vst [vmem:[#allocation132_spill] sm:$0xff] %v5641_v33  ;;  %10920 = vst [vmem:[#allocation133_spill] sm:$0xff] %v5644_v32  ;;  %v5646_v30 = vadd.f32 %v174_v31, %v62_v35  ;;  %v5649_v53 = vadd.f32 %v287_v8, %v5639_v34 }
  0xd5   :  { %10921 = vst [vmem:[#allocation134_spill] sm:$0xff] %v5646_v30  ;;  %10922 = vst [vmem:[#allocation135_spill] sm:$0xff] %v5649_v53 }
  0xd6   :  { %v178_v29 = vpop.f32.mrf.mxu0  ;;  %v291_v28 = vpop.f32.mrf.mxu1 }
  0xd7   :  { %v5651_v27 = vadd.f32 %v178_v29, %v58_v40  ;;  %v5654_v19 = vadd.f32 %v291_v28, %v5633_v38 }
  0xd8   :  { %v180_v44 = vpop.f32.mrf.mxu0  ;;  %v293_v37 = vpop.f32.mrf.mxu1 }
  0xd9   :  { %10923 = vst [vmem:[#allocation136_spill] sm:$0xff] %v5651_v27  ;;  %10924 = vst [vmem:[#allocation137_spill] sm:$0xff] %v5654_v19  ;;  %v5656_v17 = vadd.f32 %v180_v44, %v62_v35  ;;  %v5659_v36 = vadd.f32 %v293_v37, %v5639_v34 }
  0xdb   :  { %10925 = vst [vmem:[#allocation138_spill] sm:$0xff] %v5656_v17  ;;  %10926 = vst [vmem:[#allocation139_spill] sm:$0xff] %v5659_v36 }
  0xdc   :  { %v184_v32 = vpop.f32.mrf.mxu0  ;;  %v297_v31 = vpop.f32.mrf.mxu1 }
  0xdd   :  { %v5661_v30 = vadd.f32 %v184_v32, %v58_v40  ;;  %v5664_v8 = vadd.f32 %v297_v31, %v5633_v38 }
  0xde   :  { %v186_v53 = vpop.f32.mrf.mxu0  ;;  %v299_v29 = vpop.f32.mrf.mxu1 }
  0xdf   :  { %10927 = vst [vmem:[#allocation140_spill] sm:$0xff] %v5661_v30  ;;  %10928 = vst [vmem:[#allocation141_spill] sm:$0xff] %v5664_v8  ;;  %v5666_v27 = vadd.f32 %v186_v53, %v62_v35  ;;  %v5669_v28 = vadd.f32 %v299_v29, %v5639_v34 }
  0xe1   :  { %10929 = vst [vmem:[#allocation142_spill] sm:$0xff] %v5666_v27  ;;  %10930 = vst [vmem:[#allocation143_spill] sm:$0xff] %v5669_v28 }
  0xe2   :  { %v190_v19 = vpop.f32.mrf.mxu0  ;;  %v303_v44 = vpop.f32.mrf.mxu1 }
  0xe3   :  { %v5671_v17 = vadd.f32 %v190_v19, %v58_v40  ;;  %v5674_v37 = vadd.f32 %v303_v44, %v5633_v38 }
  0xe4   :  { %v192_v36 = vpop.f32.mrf.mxu0  ;;  %v305_v32 = vpop.f32.mrf.mxu1 }
  0xe5   :  { %10931 = vst [vmem:[#allocation144_spill] sm:$0xff] %v5671_v17  ;;  %10932 = vst [vmem:[#allocation145_spill] sm:$0xff] %v5674_v37  ;;  %v5676_v30 = vadd.f32 %v192_v36, %v62_v35  ;;  %v5679_v31 = vadd.f32 %v305_v32, %v5639_v34 }
  0xe7   :  { %10933 = vst [vmem:[#allocation146_spill] sm:$0xff] %v5676_v30  ;;  %10934 = vst [vmem:[#allocation147_spill] sm:$0xff] %v5679_v31 }
  0xe8   :  { %v196_v8 = vpop.f32.mrf.mxu0  ;;  %v309_v53 = vpop.f32.mrf.mxu1 }
  0xe9   :  { %v5681_v27 = vadd.f32 %v196_v8, %v58_v40  ;;  %v5684_v29 = vadd.f32 %v309_v53, %v5633_v38 }
  0xea   :  { %v198_v28 = vpop.f32.mrf.mxu0  ;;  %v311_v19 = vpop.f32.mrf.mxu1 }
  0xeb   :  { %10935 = vst [vmem:[#allocation148_spill] sm:$0xff] %v5681_v27  ;;  %10936 = vst [vmem:[#allocation149_spill] sm:$0xff] %v5684_v29  ;;  %v5686_v17 = vadd.f32 %v198_v28, %v62_v35  ;;  %v5689_v44 = vadd.f32 %v311_v19, %v5639_v34 }
  0xed   :  { %10937 = vst [vmem:[#allocation150_spill] sm:$0xff] %v5686_v17  ;;  %10938 = vst [vmem:[#allocation151_spill] sm:$0xff] %v5689_v44 }
  0xee   :  { %v202_v37 = vpop.f32.mrf.mxu0  ;;  %v315_v36 = vpop.f32.mrf.mxu1 }
  0xef   :  { %v5691_v30 = vadd.f32 %v202_v37, %v58_v40  ;;  %v5694_v32 = vadd.f32 %v315_v36, %v5633_v38 }
  0xf0   :  { %v204_v31 = vpop.f32.mrf.mxu0  ;;  %v317_v8 = vpop.f32.mrf.mxu1 }
  0xf1   :  { %10939 = vst [vmem:[#allocation152_spill] sm:$0xff] %v5691_v30  ;;  %10940 = vst [vmem:[#allocation153_spill] sm:$0xff] %v5694_v32  ;;  %v5696_v27 = vadd.f32 %v204_v31, %v62_v35  ;;  %v5699_v53 = vadd.f32 %v317_v8, %v5639_v34  ;;  %v167_v31 = vadd.f32 %v5614_v39, %v58_v40 }
  0xf2   :  { %v169_v8 = vadd.f32 %v5623_v62, %v62_v35 }
  0xf3   :  { %10941 = vst [vmem:[#allocation154_spill] sm:$0xff] %v5696_v27  ;;  %10942 = vst [vmem:[#allocation155_spill] sm:$0xff] %v5699_v53 }
  0xf4   :  { %v208_v29 = vpop.f32.mrf.mxu0  ;;  %v321_v28 = vpop.f32.mrf.mxu1 }
  0xf5   :  { %v5701_v17 = vadd.f32 %v208_v29, %v58_v40  ;;  %v5704_v19 = vadd.f32 %v321_v28, %v5633_v38 }
  0xf6   :  { %v210_v44 = vpop.f32.mrf.mxu0  ;;  %v323_v37 = vpop.f32.mrf.mxu1 }
  0xf7   :  { %10943 = vst [vmem:[#allocation156_spill] sm:$0xff] %v5701_v17  ;;  %10944 = vst [vmem:[#allocation157_spill] sm:$0xff] %v5704_v19  ;;  %v5706_v30 = vadd.f32 %v210_v44, %v62_v35  ;;  %v5709_v36 = vadd.f32 %v323_v37, %v5639_v34  ;;  %v282_v44 = vadd.f32 %v5625_v18, %v5639_v34 }
  0xf8   :  { %v280_v37 = vadd.f32 %v5616_v41, %v5633_v38 }
  0xf9   :  { %10945 = vst [vmem:[#allocation158_spill] sm:$0xff] %v5706_v30  ;;  %10946 = vst [vmem:[#allocation159_spill] sm:$0xff] %v5709_v36 }
  0xfa   :  { %v621_v32 = vpop.f32.mrf.mxu0  ;;  %v692_v17 = vpop.f32.mrf.mxu1 }
  0xfb   :  { %v697_v53 = vadd.f32 %v621_v32, %v167_v31  ;;  %v699_v36 = vadd.f32 %v692_v17, %v280_v37  ;;  %v5727_v17 = vld [vmem:[%s10243_s2 + $0x1e0] sm:$0xff]  ;;  %v5757_v37 = vld [vmem:[%s10243_s2 + $0x1d0] sm:$0xff] }
  0xfc   :  { %v623_v27 = vpop.f32.mrf.mxu0  ;;  %v694_v19 = vpop.f32.mrf.mxu1 }
  0xfd   :  { %v3406_v33 = vmul.f32 -1.442695, %v697_v53  ;;  %v698_v29 = vadd.f32 %v623_v27, %v169_v8  ;;  %v700_v30 = vadd.f32 %v694_v19, %v282_v44  ;;  %v5751_v44 = vld [vmem:[%s10243_s2 + $0x1c0] sm:$0xff] }
  0xff   :  { %3509 = vpow2.f32 %v3406_v33  ;;  %v3407_v28 = vmul.f32 -1.442695, %v698_v29  ;;  %v3408_v39 = vmul.f32 -1.442695, %v700_v30  ;;  %v5739_v29 = vld [vmem:[%s10243_s2 + $0x1c8] sm:$0xff] }
 0x101   :  { %3511 = vpow2.f32 %v3407_v28  ;;  %v5745_v28 = vld [vmem:[%s10243_s2 + $0x1d8] sm:$0xff] }
 0x102   :  { %3513 = vpow2.f32 %v3408_v39  ;;  %v5763_v39 = vld [vmem:[%s10243_s2 + $0x1a8] sm:$0xff] }
 0x10c   :  { %v3510_v40 = vpop.eup %3509 }
 0x10d   :  { %v704_v35 = vadd.f32 1.0, %v3510_v40  ;;  %v5769_v40 = vld [vmem:[%s10243_s2 + $0x1b8] sm:$0xff] }
 0x10e   :  { %v3512_v62 = vpop.eup %3511 }
 0x10f   :  { %3515 = vrcp.f32 %v704_v35  ;;  %v710_v27 = vadd.f32 1.0, %v3512_v62  ;;  %v3514_v33 = vpop.eup %3513  ;;  %v5775_v35 = vld [vmem:[%s10243_s2 + $0x1a0] sm:$0xff]  ;;  %v5781_v62 = vld [vmem:[%s10243_s2 + $0x1b0] sm:$0xff] }
 0x110   :  { %3517 = vtanh.f32 %v699_v36  ;;  %v717_v8 = vadd.f32 1.0, %v3514_v33  ;;  %v5733_v36 = vld [vmem:[%s10243_s2 + $0x1f0] sm:$0xff]  ;;  %v5793_v33 = vld [vmem:[%s10243_s2 + $0x198] sm:$0xff] }
 0x111   :  { %3519 = vrcp.f32 %v710_v27  ;;  %v5787_v27 = vld [vmem:[%s10243_s2 + $0x188] sm:$0xff] }
 0x112   :  { %3521 = vrcp.f32 %v717_v8  ;;  %v5817_v8 = vld [vmem:[%s10243_s2 + $0x178] sm:$0xff] }
 0x11c   :  { %v3516_v32 = vpop.eup %3515 }
 0x11d   :  { %v3518_v53 = vpop.eup %3517 }
 0x11e   :  { %v3520_v31 = vpop.eup %3519  ;;  %v721_v18 = vmul.f32 %v3518_v53, %v3516_v32  ;;  %v5799_v32 = vld [vmem:[%s10243_s2 + $0x180] sm:$0xff]  ;;  %v5805_v53 = vld [vmem:[%s10243_s2 + $0x190] sm:$0xff] }
 0x11f   :  { %v720_v34 = vmul.f32 0.0, %v3520_v31  ;;  %v3522_v30 = vpop.eup %3521  ;;  %v5811_v31 = vld [vmem:[%s10243_s2 + $0x168] sm:$0xff] }
 0x121   :  { %v5717_v19 = vadd.f32 %v721_v18, %v720_v34  ;;  %v5823_v34 = vld [vmem:[%s10243_s2 + $0x160] sm:$0xff]  ;;  %v5829_v18 = vld [vmem:[%s10243_s2 + $0x170] sm:$0xff] }
 0x123   :  { %3523 = vtanh.f32 %v5717_v19 }
 0x130   :  { %v3524_v38 = vpop.eup %3523 }
 0x131   :  { %v5720_v41 = vmul.f32 %v3524_v38, %v3522_v30  ;;  %v5835_v30 = vld [vmem:[%s10243_s2 + $0x148] sm:$0xff]  ;;  %v5841_v38 = vld [vmem:[%s10243_s2 + $0x158] sm:$0xff] }
 0x133   :  { %811 = vmatmul.mubr.f32.vlgmr.msra.gmra.mxu0 %v5720_v41  ;;  %882 = vmatmul.mubr.f32.vlgmr.msra.gmra.mxu1 %v5720_v41 }
 0x134   :  { %917 = vmatpush1.msra.mxu0 %v5727_v17  ;;  %988 = vmatpush1.msra.mxu1 %v5733_v36 }
 0x135   :  { %918 = vmatprep.subr.mxu0 %v5739_v29  ;;  %989 = vmatprep.subr.mxu1 %v5745_v28 }
 0x136   :  { %919 = vmatpush1.msra.mxu0 %v5751_v44  ;;  %990 = vmatpush1.msra.mxu1 %v5757_v37 }
 0x137   :  { %920 = vmatprep.subr.mxu0 %v5763_v39  ;;  %991 = vmatprep.subr.mxu1 %v5769_v40 }
 0x138   :  { %921 = vmatpush1.msra.mxu0 %v5775_v35  ;;  %992 = vmatpush1.msra.mxu1 %v5781_v62 }
 0x139   :  { %922 = vmatprep.subr.mxu0 %v5787_v27  ;;  %993 = vmatprep.subr.mxu1 %v5793_v33 }
 0x13a   :  { %923 = vmatpush1.msra.mxu0 %v5799_v32  ;;  %994 = vmatpush1.msra.mxu1 %v5805_v53 }
 0x13b   :  { %924 = vmatprep.subr.mxu0 %v5811_v31  ;;  %995 = vmatprep.subr.mxu1 %v5817_v8 }
 0x13c   :  { %925 = vmatpush1.msra.mxu0 %v5823_v34  ;;  %996 = vmatpush1.msra.mxu1 %v5829_v18 }
 0x13d   :  { %926 = vmatprep.subr.mxu0 %v5835_v30  ;;  %997 = vmatprep.subr.mxu1 %v5841_v38 }
 0x13e   :  { %927 = vmatpush1.msra.mxu0 %v4552_v42  ;;  %998 = vmatpush1.msra.mxu1 %v4557_v43  ;;  %v10947_v42 = vmov 0.0   ;;  %v10948_v43 = vld [vmem:[#allocation3_spill] sm:$0xff] }
 0x13f   :  { %928 = vmatprep.subr.mxu0 %v4567_v45  ;;  %999 = vmatprep.subr.mxu1 %v4572_v46  ;;  %v10949_v45 = vld [vmem:[#allocation4_spill] sm:$0xff]  ;;  %v10950_v46 = vld [vmem:[#allocation5_spill] sm:$0xff] }
 0x140   :  { %929 = vmatpush1.msra.mxu0 %v4579_v47  ;;  %1000 = vmatpush1.msra.mxu1 %v4584_v48  ;;  %v10951_v47 = vld [vmem:[#allocation6_spill] sm:$0xff]  ;;  %v10952_v48 = vld [vmem:[#allocation7_spill] sm:$0xff] }
 0x141   :  { %930 = vmatprep.subr.mxu0 %v4591_v49  ;;  %1001 = vmatprep.subr.mxu1 %v4596_v50  ;;  %v10953_v49 = vld [vmem:[#allocation8_spill] sm:$0xff]  ;;  %v10954_v50 = vld [vmem:[#allocation9_spill] sm:$0xff] }
 0x142   :  { %931 = vmatpush1.msra.mxu0 %v4605_v51  ;;  %1002 = vmatpush1.msra.mxu1 %v4610_v52  ;;  %v10955_v51 = vld [vmem:[#allocation10_spill] sm:$0xff]  ;;  %v10956_v52 = vld [vmem:[#allocation11_spill] sm:$0xff] }
 0x143   :  { %932 = vmatprep.subr.mxu0 %v4622_v54  ;;  %1003 = vmatprep.subr.mxu1 %v4627_v55  ;;  %v10957_v54 = vld [vmem:[#allocation12_spill] sm:$0xff]  ;;  %v10958_v55 = vld [vmem:[#allocation13_spill] sm:$0xff] }
 0x144   :  { %933 = vmatpush1.msra.mxu0 %v4634_v56  ;;  %1004 = vmatpush1.msra.mxu1 %v4639_v57  ;;  %v10959_v56 = vld [vmem:[#allocation14_spill] sm:$0xff]  ;;  %v10960_v57 = vld [vmem:[#allocation15_spill] sm:$0xff] }
 0x145   :  { %934 = vmatprep.subr.mxu0 %v4646_v58  ;;  %1005 = vmatprep.subr.mxu1 %v4651_v59  ;;  %v10961_v58 = vld [vmem:[#allocation16_spill] sm:$0xff]  ;;  %v10962_v59 = vld [vmem:[#allocation17_spill] sm:$0xff] }
 0x146   :  { %935 = vmatpush1.msra.mxu0 %v4660_v60  ;;  %1006 = vmatpush1.msra.mxu1 %v4665_v61  ;;  %v10963_v60 = vld [vmem:[#allocation18_spill] sm:$0xff]  ;;  %v10964_v61 = vld [vmem:[#allocation19_spill] sm:$0xff] }
 0x147   :  { %936 = vmatprep.subr.mxu0 %v4677_v63  ;;  %1007 = vmatprep.subr.mxu1 %v4682_v0  ;;  %v10965_v63 = vld [vmem:[#allocation20_spill] sm:$0xff]  ;;  %v10966_v0 = vld [vmem:[#allocation21_spill] sm:$0xff] }
 0x148   :  { %937 = vmatpush1.msra.mxu0 %v4689_v1  ;;  %1008 = vmatpush1.msra.mxu1 %v4694_v2  ;;  %v10967_v1 = vld [vmem:[#allocation22_spill] sm:$0xff]  ;;  %v10968_v2 = vld [vmem:[#allocation23_spill] sm:$0xff] }
 0x149   :  { %938 = vmatprep.subr.mxu0 %v4701_v4  ;;  %1009 = vmatprep.subr.mxu1 %v4706_v5  ;;  %v10969_v4 = vld [vmem:[#allocation24_spill] sm:$0xff]  ;;  %v10970_v5 = vld [vmem:[#allocation25_spill] sm:$0xff] }
 0x14a   :  { %939 = vmatpush1.msra.mxu0 %v4715_v6  ;;  %1010 = vmatpush1.msra.mxu1 %v4720_v7  ;;  %v10971_v6 = vld [vmem:[#allocation26_spill] sm:$0xff]  ;;  %v10972_v7 = vld [vmem:[#allocation27_spill] sm:$0xff] }
 0x14b   :  { %940 = vmatprep.subr.mxu0 %v4732_v9  ;;  %1011 = vmatprep.subr.mxu1 %v4737_v10  ;;  %v10973_v9 = vld [vmem:[#allocation28_spill] sm:$0xff]  ;;  %v10974_v10 = vld [vmem:[#allocation29_spill] sm:$0xff] }
 0x14c   :  { %941 = vmatpush1.msra.mxu0 %v4744_v11  ;;  %1012 = vmatpush1.msra.mxu1 %v4749_v12  ;;  %v10975_v11 = vld [vmem:[#allocation30_spill] sm:$0xff]  ;;  %v10976_v12 = vld [vmem:[#allocation31_spill] sm:$0xff] }
 0x14d   :  { %942 = vmatprep.subr.mxu0 %v4756_v13  ;;  %1013 = vmatprep.subr.mxu1 %v4761_v14  ;;  %v10977_v13 = vld [vmem:[#allocation32_spill] sm:$0xff]  ;;  %v10978_v14 = vld [vmem:[#allocation33_spill] sm:$0xff] }
 0x14e   :  { %943 = vmatpush1.msra.mxu0 %v4770_v15  ;;  %1014 = vmatpush1.msra.mxu1 %v4775_v16  ;;  %v10979_v15 = vld [vmem:[#allocation34_spill] sm:$0xff]  ;;  %v10980_v16 = vld [vmem:[#allocation35_spill] sm:$0xff] }
 0x14f   :  { %944 = vmatprep.subr.mxu0 %v4787_v20  ;;  %1015 = vmatprep.subr.mxu1 %v4792_v21  ;;  %v10981_v20 = vld [vmem:[#allocation36_spill] sm:$0xff]  ;;  %v10982_v21 = vld [vmem:[#allocation37_spill] sm:$0xff] }
 0x150   :  { %945 = vmatpush1.msra.mxu0 %v4799_v22  ;;  %1016 = vmatpush1.msra.mxu1 %v4804_v23  ;;  %v10983_v22 = vld [vmem:[#allocation38_spill] sm:$0xff]  ;;  %v10984_v23 = vld [vmem:[#allocation39_spill] sm:$0xff] }
 0x151   :  { %946 = vmatprep.subr.mxu0 %v4811_v24  ;;  %1017 = vmatprep.subr.mxu1 %v4816_v25  ;;  %v10985_v24 = vld [vmem:[#allocation40_spill] sm:$0xff]  ;;  %v10986_v25 = vld [vmem:[#allocation41_spill] sm:$0xff] }
 0x152   :  { %947 = vmatpush1.msra.mxu0 %v4823_v26  ;;  %980 = vmatprep.mubr.f32.mxu0 %v10947_v42  ;;  %v10987_v26 = vld [vmem:[#allocation42_spill] sm:$0xff] }
 0x153   :  { %1018 = vmatpush1.msra.mxu1 %v10948_v43  ;;  %1051 = vmatprep.mubr.f32.mxu1 %v10947_v42  ;;  %v10989_v43 = vld [vmem:[#allocation44_spill] sm:$0xff] }
 0x154   :  { %981 = vmatmul.mubr.f32.vlgmr.msra.gmra.mxu0 %v5720_v41  ;;  %1052 = vmatmul.mubr.f32.vlgmr.msra.gmra.mxu1 %v5720_v41  ;;  %v10988_v41 = vld [vmem:[#allocation43_spill] sm:$0xff] }
 0x155   :  { %1086 = vmatprep.subr.mxu0 %v10949_v45  ;;  %1157 = vmatprep.subr.mxu1 %v10950_v46  ;;  %v10990_v45 = vld [vmem:[#allocation45_spill] sm:$0xff]  ;;  %v10991_v46 = vld [vmem:[#allocation46_spill] sm:$0xff] }
 0x156   :  { %1087 = vmatpush1.msra.mxu0 %v10951_v47  ;;  %1158 = vmatpush1.msra.mxu1 %v10952_v48  ;;  %v10992_v47 = vld [vmem:[#allocation47_spill] sm:$0xff]  ;;  %v10993_v48 = vld [vmem:[#allocation48_spill] sm:$0xff] }
 0x157   :  { %1088 = vmatprep.subr.mxu0 %v10953_v49  ;;  %1159 = vmatprep.subr.mxu1 %v10954_v50  ;;  %v10994_v49 = vld [vmem:[#allocation49_spill] sm:$0xff]  ;;  %v10995_v50 = vld [vmem:[#allocation50_spill] sm:$0xff] }
 0x158   :  { %1089 = vmatpush1.msra.mxu0 %v10955_v51  ;;  %1160 = vmatpush1.msra.mxu1 %v10956_v52  ;;  %v10996_v51 = vld [vmem:[#allocation51_spill] sm:$0xff]  ;;  %v10997_v52 = vld [vmem:[#allocation52_spill] sm:$0xff] }
 0x159   :  { %1090 = vmatprep.subr.mxu0 %v10957_v54  ;;  %1161 = vmatprep.subr.mxu1 %v10958_v55  ;;  %v10998_v54 = vld [vmem:[#allocation53_spill] sm:$0xff]  ;;  %v10999_v55 = vld [vmem:[#allocation54_spill] sm:$0xff] }
 0x15a   :  { %1091 = vmatpush1.msra.mxu0 %v10959_v56  ;;  %1162 = vmatpush1.msra.mxu1 %v10960_v57  ;;  %v11000_v56 = vld [vmem:[#allocation55_spill] sm:$0xff]  ;;  %v11001_v57 = vld [vmem:[#allocation56_spill] sm:$0xff] }
 0x15b   :  { %1092 = vmatprep.subr.mxu0 %v10961_v58  ;;  %1163 = vmatprep.subr.mxu1 %v10962_v59  ;;  %v11002_v58 = vld [vmem:[#allocation57_spill] sm:$0xff]  ;;  %v11003_v59 = vld [vmem:[#allocation58_spill] sm:$0xff] }
 0x15c   :  { %1093 = vmatpush1.msra.mxu0 %v10963_v60  ;;  %1164 = vmatpush1.msra.mxu1 %v10964_v61  ;;  %v11004_v60 = vld [vmem:[#allocation59_spill] sm:$0xff]  ;;  %v11005_v61 = vld [vmem:[#allocation60_spill] sm:$0xff] }
 0x15d   :  { %1094 = vmatprep.subr.mxu0 %v10965_v63  ;;  %1165 = vmatprep.subr.mxu1 %v10966_v0  ;;  %v11006_v63 = vld [vmem:[#allocation61_spill] sm:$0xff]  ;;  %v11007_v0 = vld [vmem:[#allocation62_spill] sm:$0xff] }
 0x15e   :  { %1095 = vmatpush1.msra.mxu0 %v10967_v1  ;;  %1166 = vmatpush1.msra.mxu1 %v10968_v2  ;;  %v11008_v1 = vld [vmem:[#allocation63_spill] sm:$0xff]  ;;  %v11009_v2 = vld [vmem:[#allocation64_spill] sm:$0xff] }
 0x15f   :  { %1096 = vmatprep.subr.mxu0 %v10969_v4  ;;  %1167 = vmatprep.subr.mxu1 %v10970_v5  ;;  %v11010_v4 = vld [vmem:[#allocation65_spill] sm:$0xff]  ;;  %v11011_v5 = vld [vmem:[#allocation66_spill] sm:$0xff] }
 0x160   :  { %1097 = vmatpush1.msra.mxu0 %v10971_v6  ;;  %1168 = vmatpush1.msra.mxu1 %v10972_v7  ;;  %v11012_v6 = vld [vmem:[#allocation67_spill] sm:$0xff]  ;;  %v11013_v7 = vld [vmem:[#allocation68_spill] sm:$0xff] }
 0x161   :  { %1098 = vmatprep.subr.mxu0 %v10973_v9  ;;  %1169 = vmatprep.subr.mxu1 %v10974_v10  ;;  %v11014_v9 = vld [vmem:[#allocation69_spill] sm:$0xff]  ;;  %v11015_v10 = vld [vmem:[#allocation70_spill] sm:$0xff] }
 0x162   :  { %1099 = vmatpush1.msra.mxu0 %v10975_v11  ;;  %1170 = vmatpush1.msra.mxu1 %v10976_v12  ;;  %v11016_v11 = vld [vmem:[#allocation71_spill] sm:$0xff]  ;;  %v11017_v12 = vld [vmem:[#allocation72_spill] sm:$0xff] }
 0x163   :  { %1100 = vmatprep.subr.mxu0 %v10977_v13  ;;  %1171 = vmatprep.subr.mxu1 %v10978_v14  ;;  %v11018_v13 = vld [vmem:[#allocation73_spill] sm:$0xff]  ;;  %v11019_v14 = vld [vmem:[#allocation74_spill] sm:$0xff] }
 0x164   :  { %1101 = vmatpush1.msra.mxu0 %v10979_v15  ;;  %1172 = vmatpush1.msra.mxu1 %v10980_v16  ;;  %v11020_v15 = vld [vmem:[#allocation75_spill] sm:$0xff]  ;;  %v11021_v16 = vld [vmem:[#allocation76_spill] sm:$0xff] }
 0x165   :  { %1102 = vmatprep.subr.mxu0 %v10981_v20  ;;  %1173 = vmatprep.subr.mxu1 %v10982_v21  ;;  %v11022_v20 = vld [vmem:[#allocation77_spill] sm:$0xff]  ;;  %v11023_v21 = vld [vmem:[#allocation78_spill] sm:$0xff] }
 0x166   :  { %1103 = vmatpush1.msra.mxu0 %v10983_v22  ;;  %1174 = vmatpush1.msra.mxu1 %v10984_v23  ;;  %v11024_v22 = vld [vmem:[#allocation79_spill] sm:$0xff]  ;;  %v11025_v23 = vld [vmem:[#allocation80_spill] sm:$0xff] }
 0x167   :  { %1104 = vmatprep.subr.mxu0 %v10985_v24  ;;  %1175 = vmatprep.subr.mxu1 %v10986_v25  ;;  %v11026_v24 = vld [vmem:[#allocation81_spill] sm:$0xff]  ;;  %v11027_v25 = vld [vmem:[#allocation82_spill] sm:$0xff] }
 0x168   :  { %1105 = vmatpush1.msra.mxu0 %v10987_v26  ;;  %1176 = vmatpush1.msra.mxu1 %v10988_v41  ;;  %v11028_v26 = vld [vmem:[#allocation83_spill] sm:$0xff]  ;;  %v11029_v41 = vld [vmem:[#allocation84_spill] sm:$0xff] }
 0x169   :  { %1106 = vmatprep.subr.mxu0 %v10989_v43  ;;  %1177 = vmatprep.subr.mxu1 %v10990_v45  ;;  %v11030_v43 = vld [vmem:[#allocation85_spill] sm:$0xff]  ;;  %v11031_v45 = vld [vmem:[#allocation86_spill] sm:$0xff] }
 0x16a   :  { %1107 = vmatpush1.msra.mxu0 %v10991_v46  ;;  %1178 = vmatpush1.msra.mxu1 %v10992_v47  ;;  %v11032_v46 = vld [vmem:[#allocation87_spill] sm:$0xff]  ;;  %v11033_v47 = vld [vmem:[#allocation88_spill] sm:$0xff] }
 0x16b   :  { %1108 = vmatprep.subr.mxu0 %v10993_v48  ;;  %1179 = vmatprep.subr.mxu1 %v10994_v49  ;;  %v11034_v48 = vld [vmem:[#allocation89_spill] sm:$0xff]  ;;  %v11035_v49 = vld [vmem:[#allocation90_spill] sm:$0xff] }
 0x16c   :  { %1109 = vmatpush1.msra.mxu0 %v10995_v50  ;;  %1180 = vmatpush1.msra.mxu1 %v10996_v51  ;;  %v11036_v50 = vld [vmem:[#allocation91_spill] sm:$0xff]  ;;  %v11037_v51 = vld [vmem:[#allocation92_spill] sm:$0xff] }
 0x16d   :  { %1110 = vmatprep.subr.mxu0 %v10997_v52  ;;  %1181 = vmatprep.subr.mxu1 %v10998_v54  ;;  %v11038_v52 = vld [vmem:[#allocation93_spill] sm:$0xff]  ;;  %v11039_v54 = vld [vmem:[#allocation94_spill] sm:$0xff] }
 0x16e   :  { %1111 = vmatpush1.msra.mxu0 %v10999_v55  ;;  %1182 = vmatpush1.msra.mxu1 %v11000_v56  ;;  %v11040_v55 = vld [vmem:[#allocation95_spill] sm:$0xff]  ;;  %v11041_v56 = vld [vmem:[#allocation96_spill] sm:$0xff] }
 0x16f   :  { %1112 = vmatprep.subr.mxu0 %v11001_v57  ;;  %1183 = vmatprep.subr.mxu1 %v11002_v58  ;;  %v11042_v57 = vld [vmem:[#allocation97_spill] sm:$0xff]  ;;  %v11043_v58 = vld [vmem:[#allocation98_spill] sm:$0xff] }
 0x170   :  { %1113 = vmatpush1.msra.mxu0 %v11003_v59  ;;  %1184 = vmatpush1.msra.mxu1 %v11004_v60  ;;  %v11044_v59 = vld [vmem:[#allocation99_spill] sm:$0xff]  ;;  %v11045_v60 = vld [vmem:[#allocation100_spill] sm:$0xff] }
 0x171   :  { %1114 = vmatprep.subr.mxu0 %v11005_v61  ;;  %1185 = vmatprep.subr.mxu1 %v11006_v63  ;;  %v11046_v61 = vld [vmem:[#allocation101_spill] sm:$0xff]  ;;  %v11047_v63 = vld [vmem:[#allocation102_spill] sm:$0xff] }
 0x172   :  { %1115 = vmatpush1.msra.mxu0 %v11007_v0  ;;  %1186 = vmatpush1.msra.mxu1 %v11008_v1  ;;  %v11048_v0 = vld [vmem:[#allocation103_spill] sm:$0xff]  ;;  %v11049_v1 = vld [vmem:[#allocation104_spill] sm:$0xff] }
 0x173   :  { %1116 = vmatprep.subr.mxu0 %v11009_v2  ;;  %1187 = vmatprep.subr.mxu1 %v11010_v4  ;;  %v11050_v2 = vld [vmem:[#allocation105_spill] sm:$0xff]  ;;  %v11051_v4 = vld [vmem:[#allocation106_spill] sm:$0xff] }
 0x174   :  { %1117 = vmatpush1.msra.mxu0 %v11011_v5  ;;  %1188 = vmatpush1.msra.mxu1 %v11012_v6  ;;  %v11052_v5 = vld [vmem:[#allocation107_spill] sm:$0xff]  ;;  %v11053_v6 = vld [vmem:[#allocation108_spill] sm:$0xff] }
 0x175   :  { %1118 = vmatprep.subr.mxu0 %v11013_v7  ;;  %1189 = vmatprep.subr.mxu1 %v11014_v9  ;;  %v11054_v7 = vld [vmem:[#allocation109_spill] sm:$0xff]  ;;  %v11055_v9 = vld [vmem:[#allocation110_spill] sm:$0xff] }
 0x176   :  { %1119 = vmatpush2.msra.mxu0 %v11015_v10  ;;  %1190 = vmatpush2.msra.mxu1 %v11016_v11  ;;  %v11056_v10 = vld [vmem:[#allocation111_spill] sm:$0xff]  ;;  %v11057_v11 = vld [vmem:[#allocation112_spill] sm:$0xff] }
 0x177   :  { %1120 = vmatprep.subr.mxu0 %v11017_v12  ;;  %1191 = vmatprep.subr.mxu1 %v11018_v13  ;;  %v11058_v12 = vld [vmem:[#allocation113_spill] sm:$0xff]  ;;  %v11059_v13 = vld [vmem:[#allocation114_spill] sm:$0xff] }
 0x178   :  { %1121 = vmatpush2.msra.mxu0 %v11019_v14  ;;  %1192 = vmatpush2.msra.mxu1 %v11020_v15  ;;  %v11060_v14 = vld [vmem:[#allocation115_spill] sm:$0xff]  ;;  %v11061_v15 = vld [vmem:[#allocation116_spill] sm:$0xff] }
 0x179   :  { %1122 = vmatprep.subr.mxu0 %v11021_v16  ;;  %1193 = vmatprep.subr.mxu1 %v11022_v20  ;;  %v11062_v16 = vld [vmem:[#allocation117_spill] sm:$0xff]  ;;  %v11063_v20 = vld [vmem:[#allocation118_spill] sm:$0xff] }
 0x17a   :  { %1123 = vmatpush2.msra.mxu0 %v11023_v21  ;;  %1194 = vmatpush2.msra.mxu1 %v11024_v22  ;;  %v11064_v21 = vld [vmem:[#allocation119_spill] sm:$0xff]  ;;  %v11065_v22 = vld [vmem:[#allocation120_spill] sm:$0xff] }
 0x17b   :  { %1124 = vmatprep.subr.mxu0 %v11025_v23  ;;  %1195 = vmatprep.subr.mxu1 %v11026_v24  ;;  %v11066_v23 = vld [vmem:[#allocation121_spill] sm:$0xff]  ;;  %v11067_v24 = vld [vmem:[#allocation122_spill] sm:$0xff] }
 0x17c   :  { %1125 = vmatpush2.msra.mxu0 %v11027_v25  ;;  %1196 = vmatpush2.msra.mxu1 %v11028_v26  ;;  %v11068_v25 = vld [vmem:[#allocation123_spill] sm:$0xff]  ;;  %v11069_v26 = vld [vmem:[#allocation124_spill] sm:$0xff] }
 0x17d   :  { %1126 = vmatprep.subr.mxu0 %v11029_v41  ;;  %1197 = vmatprep.subr.mxu1 %v11030_v43  ;;  %v11070_v41 = vld [vmem:[#allocation125_spill] sm:$0xff]  ;;  %v11071_v43 = vld [vmem:[#allocation126_spill] sm:$0xff] }
 0x17e   :  { %1127 = vmatpush2.msra.mxu0 %v11031_v45  ;;  %1198 = vmatpush2.msra.mxu1 %v11032_v46  ;;  %v11072_v45 = vld [vmem:[#allocation127_spill] sm:$0xff]  ;;  %v11073_v46 = vld [vmem:[#allocation128_spill] sm:$0xff] }
 0x17f   :  { %1128 = vmatprep.subr.mxu0 %v11033_v47  ;;  %1199 = vmatprep.subr.mxu1 %v11034_v48  ;;  %v11074_v47 = vld [vmem:[#allocation129_spill] sm:$0xff]  ;;  %v11075_v48 = vld [vmem:[#allocation130_spill] sm:$0xff] }
 0x180   :  { %1129 = vmatpush2.msra.mxu0 %v11035_v49  ;;  %1200 = vmatpush2.msra.mxu1 %v11036_v50  ;;  %v11076_v49 = vld [vmem:[#allocation131_spill] sm:$0xff]  ;;  %v6021_v50 = vld [vmem:[%s10243_s2 + $0x1e8] sm:$0xff] }
 0x181   :  { %1130 = vmatprep.subr.mxu0 %v11037_v51  ;;  %1201 = vmatprep.subr.mxu1 %v11038_v52  ;;  %v6027_v51 = vld [vmem:[%s10243_s2 + $0x1f8] sm:$0xff]  ;;  %v550_v52 = vld [vmem:[%s10246_s5] sm:$0xf] }
 0x182   :  { %1131 = vmatpush2.msra.mxu0 %v11039_v54  ;;  %1202 = vmatpush2.msra.mxu1 %v11040_v55  ;;  %v11077_v54 = vsub.s32 0, %v5612_v3 }
 0x183   :  { %1132 = vmatprep.subr.mxu0 %v11041_v56  ;;  %1203 = vmatprep.subr.mxu1 %v11042_v57  ;;  %v11079_v56 = vsub.s32 1, %v5612_v3 }
 0x184   :  { %1133 = vmatpush2.msra.mxu0 %v11043_v58  ;;  %1204 = vmatpush2.msra.mxu1 %v11044_v59  ;;  %v6035_v55 = vrot.slane %v550_v52, %v11077_v54 }
 0x185   :  { %1134 = vmatprep.subr.mxu0 %v11045_v60  ;;  %1205 = vmatprep.subr.mxu1 %v11046_v61  ;;  %v6039_v57 = vrot.slane %v550_v52, %v11079_v56  ;;  %v11087_v56 = vld [vmem:[#allocation135_spill] sm:$0xff] }
 0x186   :  { %1135 = vmatpush2.msra.mxu0 %v11047_v63  ;;  %1206 = vmatpush2.msra.mxu1 %v11048_v0  ;;  %11078 = vst [vmem:[#allocation3_spill] sm:$0xff] %v6035_v55 }
 0x187   :  { %1136 = vmatprep.subr.mxu0 %v11049_v1  ;;  %1207 = vmatprep.subr.mxu1 %v11050_v2  ;;  %11080 = vst [vmem:[#allocation4_spill] sm:$0xff] %v6039_v57  ;;  %v11081_v2 = vsub.s32 3, %v5612_v3 }
 0x188   :  { %1137 = vmatpush2.msra.mxu0 %v11051_v4  ;;  %1208 = vmatpush2.msra.mxu1 %v11052_v5 }
 0x189   :  { %1138 = vmatprep.subr.mxu0 %v11053_v6  ;;  %1209 = vmatprep.subr.mxu1 %v11054_v7  ;;  %v6045_v4 = vrot.slane %v550_v52, %v11081_v2  ;;  %v11083_v7 = vsub.s32 2, %v5612_v3 }
 0x18a   :  { %1139 = vmatpush2.msra.mxu0 %v11055_v9  ;;  %1210 = vmatpush2.msra.mxu1 %v11056_v10 }
 0x18b   :  { %1140 = vmatprep.subr.mxu0 %v11057_v11  ;;  %1211 = vmatprep.subr.mxu1 %v11058_v12  ;;  %11082 = vst [vmem:[#allocation5_spill] sm:$0xff] %v6045_v4  ;;  %v6050_v9 = vrot.slane %v550_v52, %v11083_v7 }
 0x18c   :  { %1141 = vmatpush2.msra.mxu0 %v11059_v13  ;;  %1212 = vmatpush2.msra.mxu1 %v11060_v14 }
 0x18d   :  { %1142 = vmatprep.subr.mxu0 %v11061_v15  ;;  %1213 = vmatprep.subr.mxu1 %v11062_v16  ;;  %11084 = vst [vmem:[#allocation6_spill] sm:$0xff] %v6050_v9 }
 0x18e   :  { %1143 = vmatpush2.msra.mxu0 %v11063_v20  ;;  %1214 = vmatpush2.msra.mxu1 %v11064_v21 }
 0x18f   :  { %1144 = vmatprep.subr.mxu0 %v11065_v22  ;;  %1215 = vmatprep.subr.mxu1 %v11066_v23  ;;  %v11085_v22 = vld [vmem:[#allocation132_spill] sm:$0xff] }
 0x190   :  { %1145 = vmatpush2.msra.mxu0 %v11067_v24  ;;  %1216 = vmatpush2.msra.mxu1 %v11068_v25 }
 0x191   :  { %1146 = vmatprep.subr.mxu0 %v11069_v26  ;;  %1217 = vmatprep.subr.mxu1 %v11070_v41 }
 0x192   :  { %1147 = vmatpush2.msra.mxu0 %v11071_v43  ;;  %1218 = vmatpush2.msra.mxu1 %v11072_v45  ;;  %v11086_v43 = vld [vmem:[#allocation134_spill] sm:$0xff] }
 0x193   :  { %1148 = vmatprep.subr.mxu0 %v11073_v46  ;;  %1219 = vmatprep.subr.mxu1 %v11074_v47 }
 0x194   :  { %1149 = vmatpush2.msra.mxu0 %v11075_v48  ;;  %1220 = vmatpush2.msra.mxu1 %v11076_v49 }
 0x195   :  { %1256 = vmatprep.subr.mxu0 %v6021_v50  ;;  %1327 = vmatprep.subr.mxu1 %v6027_v51 }
 0x1f3   :  { %v812_v58 = vpop.f32.mrf.mxu0  ;;  %v883_v0 = vpop.f32.mrf.mxu1 }
 0x1f4   :  { %v813_v59 = vadd.f32 %v812_v58, %v6035_v55  ;;  %v884_v12 = vadd.f32 %v883_v0, %v6050_v9 }
 0x1f5   :  { %v814_v60 = vpop.f32.mrf.mxu0  ;;  %v885_v5 = vpop.f32.mrf.mxu1 }
 0x1f6   :  { %v3409_v61 = vmul.f32 -1.442695, %v813_v59  ;;  %v815_v63 = vadd.f32 %v814_v60, %v6039_v57  ;;  %v886_v6 = vadd.f32 %v885_v5, %v6045_v4  ;;  %v11088_v59 = vld [vmem:[#allocation133_spill] sm:$0xff] }
 0x1f8   :  { %3525 = vpow2.f32 %v3409_v61  ;;  %v3410_v1 = vmul.f32 -1.442695, %v815_v63  ;;  %v3411_v10 = vmul.f32 -1.442695, %v886_v6 }
 0x1fa   :  { %3527 = vpow2.f32 %v3410_v1 }
 0x1fb   :  { %3529 = vpow2.f32 %v3411_v10 }
 0x205   :  { %v3526_v11 = vpop.eup %3525 }
 0x206   :  { %v891_v13 = vadd.f32 1.0, %v3526_v11 }
 0x207   :  { %v3528_v14 = vpop.eup %3527 }
 0x208   :  { %3531 = vrcp.f32 %v891_v13  ;;  %v897_v15 = vadd.f32 1.0, %v3528_v14  ;;  %v3530_v16 = vpop.eup %3529 }
 0x209   :  { %3533 = vtanh.f32 %v884_v12  ;;  %v904_v3 = vadd.f32 1.0, %v3530_v16 }
 0x20a   :  { %3535 = vrcp.f32 %v897_v15 }
 0x214   :  { %v982_v20 = vpop.f32.mrf.mxu0  ;;  %v1053_v48 = vpop.f32.mrf.mxu1 }
 0x215   :  { %v3532_v21 = vpop.eup %3531  ;;  %v1058_v23 = vadd.f32 %v982_v20, %v11085_v22  ;;  %v1060_v60 = vadd.f32 %v1053_v48, %v11088_v59  ;;  %v6271_v48 = vld [vmem:[%s10243_s2 + $0x48] sm:$0xff]  ;;  %v6301_v59 = vld [vmem:[%s10243_s2 + $0x38] sm:$0xff] }
 0x216   :  { %v3534_v24 = vpop.eup %3533  ;;  %v984_v25 = vpop.f32.mrf.mxu0 }
 0x217   :  { %v3536_v26 = vpop.eup %3535  ;;  %v3412_v41 = vmul.f32 -1.442695, %v1058_v23  ;;  %v1059_v45 = vadd.f32 %v984_v25, %v11086_v43  ;;  %v908_v47 = vmul.f32 %v3534_v24, %v3532_v21  ;;  %v1055_v54 = vpop.f32.mrf.mxu1  ;;  %v6217_v24 = vld [vmem:[%s10243_s2 + $0xb0] sm:$0xff]  ;;  %v6229_v25 = vld [vmem:[%s10243_s2 + $0x98] sm:$0xff]  ;;  %v6247_v43 = vld [vmem:[%s10243_s2 + $0x68] sm:$0xff] }
 0x218   :  { %v907_v46 = vmul.f32 0.0, %v3536_v26  ;;  %v1061_v58 = vadd.f32 %v1055_v54, %v11087_v56  ;;  %v6235_v26 = vld [vmem:[%s10243_s2 + $0x80] sm:$0xff]  ;;  %v6289_v56 = vld [vmem:[%s10243_s2 + $0x50] sm:$0xff] }
 0x219   :  { %3537 = vpow2.f32 %v3412_v41  ;;  %v3413_v49 = vmul.f32 -1.442695, %v1059_v45  ;;  %v6241_v41 = vld [vmem:[%s10243_s2 + $0x90] sm:$0xff]  ;;  %v6253_v45 = vld [vmem:[%s10243_s2 + $0x78] sm:$0xff]  ;;  %v6283_v54 = vld [vmem:[%s10243_s2 + $0x40] sm:$0xff] }
 0x21a   :  { %v6055_v52 = vadd.f32 %v908_v47, %v907_v46  ;;  %3539 = vrcp.f32 %v904_v3  ;;  %v3414_v61 = vmul.f32 -1.442695, %v1061_v58  ;;  %v6223_v3 = vld [vmem:[%s10243_s2 + $0x88] sm:$0xff]  ;;  %v6259_v46 = vld [vmem:[%s10243_s2 + $0x60] sm:$0xff]  ;;  %v6265_v47 = vld [vmem:[%s10243_s2 + $0x70] sm:$0xff] }
 0x21b   :  { %3541 = vpow2.f32 %v3413_v49  ;;  %v6277_v49 = vld [vmem:[%s10243_s2 + $0x58] sm:$0xff]  ;;  %v6295_v58 = vld [vmem:[%s10243_s2 + $0x28] sm:$0xff] }
 0x21c   :  { %3543 = vtanh.f32 %v6055_v52 }
 0x21d   :  { %3545 = vtanh.f32 %v1060_v60  ;;  %v6307_v60 = vld [vmem:[%s10243_s2 + $0x20] sm:$0xff] }
 0x21e   :  { %3547 = vpow2.f32 %v3414_v61  ;;  %v6313_v61 = vld [vmem:[%s10243_s2 + $0x30] sm:$0xff] }
 0x226   :  { %v3538_v63 = vpop.eup %3537 }
 0x227   :  { %v3540_v0 = vpop.eup %3539  ;;  %v1065_v1 = vadd.f32 1.0, %v3538_v63  ;;  %v6319_v63 = vld [vmem:[%s10243_s2 + $0x8] sm:$0xff] }
 0x228   :  { %v3542_v2 = vpop.eup %3541 }
 0x229   :  { %v3544_v5 = vpop.eup %3543  ;;  %3549 = vrcp.f32 %v1065_v1  ;;  %v1071_v6 = vadd.f32 1.0, %v3542_v2  ;;  %v6331_v1 = vld [vmem:[%s10243_s2] sm:$0xff]  ;;  %v6338_v2 = vld [vmem:[%s10243_s2 + $0x10] sm:$0xff] }
 0x22a   :  { %v911_v7 = vmul.f32 %v3544_v5, %v3540_v0  ;;  %v3546_v10 = vpop.eup %3545  ;;  %v6325_v0 = vld [vmem:[%s10243_s2 + $0x18] sm:$0xff]  ;;  %11089 = vst [vmem:[#allocation7_spill] sm:$0xff] %v6338_v2  ;;  %v6347_v5 = vld [vmem:[%s10244_s4 + $0x1e8] sm:$0xff] }
 0x22b   :  { %3551 = vrcp.f32 %v1071_v6  ;;  %v3548_v11 = vpop.eup %3547  ;;  %11090 = vst [vmem:[#allocation8_spill] sm:$0xff] %v6347_v5  ;;  %v6353_v6 = vld [vmem:[%s10244_s4 + $0x1f8] sm:$0xff] }
 0x22c   :  { %1150 = vmatprep.mubr.f32.mxu0 %v911_v7  ;;  %1221 = vmatprep.mubr.f32.mxu1 %v911_v7  ;;  %v1078_v15 = vadd.f32 1.0, %v3548_v11  ;;  %11091 = vst [vmem:[#allocation9_spill] sm:$0xff] %v6353_v6  ;;  %v6359_v7 = vld [vmem:[%s10244_s4 + $0x1e0] sm:$0xff]  ;;  %v6371_v11 = vld [vmem:[%s10244_s4 + $0x1c8] sm:$0xff] }
 0x22d   :  { %11092 = vst [vmem:[#allocation10_spill] sm:$0xff] %v6359_v7  ;;  %11094 = vst [vmem:[#allocation12_spill] sm:$0xff] %v6371_v11 }
 0x22e   :  { %3553 = vrcp.f32 %v1078_v15  ;;  %v6395_v15 = vld [vmem:[%s10244_s4 + $0x1a8] sm:$0xff] }
 0x22f   :  { %11098 = vst [vmem:[#allocation16_spill] sm:$0xff] %v6395_v15 }
 0x236   :  { %v3550_v12 = vpop.eup %3549 }
 0x237   :  { %v1082_v13 = vmul.f32 %v3550_v12, %v3546_v10  ;;  %v6365_v10 = vld [vmem:[%s10244_s4 + $0x1f0] sm:$0xff]  ;;  %v6377_v12 = vld [vmem:[%s10244_s4 + $0x1d8] sm:$0xff] }
 0x238   :  { %v3552_v14 = vpop.eup %3551  ;;  %11093 = vst [vmem:[#allocation11_spill] sm:$0xff] %v6365_v10  ;;  %11095 = vst [vmem:[#allocation13_spill] sm:$0xff] %v6377_v12 }
 0x239   :  { %v1081_v16 = vmul.f32 %v3552_v14, %v5717_v19  ;;  %v6091_v19 = vld [vmem:[%s10243_s2 + $0x140] sm:$0xff]  ;;  %v6389_v14 = vld [vmem:[%s10244_s4 + $0x1d0] sm:$0xff] }
 0x23a   :  { %11097 = vst [vmem:[#allocation15_spill] sm:$0xff] %v6389_v14 }
 0x23b   :  { %v6061_v20 = vadd.f32 %v1082_v13, %v1081_v16  ;;  %v3554_v21 = vpop.eup %3553  ;;  %v6383_v13 = vld [vmem:[%s10244_s4 + $0x1c0] sm:$0xff]  ;;  %v6401_v16 = vld [vmem:[%s10244_s4 + $0x1b8] sm:$0xff] }
 0x23c   :  { %11096 = vst [vmem:[#allocation14_spill] sm:$0xff] %v6383_v13  ;;  %11099 = vst [vmem:[#allocation17_spill] sm:$0xff] %v6401_v16 }
 0x23d   :  { %3555 = vtanh.f32 %v6061_v20 }
 0x24a   :  { %v3556_v22 = vpop.eup %3555 }
 0x24b   :  { %v6064_v23 = vmul.f32 %v3556_v22, %v3554_v21  ;;  %v6407_v21 = vld [vmem:[%s10244_s4 + $0x1a0] sm:$0xff]  ;;  %v6413_v22 = vld [vmem:[%s10244_s4 + $0x1b0] sm:$0xff] }
 0x24c   :  { %11100 = vst [vmem:[#allocation18_spill] sm:$0xff] %v6407_v21  ;;  %11101 = vst [vmem:[#allocation19_spill] sm:$0xff] %v6413_v22 }
 0x24d   :  { %1151 = vmatmul.mubr.f32.vlgmr.msra.gmra.mxu0 %v6064_v23  ;;  %1222 = vmatmul.mubr.f32.vlgmr.msra.gmra.mxu1 %v6064_v23 }
 0x24e   :  { %1257 = vmatpush1.msra.mxu0 %v5727_v17  ;;  %1328 = vmatpush1.msra.mxu1 %v5733_v36  ;;  %v6097_v17 = vld [vmem:[%s10243_s2 + $0x150] sm:$0xff]  ;;  %v6103_v36 = vld [vmem:[%s10243_s2 + $0x128] sm:$0xff] }
 0x24f   :  { %1258 = vmatprep.subr.mxu0 %v5739_v29  ;;  %1329 = vmatprep.subr.mxu1 %v5745_v28  ;;  %v6109_v29 = vld [vmem:[%s10243_s2 + $0x138] sm:$0xff]  ;;  %v6115_v28 = vld [vmem:[%s10243_s2 + $0x120] sm:$0xff] }
 0x250   :  { %1259 = vmatpush1.msra.mxu0 %v5751_v44  ;;  %1330 = vmatpush1.msra.mxu1 %v5757_v37  ;;  %v6121_v44 = vld [vmem:[%s10243_s2 + $0x130] sm:$0xff]  ;;  %v6127_v37 = vld [vmem:[%s10243_s2 + $0x108] sm:$0xff] }
 0x251   :  { %1260 = vmatprep.subr.mxu0 %v5763_v39  ;;  %1331 = vmatprep.subr.mxu1 %v5769_v40  ;;  %v6133_v39 = vld [vmem:[%s10243_s2 + $0x118] sm:$0xff]  ;;  %v6139_v40 = vld [vmem:[%s10243_s2 + $0x100] sm:$0xff] }
 0x252   :  { %1261 = vmatpush1.msra.mxu0 %v5775_v35  ;;  %1332 = vmatpush1.msra.mxu1 %v5781_v62  ;;  %v6145_v35 = vld [vmem:[%s10243_s2 + $0x110] sm:$0xff]  ;;  %v6151_v62 = vld [vmem:[%s10243_s2 + $0xe8] sm:$0xff] }
 0x253   :  { %1262 = vmatprep.subr.mxu0 %v5787_v27  ;;  %1333 = vmatprep.subr.mxu1 %v5793_v33  ;;  %v6157_v27 = vld [vmem:[%s10243_s2 + $0xf8] sm:$0xff]  ;;  %v6163_v33 = vld [vmem:[%s10243_s2 + $0xe0] sm:$0xff] }
 0x254   :  { %1263 = vmatpush1.msra.mxu0 %v5799_v32  ;;  %1334 = vmatpush1.msra.mxu1 %v5805_v53  ;;  %v6169_v32 = vld [vmem:[%s10243_s2 + $0xf0] sm:$0xff]  ;;  %v6175_v53 = vld [vmem:[%s10243_s2 + $0xc8] sm:$0xff] }
 0x255   :  { %1264 = vmatprep.subr.mxu0 %v5811_v31  ;;  %1335 = vmatprep.subr.mxu1 %v5817_v8  ;;  %v6181_v31 = vld [vmem:[%s10243_s2 + $0xd8] sm:$0xff]  ;;  %v6187_v8 = vld [vmem:[%s10243_s2 + $0xc0] sm:$0xff] }
 0x256   :  { %1265 = vmatpush1.msra.mxu0 %v5823_v34  ;;  %1336 = vmatpush1.msra.mxu1 %v5829_v18  ;;  %v6193_v34 = vld [vmem:[%s10243_s2 + $0xd0] sm:$0xff]  ;;  %v6199_v18 = vld [vmem:[%s10243_s2 + $0xa8] sm:$0xff] }
 0x257   :  { %1266 = vmatprep.subr.mxu0 %v5835_v30  ;;  %1337 = vmatprep.subr.mxu1 %v5841_v38  ;;  %v6205_v30 = vld [vmem:[%s10243_s2 + $0xb8] sm:$0xff]  ;;  %v6211_v38 = vld [vmem:[%s10243_s2 + $0xa0] sm:$0xff] }
 0x258   :  { %1267 = vmatpush1.msra.mxu0 %v6091_v19  ;;  %1338 = vmatpush1.msra.mxu1 %v6097_v17 }
 0x259   :  { %1268 = vmatprep.subr.mxu0 %v6103_v36  ;;  %1339 = vmatprep.subr.mxu1 %v6109_v29 }
 0x25a   :  { %1269 = vmatpush1.msra.mxu0 %v6115_v28  ;;  %1340 = vmatpush1.msra.mxu1 %v6121_v44 }
 0x25b   :  { %1270 = vmatprep.subr.mxu0 %v6127_v37  ;;  %1341 = vmatprep.subr.mxu1 %v6133_v39 }
 0x25c   :  { %1271 = vmatpush1.msra.mxu0 %v6139_v40  ;;  %1342 = vmatpush1.msra.mxu1 %v6145_v35 }
 0x25d   :  { %1272 = vmatprep.subr.mxu0 %v6151_v62  ;;  %1343 = vmatprep.subr.mxu1 %v6157_v27 }
 0x25e   :  { %1273 = vmatpush1.msra.mxu0 %v6163_v33  ;;  %1344 = vmatpush1.msra.mxu1 %v6169_v32 }
 0x25f   :  { %1274 = vmatprep.subr.mxu0 %v6175_v53  ;;  %1345 = vmatprep.subr.mxu1 %v6181_v31 }
 0x260   :  { %1275 = vmatpush1.msra.mxu0 %v6187_v8  ;;  %1346 = vmatpush1.msra.mxu1 %v6193_v34 }
 0x261   :  { %1276 = vmatprep.subr.mxu0 %v6199_v18  ;;  %1347 = vmatprep.subr.mxu1 %v6205_v30 }
 0x262   :  { %1277 = vmatpush1.msra.mxu0 %v6211_v38  ;;  %1348 = vmatpush1.msra.mxu1 %v6217_v24 }
 0x263   :  { %1278 = vmatprep.subr.mxu0 %v6223_v3  ;;  %1349 = vmatprep.subr.mxu1 %v6229_v25 }
 0x264   :  { %1279 = vmatpush1.msra.mxu0 %v6235_v26  ;;  %1350 = vmatpush1.msra.mxu1 %v6241_v41 }
 0x265   :  { %1280 = vmatprep.subr.mxu0 %v6247_v43  ;;  %1351 = vmatprep.subr.mxu1 %v6253_v45 }
 0x266   :  { %1281 = vmatpush1.msra.mxu0 %v6259_v46  ;;  %1352 = vmatpush1.msra.mxu1 %v6265_v47 }
 0x267   :  { %1282 = vmatprep.subr.mxu0 %v6271_v48  ;;  %1353 = vmatprep.subr.mxu1 %v6277_v49 }
 0x268   :  { %1283 = vmatpush1.msra.mxu0 %v6283_v54  ;;  %1354 = vmatpush1.msra.mxu1 %v6289_v56 }
 0x269   :  { %1284 = vmatprep.subr.mxu0 %v6295_v58  ;;  %1355 = vmatprep.subr.mxu1 %v6301_v59 }
 0x26a   :  { %1285 = vmatpush1.msra.mxu0 %v6307_v60  ;;  %1356 = vmatpush1.msra.mxu1 %v6313_v61 }
 0x26b   :  { %1286 = vmatprep.subr.mxu0 %v6319_v63  ;;  %1357 = vmatprep.subr.mxu1 %v6325_v0 }
 0x26c   :  { %1287 = vmatpush1.msra.mxu0 %v6331_v1  ;;  %1320 = vmatprep.mubr.f32.mxu0 %v10947_v42 }
 0x26d   :  { %1358 = vmatpush1.msra.mxu1 %v6338_v2  ;;  %1391 = vmatprep.mubr.f32.mxu1 %v10947_v42 }
 0x26e   :  { %1321 = vmatmul.mubr.f32.vlgmr.msra.gmra.mxu0 %v6064_v23  ;;  %1392 = vmatmul.mubr.f32.vlgmr.msra.gmra.mxu1 %v6064_v23  ;;  %v6419_v23 = vld [vmem:[%s10244_s4 + $0x188] sm:$0xff] }
 0x26f   :  { %1426 = vmatprep.subr.mxu0 %v6347_v5  ;;  %1497 = vmatprep.subr.mxu1 %v6353_v6  ;;  %11102 = vst [vmem:[#allocation20_spill] sm:$0xff] %v6419_v23 }
 0x270   :  { %1427 = vmatpush1.msra.mxu0 %v6359_v7  ;;  %1498 = vmatpush1.msra.mxu1 %v6365_v10 }
 0x271   :  { %1428 = vmatprep.subr.mxu0 %v6371_v11  ;;  %1499 = vmatprep.subr.mxu1 %v6377_v12 }
 0x272   :  { %1429 = vmatpush1.msra.mxu0 %v6383_v13  ;;  %1500 = vmatpush1.msra.mxu1 %v6389_v14 }
 0x273   :  { %1430 = vmatprep.subr.mxu0 %v6395_v15  ;;  %1501 = vmatprep.subr.mxu1 %v6401_v16  ;;  %v6425_v16 = vld [vmem:[%s10244_s4 + $0x198] sm:$0xff] }
 0x274   :  { %1431 = vmatpush1.msra.mxu0 %v6407_v21  ;;  %1502 = vmatpush1.msra.mxu1 %v6413_v22  ;;  %11103 = vst [vmem:[#allocation21_spill] sm:$0xff] %v6425_v16  ;;  %v6431_v21 = vld [vmem:[%s10244_s4 + $0x180] sm:$0xff]  ;;  %v6437_v22 = vld [vmem:[%s10244_s4 + $0x190] sm:$0xff] }
 0x275   :  { %1432 = vmatprep.subr.mxu0 %v6419_v23  ;;  %1503 = vmatprep.subr.mxu1 %v6425_v16  ;;  %11104 = vst [vmem:[#allocation22_spill] sm:$0xff] %v6431_v21  ;;  %11105 = vst [vmem:[#allocation23_spill] sm:$0xff] %v6437_v22  ;;  %v6443_v23 = vld [vmem:[%s10244_s4 + $0x168] sm:$0xff]  ;;  %v6449_v16 = vld [vmem:[%s10244_s4 + $0x178] sm:$0xff] }
 0x276   :  { %1433 = vmatpush1.msra.mxu0 %v6431_v21  ;;  %1504 = vmatpush1.msra.mxu1 %v6437_v22  ;;  %11106 = vst [vmem:[#allocation24_spill] sm:$0xff] %v6443_v23  ;;  %11107 = vst [vmem:[#allocation25_spill] sm:$0xff] %v6449_v16  ;;  %v6455_v21 = vld [vmem:[%s10244_s4 + $0x160] sm:$0xff]  ;;  %v6461_v22 = vld [vmem:[%s10244_s4 + $0x170] sm:$0xff] }
 0x277   :  { %1434 = vmatprep.subr.mxu0 %v6443_v23  ;;  %1505 = vmatprep.subr.mxu1 %v6449_v16  ;;  %11108 = vst [vmem:[#allocation26_spill] sm:$0xff] %v6455_v21  ;;  %11109 = vst [vmem:[#allocation27_spill] sm:$0xff] %v6461_v22  ;;  %v6467_v23 = vld [vmem:[%s10244_s4 + $0x148] sm:$0xff]  ;;  %v6473_v16 = vld [vmem:[%s10244_s4 + $0x158] sm:$0xff] }
 0x278   :  { %1435 = vmatpush1.msra.mxu0 %v6455_v21  ;;  %1506 = vmatpush1.msra.mxu1 %v6461_v22  ;;  %11110 = vst [vmem:[#allocation28_spill] sm:$0xff] %v6467_v23  ;;  %11111 = vst [vmem:[#allocation29_spill] sm:$0xff] %v6473_v16  ;;  %v6479_v21 = vld [vmem:[%s10244_s4 + $0x140] sm:$0xff]  ;;  %v6485_v22 = vld [vmem:[%s10244_s4 + $0x150] sm:$0xff] }
 0x279   :  { %1436 = vmatprep.subr.mxu0 %v6467_v23  ;;  %1507 = vmatprep.subr.mxu1 %v6473_v16  ;;  %11112 = vst [vmem:[#allocation30_spill] sm:$0xff] %v6479_v21  ;;  %11113 = vst [vmem:[#allocation31_spill] sm:$0xff] %v6485_v22  ;;  %v6491_v23 = vld [vmem:[%s10244_s4 + $0x128] sm:$0xff]  ;;  %v6497_v16 = vld [vmem:[%s10244_s4 + $0x138] sm:$0xff] }
 0x27a   :  { %1437 = vmatpush1.msra.mxu0 %v6479_v21  ;;  %1508 = vmatpush1.msra.mxu1 %v6485_v22  ;;  %11114 = vst [vmem:[#allocation32_spill] sm:$0xff] %v6491_v23  ;;  %11115 = vst [vmem:[#allocation33_spill] sm:$0xff] %v6497_v16  ;;  %v6503_v21 = vld [vmem:[%s10244_s4 + $0x120] sm:$0xff]  ;;  %v6509_v22 = vld [vmem:[%s10244_s4 + $0x130] sm:$0xff] }
 0x27b   :  { %1438 = vmatprep.subr.mxu0 %v6491_v23  ;;  %1509 = vmatprep.subr.mxu1 %v6497_v16  ;;  %11116 = vst [vmem:[#allocation34_spill] sm:$0xff] %v6503_v21  ;;  %11117 = vst [vmem:[#allocation35_spill] sm:$0xff] %v6509_v22  ;;  %v6515_v23 = vld [vmem:[%s10244_s4 + $0x108] sm:$0xff]  ;;  %v6521_v16 = vld [vmem:[%s10244_s4 + $0x118] sm:$0xff] }
 0x27c   :  { %1439 = vmatpush1.msra.mxu0 %v6503_v21  ;;  %1510 = vmatpush1.msra.mxu1 %v6509_v22  ;;  %11118 = vst [vmem:[#allocation36_spill] sm:$0xff] %v6515_v23  ;;  %11119 = vst [vmem:[#allocation37_spill] sm:$0xff] %v6521_v16  ;;  %v6527_v21 = vld [vmem:[%s10244_s4 + $0x100] sm:$0xff]  ;;  %v6533_v22 = vld [vmem:[%s10244_s4 + $0x110] sm:$0xff] }
 0x27d   :  { %1440 = vmatprep.subr.mxu0 %v6515_v23  ;;  %1511 = vmatprep.subr.mxu1 %v6521_v16  ;;  %11120 = vst [vmem:[#allocation38_spill] sm:$0xff] %v6527_v21  ;;  %11121 = vst [vmem:[#allocation39_spill] sm:$0xff] %v6533_v22  ;;  %v6539_v23 = vld [vmem:[%s10244_s4 + $0xe8] sm:$0xff]  ;;  %v6545_v16 = vld [vmem:[%s10244_s4 + $0xf8] sm:$0xff] }
 0x27e   :  { %1441 = vmatpush1.msra.mxu0 %v6527_v21  ;;  %1512 = vmatpush1.msra.mxu1 %v6533_v22  ;;  %11122 = vst [vmem:[#allocation40_spill] sm:$0xff] %v6539_v23  ;;  %11123 = vst [vmem:[#allocation41_spill] sm:$0xff] %v6545_v16  ;;  %v6551_v21 = vld [vmem:[%s10244_s4 + $0xe0] sm:$0xff]  ;;  %v6557_v22 = vld [vmem:[%s10244_s4 + $0xf0] sm:$0xff] }
 0x27f   :  { %1442 = vmatprep.subr.mxu0 %v6539_v23  ;;  %1513 = vmatprep.subr.mxu1 %v6545_v16  ;;  %11124 = vst [vmem:[#allocation42_spill] sm:$0xff] %v6551_v21  ;;  %11125 = vst [vmem:[#allocation43_spill] sm:$0xff] %v6557_v22  ;;  %v6563_v23 = vld [vmem:[%s10244_s4 + $0xc8] sm:$0xff]  ;;  %v6569_v16 = vld [vmem:[%s10244_s4 + $0xd8] sm:$0xff] }
 0x280   :  { %1443 = vmatpush1.msra.mxu0 %v6551_v21  ;;  %1514 = vmatpush1.msra.mxu1 %v6557_v22  ;;  %11126 = vst [vmem:[#allocation44_spill] sm:$0xff] %v6563_v23  ;;  %11127 = vst [vmem:[#allocation45_spill] sm:$0xff] %v6569_v16  ;;  %v6575_v21 = vld [vmem:[%s10244_s4 + $0xc0] sm:$0xff]  ;;  %v6581_v22 = vld [vmem:[%s10244_s4 + $0xd0] sm:$0xff] }
 0x281   :  { %1444 = vmatprep.subr.mxu0 %v6563_v23  ;;  %1515 = vmatprep.subr.mxu1 %v6569_v16  ;;  %11128 = vst [vmem:[#allocation46_spill] sm:$0xff] %v6575_v21  ;;  %11129 = vst [vmem:[#allocation47_spill] sm:$0xff] %v6581_v22  ;;  %v6587_v23 = vld [vmem:[%s10244_s4 + $0xa8] sm:$0xff]  ;;  %v6593_v16 = vld [vmem:[%s10244_s4 + $0xb8] sm:$0xff] }
 0x282   :  { %1445 = vmatpush1.msra.mxu0 %v6575_v21  ;;  %1516 = vmatpush1.msra.mxu1 %v6581_v22  ;;  %11130 = vst [vmem:[#allocation48_spill] sm:$0xff] %v6587_v23  ;;  %11131 = vst [vmem:[#allocation49_spill] sm:$0xff] %v6593_v16  ;;  %v6599_v21 = vld [vmem:[%s10244_s4 + $0xa0] sm:$0xff]  ;;  %v6605_v22 = vld [vmem:[%s10244_s4 + $0xb0] sm:$0xff] }
 0x283   :  { %1446 = vmatprep.subr.mxu0 %v6587_v23  ;;  %1517 = vmatprep.subr.mxu1 %v6593_v16  ;;  %11132 = vst [vmem:[#allocation50_spill] sm:$0xff] %v6599_v21  ;;  %11133 = vst [vmem:[#allocation51_spill] sm:$0xff] %v6605_v22  ;;  %v6611_v23 = vld [vmem:[%s10244_s4 + $0x88] sm:$0xff]  ;;  %v6617_v16 = vld [vmem:[%s10244_s4 + $0x98] sm:$0xff] }
 0x284   :  { %1447 = vmatpush1.msra.mxu0 %v6599_v21  ;;  %1518 = vmatpush1.msra.mxu1 %v6605_v22  ;;  %11134 = vst [vmem:[#allocation52_spill] sm:$0xff] %v6611_v23  ;;  %11135 = vst [vmem:[#allocation53_spill] sm:$0xff] %v6617_v16  ;;  %v6623_v21 = vld [vmem:[%s10244_s4 + $0x80] sm:$0xff]  ;;  %v6629_v22 = vld [vmem:[%s10244_s4 + $0x90] sm:$0xff] }
 0x285   :  { %1448 = vmatprep.subr.mxu0 %v6611_v23  ;;  %1519 = vmatprep.subr.mxu1 %v6617_v16  ;;  %11136 = vst [vmem:[#allocation54_spill] sm:$0xff] %v6623_v21  ;;  %11137 = vst [vmem:[#allocation55_spill] sm:$0xff] %v6629_v22  ;;  %v6635_v23 = vld [vmem:[%s10244_s4 + $0x68] sm:$0xff]  ;;  %v6641_v16 = vld [vmem:[%s10244_s4 + $0x78] sm:$0xff] }
 0x286   :  { %1449 = vmatpush1.msra.mxu0 %v6623_v21  ;;  %1520 = vmatpush1.msra.mxu1 %v6629_v22  ;;  %11138 = vst [vmem:[#allocation56_spill] sm:$0xff] %v6635_v23  ;;  %11139 = vst [vmem:[#allocation57_spill] sm:$0xff] %v6641_v16  ;;  %v6647_v21 = vld [vmem:[%s10244_s4 + $0x60] sm:$0xff]  ;;  %v6653_v22 = vld [vmem:[%s10244_s4 + $0x70] sm:$0xff] }
 0x287   :  { %1450 = vmatprep.subr.mxu0 %v6635_v23  ;;  %1521 = vmatprep.subr.mxu1 %v6641_v16  ;;  %11140 = vst [vmem:[#allocation58_spill] sm:$0xff] %v6647_v21  ;;  %11141 = vst [vmem:[#allocation59_spill] sm:$0xff] %v6653_v22  ;;  %v6659_v23 = vld [vmem:[%s10244_s4 + $0x48] sm:$0xff]  ;;  %v6665_v16 = vld [vmem:[%s10244_s4 + $0x58] sm:$0xff] }
 0x288   :  { %1451 = vmatpush1.msra.mxu0 %v6647_v21  ;;  %1522 = vmatpush1.msra.mxu1 %v6653_v22  ;;  %11142 = vst [vmem:[#allocation60_spill] sm:$0xff] %v6659_v23  ;;  %11143 = vst [vmem:[#allocation61_spill] sm:$0xff] %v6665_v16  ;;  %v6671_v21 = vld [vmem:[%s10244_s4 + $0x40] sm:$0xff]  ;;  %v6677_v22 = vld [vmem:[%s10244_s4 + $0x50] sm:$0xff] }
 0x289   :  { %1452 = vmatprep.subr.mxu0 %v6659_v23  ;;  %1523 = vmatprep.subr.mxu1 %v6665_v16  ;;  %11144 = vst [vmem:[#allocation62_spill] sm:$0xff] %v6671_v21  ;;  %11145 = vst [vmem:[#allocation63_spill] sm:$0xff] %v6677_v22  ;;  %v6683_v23 = vld [vmem:[%s10244_s4 + $0x28] sm:$0xff]  ;;  %v6689_v16 = vld [vmem:[%s10244_s4 + $0x38] sm:$0xff] }
 0x28a   :  { %1453 = vmatpush1.msra.mxu0 %v6671_v21  ;;  %1524 = vmatpush1.msra.mxu1 %v6677_v22  ;;  %11146 = vst [vmem:[#allocation64_spill] sm:$0xff] %v6683_v23  ;;  %11147 = vst [vmem:[#allocation65_spill] sm:$0xff] %v6689_v16  ;;  %v6695_v21 = vld [vmem:[%s10244_s4 + $0x20] sm:$0xff]  ;;  %v6701_v22 = vld [vmem:[%s10244_s4 + $0x30] sm:$0xff] }
 0x28b   :  { %1454 = vmatprep.subr.mxu0 %v6683_v23  ;;  %1525 = vmatprep.subr.mxu1 %v6689_v16  ;;  %11148 = vst [vmem:[#allocation66_spill] sm:$0xff] %v6695_v21  ;;  %11149 = vst [vmem:[#allocation67_spill] sm:$0xff] %v6701_v22  ;;  %v6707_v23 = vld [vmem:[%s10244_s4 + $0x8] sm:$0xff]  ;;  %v6713_v16 = vld [vmem:[%s10244_s4 + $0x18] sm:$0xff] }
 0x28c   :  { %1455 = vmatpush1.msra.mxu0 %v6695_v21  ;;  %1526 = vmatpush1.msra.mxu1 %v6701_v22  ;;  %11150 = vst [vmem:[#allocation68_spill] sm:$0xff] %v6707_v23  ;;  %11151 = vst [vmem:[#allocation69_spill] sm:$0xff] %v6713_v16  ;;  %v6719_v21 = vld [vmem:[%s10244_s4] sm:$0xff]  ;;  %v6725_v22 = vld [vmem:[%s10244_s4 + $0x10] sm:$0xff] }
 0x28d   :  { %1456 = vmatprep.subr.mxu0 %v6707_v23  ;;  %1527 = vmatprep.subr.mxu1 %v6713_v16  ;;  %11152 = vst [vmem:[#allocation70_spill] sm:$0xff] %v6719_v21  ;;  %11153 = vst [vmem:[#allocation71_spill] sm:$0xff] %v6725_v22  ;;  %v6731_v23 = vld [vmem:[%s10244_s4 + $0x3e8] sm:$0xff]  ;;  %v6737_v16 = vld [vmem:[%s10244_s4 + $0x3f8] sm:$0xff] }
 0x28e   :  { %1457 = vmatpush1.msra.mxu0 %v6719_v21  ;;  %1528 = vmatpush1.msra.mxu1 %v6725_v22  ;;  %11154 = vst [vmem:[#allocation72_spill] sm:$0xff] %v6731_v23  ;;  %11155 = vst [vmem:[#allocation73_spill] sm:$0xff] %v6737_v16  ;;  %v6743_v21 = vld [vmem:[%s10244_s4 + $0x3e0] sm:$0xff]  ;;  %v6749_v22 = vld [vmem:[%s10244_s4 + $0x3f0] sm:$0xff] }
 0x28f   :  { %1458 = vmatprep.subr.mxu0 %v6731_v23  ;;  %1529 = vmatprep.subr.mxu1 %v6737_v16  ;;  %11156 = vst [vmem:[#allocation74_spill] sm:$0xff] %v6743_v21  ;;  %11157 = vst [vmem:[#allocation75_spill] sm:$0xff] %v6749_v22  ;;  %v6755_v23 = vld [vmem:[%s10244_s4 + $0x3c8] sm:$0xff]  ;;  %v6761_v16 = vld [vmem:[%s10244_s4 + $0x3d8] sm:$0xff] }
 0x290   :  { %1459 = vmatpush2.msra.mxu0 %v6743_v21  ;;  %1530 = vmatpush2.msra.mxu1 %v6749_v22  ;;  %11158 = vst [vmem:[#allocation76_spill] sm:$0xff] %v6755_v23  ;;  %11159 = vst [vmem:[#allocation77_spill] sm:$0xff] %v6761_v16  ;;  %v6767_v21 = vld [vmem:[%s10244_s4 + $0x3c0] sm:$0xff]  ;;  %v6773_v22 = vld [vmem:[%s10244_s4 + $0x3d0] sm:$0xff] }
 0x291   :  { %1460 = vmatprep.subr.mxu0 %v6755_v23  ;;  %1531 = vmatprep.subr.mxu1 %v6761_v16  ;;  %11160 = vst [vmem:[#allocation78_spill] sm:$0xff] %v6767_v21  ;;  %11161 = vst [vmem:[#allocation79_spill] sm:$0xff] %v6773_v22  ;;  %v6779_v23 = vld [vmem:[%s10244_s4 + $0x3a8] sm:$0xff]  ;;  %v6785_v16 = vld [vmem:[%s10244_s4 + $0x3b8] sm:$0xff] }
 0x292   :  { %1461 = vmatpush2.msra.mxu0 %v6767_v21  ;;  %1532 = vmatpush2.msra.mxu1 %v6773_v22  ;;  %11162 = vst [vmem:[#allocation80_spill] sm:$0xff] %v6779_v23  ;;  %11163 = vst [vmem:[#allocation81_spill] sm:$0xff] %v6785_v16  ;;  %v6791_v21 = vld [vmem:[%s10244_s4 + $0x3a0] sm:$0xff]  ;;  %v6797_v22 = vld [vmem:[%s10244_s4 + $0x3b0] sm:$0xff] }
 0x293   :  { %1462 = vmatprep.subr.mxu0 %v6779_v23  ;;  %1533 = vmatprep.subr.mxu1 %v6785_v16  ;;  %11164 = vst [vmem:[#allocation82_spill] sm:$0xff] %v6791_v21  ;;  %11165 = vst [vmem:[#allocation83_spill] sm:$0xff] %v6797_v22  ;;  %v6803_v23 = vld [vmem:[%s10244_s4 + $0x388] sm:$0xff]  ;;  %v6809_v16 = vld [vmem:[%s10244_s4 + $0x398] sm:$0xff] }
 0x294   :  { %1463 = vmatpush2.msra.mxu0 %v6791_v21  ;;  %1534 = vmatpush2.msra.mxu1 %v6797_v22  ;;  %11166 = vst [vmem:[#allocation84_spill] sm:$0xff] %v6803_v23  ;;  %11167 = vst [vmem:[#allocation85_spill] sm:$0xff] %v6809_v16  ;;  %v6815_v21 = vld [vmem:[%s10244_s4 + $0x380] sm:$0xff]  ;;  %v6821_v22 = vld [vmem:[%s10244_s4 + $0x390] sm:$0xff] }
 0x295   :  { %1464 = vmatprep.subr.mxu0 %v6803_v23  ;;  %1535 = vmatprep.subr.mxu1 %v6809_v16  ;;  %11168 = vst [vmem:[#allocation86_spill] sm:$0xff] %v6815_v21  ;;  %11169 = vst [vmem:[#allocation87_spill] sm:$0xff] %v6821_v22  ;;  %v6827_v23 = vld [vmem:[%s10244_s4 + $0x368] sm:$0xff]  ;;  %v6833_v16 = vld [vmem:[%s10244_s4 + $0x378] sm:$0xff] }
 0x296   :  { %1465 = vmatpush2.msra.mxu0 %v6815_v21  ;;  %1536 = vmatpush2.msra.mxu1 %v6821_v22  ;;  %11170 = vst [vmem:[#allocation88_spill] sm:$0xff] %v6827_v23  ;;  %11171 = vst [vmem:[#allocation89_spill] sm:$0xff] %v6833_v16  ;;  %v6839_v21 = vld [vmem:[%s10244_s4 + $0x360] sm:$0xff]  ;;  %v6845_v22 = vld [vmem:[%s10244_s4 + $0x370] sm:$0xff] }
 0x297   :  { %1466 = vmatprep.subr.mxu0 %v6827_v23  ;;  %1537 = vmatprep.subr.mxu1 %v6833_v16  ;;  %11172 = vst [vmem:[#allocation90_spill] sm:$0xff] %v6839_v21  ;;  %11173 = vst [vmem:[#allocation91_spill] sm:$0xff] %v6845_v22  ;;  %v6851_v23 = vld [vmem:[%s10244_s4 + $0x348] sm:$0xff]  ;;  %v6857_v16 = vld [vmem:[%s10244_s4 + $0x358] sm:$0xff] }
 0x298   :  { %1467 = vmatpush2.msra.mxu0 %v6839_v21  ;;  %1538 = vmatpush2.msra.mxu1 %v6845_v22  ;;  %11174 = vst [vmem:[#allocation92_spill] sm:$0xff] %v6851_v23  ;;  %11175 = vst [vmem:[#allocation93_spill] sm:$0xff] %v6857_v16  ;;  %v6863_v21 = vld [vmem:[%s10244_s4 + $0x340] sm:$0xff]  ;;  %v6869_v22 = vld [vmem:[%s10244_s4 + $0x350] sm:$0xff] }
 0x299   :  { %1468 = vmatprep.subr.mxu0 %v6851_v23  ;;  %1539 = vmatprep.subr.mxu1 %v6857_v16  ;;  %11176 = vst [vmem:[#allocation94_spill] sm:$0xff] %v6863_v21  ;;  %11177 = vst [vmem:[#allocation95_spill] sm:$0xff] %v6869_v22  ;;  %v6875_v23 = vld [vmem:[%s10244_s4 + $0x328] sm:$0xff]  ;;  %v6881_v16 = vld [vmem:[%s10244_s4 + $0x338] sm:$0xff] }
 0x29a   :  { %1469 = vmatpush2.msra.mxu0 %v6863_v21  ;;  %1540 = vmatpush2.msra.mxu1 %v6869_v22  ;;  %11178 = vst [vmem:[#allocation96_spill] sm:$0xff] %v6875_v23  ;;  %11179 = vst [vmem:[#allocation97_spill] sm:$0xff] %v6881_v16  ;;  %v6887_v21 = vld [vmem:[%s10244_s4 + $0x320] sm:$0xff]  ;;  %v6893_v22 = vld [vmem:[%s10244_s4 + $0x330] sm:$0xff] }
 0x29b   :  { %1470 = vmatprep.subr.mxu0 %v6875_v23  ;;  %1541 = vmatprep.subr.mxu1 %v6881_v16  ;;  %11180 = vst [vmem:[#allocation98_spill] sm:$0xff] %v6887_v21  ;;  %11181 = vst [vmem:[#allocation99_spill] sm:$0xff] %v6893_v22  ;;  %v6899_v23 = vld [vmem:[%s10244_s4 + $0x308] sm:$0xff]  ;;  %v6905_v16 = vld [vmem:[%s10244_s4 + $0x318] sm:$0xff] }
 0x29c   :  { %1471 = vmatpush2.msra.mxu0 %v6887_v21  ;;  %1542 = vmatpush2.msra.mxu1 %v6893_v22  ;;  %11182 = vst [vmem:[#allocation100_spill] sm:$0xff] %v6899_v23  ;;  %11183 = vst [vmem:[#allocation101_spill] sm:$0xff] %v6905_v16  ;;  %v6911_v21 = vld [vmem:[%s10244_s4 + $0x300] sm:$0xff]  ;;  %v6917_v22 = vld [vmem:[%s10244_s4 + $0x310] sm:$0xff] }
 0x29d   :  { %1472 = vmatprep.subr.mxu0 %v6899_v23  ;;  %1543 = vmatprep.subr.mxu1 %v6905_v16  ;;  %11184 = vst [vmem:[#allocation102_spill] sm:$0xff] %v6911_v21  ;;  %11185 = vst [vmem:[#allocation103_spill] sm:$0xff] %v6917_v22  ;;  %v6923_v23 = vld [vmem:[%s10244_s4 + $0x2e8] sm:$0xff]  ;;  %v6929_v16 = vld [vmem:[%s10244_s4 + $0x2f8] sm:$0xff] }
 0x29e   :  { %1473 = vmatpush2.msra.mxu0 %v6911_v21  ;;  %1544 = vmatpush2.msra.mxu1 %v6917_v22  ;;  %11186 = vst [vmem:[#allocation104_spill] sm:$0xff] %v6923_v23  ;;  %11187 = vst [vmem:[#allocation105_spill] sm:$0xff] %v6929_v16  ;;  %v6935_v21 = vld [vmem:[%s10244_s4 + $0x2e0] sm:$0xff]  ;;  %v6941_v22 = vld [vmem:[%s10244_s4 + $0x2f0] sm:$0xff] }
 0x29f   :  { %1474 = vmatprep.subr.mxu0 %v6923_v23  ;;  %1545 = vmatprep.subr.mxu1 %v6929_v16  ;;  %11188 = vst [vmem:[#allocation106_spill] sm:$0xff] %v6935_v21  ;;  %11189 = vst [vmem:[#allocation107_spill] sm:$0xff] %v6941_v22  ;;  %v6947_v23 = vld [vmem:[%s10244_s4 + $0x2c8] sm:$0xff]  ;;  %v6953_v16 = vld [vmem:[%s10244_s4 + $0x2d8] sm:$0xff] }
 0x2a0   :  { %1475 = vmatpush2.msra.mxu0 %v6935_v21  ;;  %1546 = vmatpush2.msra.mxu1 %v6941_v22  ;;  %11190 = vst [vmem:[#allocation108_spill] sm:$0xff] %v6947_v23  ;;  %11191 = vst [vmem:[#allocation109_spill] sm:$0xff] %v6953_v16  ;;  %v6959_v21 = vld [vmem:[%s10244_s4 + $0x2c0] sm:$0xff]  ;;  %v6965_v22 = vld [vmem:[%s10244_s4 + $0x2d0] sm:$0xff] }
 0x2a1   :  { %1476 = vmatprep.subr.mxu0 %v6947_v23  ;;  %1547 = vmatprep.subr.mxu1 %v6953_v16  ;;  %11192 = vst [vmem:[#allocation110_spill] sm:$0xff] %v6959_v21  ;;  %11193 = vst [vmem:[#allocation111_spill] sm:$0xff] %v6965_v22  ;;  %v6971_v23 = vld [vmem:[%s10244_s4 + $0x2a8] sm:$0xff]  ;;  %v6977_v16 = vld [vmem:[%s10244_s4 + $0x2b8] sm:$0xff] }
 0x2a2   :  { %1477 = vmatpush2.msra.mxu0 %v6959_v21  ;;  %1548 = vmatpush2.msra.mxu1 %v6965_v22  ;;  %11194 = vst [vmem:[#allocation112_spill] sm:$0xff] %v6971_v23  ;;  %11195 = vst [vmem:[#allocation113_spill] sm:$0xff] %v6977_v16  ;;  %v6983_v21 = vld [vmem:[%s10244_s4 + $0x2a0] sm:$0xff]  ;;  %v6989_v22 = vld [vmem:[%s10244_s4 + $0x2b0] sm:$0xff] }
 0x2a3   :  { %1478 = vmatprep.subr.mxu0 %v6971_v23  ;;  %1549 = vmatprep.subr.mxu1 %v6977_v16  ;;  %11196 = vst [vmem:[#allocation114_spill] sm:$0xff] %v6983_v21  ;;  %11197 = vst [vmem:[#allocation115_spill] sm:$0xff] %v6989_v22  ;;  %v6995_v23 = vld [vmem:[%s10244_s4 + $0x288] sm:$0xff]  ;;  %v7001_v16 = vld [vmem:[%s10244_s4 + $0x298] sm:$0xff] }
 0x2a4   :  { %1479 = vmatpush2.msra.mxu0 %v6983_v21  ;;  %1550 = vmatpush2.msra.mxu1 %v6989_v22  ;;  %11198 = vst [vmem:[#allocation116_spill] sm:$0xff] %v6995_v23  ;;  %11199 = vst [vmem:[#allocation117_spill] sm:$0xff] %v7001_v16  ;;  %v7007_v21 = vld [vmem:[%s10244_s4 + $0x280] sm:$0xff]  ;;  %v7013_v22 = vld [vmem:[%s10244_s4 + $0x290] sm:$0xff] }
 0x2a5   :  { %1480 = vmatprep.subr.mxu0 %v6995_v23  ;;  %1551 = vmatprep.subr.mxu1 %v7001_v16  ;;  %11200 = vst [vmem:[#allocation118_spill] sm:$0xff] %v7007_v21  ;;  %11201 = vst [vmem:[#allocation119_spill] sm:$0xff] %v7013_v22  ;;  %v7019_v23 = vld [vmem:[%s10244_s4 + $0x268] sm:$0xff]  ;;  %v7025_v16 = vld [vmem:[%s10244_s4 + $0x278] sm:$0xff] }
 0x2a6   :  { %1481 = vmatpush2.msra.mxu0 %v7007_v21  ;;  %1552 = vmatpush2.msra.mxu1 %v7013_v22  ;;  %11202 = vst [vmem:[#allocation120_spill] sm:$0xff] %v7019_v23  ;;  %11203 = vst [vmem:[#allocation121_spill] sm:$0xff] %v7025_v16  ;;  %v7031_v21 = vld [vmem:[%s10244_s4 + $0x260] sm:$0xff]  ;;  %v7037_v22 = vld [vmem:[%s10244_s4 + $0x270] sm:$0xff] }
 0x2a7   :  { %1482 = vmatprep.subr.mxu0 %v7019_v23  ;;  %1553 = vmatprep.subr.mxu1 %v7025_v16  ;;  %11204 = vst [vmem:[#allocation122_spill] sm:$0xff] %v7031_v21  ;;  %11205 = vst [vmem:[#allocation123_spill] sm:$0xff] %v7037_v22  ;;  %v7043_v23 = vld [vmem:[%s10244_s4 + $0x248] sm:$0xff]  ;;  %v7049_v16 = vld [vmem:[%s10244_s4 + $0x258] sm:$0xff] }
 0x2a8   :  { %1483 = vmatpush2.msra.mxu0 %v7031_v21  ;;  %1554 = vmatpush2.msra.mxu1 %v7037_v22  ;;  %11206 = vst [vmem:[#allocation124_spill] sm:$0xff] %v7043_v23  ;;  %11207 = vst [vmem:[#allocation125_spill] sm:$0xff] %v7049_v16  ;;  %v7055_v21 = vld [vmem:[%s10244_s4 + $0x240] sm:$0xff]  ;;  %v7061_v22 = vld [vmem:[%s10244_s4 + $0x250] sm:$0xff] }
 0x2a9   :  { %1484 = vmatprep.subr.mxu0 %v7043_v23  ;;  %1555 = vmatprep.subr.mxu1 %v7049_v16  ;;  %11208 = vst [vmem:[#allocation126_spill] sm:$0xff] %v7055_v21  ;;  %11209 = vst [vmem:[#allocation127_spill] sm:$0xff] %v7061_v22  ;;  %v7067_v23 = vld [vmem:[%s10244_s4 + $0x228] sm:$0xff]  ;;  %v7073_v16 = vld [vmem:[%s10244_s4 + $0x238] sm:$0xff] }
 0x2aa   :  { %1485 = vmatpush2.msra.mxu0 %v7055_v21  ;;  %1556 = vmatpush2.msra.mxu1 %v7061_v22  ;;  %11210 = vst [vmem:[#allocation128_spill] sm:$0xff] %v7067_v23  ;;  %11211 = vst [vmem:[#allocation129_spill] sm:$0xff] %v7073_v16  ;;  %v7079_v21 = vld [vmem:[%s10244_s4 + $0x220] sm:$0xff]  ;;  %v7085_v22 = vld [vmem:[%s10244_s4 + $0x230] sm:$0xff] }
 0x2ab   :  { %1486 = vmatprep.subr.mxu0 %v7067_v23  ;;  %1557 = vmatprep.subr.mxu1 %v7073_v16  ;;  %11212 = vst [vmem:[#allocation130_spill] sm:$0xff] %v7079_v21  ;;  %11213 = vst [vmem:[#allocation131_spill] sm:$0xff] %v7085_v22  ;;  %v7091_v23 = vld [vmem:[%s10244_s4 + $0x208] sm:$0xff]  ;;  %v7097_v16 = vld [vmem:[%s10244_s4 + $0x218] sm:$0xff] }
 0x2ac   :  { %1487 = vmatpush2.msra.mxu0 %v7079_v21  ;;  %1558 = vmatpush2.msra.mxu1 %v7085_v22  ;;  %11214 = vst [vmem:[#allocation132_spill] sm:$0xff] %v7091_v23  ;;  %11215 = vst [vmem:[#allocation134_spill] sm:$0xff] %v7097_v16  ;;  %v7103_v21 = vld [vmem:[%s10244_s4 + $0x200] sm:$0xff]  ;;  %v7109_v22 = vld [vmem:[%s10244_s4 + $0x210] sm:$0xff] }
 0x2ad   :  { %1488 = vmatprep.subr.mxu0 %v7091_v23  ;;  %1559 = vmatprep.subr.mxu1 %v7097_v16  ;;  %11216 = vst [vmem:[#allocation135_spill] sm:$0xff] %v7103_v21  ;;  %11217 = vst [vmem:[#allocation133_spill] sm:$0xff] %v7109_v22 }
 0x2ae   :  { %1489 = vmatpush2.msra.mxu0 %v7103_v21  ;;  %1560 = vmatpush2.msra.mxu1 %v7109_v22 }
 0x2af   :  { %1596 = vmatprep.subr.mxu0 %v6021_v50  ;;  %1667 = vmatprep.subr.mxu1 %v6027_v51 }
 0x30d   :  { %v1152_v23 = vpop.f32.mrf.mxu0  ;;  %v1223_v21 = vpop.f32.mrf.mxu1 }
 0x30e   :  { %v1153_v16 = vadd.f32 %v1152_v23, %v6035_v55  ;;  %v1224_v50 = vadd.f32 %v1223_v21, %v6050_v9 }
 0x30f   :  { %v1154_v15 = vpop.f32.mrf.mxu0  ;;  %v1225_v11 = vpop.f32.mrf.mxu1 }
 0x310   :  { %v3415_v14 = vmul.f32 -1.442695, %v1153_v16  ;;  %v1155_v13 = vadd.f32 %v1154_v15, %v6039_v57  ;;  %v1226_v10 = vadd.f32 %v1225_v11, %v6045_v4  ;;  %v11218_v57 = vld [vmem:[#allocation136_spill] sm:$0xff] }
 0x312   :  { %3557 = vpow2.f32 %v3415_v14  ;;  %v3416_v12 = vmul.f32 -1.442695, %v1155_v13  ;;  %v3417_v7 = vmul.f32 -1.442695, %v1226_v10  ;;  %v11219_v10 = vld [vmem:[#allocation138_spill] sm:$0xff] }
 0x314   :  { %3559 = vpow2.f32 %v3416_v12 }
 0x315   :  { %3561 = vpow2.f32 %v3417_v7 }
 0x31f   :  { %v3558_v22 = vpop.eup %3557 }
 0x320   :  { %v1231_v6 = vadd.f32 1.0, %v3558_v22 }
 0x321   :  { %v3560_v51 = vpop.eup %3559 }
 0x322   :  { %3563 = vrcp.f32 %v1231_v6  ;;  %v1237_v23 = vadd.f32 1.0, %v3560_v51  ;;  %v3562_v16 = vpop.eup %3561 }
 0x323   :  { %3565 = vtanh.f32 %v1224_v50  ;;  %v1244_v22 = vadd.f32 1.0, %v3562_v16 }
 0x324   :  { %3567 = vrcp.f32 %v1237_v23 }
 0x32e   :  { %v1322_v15 = vpop.f32.mrf.mxu0  ;;  %v1393_v6 = vpop.f32.mrf.mxu1 }
 0x32f   :  { %v3564_v14 = vpop.eup %3563  ;;  %v1398_v13 = vadd.f32 %v1322_v15, %v11218_v57  ;;  %v11220_v57 = vld [vmem:[#allocation139_spill] sm:$0xff]  ;;  %v11221_v15 = vld [vmem:[#allocation137_spill] sm:$0xff] }
 0x330   :  { %v3566_v12 = vpop.eup %3565  ;;  %v1324_v55 = vpop.f32.mrf.mxu0 }
 0x331   :  { %v3568_v5 = vpop.eup %3567  ;;  %v3418_v11 = vmul.f32 -1.442695, %v1398_v13  ;;  %v1399_v4 = vadd.f32 %v1324_v55, %v11219_v10  ;;  %v1248_v2 = vmul.f32 %v3566_v12, %v3564_v14  ;;  %v1395_v51 = vpop.f32.mrf.mxu1  ;;  %v1400_v13 = vadd.f32 %v1393_v6, %v11221_v15  ;;  %v7137_v15 = vld [vmem:[%s10243_s2 + $0x1e0] sm:$0xff] }
 0x332   :  { %v1247_v21 = vmul.f32 %v3568_v5, %v6055_v52  ;;  %v1401_v23 = vadd.f32 %v1395_v51, %v11220_v57 }
 0x333   :  { %3569 = vpow2.f32 %v3418_v11  ;;  %v3419_v7 = vmul.f32 -1.442695, %v1399_v4 }
 0x334   :  { %v7121_v50 = vadd.f32 %v1248_v2, %v1247_v21  ;;  %v3420_v9 = vmul.f32 -1.442695, %v1401_v23 }
 0x335   :  { %3571 = vpow2.f32 %v3419_v7 }
 0x336   :  { %3573 = vrcp.f32 %v1244_v22 }
 0x337   :  { %3575 = vtanh.f32 %v7121_v50 }
 0x338   :  { %3577 = vtanh.f32 %v1400_v13  ;;  %v7149_v13 = vld [vmem:[%s10243_s2 + $0x1c8] sm:$0xff] }
 0x339   :  { %3579 = vpow2.f32 %v3420_v9 }
 0x340   :  { %v3570_v55 = vpop.eup %3569 }
 0x341   :  { %v1405_v14 = vadd.f32 1.0, %v3570_v55  ;;  %v7155_v55 = vld [vmem:[%s10243_s2 + $0x1d8] sm:$0xff] }
 0x342   :  { %v3572_v52 = vpop.eup %3571 }
 0x343   :  { %v3574_v5 = vpop.eup %3573  ;;  %3581 = vrcp.f32 %v1405_v14  ;;  %v1411_v4 = vadd.f32 1.0, %v3572_v52  ;;  %v7161_v14 = vld [vmem:[%s10243_s2 + $0x1c0] sm:$0xff]  ;;  %v7167_v52 = vld [vmem:[%s10243_s2 + $0x1d0] sm:$0xff] }
 0x344   :  { %v3576_v2 = vpop.eup %3575 }
 0x345   :  { %3583 = vrcp.f32 %v1411_v4  ;;  %v1251_v16 = vmul.f32 %v3576_v2, %v3574_v5  ;;  %v3578_v12 = vpop.eup %3577  ;;  %v7173_v5 = vld [vmem:[%s10243_s2 + $0x1a8] sm:$0xff]  ;;  %v7179_v4 = vld [vmem:[%s10243_s2 + $0x1b8] sm:$0xff]  ;;  %v7185_v2 = vld [vmem:[%s10243_s2 + $0x1a0] sm:$0xff] }
 0x346   :  { %v3580_v11 = vpop.eup %3579 }
 0x347   :  { %1490 = vmatprep.mubr.f32.mxu0 %v1251_v16  ;;  %1561 = vmatprep.mubr.f32.mxu1 %v1251_v16  ;;  %v1418_v6 = vadd.f32 1.0, %v3580_v11  ;;  %v7191_v16 = vld [vmem:[%s10243_s2 + $0x1b0] sm:$0xff]  ;;  %v7203_v11 = vld [vmem:[%s10243_s2 + $0x198] sm:$0xff] }
 0x349   :  { %3585 = vrcp.f32 %v1418_v6  ;;  %v7227_v6 = vld [vmem:[%s10243_s2 + $0x178] sm:$0xff] }
 0x34a   :  { %11222 = vst [vmem:[#allocation136_spill] sm:$0xff] %v7227_v6 }
 0x350   :  { %v3582_v10 = vpop.eup %3581 }
 0x351   :  { %v1422_v21 = vmul.f32 %v3582_v10, %v3578_v12  ;;  %v7197_v12 = vld [vmem:[%s10243_s2 + $0x188] sm:$0xff]  ;;  %v7209_v10 = vld [vmem:[%s10243_s2 + $0x180] sm:$0xff] }
 0x352   :  { %v3584_v22 = vpop.eup %3583 }
 0x353   :  { %v1421_v7 = vmul.f32 %v3584_v22, %v6061_v20  ;;  %v7143_v20 = vld [vmem:[%s10243_s2 + $0x1f0] sm:$0xff]  ;;  %v7221_v22 = vld [vmem:[%s10243_s2 + $0x168] sm:$0xff] }
 0x355   :  { %v7127_v51 = vadd.f32 %v1422_v21, %v1421_v7  ;;  %v7215_v21 = vld [vmem:[%s10243_s2 + $0x190] sm:$0xff]  ;;  %v7233_v7 = vld [vmem:[%s10243_s2 + $0x160] sm:$0xff] }
 0x356   :  { %v3586_v9 = vpop.eup %3585 }
 0x357   :  { %3587 = vtanh.f32 %v7127_v51 }
 0x364   :  { %v3588_v57 = vpop.eup %3587 }
 0x365   :  { %v7130_v23 = vmul.f32 %v3588_v57, %v3586_v9  ;;  %v7239_v9 = vld [vmem:[%s10243_s2 + $0x170] sm:$0xff]  ;;  %v7245_v57 = vld [vmem:[%s10243_s2 + $0x148] sm:$0xff] }
 0x367   :  { %1491 = vmatmul.mubr.f32.vlgmr.msra.gmra.mxu0 %v7130_v23  ;;  %1562 = vmatmul.mubr.f32.vlgmr.msra.gmra.mxu1 %v7130_v23 }
 0x368   :  { %1597 = vmatpush1.msra.mxu0 %v7137_v15  ;;  %1668 = vmatpush1.msra.mxu1 %v7143_v20 }
 0x369   :  { %1598 = vmatprep.subr.mxu0 %v7149_v13  ;;  %1669 = vmatprep.subr.mxu1 %v7155_v55 }
 0x36a   :  { %1599 = vmatpush1.msra.mxu0 %v7161_v14  ;;  %1670 = vmatpush1.msra.mxu1 %v7167_v52 }
 0x36b   :  { %1600 = vmatprep.subr.mxu0 %v7173_v5  ;;  %1671 = vmatprep.subr.mxu1 %v7179_v4 }
 0x36c   :  { %1601 = vmatpush1.msra.mxu0 %v7185_v2  ;;  %1672 = vmatpush1.msra.mxu1 %v7191_v16 }
 0x36d   :  { %1602 = vmatprep.subr.mxu0 %v7197_v12  ;;  %1673 = vmatprep.subr.mxu1 %v7203_v11 }
 0x36e   :  { %1603 = vmatpush1.msra.mxu0 %v7209_v10  ;;  %1674 = vmatpush1.msra.mxu1 %v7215_v21 }
 0x36f   :  { %1604 = vmatprep.subr.mxu0 %v7221_v22  ;;  %1675 = vmatprep.subr.mxu1 %v7227_v6  ;;  %v7251_v6 = vld [vmem:[%s10243_s2 + $0x158] sm:$0xff] }
 0x370   :  { %1605 = vmatpush1.msra.mxu0 %v7233_v7  ;;  %1676 = vmatpush1.msra.mxu1 %v7239_v9 }
 0x371   :  { %1606 = vmatprep.subr.mxu0 %v7245_v57  ;;  %1677 = vmatprep.subr.mxu1 %v7251_v6 }
 0x372   :  { %1607 = vmatpush1.msra.mxu0 %v6091_v19  ;;  %1678 = vmatpush1.msra.mxu1 %v6097_v17  ;;  %v11223_v19 = vld [vmem:[#allocation7_spill] sm:$0xff]  ;;  %v11224_v17 = vld [vmem:[#allocation8_spill] sm:$0xff] }
 0x373   :  { %1608 = vmatprep.subr.mxu0 %v6103_v36  ;;  %1679 = vmatprep.subr.mxu1 %v6109_v29  ;;  %v11225_v36 = vld [vmem:[#allocation9_spill] sm:$0xff]  ;;  %v11226_v29 = vld [vmem:[#allocation10_spill] sm:$0xff] }
 0x374   :  { %1609 = vmatpush1.msra.mxu0 %v6115_v28  ;;  %1680 = vmatpush1.msra.mxu1 %v6121_v44  ;;  %v11227_v28 = vld [vmem:[#allocation11_spill] sm:$0xff]  ;;  %v11228_v44 = vld [vmem:[#allocation12_spill] sm:$0xff] }
 0x375   :  { %1610 = vmatprep.subr.mxu0 %v6127_v37  ;;  %1681 = vmatprep.subr.mxu1 %v6133_v39  ;;  %v11229_v37 = vld [vmem:[#allocation13_spill] sm:$0xff]  ;;  %v11230_v39 = vld [vmem:[#allocation14_spill] sm:$0xff] }
 0x376   :  { %1611 = vmatpush1.msra.mxu0 %v6139_v40  ;;  %1682 = vmatpush1.msra.mxu1 %v6145_v35  ;;  %v11231_v40 = vld [vmem:[#allocation15_spill] sm:$0xff]  ;;  %v11232_v35 = vld [vmem:[#allocation16_spill] sm:$0xff] }
 0x377   :  { %1612 = vmatprep.subr.mxu0 %v6151_v62  ;;  %1683 = vmatprep.subr.mxu1 %v6157_v27  ;;  %v11233_v62 = vld [vmem:[#allocation17_spill] sm:$0xff]  ;;  %v11234_v27 = vld [vmem:[#allocation18_spill] sm:$0xff] }
 0x378   :  { %1613 = vmatpush1.msra.mxu0 %v6163_v33  ;;  %1684 = vmatpush1.msra.mxu1 %v6169_v32  ;;  %v11235_v33 = vld [vmem:[#allocation19_spill] sm:$0xff]  ;;  %v11236_v32 = vld [vmem:[#allocation20_spill] sm:$0xff] }
 0x379   :  { %1614 = vmatprep.subr.mxu0 %v6175_v53  ;;  %1685 = vmatprep.subr.mxu1 %v6181_v31  ;;  %v11237_v53 = vld [vmem:[#allocation21_spill] sm:$0xff]  ;;  %v11238_v31 = vld [vmem:[#allocation22_spill] sm:$0xff] }
 0x37a   :  { %1615 = vmatpush1.msra.mxu0 %v6187_v8  ;;  %1686 = vmatpush1.msra.mxu1 %v6193_v34  ;;  %v11239_v8 = vld [vmem:[#allocation23_spill] sm:$0xff]  ;;  %v11240_v34 = vld [vmem:[#allocation24_spill] sm:$0xff] }
 0x37b   :  { %1616 = vmatprep.subr.mxu0 %v6199_v18  ;;  %1687 = vmatprep.subr.mxu1 %v6205_v30  ;;  %v11241_v18 = vld [vmem:[#allocation25_spill] sm:$0xff]  ;;  %v11242_v30 = vld [vmem:[#allocation26_spill] sm:$0xff] }
 0x37c   :  { %1617 = vmatpush1.msra.mxu0 %v6211_v38  ;;  %1688 = vmatpush1.msra.mxu1 %v6217_v24  ;;  %v11243_v38 = vld [vmem:[#allocation27_spill] sm:$0xff]  ;;  %v11244_v24 = vld [vmem:[#allocation28_spill] sm:$0xff] }
 0x37d   :  { %1618 = vmatprep.subr.mxu0 %v6223_v3  ;;  %1689 = vmatprep.subr.mxu1 %v6229_v25  ;;  %v11245_v3 = vld [vmem:[#allocation29_spill] sm:$0xff]  ;;  %v11246_v25 = vld [vmem:[#allocation30_spill] sm:$0xff] }
 0x37e   :  { %1619 = vmatpush1.msra.mxu0 %v6235_v26  ;;  %1690 = vmatpush1.msra.mxu1 %v6241_v41  ;;  %v11247_v26 = vld [vmem:[#allocation31_spill] sm:$0xff]  ;;  %v11248_v41 = vld [vmem:[#allocation32_spill] sm:$0xff] }
 0x37f   :  { %1620 = vmatprep.subr.mxu0 %v6247_v43  ;;  %1691 = vmatprep.subr.mxu1 %v6253_v45  ;;  %v11249_v43 = vld [vmem:[#allocation33_spill] sm:$0xff]  ;;  %v11250_v45 = vld [vmem:[#allocation34_spill] sm:$0xff] }
 0x380   :  { %1621 = vmatpush1.msra.mxu0 %v6259_v46  ;;  %1692 = vmatpush1.msra.mxu1 %v6265_v47  ;;  %v11251_v46 = vld [vmem:[#allocation35_spill] sm:$0xff]  ;;  %v11252_v47 = vld [vmem:[#allocation36_spill] sm:$0xff] }
 0x381   :  { %1622 = vmatprep.subr.mxu0 %v6271_v48  ;;  %1693 = vmatprep.subr.mxu1 %v6277_v49  ;;  %v11253_v48 = vld [vmem:[#allocation37_spill] sm:$0xff]  ;;  %v11254_v49 = vld [vmem:[#allocation38_spill] sm:$0xff] }
 0x382   :  { %1623 = vmatpush1.msra.mxu0 %v6283_v54  ;;  %1694 = vmatpush1.msra.mxu1 %v6289_v56  ;;  %v11255_v54 = vld [vmem:[#allocation39_spill] sm:$0xff]  ;;  %v11256_v56 = vld [vmem:[#allocation40_spill] sm:$0xff] }
 0x383   :  { %1624 = vmatprep.subr.mxu0 %v6295_v58  ;;  %1695 = vmatprep.subr.mxu1 %v6301_v59  ;;  %v11257_v58 = vld [vmem:[#allocation41_spill] sm:$0xff]  ;;  %v11258_v59 = vld [vmem:[#allocation42_spill] sm:$0xff] }
 0x384   :  { %1625 = vmatpush1.msra.mxu0 %v6307_v60  ;;  %1696 = vmatpush1.msra.mxu1 %v6313_v61  ;;  %v11259_v60 = vld [vmem:[#allocation43_spill] sm:$0xff]  ;;  %v11260_v61 = vld [vmem:[#allocation44_spill] sm:$0xff] }
 0x385   :  { %1626 = vmatprep.subr.mxu0 %v6319_v63  ;;  %1697 = vmatprep.subr.mxu1 %v6325_v0  ;;  %v11261_v63 = vld [vmem:[#allocation45_spill] sm:$0xff]  ;;  %v11262_v0 = vld [vmem:[#allocation46_spill] sm:$0xff] }
 0x386   :  { %1627 = vmatpush1.msra.mxu0 %v6331_v1  ;;  %1660 = vmatprep.mubr.f32.mxu0 %v10947_v42  ;;  %v11263_v1 = vld [vmem:[#allocation47_spill] sm:$0xff] }
 0x387   :  { %1698 = vmatpush1.msra.mxu1 %v11223_v19  ;;  %1731 = vmatprep.mubr.f32.mxu1 %v10947_v42  ;;  %v11265_v19 = vld [vmem:[#allocation49_spill] sm:$0xff] }
 0x388   :  { %1661 = vmatmul.mubr.f32.vlgmr.msra.gmra.mxu0 %v7130_v23  ;;  %1732 = vmatmul.mubr.f32.vlgmr.msra.gmra.mxu1 %v7130_v23  ;;  %v11264_v23 = vld [vmem:[#allocation48_spill] sm:$0xff] }
 0x389   :  { %1766 = vmatprep.subr.mxu0 %v11224_v17  ;;  %1837 = vmatprep.subr.mxu1 %v11225_v36  ;;  %v11266_v17 = vld [vmem:[#allocation50_spill] sm:$0xff]  ;;  %v11267_v36 = vld [vmem:[#allocation51_spill] sm:$0xff] }
 0x38a   :  { %1767 = vmatpush1.msra.mxu0 %v11226_v29  ;;  %1838 = vmatpush1.msra.mxu1 %v11227_v28  ;;  %v11268_v29 = vld [vmem:[#allocation52_spill] sm:$0xff]  ;;  %v11269_v28 = vld [vmem:[#allocation53_spill] sm:$0xff] }
 0x38b   :  { %1768 = vmatprep.subr.mxu0 %v11228_v44  ;;  %1839 = vmatprep.subr.mxu1 %v11229_v37  ;;  %v11270_v44 = vld [vmem:[#allocation54_spill] sm:$0xff]  ;;  %v11271_v37 = vld [vmem:[#allocation55_spill] sm:$0xff] }
 0x38c   :  { %1769 = vmatpush1.msra.mxu0 %v11230_v39  ;;  %1840 = vmatpush1.msra.mxu1 %v11231_v40  ;;  %v11272_v39 = vld [vmem:[#allocation56_spill] sm:$0xff]  ;;  %v11273_v40 = vld [vmem:[#allocation57_spill] sm:$0xff] }
 0x38d   :  { %1770 = vmatprep.subr.mxu0 %v11232_v35  ;;  %1841 = vmatprep.subr.mxu1 %v11233_v62  ;;  %v11274_v35 = vld [vmem:[#allocation58_spill] sm:$0xff]  ;;  %v11275_v62 = vld [vmem:[#allocation59_spill] sm:$0xff] }
 0x38e   :  { %1771 = vmatpush1.msra.mxu0 %v11234_v27  ;;  %1842 = vmatpush1.msra.mxu1 %v11235_v33  ;;  %v11276_v27 = vld [vmem:[#allocation60_spill] sm:$0xff]  ;;  %v11277_v33 = vld [vmem:[#allocation61_spill] sm:$0xff] }
 0x38f   :  { %1772 = vmatprep.subr.mxu0 %v11236_v32  ;;  %1843 = vmatprep.subr.mxu1 %v11237_v53  ;;  %v11278_v32 = vld [vmem:[#allocation62_spill] sm:$0xff]  ;;  %v11279_v53 = vld [vmem:[#allocation63_spill] sm:$0xff] }
 0x390   :  { %1773 = vmatpush1.msra.mxu0 %v11238_v31  ;;  %1844 = vmatpush1.msra.mxu1 %v11239_v8  ;;  %v11280_v31 = vld [vmem:[#allocation64_spill] sm:$0xff]  ;;  %v11281_v8 = vld [vmem:[#allocation65_spill] sm:$0xff] }
 0x391   :  { %1774 = vmatprep.subr.mxu0 %v11240_v34  ;;  %1845 = vmatprep.subr.mxu1 %v11241_v18  ;;  %v11282_v34 = vld [vmem:[#allocation66_spill] sm:$0xff]  ;;  %v11283_v18 = vld [vmem:[#allocation67_spill] sm:$0xff] }
 0x392   :  { %1775 = vmatpush1.msra.mxu0 %v11242_v30  ;;  %1846 = vmatpush1.msra.mxu1 %v11243_v38  ;;  %v11284_v30 = vld [vmem:[#allocation68_spill] sm:$0xff]  ;;  %v11285_v38 = vld [vmem:[#allocation69_spill] sm:$0xff] }
 0x393   :  { %1776 = vmatprep.subr.mxu0 %v11244_v24  ;;  %1847 = vmatprep.subr.mxu1 %v11245_v3  ;;  %v11286_v24 = vld [vmem:[#allocation70_spill] sm:$0xff]  ;;  %v11287_v3 = vld [vmem:[#allocation71_spill] sm:$0xff] }
 0x394   :  { %1777 = vmatpush1.msra.mxu0 %v11246_v25  ;;  %1848 = vmatpush1.msra.mxu1 %v11247_v26  ;;  %v11288_v25 = vld [vmem:[#allocation72_spill] sm:$0xff]  ;;  %v11289_v26 = vld [vmem:[#allocation73_spill] sm:$0xff] }
 0x395   :  { %1778 = vmatprep.subr.mxu0 %v11248_v41  ;;  %1849 = vmatprep.subr.mxu1 %v11249_v43  ;;  %v11290_v41 = vld [vmem:[#allocation74_spill] sm:$0xff]  ;;  %v11291_v43 = vld [vmem:[#allocation75_spill] sm:$0xff] }
 0x396   :  { %1779 = vmatpush1.msra.mxu0 %v11250_v45  ;;  %1850 = vmatpush1.msra.mxu1 %v11251_v46  ;;  %v11292_v45 = vld [vmem:[#allocation76_spill] sm:$0xff]  ;;  %v11293_v46 = vld [vmem:[#allocation77_spill] sm:$0xff] }
 0x397   :  { %1780 = vmatprep.subr.mxu0 %v11252_v47  ;;  %1851 = vmatprep.subr.mxu1 %v11253_v48  ;;  %v11294_v47 = vld [vmem:[#allocation78_spill] sm:$0xff]  ;;  %v11295_v48 = vld [vmem:[#allocation79_spill] sm:$0xff] }
 0x398   :  { %1781 = vmatpush1.msra.mxu0 %v11254_v49  ;;  %1852 = vmatpush1.msra.mxu1 %v11255_v54  ;;  %v11296_v49 = vld [vmem:[#allocation80_spill] sm:$0xff]  ;;  %v11297_v54 = vld [vmem:[#allocation81_spill] sm:$0xff] }
 0x399   :  { %1782 = vmatprep.subr.mxu0 %v11256_v56  ;;  %1853 = vmatprep.subr.mxu1 %v11257_v58  ;;  %v11298_v56 = vld [vmem:[#allocation82_spill] sm:$0xff]  ;;  %v11299_v58 = vld [vmem:[#allocation83_spill] sm:$0xff] }
 0x39a   :  { %1783 = vmatpush1.msra.mxu0 %v11258_v59  ;;  %1854 = vmatpush1.msra.mxu1 %v11259_v60  ;;  %v11300_v59 = vld [vmem:[#allocation84_spill] sm:$0xff]  ;;  %v11301_v60 = vld [vmem:[#allocation85_spill] sm:$0xff] }
 0x39b   :  { %1784 = vmatprep.subr.mxu0 %v11260_v61  ;;  %1855 = vmatprep.subr.mxu1 %v11261_v63  ;;  %v11302_v61 = vld [vmem:[#allocation86_spill] sm:$0xff]  ;;  %v11303_v63 = vld [vmem:[#allocation87_spill] sm:$0xff] }
 0x39c   :  { %1785 = vmatpush1.msra.mxu0 %v11262_v0  ;;  %1856 = vmatpush1.msra.mxu1 %v11263_v1  ;;  %v11304_v0 = vld [vmem:[#allocation88_spill] sm:$0xff]  ;;  %v11305_v1 = vld [vmem:[#allocation89_spill] sm:$0xff] }
 0x39d   :  { %1786 = vmatprep.subr.mxu0 %v11264_v23  ;;  %1857 = vmatprep.subr.mxu1 %v11265_v19  ;;  %v11306_v23 = vld [vmem:[#allocation90_spill] sm:$0xff]  ;;  %v11307_v19 = vld [vmem:[#allocation91_spill] sm:$0xff] }
 0x39e   :  { %1787 = vmatpush1.msra.mxu0 %v11266_v17  ;;  %1858 = vmatpush1.msra.mxu1 %v11267_v36  ;;  %v11308_v17 = vld [vmem:[#allocation92_spill] sm:$0xff]  ;;  %v11309_v36 = vld [vmem:[#allocation93_spill] sm:$0xff] }
 0x39f   :  { %1788 = vmatprep.subr.mxu0 %v11268_v29  ;;  %1859 = vmatprep.subr.mxu1 %v11269_v28  ;;  %v11310_v29 = vld [vmem:[#allocation94_spill] sm:$0xff]  ;;  %v11311_v28 = vld [vmem:[#allocation95_spill] sm:$0xff] }
 0x3a0   :  { %1789 = vmatpush1.msra.mxu0 %v11270_v44  ;;  %1860 = vmatpush1.msra.mxu1 %v11271_v37  ;;  %v11312_v44 = vld [vmem:[#allocation96_spill] sm:$0xff]  ;;  %v11313_v37 = vld [vmem:[#allocation97_spill] sm:$0xff] }
 0x3a1   :  { %1790 = vmatprep.subr.mxu0 %v11272_v39  ;;  %1861 = vmatprep.subr.mxu1 %v11273_v40  ;;  %v11314_v39 = vld [vmem:[#allocation98_spill] sm:$0xff]  ;;  %v11315_v40 = vld [vmem:[#allocation99_spill] sm:$0xff] }
 0x3a2   :  { %1791 = vmatpush1.msra.mxu0 %v11274_v35  ;;  %1862 = vmatpush1.msra.mxu1 %v11275_v62  ;;  %v11316_v35 = vld [vmem:[#allocation100_spill] sm:$0xff]  ;;  %v11317_v62 = vld [vmem:[#allocation101_spill] sm:$0xff] }
 0x3a3   :  { %1792 = vmatprep.subr.mxu0 %v11276_v27  ;;  %1863 = vmatprep.subr.mxu1 %v11277_v33  ;;  %v11318_v27 = vld [vmem:[#allocation102_spill] sm:$0xff]  ;;  %v11319_v33 = vld [vmem:[#allocation103_spill] sm:$0xff] }
 0x3a4   :  { %1793 = vmatpush1.msra.mxu0 %v11278_v32  ;;  %1864 = vmatpush1.msra.mxu1 %v11279_v53  ;;  %v11320_v32 = vld [vmem:[#allocation104_spill] sm:$0xff]  ;;  %v11321_v53 = vld [vmem:[#allocation105_spill] sm:$0xff] }
 0x3a5   :  { %1794 = vmatprep.subr.mxu0 %v11280_v31  ;;  %1865 = vmatprep.subr.mxu1 %v11281_v8  ;;  %v11322_v31 = vld [vmem:[#allocation106_spill] sm:$0xff]  ;;  %v11323_v8 = vld [vmem:[#allocation107_spill] sm:$0xff] }
 0x3a6   :  { %1795 = vmatpush1.msra.mxu0 %v11282_v34  ;;  %1866 = vmatpush1.msra.mxu1 %v11283_v18  ;;  %v11324_v34 = vld [vmem:[#allocation108_spill] sm:$0xff]  ;;  %v11325_v18 = vld [vmem:[#allocation109_spill] sm:$0xff] }
 0x3a7   :  { %1796 = vmatprep.subr.mxu0 %v11284_v30  ;;  %1867 = vmatprep.subr.mxu1 %v11285_v38  ;;  %v11326_v30 = vld [vmem:[#allocation110_spill] sm:$0xff]  ;;  %v11327_v38 = vld [vmem:[#allocation111_spill] sm:$0xff] }
 0x3a8   :  { %1797 = vmatpush1.msra.mxu0 %v11286_v24  ;;  %1868 = vmatpush1.msra.mxu1 %v11287_v3  ;;  %v11328_v24 = vld [vmem:[#allocation112_spill] sm:$0xff]  ;;  %v11329_v3 = vld [vmem:[#allocation113_spill] sm:$0xff] }
 0x3a9   :  { %1798 = vmatprep.subr.mxu0 %v11288_v25  ;;  %1869 = vmatprep.subr.mxu1 %v11289_v26  ;;  %v11330_v25 = vld [vmem:[#allocation114_spill] sm:$0xff]  ;;  %v11331_v26 = vld [vmem:[#allocation115_spill] sm:$0xff] }
 0x3aa   :  { %1799 = vmatpush2.msra.mxu0 %v11290_v41  ;;  %1870 = vmatpush2.msra.mxu1 %v11291_v43  ;;  %v11332_v41 = vld [vmem:[#allocation116_spill] sm:$0xff]  ;;  %v11333_v43 = vld [vmem:[#allocation117_spill] sm:$0xff] }
 0x3ab   :  { %1800 = vmatprep.subr.mxu0 %v11292_v45  ;;  %1871 = vmatprep.subr.mxu1 %v11293_v46  ;;  %v11334_v45 = vld [vmem:[#allocation118_spill] sm:$0xff]  ;;  %v11335_v46 = vld [vmem:[#allocation119_spill] sm:$0xff] }
 0x3ac   :  { %1801 = vmatpush2.msra.mxu0 %v11294_v47  ;;  %1872 = vmatpush2.msra.mxu1 %v11295_v48  ;;  %v11336_v47 = vld [vmem:[#allocation120_spill] sm:$0xff]  ;;  %v11337_v48 = vld [vmem:[#allocation121_spill] sm:$0xff] }
 0x3ad   :  { %1802 = vmatprep.subr.mxu0 %v11296_v49  ;;  %1873 = vmatprep.subr.mxu1 %v11297_v54  ;;  %v11338_v49 = vld [vmem:[#allocation122_spill] sm:$0xff]  ;;  %v11339_v54 = vld [vmem:[#allocation123_spill] sm:$0xff] }
 0x3ae   :  { %1803 = vmatpush2.msra.mxu0 %v11298_v56  ;;  %1874 = vmatpush2.msra.mxu1 %v11299_v58  ;;  %v11340_v56 = vld [vmem:[#allocation124_spill] sm:$0xff]  ;;  %v11341_v58 = vld [vmem:[#allocation125_spill] sm:$0xff] }
 0x3af   :  { %1804 = vmatprep.subr.mxu0 %v11300_v59  ;;  %1875 = vmatprep.subr.mxu1 %v11301_v60  ;;  %v11342_v59 = vld [vmem:[#allocation126_spill] sm:$0xff]  ;;  %v11343_v60 = vld [vmem:[#allocation127_spill] sm:$0xff] }
 0x3b0   :  { %1805 = vmatpush2.msra.mxu0 %v11302_v61  ;;  %1876 = vmatpush2.msra.mxu1 %v11303_v63  ;;  %v11344_v61 = vld [vmem:[#allocation128_spill] sm:$0xff]  ;;  %v11345_v63 = vld [vmem:[#allocation129_spill] sm:$0xff] }
 0x3b1   :  { %1806 = vmatprep.subr.mxu0 %v11304_v0  ;;  %1877 = vmatprep.subr.mxu1 %v11305_v1  ;;  %v11346_v0 = vld [vmem:[#allocation130_spill] sm:$0xff]  ;;  %v11347_v1 = vld [vmem:[#allocation131_spill] sm:$0xff] }
 0x3b2   :  { %1807 = vmatpush2.msra.mxu0 %v11306_v23  ;;  %1878 = vmatpush2.msra.mxu1 %v11307_v19  ;;  %v11348_v23 = vld [vmem:[#allocation132_spill] sm:$0xff]  ;;  %v11349_v19 = vld [vmem:[#allocation134_spill] sm:$0xff] }
 0x3b3   :  { %1808 = vmatprep.subr.mxu0 %v11308_v17  ;;  %1879 = vmatprep.subr.mxu1 %v11309_v36  ;;  %v11350_v17 = vld [vmem:[#allocation135_spill] sm:$0xff]  ;;  %v11351_v36 = vld [vmem:[#allocation133_spill] sm:$0xff] }
 0x3b4   :  { %1809 = vmatpush2.msra.mxu0 %v11310_v29  ;;  %1880 = vmatpush2.msra.mxu1 %v11311_v28  ;;  %v7431_v29 = vld [vmem:[%s10243_s2 + $0x1e8] sm:$0xff]  ;;  %v7437_v28 = vld [vmem:[%s10243_s2 + $0x1f8] sm:$0xff] }
 0x3b5   :  { %1810 = vmatprep.subr.mxu0 %v11312_v44  ;;  %1881 = vmatprep.subr.mxu1 %v11313_v37  ;;  %v11352_v37 = vld [vmem:[#allocation3_spill] sm:$0xff] }
 0x3b6   :  { %1811 = vmatpush2.msra.mxu0 %v11314_v39  ;;  %1882 = vmatpush2.msra.mxu1 %v11315_v40 }
 0x3b7   :  { %1812 = vmatprep.subr.mxu0 %v11316_v35  ;;  %1883 = vmatprep.subr.mxu1 %v11317_v62  ;;  %v11353_v62 = vld [vmem:[#allocation4_spill] sm:$0xff] }
 0x3b8   :  { %1813 = vmatpush2.msra.mxu0 %v11318_v27  ;;  %1884 = vmatpush2.msra.mxu1 %v11319_v33 }
 0x3b9   :  { %1814 = vmatprep.subr.mxu0 %v11320_v32  ;;  %1885 = vmatprep.subr.mxu1 %v11321_v53 }
 0x3ba   :  { %1815 = vmatpush2.msra.mxu0 %v11322_v31  ;;  %1886 = vmatpush2.msra.mxu1 %v11323_v8  ;;  %v11354_v31 = vld [vmem:[#allocation5_spill] sm:$0xff] }
 0x3bb   :  { %1816 = vmatprep.subr.mxu0 %v11324_v34  ;;  %1887 = vmatprep.subr.mxu1 %v11325_v18 }
 0x3bc   :  { %1817 = vmatpush2.msra.mxu0 %v11326_v30  ;;  %1888 = vmatpush2.msra.mxu1 %v11327_v38  ;;  %v11355_v30 = vld [vmem:[#allocation6_spill] sm:$0xff] }
 0x3bd   :  { %1818 = vmatprep.subr.mxu0 %v11328_v24  ;;  %1889 = vmatprep.subr.mxu1 %v11329_v3 }
 0x3be   :  { %1819 = vmatpush2.msra.mxu0 %v11330_v25  ;;  %1890 = vmatpush2.msra.mxu1 %v11331_v26 }
 0x3bf   :  { %1820 = vmatprep.subr.mxu0 %v11332_v41  ;;  %1891 = vmatprep.subr.mxu1 %v11333_v43 }
 0x3c0   :  { %1821 = vmatpush2.msra.mxu0 %v11334_v45  ;;  %1892 = vmatpush2.msra.mxu1 %v11335_v46  ;;  %v11356_v45 = vld [vmem:[#allocation140_spill] sm:$0xff] }
 0x3c1   :  { %1822 = vmatprep.subr.mxu0 %v11336_v47  ;;  %1893 = vmatprep.subr.mxu1 %v11337_v48 }
 0x3c2   :  { %1823 = vmatpush2.msra.mxu0 %v11338_v49  ;;  %1894 = vmatpush2.msra.mxu1 %v11339_v54 }
 0x3c3   :  { %1824 = vmatprep.subr.mxu0 %v11340_v56  ;;  %1895 = vmatprep.subr.mxu1 %v11341_v58  ;;  %v11357_v56 = vld [vmem:[#allocation142_spill] sm:$0xff] }
 0x3c4   :  { %1825 = vmatpush2.msra.mxu0 %v11342_v59  ;;  %1896 = vmatpush2.msra.mxu1 %v11343_v60 }
 0x3c5   :  { %1826 = vmatprep.subr.mxu0 %v11344_v61  ;;  %1897 = vmatprep.subr.mxu1 %v11345_v63 }
 0x3c6   :  { %1827 = vmatpush2.msra.mxu0 %v11346_v0  ;;  %1898 = vmatpush2.msra.mxu1 %v11347_v1 }
 0x3c7   :  { %1828 = vmatprep.subr.mxu0 %v11348_v23  ;;  %1899 = vmatprep.subr.mxu1 %v11349_v19  ;;  %v11358_v19 = vld [vmem:[#allocation143_spill] sm:$0xff] }
 0x3c8   :  { %1829 = vmatpush2.msra.mxu0 %v11350_v17  ;;  %1900 = vmatpush2.msra.mxu1 %v11351_v36  ;;  %v11359_v36 = vld [vmem:[#allocation141_spill] sm:$0xff] }
 0x3c9   :  { %1936 = vmatprep.subr.mxu0 %v7431_v29  ;;  %2007 = vmatprep.subr.mxu1 %v7437_v28 }
 0x427   :  { %v1492_v44 = vpop.f32.mrf.mxu0  ;;  %v1563_v33 = vpop.f32.mrf.mxu1 }
 0x428   :  { %v1493_v39 = vadd.f32 %v1492_v44, %v11352_v37  ;;  %v1564_v38 = vadd.f32 %v1563_v33, %v11355_v30 }
 0x429   :  { %v1494_v40 = vpop.f32.mrf.mxu0  ;;  %v1565_v53 = vpop.f32.mrf.mxu1 }
 0x42a   :  { %v3421_v35 = vmul.f32 -1.442695, %v1493_v39  ;;  %v1495_v27 = vadd.f32 %v1494_v40, %v11353_v62  ;;  %v1566_v8 = vadd.f32 %v1565_v53, %v11354_v31 }
 0x42c   :  { %3589 = vpow2.f32 %v3421_v35  ;;  %v3422_v32 = vmul.f32 -1.442695, %v1495_v27  ;;  %v3423_v34 = vmul.f32 -1.442695, %v1566_v8 }
 0x42e   :  { %3591 = vpow2.f32 %v3422_v32 }
 0x42f   :  { %3593 = vpow2.f32 %v3423_v34 }
 0x439   :  { %v3590_v18 = vpop.eup %3589 }
 0x43a   :  { %v1571_v24 = vadd.f32 1.0, %v3590_v18 }
 0x43b   :  { %v3592_v3 = vpop.eup %3591 }
 0x43c   :  { %3595 = vrcp.f32 %v1571_v24  ;;  %v1577_v25 = vadd.f32 1.0, %v3592_v3  ;;  %v3594_v26 = vpop.eup %3593 }
 0x43d   :  { %3597 = vtanh.f32 %v1564_v38  ;;  %v1584_v61 = vadd.f32 1.0, %v3594_v26 }
 0x43e   :  { %3599 = vrcp.f32 %v1577_v25 }
 0x448   :  { %v1662_v41 = vpop.f32.mrf.mxu0  ;;  %v1733_v63 = vpop.f32.mrf.mxu1 }
 0x449   :  { %v3596_v43 = vpop.eup %3595  ;;  %v1738_v46 = vadd.f32 %v1662_v41, %v11356_v45  ;;  %v1740_v44 = vadd.f32 %v1733_v63, %v11359_v36  ;;  %v7657_v63 = vld [vmem:[%s10243_s2 + $0x70] sm:$0xff]  ;;  %v7687_v36 = vld [vmem:[%s10243_s2 + $0x28] sm:$0xff] }
 0x44a   :  { %v3598_v47 = vpop.eup %3597  ;;  %v1664_v48 = vpop.f32.mrf.mxu0 }
 0x44b   :  { %v3600_v49 = vpop.eup %3599  ;;  %v3424_v54 = vmul.f32 -1.442695, %v1738_v46  ;;  %v1739_v58 = vadd.f32 %v1664_v48, %v11357_v56  ;;  %v1588_v59 = vmul.f32 %v3598_v47, %v3596_v43  ;;  %v1735_v23 = vpop.f32.mrf.mxu1  ;;  %v7597_v46 = vld [vmem:[%s10243_s2 + $0xb8] sm:$0xff]  ;;  %v7603_v47 = vld [vmem:[%s10243_s2 + $0xa0] sm:$0xff]  ;;  %v7609_v48 = vld [vmem:[%s10243_s2 + $0xb0] sm:$0xff] }
 0x44c   :  { %v1587_v60 = vmul.f32 %v3600_v49, %v7121_v50  ;;  %v1741_v17 = vadd.f32 %v1735_v23, %v11358_v19  ;;  %v7615_v49 = vld [vmem:[%s10243_s2 + $0x88] sm:$0xff]  ;;  %v7627_v56 = vld [vmem:[%s10243_s2 + $0x80] sm:$0xff]  ;;  %v7669_v23 = vld [vmem:[%s10243_s2 + $0x58] sm:$0xff] }
 0x44d   :  { %3601 = vpow2.f32 %v3424_v54  ;;  %v3425_v0 = vmul.f32 -1.442695, %v1739_v58  ;;  %v7621_v54 = vld [vmem:[%s10243_s2 + $0x98] sm:$0xff]  ;;  %v7633_v58 = vld [vmem:[%s10243_s2 + $0x90] sm:$0xff]  ;;  %v7675_v19 = vld [vmem:[%s10243_s2 + $0x40] sm:$0xff] }
 0x44e   :  { %v7447_v1 = vadd.f32 %v1588_v59, %v1587_v60  ;;  %v3426_v39 = vmul.f32 -1.442695, %v1741_v17  ;;  %v7639_v59 = vld [vmem:[%s10243_s2 + $0x68] sm:$0xff]  ;;  %v7645_v60 = vld [vmem:[%s10243_s2 + $0x78] sm:$0xff]  ;;  %v7681_v17 = vld [vmem:[%s10243_s2 + $0x50] sm:$0xff] }
 0x44f   :  { %3603 = vpow2.f32 %v3425_v0  ;;  %v7663_v0 = vld [vmem:[%s10243_s2 + $0x48] sm:$0xff] }
 0x450   :  { %3605 = vrcp.f32 %v1584_v61  ;;  %v7651_v61 = vld [vmem:[%s10243_s2 + $0x60] sm:$0xff] }
 0x451   :  { %3607 = vtanh.f32 %v7447_v1 }
 0x452   :  { %3609 = vtanh.f32 %v1740_v44  ;;  %v7693_v44 = vld [vmem:[%s10243_s2 + $0x38] sm:$0xff] }
 0x453   :  { %3611 = vpow2.f32 %v3426_v39  ;;  %v7699_v39 = vld [vmem:[%s10243_s2 + $0x20] sm:$0xff] }
 0x45a   :  { %v3602_v40 = vpop.eup %3601 }
 0x45b   :  { %v1745_v35 = vadd.f32 1.0, %v3602_v40  ;;  %v7705_v40 = vld [vmem:[%s10243_s2 + $0x30] sm:$0xff] }
 0x45c   :  { %v3604_v50 = vpop.eup %3603 }
 0x45d   :  { %v3606_v27 = vpop.eup %3605  ;;  %3613 = vrcp.f32 %v1745_v35  ;;  %v1751_v33 = vadd.f32 1.0, %v3604_v50  ;;  %v7711_v35 = vld [vmem:[%s10243_s2 + $0x8] sm:$0xff]  ;;  %v7717_v50 = vld [vmem:[%s10243_s2 + $0x18] sm:$0xff] }
 0x45e   :  { %v3608_v32 = vpop.eup %3607 }
 0x45f   :  { %3615 = vrcp.f32 %v1751_v33  ;;  %v1591_v53 = vmul.f32 %v3608_v32, %v3606_v27  ;;  %v3610_v8 = vpop.eup %3609  ;;  %v7723_v27 = vld [vmem:[%s10243_s2] sm:$0xff]  ;;  %v7730_v33 = vld [vmem:[%s10243_s2 + $0x10] sm:$0xff]  ;;  %v7739_v32 = vld [vmem:[%s10244_s4 + $0x1e8] sm:$0xff] }
 0x460   :  { %v3612_v34 = vpop.eup %3611  ;;  %11361 = vst [vmem:[#allocation138_spill] sm:$0xff] %v7730_v33  ;;  %11362 = vst [vmem:[#allocation139_spill] sm:$0xff] %v7739_v32 }
 0x461   :  { %1830 = vmatprep.mubr.f32.mxu0 %v1591_v53  ;;  %1901 = vmatprep.mubr.f32.mxu1 %v1591_v53  ;;  %v1758_v3 = vadd.f32 1.0, %v3612_v34  ;;  %v7745_v53 = vld [vmem:[%s10244_s4 + $0x1f8] sm:$0xff]  ;;  %v7757_v34 = vld [vmem:[%s10244_s4 + $0x1f0] sm:$0xff] }
 0x462   :  { %11363 = vst [vmem:[#allocation137_spill] sm:$0xff] %v7745_v53  ;;  %11365 = vst [vmem:[#allocation8_spill] sm:$0xff] %v7757_v34 }
 0x463   :  { %3617 = vrcp.f32 %v1758_v3  ;;  %v7781_v3 = vld [vmem:[%s10244_s4 + $0x1d0] sm:$0xff] }
 0x464   :  { %11369 = vst [vmem:[#allocation12_spill] sm:$0xff] %v7781_v3 }
 0x46a   :  { %v3614_v18 = vpop.eup %3613 }
 0x46b   :  { %v1762_v38 = vmul.f32 %v3614_v18, %v3610_v8  ;;  %v7751_v8 = vld [vmem:[%s10244_s4 + $0x1e0] sm:$0xff]  ;;  %v7763_v18 = vld [vmem:[%s10244_s4 + $0x1c8] sm:$0xff] }
 0x46c   :  { %v3616_v24 = vpop.eup %3615  ;;  %11364 = vst [vmem:[#allocation7_spill] sm:$0xff] %v7751_v8  ;;  %11366 = vst [vmem:[#allocation9_spill] sm:$0xff] %v7763_v18 }
 0x46d   :  { %v1761_v25 = vmul.f32 %v3616_v24, %v7127_v51  ;;  %v11360_v51 = vld [vmem:[#allocation136_spill] sm:$0xff]  ;;  %v7775_v24 = vld [vmem:[%s10244_s4 + $0x1c0] sm:$0xff] }
 0x46e   :  { %11368 = vst [vmem:[#allocation11_spill] sm:$0xff] %v7775_v24 }
 0x46f   :  { %v7453_v26 = vadd.f32 %v1762_v38, %v1761_v25  ;;  %v7769_v38 = vld [vmem:[%s10244_s4 + $0x1d8] sm:$0xff]  ;;  %v7787_v25 = vld [vmem:[%s10244_s4 + $0x1a8] sm:$0xff] }
 0x470   :  { %v3618_v41 = vpop.eup %3617  ;;  %11367 = vst [vmem:[#allocation10_spill] sm:$0xff] %v7769_v38  ;;  %11370 = vst [vmem:[#allocation13_spill] sm:$0xff] %v7787_v25 }
 0x471   :  { %3619 = vtanh.f32 %v7453_v26 }
 0x47e   :  { %v3620_v43 = vpop.eup %3619 }
 0x47f   :  { %v7456_v45 = vmul.f32 %v3620_v43, %v3618_v41  ;;  %v7793_v41 = vld [vmem:[%s10244_s4 + $0x1b8] sm:$0xff]  ;;  %v7799_v43 = vld [vmem:[%s10244_s4 + $0x1a0] sm:$0xff] }
 0x480   :  { %11371 = vst [vmem:[#allocation14_spill] sm:$0xff] %v7793_v41  ;;  %11372 = vst [vmem:[#allocation15_spill] sm:$0xff] %v7799_v43 }
 0x481   :  { %1831 = vmatmul.mubr.f32.vlgmr.msra.gmra.mxu0 %v7456_v45  ;;  %1902 = vmatmul.mubr.f32.vlgmr.msra.gmra.mxu1 %v7456_v45 }
 0x482   :  { %1937 = vmatpush1.msra.mxu0 %v7137_v15  ;;  %2008 = vmatpush1.msra.mxu1 %v7143_v20  ;;  %v7483_v15 = vld [vmem:[%s10243_s2 + $0x140] sm:$0xff]  ;;  %v7489_v20 = vld [vmem:[%s10243_s2 + $0x150] sm:$0xff] }
 0x483   :  { %1938 = vmatprep.subr.mxu0 %v7149_v13  ;;  %2009 = vmatprep.subr.mxu1 %v7155_v55  ;;  %v7495_v13 = vld [vmem:[%s10243_s2 + $0x128] sm:$0xff]  ;;  %v7501_v55 = vld [vmem:[%s10243_s2 + $0x138] sm:$0xff] }
 0x484   :  { %1939 = vmatpush1.msra.mxu0 %v7161_v14  ;;  %2010 = vmatpush1.msra.mxu1 %v7167_v52  ;;  %v7507_v14 = vld [vmem:[%s10243_s2 + $0x120] sm:$0xff]  ;;  %v7513_v52 = vld [vmem:[%s10243_s2 + $0x130] sm:$0xff] }
 0x485   :  { %1940 = vmatprep.subr.mxu0 %v7173_v5  ;;  %2011 = vmatprep.subr.mxu1 %v7179_v4  ;;  %v7519_v5 = vld [vmem:[%s10243_s2 + $0x108] sm:$0xff]  ;;  %v7525_v4 = vld [vmem:[%s10243_s2 + $0x118] sm:$0xff] }
 0x486   :  { %1941 = vmatpush1.msra.mxu0 %v7185_v2  ;;  %2012 = vmatpush1.msra.mxu1 %v7191_v16  ;;  %v7531_v2 = vld [vmem:[%s10243_s2 + $0x100] sm:$0xff]  ;;  %v7537_v16 = vld [vmem:[%s10243_s2 + $0x110] sm:$0xff] }
 0x487   :  { %1942 = vmatprep.subr.mxu0 %v7197_v12  ;;  %2013 = vmatprep.subr.mxu1 %v7203_v11  ;;  %v7543_v12 = vld [vmem:[%s10243_s2 + $0xe8] sm:$0xff]  ;;  %v7549_v11 = vld [vmem:[%s10243_s2 + $0xf8] sm:$0xff] }
 0x488   :  { %1943 = vmatpush1.msra.mxu0 %v7209_v10  ;;  %2014 = vmatpush1.msra.mxu1 %v7215_v21  ;;  %v7555_v10 = vld [vmem:[%s10243_s2 + $0xe0] sm:$0xff]  ;;  %v7561_v21 = vld [vmem:[%s10243_s2 + $0xf0] sm:$0xff] }
 0x489   :  { %1944 = vmatprep.subr.mxu0 %v7221_v22  ;;  %2015 = vmatprep.subr.mxu1 %v11360_v51  ;;  %v7567_v22 = vld [vmem:[%s10243_s2 + $0xc8] sm:$0xff] }
 0x48a   :  { %1945 = vmatpush1.msra.mxu0 %v7233_v7  ;;  %2016 = vmatpush1.msra.mxu1 %v7239_v9  ;;  %v7579_v7 = vld [vmem:[%s10243_s2 + $0xc0] sm:$0xff]  ;;  %v7585_v9 = vld [vmem:[%s10243_s2 + $0xd0] sm:$0xff]  ;;  %v7811_v51 = vld [vmem:[%s10244_s4 + $0x188] sm:$0xff] }
 0x48b   :  { %1946 = vmatprep.subr.mxu0 %v7245_v57  ;;  %2017 = vmatprep.subr.mxu1 %v7251_v6  ;;  %v7573_v6 = vld [vmem:[%s10243_s2 + $0xd8] sm:$0xff]  ;;  %v7591_v57 = vld [vmem:[%s10243_s2 + $0xa8] sm:$0xff]  ;;  %11374 = vst [vmem:[#allocation17_spill] sm:$0xff] %v7811_v51 }
 0x48c   :  { %1947 = vmatpush1.msra.mxu0 %v7483_v15  ;;  %2018 = vmatpush1.msra.mxu1 %v7489_v20 }
 0x48d   :  { %1948 = vmatprep.subr.mxu0 %v7495_v13  ;;  %2019 = vmatprep.subr.mxu1 %v7501_v55 }
 0x48e   :  { %1949 = vmatpush1.msra.mxu0 %v7507_v14  ;;  %2020 = vmatpush1.msra.mxu1 %v7513_v52 }
 0x48f   :  { %1950 = vmatprep.subr.mxu0 %v7519_v5  ;;  %2021 = vmatprep.subr.mxu1 %v7525_v4 }
 0x490   :  { %1951 = vmatpush1.msra.mxu0 %v7531_v2  ;;  %2022 = vmatpush1.msra.mxu1 %v7537_v16 }
 0x491   :  { %1952 = vmatprep.subr.mxu0 %v7543_v12  ;;  %2023 = vmatprep.subr.mxu1 %v7549_v11 }
 0x492   :  { %1953 = vmatpush1.msra.mxu0 %v7555_v10  ;;  %2024 = vmatpush1.msra.mxu1 %v7561_v21 }
 0x493   :  { %1954 = vmatprep.subr.mxu0 %v7567_v22  ;;  %2025 = vmatprep.subr.mxu1 %v7573_v6 }
 0x494   :  { %1955 = vmatpush1.msra.mxu0 %v7579_v7  ;;  %2026 = vmatpush1.msra.mxu1 %v7585_v9 }
 0x495   :  { %1956 = vmatprep.subr.mxu0 %v7591_v57  ;;  %2027 = vmatprep.subr.mxu1 %v7597_v46 }
 0x496   :  { %1957 = vmatpush1.msra.mxu0 %v7603_v47  ;;  %2028 = vmatpush1.msra.mxu1 %v7609_v48 }
 0x497   :  { %1958 = vmatprep.subr.mxu0 %v7615_v49  ;;  %2029 = vmatprep.subr.mxu1 %v7621_v54 }
 0x498   :  { %1959 = vmatpush1.msra.mxu0 %v7627_v56  ;;  %2030 = vmatpush1.msra.mxu1 %v7633_v58 }
 0x499   :  { %1960 = vmatprep.subr.mxu0 %v7639_v59  ;;  %2031 = vmatprep.subr.mxu1 %v7645_v60 }
 0x49a   :  { %1961 = vmatpush1.msra.mxu0 %v7651_v61  ;;  %2032 = vmatpush1.msra.mxu1 %v7657_v63 }
 0x49b   :  { %1962 = vmatprep.subr.mxu0 %v7663_v0  ;;  %2033 = vmatprep.subr.mxu1 %v7669_v23 }
 0x49c   :  { %1963 = vmatpush1.msra.mxu0 %v7675_v19  ;;  %2034 = vmatpush1.msra.mxu1 %v7681_v17 }
 0x49d   :  { %1964 = vmatprep.subr.mxu0 %v7687_v36  ;;  %2035 = vmatprep.subr.mxu1 %v7693_v44 }
 0x49e   :  { %1965 = vmatpush1.msra.mxu0 %v7699_v39  ;;  %2036 = vmatpush1.msra.mxu1 %v7705_v40 }
 0x49f   :  { %1966 = vmatprep.subr.mxu0 %v7711_v35  ;;  %2037 = vmatprep.subr.mxu1 %v7717_v50 }
 0x4a0   :  { %1967 = vmatpush1.msra.mxu0 %v7723_v27  ;;  %2000 = vmatprep.mubr.f32.mxu0 %v10947_v42 }
 0x4a1   :  { %2038 = vmatpush1.msra.mxu1 %v7730_v33  ;;  %2071 = vmatprep.mubr.f32.mxu1 %v10947_v42 }
 0x4a2   :  { %2001 = vmatmul.mubr.f32.vlgmr.msra.gmra.mxu0 %v7456_v45  ;;  %2072 = vmatmul.mubr.f32.vlgmr.msra.gmra.mxu1 %v7456_v45  ;;  %v7805_v45 = vld [vmem:[%s10244_s4 + $0x1b0] sm:$0xff] }
 0x4a3   :  { %2106 = vmatprep.subr.mxu0 %v7739_v32  ;;  %2177 = vmatprep.subr.mxu1 %v7745_v53  ;;  %11373 = vst [vmem:[#allocation16_spill] sm:$0xff] %v7805_v45 }
 0x4a4   :  { %2107 = vmatpush1.msra.mxu0 %v7751_v8  ;;  %2178 = vmatpush1.msra.mxu1 %v7757_v34 }
 0x4a5   :  { %2108 = vmatprep.subr.mxu0 %v7763_v18  ;;  %2179 = vmatprep.subr.mxu1 %v7769_v38 }
 0x4a6   :  { %2109 = vmatpush1.msra.mxu0 %v7775_v24  ;;  %2180 = vmatpush1.msra.mxu1 %v7781_v3 }
 0x4a7   :  { %2110 = vmatprep.subr.mxu0 %v7787_v25  ;;  %2181 = vmatprep.subr.mxu1 %v7793_v41  ;;  %v7817_v41 = vld [vmem:[%s10244_s4 + $0x198] sm:$0xff] }
 0x4a8   :  { %2111 = vmatpush1.msra.mxu0 %v7799_v43  ;;  %2182 = vmatpush1.msra.mxu1 %v7805_v45  ;;  %11375 = vst [vmem:[#allocation18_spill] sm:$0xff] %v7817_v41  ;;  %v7823_v43 = vld [vmem:[%s10244_s4 + $0x180] sm:$0xff]  ;;  %v7829_v45 = vld [vmem:[%s10244_s4 + $0x190] sm:$0xff] }
 0x4a9   :  { %2112 = vmatprep.subr.mxu0 %v7811_v51  ;;  %2183 = vmatprep.subr.mxu1 %v7817_v41  ;;  %11376 = vst [vmem:[#allocation19_spill] sm:$0xff] %v7823_v43  ;;  %11377 = vst [vmem:[#allocation20_spill] sm:$0xff] %v7829_v45  ;;  %v7835_v51 = vld [vmem:[%s10244_s4 + $0x168] sm:$0xff]  ;;  %v7841_v41 = vld [vmem:[%s10244_s4 + $0x178] sm:$0xff] }
 0x4aa   :  { %2113 = vmatpush1.msra.mxu0 %v7823_v43  ;;  %2184 = vmatpush1.msra.mxu1 %v7829_v45  ;;  %11378 = vst [vmem:[#allocation21_spill] sm:$0xff] %v7835_v51  ;;  %11379 = vst [vmem:[#allocation22_spill] sm:$0xff] %v7841_v41  ;;  %v7847_v43 = vld [vmem:[%s10244_s4 + $0x160] sm:$0xff]  ;;  %v7853_v45 = vld [vmem:[%s10244_s4 + $0x170] sm:$0xff] }
 0x4ab   :  { %2114 = vmatprep.subr.mxu0 %v7835_v51  ;;  %2185 = vmatprep.subr.mxu1 %v7841_v41  ;;  %11380 = vst [vmem:[#allocation23_spill] sm:$0xff] %v7847_v43  ;;  %11381 = vst [vmem:[#allocation24_spill] sm:$0xff] %v7853_v45  ;;  %v7859_v51 = vld [vmem:[%s10244_s4 + $0x148] sm:$0xff]  ;;  %v7865_v41 = vld [vmem:[%s10244_s4 + $0x158] sm:$0xff] }
 0x4ac   :  { %2115 = vmatpush1.msra.mxu0 %v7847_v43  ;;  %2186 = vmatpush1.msra.mxu1 %v7853_v45  ;;  %11382 = vst [vmem:[#allocation25_spill] sm:$0xff] %v7859_v51  ;;  %11383 = vst [vmem:[#allocation26_spill] sm:$0xff] %v7865_v41  ;;  %v7871_v43 = vld [vmem:[%s10244_s4 + $0x140] sm:$0xff]  ;;  %v7877_v45 = vld [vmem:[%s10244_s4 + $0x150] sm:$0xff] }
 0x4ad   :  { %2116 = vmatprep.subr.mxu0 %v7859_v51  ;;  %2187 = vmatprep.subr.mxu1 %v7865_v41  ;;  %11384 = vst [vmem:[#allocation27_spill] sm:$0xff] %v7871_v43  ;;  %11385 = vst [vmem:[#allocation28_spill] sm:$0xff] %v7877_v45  ;;  %v7883_v51 = vld [vmem:[%s10244_s4 + $0x128] sm:$0xff]  ;;  %v7889_v41 = vld [vmem:[%s10244_s4 + $0x138] sm:$0xff] }
 0x4ae   :  { %2117 = vmatpush1.msra.mxu0 %v7871_v43  ;;  %2188 = vmatpush1.msra.mxu1 %v7877_v45  ;;  %11386 = vst [vmem:[#allocation29_spill] sm:$0xff] %v7883_v51  ;;  %11387 = vst [vmem:[#allocation30_spill] sm:$0xff] %v7889_v41  ;;  %v7895_v43 = vld [vmem:[%s10244_s4 + $0x120] sm:$0xff]  ;;  %v7901_v45 = vld [vmem:[%s10244_s4 + $0x130] sm:$0xff] }
 0x4af   :  { %2118 = vmatprep.subr.mxu0 %v7883_v51  ;;  %2189 = vmatprep.subr.mxu1 %v7889_v41  ;;  %11388 = vst [vmem:[#allocation31_spill] sm:$0xff] %v7895_v43  ;;  %11389 = vst [vmem:[#allocation32_spill] sm:$0xff] %v7901_v45  ;;  %v7907_v51 = vld [vmem:[%s10244_s4 + $0x108] sm:$0xff]  ;;  %v7913_v41 = vld [vmem:[%s10244_s4 + $0x118] sm:$0xff] }
 0x4b0   :  { %2119 = vmatpush1.msra.mxu0 %v7895_v43  ;;  %2190 = vmatpush1.msra.mxu1 %v7901_v45  ;;  %11390 = vst [vmem:[#allocation33_spill] sm:$0xff] %v7907_v51  ;;  %11391 = vst [vmem:[#allocation34_spill] sm:$0xff] %v7913_v41  ;;  %v7919_v43 = vld [vmem:[%s10244_s4 + $0x100] sm:$0xff]  ;;  %v7925_v45 = vld [vmem:[%s10244_s4 + $0x110] sm:$0xff] }
 0x4b1   :  { %2120 = vmatprep.subr.mxu0 %v7907_v51  ;;  %2191 = vmatprep.subr.mxu1 %v7913_v41  ;;  %11392 = vst [vmem:[#allocation35_spill] sm:$0xff] %v7919_v43  ;;  %11393 = vst [vmem:[#allocation36_spill] sm:$0xff] %v7925_v45  ;;  %v7931_v51 = vld [vmem:[%s10244_s4 + $0xe8] sm:$0xff]  ;;  %v7937_v41 = vld [vmem:[%s10244_s4 + $0xf8] sm:$0xff] }
 0x4b2   :  { %2121 = vmatpush1.msra.mxu0 %v7919_v43  ;;  %2192 = vmatpush1.msra.mxu1 %v7925_v45  ;;  %11394 = vst [vmem:[#allocation37_spill] sm:$0xff] %v7931_v51  ;;  %11395 = vst [vmem:[#allocation38_spill] sm:$0xff] %v7937_v41  ;;  %v7943_v43 = vld [vmem:[%s10244_s4 + $0xe0] sm:$0xff]  ;;  %v7949_v45 = vld [vmem:[%s10244_s4 + $0xf0] sm:$0xff] }
 0x4b3   :  { %2122 = vmatprep.subr.mxu0 %v7931_v51  ;;  %2193 = vmatprep.subr.mxu1 %v7937_v41  ;;  %11396 = vst [vmem:[#allocation39_spill] sm:$0xff] %v7943_v43  ;;  %11397 = vst [vmem:[#allocation40_spill] sm:$0xff] %v7949_v45  ;;  %v7955_v51 = vld [vmem:[%s10244_s4 + $0xc8] sm:$0xff]  ;;  %v7961_v41 = vld [vmem:[%s10244_s4 + $0xd8] sm:$0xff] }
 0x4b4   :  { %2123 = vmatpush1.msra.mxu0 %v7943_v43  ;;  %2194 = vmatpush1.msra.mxu1 %v7949_v45  ;;  %11398 = vst [vmem:[#allocation41_spill] sm:$0xff] %v7955_v51  ;;  %11399 = vst [vmem:[#allocation42_spill] sm:$0xff] %v7961_v41  ;;  %v7967_v43 = vld [vmem:[%s10244_s4 + $0xc0] sm:$0xff]  ;;  %v7973_v45 = vld [vmem:[%s10244_s4 + $0xd0] sm:$0xff] }
 0x4b5   :  { %2124 = vmatprep.subr.mxu0 %v7955_v51  ;;  %2195 = vmatprep.subr.mxu1 %v7961_v41  ;;  %11400 = vst [vmem:[#allocation43_spill] sm:$0xff] %v7967_v43  ;;  %11401 = vst [vmem:[#allocation44_spill] sm:$0xff] %v7973_v45  ;;  %v7979_v51 = vld [vmem:[%s10244_s4 + $0xa8] sm:$0xff]  ;;  %v7985_v41 = vld [vmem:[%s10244_s4 + $0xb8] sm:$0xff] }
 0x4b6   :  { %2125 = vmatpush1.msra.mxu0 %v7967_v43  ;;  %2196 = vmatpush1.msra.mxu1 %v7973_v45  ;;  %11402 = vst [vmem:[#allocation45_spill] sm:$0xff] %v7979_v51  ;;  %11403 = vst [vmem:[#allocation46_spill] sm:$0xff] %v7985_v41  ;;  %v7991_v43 = vld [vmem:[%s10244_s4 + $0xa0] sm:$0xff]  ;;  %v7997_v45 = vld [vmem:[%s10244_s4 + $0xb0] sm:$0xff] }
 0x4b7   :  { %2126 = vmatprep.subr.mxu0 %v7979_v51  ;;  %2197 = vmatprep.subr.mxu1 %v7985_v41  ;;  %11404 = vst [vmem:[#allocation47_spill] sm:$0xff] %v7991_v43  ;;  %11405 = vst [vmem:[#allocation48_spill] sm:$0xff] %v7997_v45  ;;  %v8003_v51 = vld [vmem:[%s10244_s4 + $0x88] sm:$0xff]  ;;  %v8009_v41 = vld [vmem:[%s10244_s4 + $0x98] sm:$0xff] }
 0x4b8   :  { %2127 = vmatpush1.msra.mxu0 %v7991_v43  ;;  %2198 = vmatpush1.msra.mxu1 %v7997_v45  ;;  %11406 = vst [vmem:[#allocation49_spill] sm:$0xff] %v8003_v51  ;;  %11407 = vst [vmem:[#allocation50_spill] sm:$0xff] %v8009_v41  ;;  %v8015_v43 = vld [vmem:[%s10244_s4 + $0x80] sm:$0xff]  ;;  %v8021_v45 = vld [vmem:[%s10244_s4 + $0x90] sm:$0xff] }
 0x4b9   :  { %2128 = vmatprep.subr.mxu0 %v8003_v51  ;;  %2199 = vmatprep.subr.mxu1 %v8009_v41  ;;  %11408 = vst [vmem:[#allocation51_spill] sm:$0xff] %v8015_v43  ;;  %11409 = vst [vmem:[#allocation52_spill] sm:$0xff] %v8021_v45  ;;  %v8027_v51 = vld [vmem:[%s10244_s4 + $0x68] sm:$0xff]  ;;  %v8033_v41 = vld [vmem:[%s10244_s4 + $0x78] sm:$0xff] }
 0x4ba   :  { %2129 = vmatpush1.msra.mxu0 %v8015_v43  ;;  %2200 = vmatpush1.msra.mxu1 %v8021_v45  ;;  %11410 = vst [vmem:[#allocation53_spill] sm:$0xff] %v8027_v51  ;;  %11411 = vst [vmem:[#allocation54_spill] sm:$0xff] %v8033_v41  ;;  %v8039_v43 = vld [vmem:[%s10244_s4 + $0x60] sm:$0xff]  ;;  %v8045_v45 = vld [vmem:[%s10244_s4 + $0x70] sm:$0xff] }
 0x4bb   :  { %2130 = vmatprep.subr.mxu0 %v8027_v51  ;;  %2201 = vmatprep.subr.mxu1 %v8033_v41  ;;  %11412 = vst [vmem:[#allocation55_spill] sm:$0xff] %v8039_v43  ;;  %11413 = vst [vmem:[#allocation56_spill] sm:$0xff] %v8045_v45  ;;  %v8051_v51 = vld [vmem:[%s10244_s4 + $0x48] sm:$0xff]  ;;  %v8057_v41 = vld [vmem:[%s10244_s4 + $0x58] sm:$0xff] }
 0x4bc   :  { %2131 = vmatpush1.msra.mxu0 %v8039_v43  ;;  %2202 = vmatpush1.msra.mxu1 %v8045_v45  ;;  %11414 = vst [vmem:[#allocation57_spill] sm:$0xff] %v8051_v51  ;;  %11415 = vst [vmem:[#allocation58_spill] sm:$0xff] %v8057_v41  ;;  %v8063_v43 = vld [vmem:[%s10244_s4 + $0x40] sm:$0xff]  ;;  %v8069_v45 = vld [vmem:[%s10244_s4 + $0x50] sm:$0xff] }
 0x4bd   :  { %2132 = vmatprep.subr.mxu0 %v8051_v51  ;;  %2203 = vmatprep.subr.mxu1 %v8057_v41  ;;  %11416 = vst [vmem:[#allocation59_spill] sm:$0xff] %v8063_v43  ;;  %11417 = vst [vmem:[#allocation60_spill] sm:$0xff] %v8069_v45  ;;  %v8075_v51 = vld [vmem:[%s10244_s4 + $0x28] sm:$0xff]  ;;  %v8081_v41 = vld [vmem:[%s10244_s4 + $0x38] sm:$0xff] }
 0x4be   :  { %2133 = vmatpush1.msra.mxu0 %v8063_v43  ;;  %2204 = vmatpush1.msra.mxu1 %v8069_v45  ;;  %11418 = vst [vmem:[#allocation61_spill] sm:$0xff] %v8075_v51  ;;  %11419 = vst [vmem:[#allocation62_spill] sm:$0xff] %v8081_v41  ;;  %v8087_v43 = vld [vmem:[%s10244_s4 + $0x20] sm:$0xff]  ;;  %v8093_v45 = vld [vmem:[%s10244_s4 + $0x30] sm:$0xff] }
 0x4bf   :  { %2134 = vmatprep.subr.mxu0 %v8075_v51  ;;  %2205 = vmatprep.subr.mxu1 %v8081_v41  ;;  %11420 = vst [vmem:[#allocation63_spill] sm:$0xff] %v8087_v43  ;;  %11421 = vst [vmem:[#allocation64_spill] sm:$0xff] %v8093_v45  ;;  %v8099_v51 = vld [vmem:[%s10244_s4 + $0x8] sm:$0xff]  ;;  %v8105_v41 = vld [vmem:[%s10244_s4 + $0x18] sm:$0xff] }
 0x4c0   :  { %2135 = vmatpush1.msra.mxu0 %v8087_v43  ;;  %2206 = vmatpush1.msra.mxu1 %v8093_v45  ;;  %11422 = vst [vmem:[#allocation65_spill] sm:$0xff] %v8099_v51  ;;  %11423 = vst [vmem:[#allocation66_spill] sm:$0xff] %v8105_v41  ;;  %v8111_v43 = vld [vmem:[%s10244_s4] sm:$0xff]  ;;  %v8117_v45 = vld [vmem:[%s10244_s4 + $0x10] sm:$0xff] }
 0x4c1   :  { %2136 = vmatprep.subr.mxu0 %v8099_v51  ;;  %2207 = vmatprep.subr.mxu1 %v8105_v41  ;;  %11424 = vst [vmem:[#allocation67_spill] sm:$0xff] %v8111_v43  ;;  %11425 = vst [vmem:[#allocation68_spill] sm:$0xff] %v8117_v45  ;;  %v8123_v51 = vld [vmem:[%s10244_s4 + $0x3e8] sm:$0xff]  ;;  %v8129_v41 = vld [vmem:[%s10244_s4 + $0x3f8] sm:$0xff] }
 0x4c2   :  { %2137 = vmatpush1.msra.mxu0 %v8111_v43  ;;  %2208 = vmatpush1.msra.mxu1 %v8117_v45  ;;  %11426 = vst [vmem:[#allocation69_spill] sm:$0xff] %v8123_v51  ;;  %11427 = vst [vmem:[#allocation70_spill] sm:$0xff] %v8129_v41  ;;  %v8135_v43 = vld [vmem:[%s10244_s4 + $0x3e0] sm:$0xff]  ;;  %v8141_v45 = vld [vmem:[%s10244_s4 + $0x3f0] sm:$0xff] }
 0x4c3   :  { %2138 = vmatprep.subr.mxu0 %v8123_v51  ;;  %2209 = vmatprep.subr.mxu1 %v8129_v41  ;;  %11428 = vst [vmem:[#allocation71_spill] sm:$0xff] %v8135_v43  ;;  %11429 = vst [vmem:[#allocation72_spill] sm:$0xff] %v8141_v45  ;;  %v8147_v51 = vld [vmem:[%s10244_s4 + $0x3c8] sm:$0xff]  ;;  %v8153_v41 = vld [vmem:[%s10244_s4 + $0x3d8] sm:$0xff] }
 0x4c4   :  { %2139 = vmatpush2.msra.mxu0 %v8135_v43  ;;  %2210 = vmatpush2.msra.mxu1 %v8141_v45  ;;  %11430 = vst [vmem:[#allocation73_spill] sm:$0xff] %v8147_v51  ;;  %11431 = vst [vmem:[#allocation74_spill] sm:$0xff] %v8153_v41  ;;  %v8159_v43 = vld [vmem:[%s10244_s4 + $0x3c0] sm:$0xff]  ;;  %v8165_v45 = vld [vmem:[%s10244_s4 + $0x3d0] sm:$0xff] }
 0x4c5   :  { %2140 = vmatprep.subr.mxu0 %v8147_v51  ;;  %2211 = vmatprep.subr.mxu1 %v8153_v41  ;;  %11432 = vst [vmem:[#allocation75_spill] sm:$0xff] %v8159_v43  ;;  %11433 = vst [vmem:[#allocation76_spill] sm:$0xff] %v8165_v45  ;;  %v8171_v51 = vld [vmem:[%s10244_s4 + $0x3a8] sm:$0xff]  ;;  %v8177_v41 = vld [vmem:[%s10244_s4 + $0x3b8] sm:$0xff] }
 0x4c6   :  { %2141 = vmatpush2.msra.mxu0 %v8159_v43  ;;  %2212 = vmatpush2.msra.mxu1 %v8165_v45  ;;  %11434 = vst [vmem:[#allocation77_spill] sm:$0xff] %v8171_v51  ;;  %11435 = vst [vmem:[#allocation78_spill] sm:$0xff] %v8177_v41  ;;  %v8183_v43 = vld [vmem:[%s10244_s4 + $0x3a0] sm:$0xff]  ;;  %v8189_v45 = vld [vmem:[%s10244_s4 + $0x3b0] sm:$0xff] }
 0x4c7   :  { %2142 = vmatprep.subr.mxu0 %v8171_v51  ;;  %2213 = vmatprep.subr.mxu1 %v8177_v41  ;;  %11436 = vst [vmem:[#allocation79_spill] sm:$0xff] %v8183_v43  ;;  %11437 = vst [vmem:[#allocation80_spill] sm:$0xff] %v8189_v45  ;;  %v8195_v51 = vld [vmem:[%s10244_s4 + $0x388] sm:$0xff]  ;;  %v8201_v41 = vld [vmem:[%s10244_s4 + $0x398] sm:$0xff] }
 0x4c8   :  { %2143 = vmatpush2.msra.mxu0 %v8183_v43  ;;  %2214 = vmatpush2.msra.mxu1 %v8189_v45  ;;  %11438 = vst [vmem:[#allocation81_spill] sm:$0xff] %v8195_v51  ;;  %11439 = vst [vmem:[#allocation82_spill] sm:$0xff] %v8201_v41  ;;  %v8207_v43 = vld [vmem:[%s10244_s4 + $0x380] sm:$0xff]  ;;  %v8213_v45 = vld [vmem:[%s10244_s4 + $0x390] sm:$0xff] }
 0x4c9   :  { %2144 = vmatprep.subr.mxu0 %v8195_v51  ;;  %2215 = vmatprep.subr.mxu1 %v8201_v41  ;;  %11440 = vst [vmem:[#allocation83_spill] sm:$0xff] %v8207_v43  ;;  %11441 = vst [vmem:[#allocation84_spill] sm:$0xff] %v8213_v45  ;;  %v8219_v51 = vld [vmem:[%s10244_s4 + $0x368] sm:$0xff]  ;;  %v8225_v41 = vld [vmem:[%s10244_s4 + $0x378] sm:$0xff] }
 0x4ca   :  { %2145 = vmatpush2.msra.mxu0 %v8207_v43  ;;  %2216 = vmatpush2.msra.mxu1 %v8213_v45  ;;  %11442 = vst [vmem:[#allocation85_spill] sm:$0xff] %v8219_v51  ;;  %11443 = vst [vmem:[#allocation86_spill] sm:$0xff] %v8225_v41  ;;  %v8231_v43 = vld [vmem:[%s10244_s4 + $0x360] sm:$0xff]  ;;  %v8237_v45 = vld [vmem:[%s10244_s4 + $0x370] sm:$0xff] }
 0x4cb   :  { %2146 = vmatprep.subr.mxu0 %v8219_v51  ;;  %2217 = vmatprep.subr.mxu1 %v8225_v41  ;;  %11444 = vst [vmem:[#allocation87_spill] sm:$0xff] %v8231_v43  ;;  %11445 = vst [vmem:[#allocation88_spill] sm:$0xff] %v8237_v45  ;;  %v8243_v51 = vld [vmem:[%s10244_s4 + $0x348] sm:$0xff]  ;;  %v8249_v41 = vld [vmem:[%s10244_s4 + $0x358] sm:$0xff] }
 0x4cc   :  { %2147 = vmatpush2.msra.mxu0 %v8231_v43  ;;  %2218 = vmatpush2.msra.mxu1 %v8237_v45  ;;  %11446 = vst [vmem:[#allocation89_spill] sm:$0xff] %v8243_v51  ;;  %11447 = vst [vmem:[#allocation90_spill] sm:$0xff] %v8249_v41  ;;  %v8255_v43 = vld [vmem:[%s10244_s4 + $0x340] sm:$0xff]  ;;  %v8261_v45 = vld [vmem:[%s10244_s4 + $0x350] sm:$0xff] }
 0x4cd   :  { %2148 = vmatprep.subr.mxu0 %v8243_v51  ;;  %2219 = vmatprep.subr.mxu1 %v8249_v41  ;;  %11448 = vst [vmem:[#allocation91_spill] sm:$0xff] %v8255_v43  ;;  %11449 = vst [vmem:[#allocation92_spill] sm:$0xff] %v8261_v45  ;;  %v8267_v51 = vld [vmem:[%s10244_s4 + $0x328] sm:$0xff]  ;;  %v8273_v41 = vld [vmem:[%s10244_s4 + $0x338] sm:$0xff] }
 0x4ce   :  { %2149 = vmatpush2.msra.mxu0 %v8255_v43  ;;  %2220 = vmatpush2.msra.mxu1 %v8261_v45  ;;  %11450 = vst [vmem:[#allocation93_spill] sm:$0xff] %v8267_v51  ;;  %11451 = vst [vmem:[#allocation94_spill] sm:$0xff] %v8273_v41  ;;  %v8279_v43 = vld [vmem:[%s10244_s4 + $0x320] sm:$0xff]  ;;  %v8285_v45 = vld [vmem:[%s10244_s4 + $0x330] sm:$0xff] }
 0x4cf   :  { %2150 = vmatprep.subr.mxu0 %v8267_v51  ;;  %2221 = vmatprep.subr.mxu1 %v8273_v41  ;;  %11452 = vst [vmem:[#allocation95_spill] sm:$0xff] %v8279_v43  ;;  %11453 = vst [vmem:[#allocation96_spill] sm:$0xff] %v8285_v45  ;;  %v8291_v51 = vld [vmem:[%s10244_s4 + $0x308] sm:$0xff]  ;;  %v8297_v41 = vld [vmem:[%s10244_s4 + $0x318] sm:$0xff] }
 0x4d0   :  { %2151 = vmatpush2.msra.mxu0 %v8279_v43  ;;  %2222 = vmatpush2.msra.mxu1 %v8285_v45  ;;  %11454 = vst [vmem:[#allocation97_spill] sm:$0xff] %v8291_v51  ;;  %11455 = vst [vmem:[#allocation98_spill] sm:$0xff] %v8297_v41  ;;  %v8303_v43 = vld [vmem:[%s10244_s4 + $0x300] sm:$0xff]  ;;  %v8309_v45 = vld [vmem:[%s10244_s4 + $0x310] sm:$0xff] }
 0x4d1   :  { %2152 = vmatprep.subr.mxu0 %v8291_v51  ;;  %2223 = vmatprep.subr.mxu1 %v8297_v41  ;;  %11456 = vst [vmem:[#allocation99_spill] sm:$0xff] %v8303_v43  ;;  %11457 = vst [vmem:[#allocation100_spill] sm:$0xff] %v8309_v45  ;;  %v8315_v51 = vld [vmem:[%s10244_s4 + $0x2e8] sm:$0xff]  ;;  %v8321_v41 = vld [vmem:[%s10244_s4 + $0x2f8] sm:$0xff] }
 0x4d2   :  { %2153 = vmatpush2.msra.mxu0 %v8303_v43  ;;  %2224 = vmatpush2.msra.mxu1 %v8309_v45  ;;  %11458 = vst [vmem:[#allocation101_spill] sm:$0xff] %v8315_v51  ;;  %11459 = vst [vmem:[#allocation102_spill] sm:$0xff] %v8321_v41  ;;  %v8327_v43 = vld [vmem:[%s10244_s4 + $0x2e0] sm:$0xff]  ;;  %v8333_v45 = vld [vmem:[%s10244_s4 + $0x2f0] sm:$0xff] }
 0x4d3   :  { %2154 = vmatprep.subr.mxu0 %v8315_v51  ;;  %2225 = vmatprep.subr.mxu1 %v8321_v41  ;;  %11460 = vst [vmem:[#allocation103_spill] sm:$0xff] %v8327_v43  ;;  %11461 = vst [vmem:[#allocation104_spill] sm:$0xff] %v8333_v45  ;;  %v8339_v51 = vld [vmem:[%s10244_s4 + $0x2c8] sm:$0xff]  ;;  %v8345_v41 = vld [vmem:[%s10244_s4 + $0x2d8] sm:$0xff] }
 0x4d4   :  { %2155 = vmatpush2.msra.mxu0 %v8327_v43  ;;  %2226 = vmatpush2.msra.mxu1 %v8333_v45  ;;  %11462 = vst [vmem:[#allocation105_spill] sm:$0xff] %v8339_v51  ;;  %11463 = vst [vmem:[#allocation106_spill] sm:$0xff] %v8345_v41  ;;  %v8351_v43 = vld [vmem:[%s10244_s4 + $0x2c0] sm:$0xff]  ;;  %v8357_v45 = vld [vmem:[%s10244_s4 + $0x2d0] sm:$0xff] }
 0x4d5   :  { %2156 = vmatprep.subr.mxu0 %v8339_v51  ;;  %2227 = vmatprep.subr.mxu1 %v8345_v41  ;;  %11464 = vst [vmem:[#allocation107_spill] sm:$0xff] %v8351_v43  ;;  %11465 = vst [vmem:[#allocation108_spill] sm:$0xff] %v8357_v45  ;;  %v8363_v51 = vld [vmem:[%s10244_s4 + $0x2a8] sm:$0xff]  ;;  %v8369_v41 = vld [vmem:[%s10244_s4 + $0x2b8] sm:$0xff] }
 0x4d6   :  { %2157 = vmatpush2.msra.mxu0 %v8351_v43  ;;  %2228 = vmatpush2.msra.mxu1 %v8357_v45  ;;  %11466 = vst [vmem:[#allocation109_spill] sm:$0xff] %v8363_v51  ;;  %11467 = vst [vmem:[#allocation110_spill] sm:$0xff] %v8369_v41  ;;  %v8375_v43 = vld [vmem:[%s10244_s4 + $0x2a0] sm:$0xff]  ;;  %v8381_v45 = vld [vmem:[%s10244_s4 + $0x2b0] sm:$0xff] }
 0x4d7   :  { %2158 = vmatprep.subr.mxu0 %v8363_v51  ;;  %2229 = vmatprep.subr.mxu1 %v8369_v41  ;;  %11468 = vst [vmem:[#allocation111_spill] sm:$0xff] %v8375_v43  ;;  %11469 = vst [vmem:[#allocation112_spill] sm:$0xff] %v8381_v45  ;;  %v8387_v51 = vld [vmem:[%s10244_s4 + $0x288] sm:$0xff]  ;;  %v8393_v41 = vld [vmem:[%s10244_s4 + $0x298] sm:$0xff] }
 0x4d8   :  { %2159 = vmatpush2.msra.mxu0 %v8375_v43  ;;  %2230 = vmatpush2.msra.mxu1 %v8381_v45  ;;  %11470 = vst [vmem:[#allocation113_spill] sm:$0xff] %v8387_v51  ;;  %11471 = vst [vmem:[#allocation114_spill] sm:$0xff] %v8393_v41  ;;  %v8399_v43 = vld [vmem:[%s10244_s4 + $0x280] sm:$0xff]  ;;  %v8405_v45 = vld [vmem:[%s10244_s4 + $0x290] sm:$0xff] }
 0x4d9   :  { %2160 = vmatprep.subr.mxu0 %v8387_v51  ;;  %2231 = vmatprep.subr.mxu1 %v8393_v41  ;;  %11472 = vst [vmem:[#allocation115_spill] sm:$0xff] %v8399_v43  ;;  %11473 = vst [vmem:[#allocation116_spill] sm:$0xff] %v8405_v45  ;;  %v8411_v51 = vld [vmem:[%s10244_s4 + $0x268] sm:$0xff]  ;;  %v8417_v41 = vld [vmem:[%s10244_s4 + $0x278] sm:$0xff] }
 0x4da   :  { %2161 = vmatpush2.msra.mxu0 %v8399_v43  ;;  %2232 = vmatpush2.msra.mxu1 %v8405_v45  ;;  %11474 = vst [vmem:[#allocation117_spill] sm:$0xff] %v8411_v51  ;;  %11475 = vst [vmem:[#allocation118_spill] sm:$0xff] %v8417_v41  ;;  %v8423_v43 = vld [vmem:[%s10244_s4 + $0x260] sm:$0xff]  ;;  %v8429_v45 = vld [vmem:[%s10244_s4 + $0x270] sm:$0xff] }
 0x4db   :  { %2162 = vmatprep.subr.mxu0 %v8411_v51  ;;  %2233 = vmatprep.subr.mxu1 %v8417_v41  ;;  %11476 = vst [vmem:[#allocation119_spill] sm:$0xff] %v8423_v43  ;;  %11477 = vst [vmem:[#allocation120_spill] sm:$0xff] %v8429_v45  ;;  %v8435_v51 = vld [vmem:[%s10244_s4 + $0x248] sm:$0xff]  ;;  %v8441_v41 = vld [vmem:[%s10244_s4 + $0x258] sm:$0xff] }
 0x4dc   :  { %2163 = vmatpush2.msra.mxu0 %v8423_v43  ;;  %2234 = vmatpush2.msra.mxu1 %v8429_v45  ;;  %11478 = vst [vmem:[#allocation121_spill] sm:$0xff] %v8435_v51  ;;  %11479 = vst [vmem:[#allocation122_spill] sm:$0xff] %v8441_v41  ;;  %v8447_v43 = vld [vmem:[%s10244_s4 + $0x240] sm:$0xff]  ;;  %v8453_v45 = vld [vmem:[%s10244_s4 + $0x250] sm:$0xff] }
 0x4dd   :  { %2164 = vmatprep.subr.mxu0 %v8435_v51  ;;  %2235 = vmatprep.subr.mxu1 %v8441_v41  ;;  %11480 = vst [vmem:[#allocation123_spill] sm:$0xff] %v8447_v43  ;;  %11481 = vst [vmem:[#allocation124_spill] sm:$0xff] %v8453_v45  ;;  %v8459_v51 = vld [vmem:[%s10244_s4 + $0x228] sm:$0xff]  ;;  %v8465_v41 = vld [vmem:[%s10244_s4 + $0x238] sm:$0xff] }
 0x4de   :  { %2165 = vmatpush2.msra.mxu0 %v8447_v43  ;;  %2236 = vmatpush2.msra.mxu1 %v8453_v45  ;;  %11482 = vst [vmem:[#allocation125_spill] sm:$0xff] %v8459_v51  ;;  %11483 = vst [vmem:[#allocation126_spill] sm:$0xff] %v8465_v41  ;;  %v8471_v43 = vld [vmem:[%s10244_s4 + $0x220] sm:$0xff]  ;;  %v8477_v45 = vld [vmem:[%s10244_s4 + $0x230] sm:$0xff] }
 0x4df   :  { %2166 = vmatprep.subr.mxu0 %v8459_v51  ;;  %2237 = vmatprep.subr.mxu1 %v8465_v41  ;;  %11484 = vst [vmem:[#allocation127_spill] sm:$0xff] %v8471_v43  ;;  %11485 = vst [vmem:[#allocation128_spill] sm:$0xff] %v8477_v45  ;;  %v8483_v51 = vld [vmem:[%s10244_s4 + $0x208] sm:$0xff]  ;;  %v8489_v41 = vld [vmem:[%s10244_s4 + $0x218] sm:$0xff] }
 0x4e0   :  { %2167 = vmatpush2.msra.mxu0 %v8471_v43  ;;  %2238 = vmatpush2.msra.mxu1 %v8477_v45  ;;  %11486 = vst [vmem:[#allocation129_spill] sm:$0xff] %v8483_v51  ;;  %11487 = vst [vmem:[#allocation130_spill] sm:$0xff] %v8489_v41  ;;  %v8495_v43 = vld [vmem:[%s10244_s4 + $0x200] sm:$0xff]  ;;  %v8501_v45 = vld [vmem:[%s10244_s4 + $0x210] sm:$0xff] }
 0x4e1   :  { %2168 = vmatprep.subr.mxu0 %v8483_v51  ;;  %2239 = vmatprep.subr.mxu1 %v8489_v41  ;;  %11488 = vst [vmem:[#allocation131_spill] sm:$0xff] %v8495_v43  ;;  %11489 = vst [vmem:[#allocation132_spill] sm:$0xff] %v8501_v45 }
 0x4e2   :  { %2169 = vmatpush2.msra.mxu0 %v8495_v43  ;;  %2240 = vmatpush2.msra.mxu1 %v8501_v45 }
 0x4e3   :  { %2276 = vmatprep.subr.mxu0 %v7431_v29  ;;  %2347 = vmatprep.subr.mxu1 %v7437_v28 }
 0x541   :  { %v1832_v51 = vpop.f32.mrf.mxu0  ;;  %v1903_v43 = vpop.f32.mrf.mxu1 }
 0x542   :  { %v1833_v41 = vadd.f32 %v1832_v51, %v11352_v37  ;;  %v1904_v29 = vadd.f32 %v1903_v43, %v11355_v30 }
 0x543   :  { %v1834_v25 = vpop.f32.mrf.mxu0  ;;  %v1905_v18 = vpop.f32.mrf.mxu1 }
 0x544   :  { %v3427_v3 = vmul.f32 -1.442695, %v1833_v41  ;;  %v1835_v24 = vadd.f32 %v1834_v25, %v11353_v62  ;;  %v1906_v34 = vadd.f32 %v1905_v18, %v11354_v31  ;;  %v11490_v62 = vld [vmem:[#allocation144_spill] sm:$0xff] }
 0x546   :  { %3621 = vpow2.f32 %v3427_v3  ;;  %v3428_v38 = vmul.f32 -1.442695, %v1835_v24  ;;  %v3429_v8 = vmul.f32 -1.442695, %v1906_v34  ;;  %v11491_v34 = vld [vmem:[#allocation146_spill] sm:$0xff] }
 0x548   :  { %3623 = vpow2.f32 %v3428_v38 }
 0x549   :  { %3625 = vpow2.f32 %v3429_v8 }
 0x553   :  { %v3622_v45 = vpop.eup %3621 }
 0x554   :  { %v1911_v53 = vadd.f32 1.0, %v3622_v45 }
 0x555   :  { %v3624_v28 = vpop.eup %3623 }
 0x556   :  { %3627 = vrcp.f32 %v1911_v53  ;;  %v1917_v51 = vadd.f32 1.0, %v3624_v28  ;;  %v3626_v41 = vpop.eup %3625 }
 0x557   :  { %3629 = vtanh.f32 %v1904_v29  ;;  %v1924_v45 = vadd.f32 1.0, %v3626_v41 }
 0x558   :  { %3631 = vrcp.f32 %v1917_v51 }
 0x562   :  { %v2002_v25 = vpop.f32.mrf.mxu0  ;;  %v2073_v53 = vpop.f32.mrf.mxu1 }
 0x563   :  { %v3628_v3 = vpop.eup %3627  ;;  %v2078_v24 = vadd.f32 %v2002_v25, %v11490_v62  ;;  %v11492_v62 = vld [vmem:[#allocation147_spill] sm:$0xff]  ;;  %v11493_v25 = vld [vmem:[#allocation145_spill] sm:$0xff] }
 0x564   :  { %v3630_v38 = vpop.eup %3629  ;;  %v2004_v37 = vpop.f32.mrf.mxu0 }
 0x565   :  { %v3632_v32 = vpop.eup %3631  ;;  %v3430_v18 = vmul.f32 -1.442695, %v2078_v24  ;;  %v2079_v31 = vadd.f32 %v2004_v37, %v11491_v34  ;;  %v1928_v33 = vmul.f32 %v3630_v38, %v3628_v3  ;;  %v2075_v28 = vpop.f32.mrf.mxu1  ;;  %v2080_v24 = vadd.f32 %v2073_v53, %v11493_v25  ;;  %v8529_v25 = vld [vmem:[%s10243_s2 + $0x1e0] sm:$0xff] }
 0x566   :  { %v1927_v43 = vmul.f32 %v3632_v32, %v7447_v1  ;;  %v2081_v51 = vadd.f32 %v2075_v28, %v11492_v62 }
 0x567   :  { %3633 = vpow2.f32 %v3430_v18  ;;  %v3431_v8 = vmul.f32 -1.442695, %v2079_v31 }
 0x568   :  { %v8513_v29 = vadd.f32 %v1928_v33, %v1927_v43  ;;  %v3432_v30 = vmul.f32 -1.442695, %v2081_v51 }
 0x569   :  { %3635 = vpow2.f32 %v3431_v8 }
 0x56a   :  { %3637 = vrcp.f32 %v1924_v45 }
 0x56b   :  { %3639 = vtanh.f32 %v8513_v29 }
 0x56c   :  { %3641 = vtanh.f32 %v2080_v24  ;;  %v8541_v24 = vld [vmem:[%s10243_s2 + $0x1c8] sm:$0xff] }
 0x56d   :  { %3643 = vpow2.f32 %v3432_v30 }
 0x574   :  { %v3634_v37 = vpop.eup %3633 }
 0x575   :  { %v2085_v3 = vadd.f32 1.0, %v3634_v37  ;;  %v8547_v37 = vld [vmem:[%s10243_s2 + $0x1d8] sm:$0xff] }
 0x576   :  { %v3636_v1 = vpop.eup %3635 }
 0x577   :  { %v3638_v32 = vpop.eup %3637  ;;  %3645 = vrcp.f32 %v2085_v3  ;;  %v2091_v31 = vadd.f32 1.0, %v3636_v1  ;;  %v8553_v3 = vld [vmem:[%s10243_s2 + $0x1c0] sm:$0xff]  ;;  %v8559_v1 = vld [vmem:[%s10243_s2 + $0x1d0] sm:$0xff] }
 0x578   :  { %v3640_v33 = vpop.eup %3639 }
 0x579   :  { %3647 = vrcp.f32 %v2091_v31  ;;  %v1931_v41 = vmul.f32 %v3640_v33, %v3638_v32  ;;  %v3642_v38 = vpop.eup %3641  ;;  %v8565_v32 = vld [vmem:[%s10243_s2 + $0x1a8] sm:$0xff]  ;;  %v8571_v31 = vld [vmem:[%s10243_s2 + $0x1b8] sm:$0xff]  ;;  %v8577_v33 = vld [vmem:[%s10243_s2 + $0x1a0] sm:$0xff] }
 0x57a   :  { %v3644_v18 = vpop.eup %3643 }
 0x57b   :  { %2170 = vmatprep.mubr.f32.mxu0 %v1931_v41  ;;  %2241 = vmatprep.mubr.f32.mxu1 %v1931_v41  ;;  %v2098_v53 = vadd.f32 1.0, %v3644_v18  ;;  %v8583_v41 = vld [vmem:[%s10243_s2 + $0x1b0] sm:$0xff]  ;;  %v8595_v18 = vld [vmem:[%s10243_s2 + $0x198] sm:$0xff] }
 0x57d   :  { %3649 = vrcp.f32 %v2098_v53  ;;  %v8619_v53 = vld [vmem:[%s10243_s2 + $0x178] sm:$0xff] }
 0x57e   :  { %11494 = vst [vmem:[#allocation134_spill] sm:$0xff] %v8619_v53 }
 0x584   :  { %v3646_v34 = vpop.eup %3645 }
 0x585   :  { %v2102_v43 = vmul.f32 %v3646_v34, %v3642_v38  ;;  %v8589_v38 = vld [vmem:[%s10243_s2 + $0x188] sm:$0xff]  ;;  %v8601_v34 = vld [vmem:[%s10243_s2 + $0x180] sm:$0xff] }
 0x586   :  { %v3648_v45 = vpop.eup %3647 }
 0x587   :  { %v2101_v8 = vmul.f32 %v3648_v45, %v7453_v26  ;;  %v8535_v26 = vld [vmem:[%s10243_s2 + $0x1f0] sm:$0xff]  ;;  %v8613_v45 = vld [vmem:[%s10243_s2 + $0x168] sm:$0xff] }
 0x589   :  { %v8519_v28 = vadd.f32 %v2102_v43, %v2101_v8  ;;  %v8607_v43 = vld [vmem:[%s10243_s2 + $0x190] sm:$0xff]  ;;  %v8625_v8 = vld [vmem:[%s10243_s2 + $0x160] sm:$0xff] }
 0x58a   :  { %v3650_v30 = vpop.eup %3649 }
 0x58b   :  { %3651 = vtanh.f32 %v8519_v28 }
 0x598   :  { %v3652_v62 = vpop.eup %3651 }
 0x599   :  { %v8522_v51 = vmul.f32 %v3652_v62, %v3650_v30  ;;  %v8631_v30 = vld [vmem:[%s10243_s2 + $0x170] sm:$0xff]  ;;  %v8637_v62 = vld [vmem:[%s10243_s2 + $0x148] sm:$0xff] }
 0x59b   :  { %2171 = vmatmul.mubr.f32.vlgmr.msra.gmra.mxu0 %v8522_v51  ;;  %2242 = vmatmul.mubr.f32.vlgmr.msra.gmra.mxu1 %v8522_v51 }
 0x59c   :  { %2277 = vmatpush1.msra.mxu0 %v8529_v25  ;;  %2348 = vmatpush1.msra.mxu1 %v8535_v26 }
 0x59d   :  { %2278 = vmatprep.subr.mxu0 %v8541_v24  ;;  %2349 = vmatprep.subr.mxu1 %v8547_v37 }
 0x59e   :  { %2279 = vmatpush1.msra.mxu0 %v8553_v3  ;;  %2350 = vmatpush1.msra.mxu1 %v8559_v1 }
 0x59f   :  { %2280 = vmatprep.subr.mxu0 %v8565_v32  ;;  %2351 = vmatprep.subr.mxu1 %v8571_v31 }
 0x5a0   :  { %2281 = vmatpush1.msra.mxu0 %v8577_v33  ;;  %2352 = vmatpush1.msra.mxu1 %v8583_v41 }
 0x5a1   :  { %2282 = vmatprep.subr.mxu0 %v8589_v38  ;;  %2353 = vmatprep.subr.mxu1 %v8595_v18 }
 0x5a2   :  { %2283 = vmatpush1.msra.mxu0 %v8601_v34  ;;  %2354 = vmatpush1.msra.mxu1 %v8607_v43 }
 0x5a3   :  { %2284 = vmatprep.subr.mxu0 %v8613_v45  ;;  %2355 = vmatprep.subr.mxu1 %v8619_v53  ;;  %v8643_v53 = vld [vmem:[%s10243_s2 + $0x158] sm:$0xff] }
 0x5a4   :  { %2285 = vmatpush1.msra.mxu0 %v8625_v8  ;;  %2356 = vmatpush1.msra.mxu1 %v8631_v30 }
 0x5a5   :  { %2286 = vmatprep.subr.mxu0 %v8637_v62  ;;  %2357 = vmatprep.subr.mxu1 %v8643_v53 }
 0x5a6   :  { %2287 = vmatpush1.msra.mxu0 %v7483_v15  ;;  %2358 = vmatpush1.msra.mxu1 %v7489_v20  ;;  %v11495_v15 = vld [vmem:[#allocation138_spill] sm:$0xff]  ;;  %v11496_v20 = vld [vmem:[#allocation139_spill] sm:$0xff] }
 0x5a7   :  { %2288 = vmatprep.subr.mxu0 %v7495_v13  ;;  %2359 = vmatprep.subr.mxu1 %v7501_v55  ;;  %v11497_v13 = vld [vmem:[#allocation137_spill] sm:$0xff]  ;;  %v11498_v55 = vld [vmem:[#allocation7_spill] sm:$0xff] }
 0x5a8   :  { %2289 = vmatpush1.msra.mxu0 %v7507_v14  ;;  %2360 = vmatpush1.msra.mxu1 %v7513_v52  ;;  %v11499_v14 = vld [vmem:[#allocation8_spill] sm:$0xff]  ;;  %v11500_v52 = vld [vmem:[#allocation9_spill] sm:$0xff] }
 0x5a9   :  { %2290 = vmatprep.subr.mxu0 %v7519_v5  ;;  %2361 = vmatprep.subr.mxu1 %v7525_v4  ;;  %v11501_v5 = vld [vmem:[#allocation10_spill] sm:$0xff]  ;;  %v11502_v4 = vld [vmem:[#allocation11_spill] sm:$0xff] }
 0x5aa   :  { %2291 = vmatpush1.msra.mxu0 %v7531_v2  ;;  %2362 = vmatpush1.msra.mxu1 %v7537_v16  ;;  %v11503_v2 = vld [vmem:[#allocation12_spill] sm:$0xff]  ;;  %v11504_v16 = vld [vmem:[#allocation13_spill] sm:$0xff] }
 0x5ab   :  { %2292 = vmatprep.subr.mxu0 %v7543_v12  ;;  %2363 = vmatprep.subr.mxu1 %v7549_v11  ;;  %v11505_v12 = vld [vmem:[#allocation14_spill] sm:$0xff]  ;;  %v11506_v11 = vld [vmem:[#allocation15_spill] sm:$0xff] }
 0x5ac   :  { %2293 = vmatpush1.msra.mxu0 %v7555_v10  ;;  %2364 = vmatpush1.msra.mxu1 %v7561_v21  ;;  %v11507_v10 = vld [vmem:[#allocation16_spill] sm:$0xff]  ;;  %v11508_v21 = vld [vmem:[#allocation17_spill] sm:$0xff] }
 0x5ad   :  { %2294 = vmatprep.subr.mxu0 %v7567_v22  ;;  %2365 = vmatprep.subr.mxu1 %v7573_v6  ;;  %v11509_v22 = vld [vmem:[#allocation18_spill] sm:$0xff]  ;;  %v11510_v6 = vld [vmem:[#allocation19_spill] sm:$0xff] }
 0x5ae   :  { %2295 = vmatpush1.msra.mxu0 %v7579_v7  ;;  %2366 = vmatpush1.msra.mxu1 %v7585_v9  ;;  %v11511_v7 = vld [vmem:[#allocation20_spill] sm:$0xff]  ;;  %v11512_v9 = vld [vmem:[#allocation21_spill] sm:$0xff] }
 0x5af   :  { %2296 = vmatprep.subr.mxu0 %v7591_v57  ;;  %2367 = vmatprep.subr.mxu1 %v7597_v46  ;;  %v11513_v57 = vld [vmem:[#allocation22_spill] sm:$0xff]  ;;  %v11514_v46 = vld [vmem:[#allocation23_spill] sm:$0xff] }
 0x5b0   :  { %2297 = vmatpush1.msra.mxu0 %v7603_v47  ;;  %2368 = vmatpush1.msra.mxu1 %v7609_v48  ;;  %v11515_v47 = vld [vmem:[#allocation24_spill] sm:$0xff]  ;;  %v11516_v48 = vld [vmem:[#allocation25_spill] sm:$0xff] }
 0x5b1   :  { %2298 = vmatprep.subr.mxu0 %v7615_v49  ;;  %2369 = vmatprep.subr.mxu1 %v7621_v54  ;;  %v11517_v49 = vld [vmem:[#allocation26_spill] sm:$0xff]  ;;  %v11518_v54 = vld [vmem:[#allocation27_spill] sm:$0xff] }
 0x5b2   :  { %2299 = vmatpush1.msra.mxu0 %v7627_v56  ;;  %2370 = vmatpush1.msra.mxu1 %v7633_v58  ;;  %v11519_v56 = vld [vmem:[#allocation28_spill] sm:$0xff]  ;;  %v11520_v58 = vld [vmem:[#allocation29_spill] sm:$0xff] }
 0x5b3   :  { %2300 = vmatprep.subr.mxu0 %v7639_v59  ;;  %2371 = vmatprep.subr.mxu1 %v7645_v60  ;;  %v11521_v59 = vld [vmem:[#allocation30_spill] sm:$0xff]  ;;  %v11522_v60 = vld [vmem:[#allocation31_spill] sm:$0xff] }
 0x5b4   :  { %2301 = vmatpush1.msra.mxu0 %v7651_v61  ;;  %2372 = vmatpush1.msra.mxu1 %v7657_v63  ;;  %v11523_v61 = vld [vmem:[#allocation32_spill] sm:$0xff]  ;;  %v11524_v63 = vld [vmem:[#allocation33_spill] sm:$0xff] }
 0x5b5   :  { %2302 = vmatprep.subr.mxu0 %v7663_v0  ;;  %2373 = vmatprep.subr.mxu1 %v7669_v23  ;;  %v11525_v0 = vld [vmem:[#allocation34_spill] sm:$0xff]  ;;  %v11526_v23 = vld [vmem:[#allocation35_spill] sm:$0xff] }
 0x5b6   :  { %2303 = vmatpush1.msra.mxu0 %v7675_v19  ;;  %2374 = vmatpush1.msra.mxu1 %v7681_v17  ;;  %v11527_v19 = vld [vmem:[#allocation36_spill] sm:$0xff]  ;;  %v11528_v17 = vld [vmem:[#allocation37_spill] sm:$0xff] }
 0x5b7   :  { %2304 = vmatprep.subr.mxu0 %v7687_v36  ;;  %2375 = vmatprep.subr.mxu1 %v7693_v44  ;;  %v11529_v36 = vld [vmem:[#allocation38_spill] sm:$0xff]  ;;  %v11530_v44 = vld [vmem:[#allocation39_spill] sm:$0xff] }
 0x5b8   :  { %2305 = vmatpush1.msra.mxu0 %v7699_v39  ;;  %2376 = vmatpush1.msra.mxu1 %v7705_v40  ;;  %v11531_v39 = vld [vmem:[#allocation40_spill] sm:$0xff]  ;;  %v11532_v40 = vld [vmem:[#allocation41_spill] sm:$0xff] }
 0x5b9   :  { %2306 = vmatprep.subr.mxu0 %v7711_v35  ;;  %2377 = vmatprep.subr.mxu1 %v7717_v50  ;;  %v11533_v35 = vld [vmem:[#allocation42_spill] sm:$0xff]  ;;  %v11534_v50 = vld [vmem:[#allocation43_spill] sm:$0xff] }
 0x5ba   :  { %2307 = vmatpush1.msra.mxu0 %v7723_v27  ;;  %2340 = vmatprep.mubr.f32.mxu0 %v10947_v42  ;;  %v11535_v27 = vld [vmem:[#allocation44_spill] sm:$0xff] }
 0x5bb   :  { %2378 = vmatpush1.msra.mxu1 %v11495_v15  ;;  %2411 = vmatprep.mubr.f32.mxu1 %v10947_v42  ;;  %v11537_v15 = vld [vmem:[#allocation46_spill] sm:$0xff] }
 0x5bc   :  { %2341 = vmatmul.mubr.f32.vlgmr.msra.gmra.mxu0 %v8522_v51  ;;  %2412 = vmatmul.mubr.f32.vlgmr.msra.gmra.mxu1 %v8522_v51  ;;  %v11536_v51 = vld [vmem:[#allocation45_spill] sm:$0xff] }
 0x5bd   :  { %2446 = vmatprep.subr.mxu0 %v11496_v20  ;;  %2517 = vmatprep.subr.mxu1 %v11497_v13  ;;  %v11538_v20 = vld [vmem:[#allocation47_spill] sm:$0xff]  ;;  %v11539_v13 = vld [vmem:[#allocation48_spill] sm:$0xff] }
 0x5be   :  { %2447 = vmatpush1.msra.mxu0 %v11498_v55  ;;  %2518 = vmatpush1.msra.mxu1 %v11499_v14  ;;  %v11540_v55 = vld [vmem:[#allocation49_spill] sm:$0xff]  ;;  %v11541_v14 = vld [vmem:[#allocation50_spill] sm:$0xff] }
 0x5bf   :  { %2448 = vmatprep.subr.mxu0 %v11500_v52  ;;  %2519 = vmatprep.subr.mxu1 %v11501_v5  ;;  %v11542_v52 = vld [vmem:[#allocation51_spill] sm:$0xff]  ;;  %v11543_v5 = vld [vmem:[#allocation52_spill] sm:$0xff] }
 0x5c0   :  { %2449 = vmatpush1.msra.mxu0 %v11502_v4  ;;  %2520 = vmatpush1.msra.mxu1 %v11503_v2  ;;  %v11544_v4 = vld [vmem:[#allocation53_spill] sm:$0xff]  ;;  %v11545_v2 = vld [vmem:[#allocation54_spill] sm:$0xff] }
 0x5c1   :  { %2450 = vmatprep.subr.mxu0 %v11504_v16  ;;  %2521 = vmatprep.subr.mxu1 %v11505_v12  ;;  %v11546_v16 = vld [vmem:[#allocation55_spill] sm:$0xff]  ;;  %v11547_v12 = vld [vmem:[#allocation56_spill] sm:$0xff] }
 0x5c2   :  { %2451 = vmatpush1.msra.mxu0 %v11506_v11  ;;  %2522 = vmatpush1.msra.mxu1 %v11507_v10  ;;  %v11548_v11 = vld [vmem:[#allocation57_spill] sm:$0xff]  ;;  %v11549_v10 = vld [vmem:[#allocation58_spill] sm:$0xff] }
 0x5c3   :  { %2452 = vmatprep.subr.mxu0 %v11508_v21  ;;  %2523 = vmatprep.subr.mxu1 %v11509_v22  ;;  %v11550_v21 = vld [vmem:[#allocation59_spill] sm:$0xff]  ;;  %v11551_v22 = vld [vmem:[#allocation60_spill] sm:$0xff] }
 0x5c4   :  { %2453 = vmatpush1.msra.mxu0 %v11510_v6  ;;  %2524 = vmatpush1.msra.mxu1 %v11511_v7  ;;  %v11552_v6 = vld [vmem:[#allocation61_spill] sm:$0xff]  ;;  %v11553_v7 = vld [vmem:[#allocation62_spill] sm:$0xff] }
 0x5c5   :  { %2454 = vmatprep.subr.mxu0 %v11512_v9  ;;  %2525 = vmatprep.subr.mxu1 %v11513_v57  ;;  %v11554_v9 = vld [vmem:[#allocation63_spill] sm:$0xff]  ;;  %v11555_v57 = vld [vmem:[#allocation64_spill] sm:$0xff] }
 0x5c6   :  { %2455 = vmatpush1.msra.mxu0 %v11514_v46  ;;  %2526 = vmatpush1.msra.mxu1 %v11515_v47  ;;  %v11556_v46 = vld [vmem:[#allocation65_spill] sm:$0xff]  ;;  %v11557_v47 = vld [vmem:[#allocation66_spill] sm:$0xff] }
 0x5c7   :  { %2456 = vmatprep.subr.mxu0 %v11516_v48  ;;  %2527 = vmatprep.subr.mxu1 %v11517_v49  ;;  %v11558_v48 = vld [vmem:[#allocation67_spill] sm:$0xff]  ;;  %v11559_v49 = vld [vmem:[#allocation68_spill] sm:$0xff] }
 0x5c8   :  { %2457 = vmatpush1.msra.mxu0 %v11518_v54  ;;  %2528 = vmatpush1.msra.mxu1 %v11519_v56  ;;  %v11560_v54 = vld [vmem:[#allocation69_spill] sm:$0xff]  ;;  %v11561_v56 = vld [vmem:[#allocation70_spill] sm:$0xff] }
 0x5c9   :  { %2458 = vmatprep.subr.mxu0 %v11520_v58  ;;  %2529 = vmatprep.subr.mxu1 %v11521_v59  ;;  %v11562_v58 = vld [vmem:[#allocation71_spill] sm:$0xff]  ;;  %v11563_v59 = vld [vmem:[#allocation72_spill] sm:$0xff] }
 0x5ca   :  { %2459 = vmatpush1.msra.mxu0 %v11522_v60  ;;  %2530 = vmatpush1.msra.mxu1 %v11523_v61  ;;  %v11564_v60 = vld [vmem:[#allocation73_spill] sm:$0xff]  ;;  %v11565_v61 = vld [vmem:[#allocation74_spill] sm:$0xff] }
 0x5cb   :  { %2460 = vmatprep.subr.mxu0 %v11524_v63  ;;  %2531 = vmatprep.subr.mxu1 %v11525_v0  ;;  %v11566_v63 = vld [vmem:[#allocation75_spill] sm:$0xff]  ;;  %v11567_v0 = vld [vmem:[#allocation76_spill] sm:$0xff] }
 0x5cc   :  { %2461 = vmatpush1.msra.mxu0 %v11526_v23  ;;  %2532 = vmatpush1.msra.mxu1 %v11527_v19  ;;  %v11568_v23 = vld [vmem:[#allocation77_spill] sm:$0xff]  ;;  %v11569_v19 = vld [vmem:[#allocation78_spill] sm:$0xff] }
 0x5cd   :  { %2462 = vmatprep.subr.mxu0 %v11528_v17  ;;  %2533 = vmatprep.subr.mxu1 %v11529_v36  ;;  %v11570_v17 = vld [vmem:[#allocation79_spill] sm:$0xff]  ;;  %v11571_v36 = vld [vmem:[#allocation80_spill] sm:$0xff] }
 0x5ce   :  { %2463 = vmatpush1.msra.mxu0 %v11530_v44  ;;  %2534 = vmatpush1.msra.mxu1 %v11531_v39  ;;  %v11572_v44 = vld [vmem:[#allocation81_spill] sm:$0xff]  ;;  %v11573_v39 = vld [vmem:[#allocation82_spill] sm:$0xff] }
 0x5cf   :  { %2464 = vmatprep.subr.mxu0 %v11532_v40  ;;  %2535 = vmatprep.subr.mxu1 %v11533_v35  ;;  %v11574_v40 = vld [vmem:[#allocation83_spill] sm:$0xff]  ;;  %v11575_v35 = vld [vmem:[#allocation84_spill] sm:$0xff] }
 0x5d0   :  { %2465 = vmatpush1.msra.mxu0 %v11534_v50  ;;  %2536 = vmatpush1.msra.mxu1 %v11535_v27  ;;  %v11576_v50 = vld [vmem:[#allocation85_spill] sm:$0xff]  ;;  %v11577_v27 = vld [vmem:[#allocation86_spill] sm:$0xff] }
 0x5d1   :  { %2466 = vmatprep.subr.mxu0 %v11536_v51  ;;  %2537 = vmatprep.subr.mxu1 %v11537_v15  ;;  %v11578_v51 = vld [vmem:[#allocation87_spill] sm:$0xff]  ;;  %v11579_v15 = vld [vmem:[#allocation88_spill] sm:$0xff] }
 0x5d2   :  { %2467 = vmatpush1.msra.mxu0 %v11538_v20  ;;  %2538 = vmatpush1.msra.mxu1 %v11539_v13  ;;  %v11580_v20 = vld [vmem:[#allocation89_spill] sm:$0xff]  ;;  %v11581_v13 = vld [vmem:[#allocation90_spill] sm:$0xff] }
 0x5d3   :  { %2468 = vmatprep.subr.mxu0 %v11540_v55  ;;  %2539 = vmatprep.subr.mxu1 %v11541_v14  ;;  %v11582_v55 = vld [vmem:[#allocation91_spill] sm:$0xff]  ;;  %v11583_v14 = vld [vmem:[#allocation92_spill] sm:$0xff] }
 0x5d4   :  { %2469 = vmatpush1.msra.mxu0 %v11542_v52  ;;  %2540 = vmatpush1.msra.mxu1 %v11543_v5  ;;  %v11584_v52 = vld [vmem:[#allocation93_spill] sm:$0xff]  ;;  %v11585_v5 = vld [vmem:[#allocation94_spill] sm:$0xff] }
 0x5d5   :  { %2470 = vmatprep.subr.mxu0 %v11544_v4  ;;  %2541 = vmatprep.subr.mxu1 %v11545_v2  ;;  %v11586_v4 = vld [vmem:[#allocation95_spill] sm:$0xff]  ;;  %v11587_v2 = vld [vmem:[#allocation96_spill] sm:$0xff] }
 0x5d6   :  { %2471 = vmatpush1.msra.mxu0 %v11546_v16  ;;  %2542 = vmatpush1.msra.mxu1 %v11547_v12  ;;  %v11588_v16 = vld [vmem:[#allocation97_spill] sm:$0xff]  ;;  %v11589_v12 = vld [vmem:[#allocation98_spill] sm:$0xff] }
 0x5d7   :  { %2472 = vmatprep.subr.mxu0 %v11548_v11  ;;  %2543 = vmatprep.subr.mxu1 %v11549_v10  ;;  %v11590_v11 = vld [vmem:[#allocation99_spill] sm:$0xff]  ;;  %v11591_v10 = vld [vmem:[#allocation100_spill] sm:$0xff] }
 0x5d8   :  { %2473 = vmatpush1.msra.mxu0 %v11550_v21  ;;  %2544 = vmatpush1.msra.mxu1 %v11551_v22  ;;  %v11592_v21 = vld [vmem:[#allocation101_spill] sm:$0xff]  ;;  %v11593_v22 = vld [vmem:[#allocation102_spill] sm:$0xff] }
 0x5d9   :  { %2474 = vmatprep.subr.mxu0 %v11552_v6  ;;  %2545 = vmatprep.subr.mxu1 %v11553_v7  ;;  %v11594_v6 = vld [vmem:[#allocation103_spill] sm:$0xff]  ;;  %v11595_v7 = vld [vmem:[#allocation104_spill] sm:$0xff] }
 0x5da   :  { %2475 = vmatpush1.msra.mxu0 %v11554_v9  ;;  %2546 = vmatpush1.msra.mxu1 %v11555_v57  ;;  %v11596_v9 = vld [vmem:[#allocation105_spill] sm:$0xff]  ;;  %v11597_v57 = vld [vmem:[#allocation106_spill] sm:$0xff] }
 0x5db   :  { %2476 = vmatprep.subr.mxu0 %v11556_v46  ;;  %2547 = vmatprep.subr.mxu1 %v11557_v47  ;;  %v11598_v46 = vld [vmem:[#allocation107_spill] sm:$0xff]  ;;  %v11599_v47 = vld [vmem:[#allocation108_spill] sm:$0xff] }
 0x5dc   :  { %2477 = vmatpush1.msra.mxu0 %v11558_v48  ;;  %2548 = vmatpush1.msra.mxu1 %v11559_v49  ;;  %v11600_v48 = vld [vmem:[#allocation109_spill] sm:$0xff]  ;;  %v11601_v49 = vld [vmem:[#allocation110_spill] sm:$0xff] }
 0x5dd   :  { %2478 = vmatprep.subr.mxu0 %v11560_v54  ;;  %2549 = vmatprep.subr.mxu1 %v11561_v56  ;;  %v11602_v54 = vld [vmem:[#allocation111_spill] sm:$0xff]  ;;  %v11603_v56 = vld [vmem:[#allocation112_spill] sm:$0xff] }
 0x5de   :  { %2479 = vmatpush2.msra.mxu0 %v11562_v58  ;;  %2550 = vmatpush2.msra.mxu1 %v11563_v59  ;;  %v11604_v58 = vld [vmem:[#allocation113_spill] sm:$0xff]  ;;  %v11605_v59 = vld [vmem:[#allocation114_spill] sm:$0xff] }
 0x5df   :  { %2480 = vmatprep.subr.mxu0 %v11564_v60  ;;  %2551 = vmatprep.subr.mxu1 %v11565_v61  ;;  %v11606_v60 = vld [vmem:[#allocation115_spill] sm:$0xff]  ;;  %v11607_v61 = vld [vmem:[#allocation116_spill] sm:$0xff] }
 0x5e0   :  { %2481 = vmatpush2.msra.mxu0 %v11566_v63  ;;  %2552 = vmatpush2.msra.mxu1 %v11567_v0  ;;  %v11608_v63 = vld [vmem:[#allocation117_spill] sm:$0xff]  ;;  %v11609_v0 = vld [vmem:[#allocation118_spill] sm:$0xff] }
 0x5e1   :  { %2482 = vmatprep.subr.mxu0 %v11568_v23  ;;  %2553 = vmatprep.subr.mxu1 %v11569_v19  ;;  %v11610_v23 = vld [vmem:[#allocation119_spill] sm:$0xff]  ;;  %v11611_v19 = vld [vmem:[#allocation120_spill] sm:$0xff] }
 0x5e2   :  { %2483 = vmatpush2.msra.mxu0 %v11570_v17  ;;  %2554 = vmatpush2.msra.mxu1 %v11571_v36  ;;  %v11612_v17 = vld [vmem:[#allocation121_spill] sm:$0xff]  ;;  %v11613_v36 = vld [vmem:[#allocation122_spill] sm:$0xff] }
 0x5e3   :  { %2484 = vmatprep.subr.mxu0 %v11572_v44  ;;  %2555 = vmatprep.subr.mxu1 %v11573_v39  ;;  %v11614_v44 = vld [vmem:[#allocation123_spill] sm:$0xff]  ;;  %v11615_v39 = vld [vmem:[#allocation124_spill] sm:$0xff] }
 0x5e4   :  { %2485 = vmatpush2.msra.mxu0 %v11574_v40  ;;  %2556 = vmatpush2.msra.mxu1 %v11575_v35  ;;  %v11616_v40 = vld [vmem:[#allocation125_spill] sm:$0xff]  ;;  %v11617_v35 = vld [vmem:[#allocation126_spill] sm:$0xff] }
 0x5e5   :  { %2486 = vmatprep.subr.mxu0 %v11576_v50  ;;  %2557 = vmatprep.subr.mxu1 %v11577_v27  ;;  %v11618_v50 = vld [vmem:[#allocation127_spill] sm:$0xff]  ;;  %v11619_v27 = vld [vmem:[#allocation128_spill] sm:$0xff] }
 0x5e6   :  { %2487 = vmatpush2.msra.mxu0 %v11578_v51  ;;  %2558 = vmatpush2.msra.mxu1 %v11579_v15  ;;  %v11620_v51 = vld [vmem:[#allocation129_spill] sm:$0xff]  ;;  %v11621_v15 = vld [vmem:[#allocation130_spill] sm:$0xff] }
 0x5e7   :  { %2488 = vmatprep.subr.mxu0 %v11580_v20  ;;  %2559 = vmatprep.subr.mxu1 %v11581_v13  ;;  %v11622_v20 = vld [vmem:[#allocation131_spill] sm:$0xff]  ;;  %v11623_v13 = vld [vmem:[#allocation132_spill] sm:$0xff] }
 0x5e8   :  { %2489 = vmatpush2.msra.mxu0 %v11582_v55  ;;  %2560 = vmatpush2.msra.mxu1 %v11583_v14  ;;  %v8823_v55 = vld [vmem:[%s10243_s2 + $0x1e8] sm:$0xff]  ;;  %v8829_v14 = vld [vmem:[%s10243_s2 + $0x1f8] sm:$0xff] }
 0x5e9   :  { %2490 = vmatprep.subr.mxu0 %v11584_v52  ;;  %2561 = vmatprep.subr.mxu1 %v11585_v5  ;;  %v11624_v5 = vld [vmem:[#allocation3_spill] sm:$0xff] }
 0x5ea   :  { %2491 = vmatpush2.msra.mxu0 %v11586_v4  ;;  %2562 = vmatpush2.msra.mxu1 %v11587_v2 }
 0x5eb   :  { %2492 = vmatprep.subr.mxu0 %v11588_v16  ;;  %2563 = vmatprep.subr.mxu1 %v11589_v12  ;;  %v11625_v12 = vld [vmem:[#allocation4_spill] sm:$0xff] }
 0x5ec   :  { %2493 = vmatpush2.msra.mxu0 %v11590_v11  ;;  %2564 = vmatpush2.msra.mxu1 %v11591_v10 }
 0x5ed   :  { %2494 = vmatprep.subr.mxu0 %v11592_v21  ;;  %2565 = vmatprep.subr.mxu1 %v11593_v22 }
 0x5ee   :  { %2495 = vmatpush2.msra.mxu0 %v11594_v6  ;;  %2566 = vmatpush2.msra.mxu1 %v11595_v7  ;;  %v11626_v6 = vld [vmem:[#allocation5_spill] sm:$0xff] }
 0x5ef   :  { %2496 = vmatprep.subr.mxu0 %v11596_v9  ;;  %2567 = vmatprep.subr.mxu1 %v11597_v57 }
 0x5f0   :  { %2497 = vmatpush2.msra.mxu0 %v11598_v46  ;;  %2568 = vmatpush2.msra.mxu1 %v11599_v47  ;;  %v11627_v46 = vld [vmem:[#allocation6_spill] sm:$0xff] }
 0x5f1   :  { %2498 = vmatprep.subr.mxu0 %v11600_v48  ;;  %2569 = vmatprep.subr.mxu1 %v11601_v49 }
 0x5f2   :  { %2499 = vmatpush2.msra.mxu0 %v11602_v54  ;;  %2570 = vmatpush2.msra.mxu1 %v11603_v56 }
 0x5f3   :  { %2500 = vmatprep.subr.mxu0 %v11604_v58  ;;  %2571 = vmatprep.subr.mxu1 %v11605_v59 }
 0x5f4   :  { %2501 = vmatpush2.msra.mxu0 %v11606_v60  ;;  %2572 = vmatpush2.msra.mxu1 %v11607_v61  ;;  %v11628_v60 = vld [vmem:[#allocation148_spill] sm:$0xff] }
 0x5f5   :  { %2502 = vmatprep.subr.mxu0 %v11608_v63  ;;  %2573 = vmatprep.subr.mxu1 %v11609_v0 }
 0x5f6   :  { %2503 = vmatpush2.msra.mxu0 %v11610_v23  ;;  %2574 = vmatpush2.msra.mxu1 %v11611_v19 }
 0x5f7   :  { %2504 = vmatprep.subr.mxu0 %v11612_v17  ;;  %2575 = vmatprep.subr.mxu1 %v11613_v36  ;;  %v11629_v17 = vld [vmem:[#allocation150_spill] sm:$0xff] }
 0x5f8   :  { %2505 = vmatpush2.msra.mxu0 %v11614_v44  ;;  %2576 = vmatpush2.msra.mxu1 %v11615_v39 }
 0x5f9   :  { %2506 = vmatprep.subr.mxu0 %v11616_v40  ;;  %2577 = vmatprep.subr.mxu1 %v11617_v35 }
 0x5fa   :  { %2507 = vmatpush2.msra.mxu0 %v11618_v50  ;;  %2578 = vmatpush2.msra.mxu1 %v11619_v27 }
 0x5fb   :  { %2508 = vmatprep.subr.mxu0 %v11620_v51  ;;  %2579 = vmatprep.subr.mxu1 %v11621_v15  ;;  %v11630_v15 = vld [vmem:[#allocation151_spill] sm:$0xff] }
 0x5fc   :  { %2509 = vmatpush2.msra.mxu0 %v11622_v20  ;;  %2580 = vmatpush2.msra.mxu1 %v11623_v13  ;;  %v11631_v13 = vld [vmem:[#allocation149_spill] sm:$0xff] }
 0x5fd   :  { %2616 = vmatprep.subr.mxu0 %v8823_v55  ;;  %2687 = vmatprep.subr.mxu1 %v8829_v14 }
 0x65b   :  { %v2172_v52 = vpop.f32.mrf.mxu0  ;;  %v2243_v10 = vpop.f32.mrf.mxu1 }
 0x65c   :  { %v2173_v4 = vadd.f32 %v2172_v52, %v11624_v5  ;;  %v2244_v47 = vadd.f32 %v2243_v10, %v11627_v46 }
 0x65d   :  { %v2174_v2 = vpop.f32.mrf.mxu0  ;;  %v2245_v22 = vpop.f32.mrf.mxu1 }
 0x65e   :  { %v3433_v16 = vmul.f32 -1.442695, %v2173_v4  ;;  %v2175_v11 = vadd.f32 %v2174_v2, %v11625_v12  ;;  %v2246_v7 = vadd.f32 %v2245_v22, %v11626_v6 }
 0x660   :  { %3653 = vpow2.f32 %v3433_v16  ;;  %v3434_v21 = vmul.f32 -1.442695, %v2175_v11  ;;  %v3435_v9 = vmul.f32 -1.442695, %v2246_v7 }
 0x662   :  { %3655 = vpow2.f32 %v3434_v21 }
 0x663   :  { %3657 = vpow2.f32 %v3435_v9 }
 0x66d   :  { %v3654_v57 = vpop.eup %3653 }
 0x66e   :  { %v2251_v48 = vadd.f32 1.0, %v3654_v57 }
 0x66f   :  { %v3656_v49 = vpop.eup %3655 }
 0x670   :  { %3659 = vrcp.f32 %v2251_v48  ;;  %v2257_v54 = vadd.f32 1.0, %v3656_v49  ;;  %v3658_v56 = vpop.eup %3657 }
 0x671   :  { %3661 = vtanh.f32 %v2244_v47  ;;  %v2264_v40 = vadd.f32 1.0, %v3658_v56 }
 0x672   :  { %3663 = vrcp.f32 %v2257_v54 }
 0x67c   :  { %v2342_v58 = vpop.f32.mrf.mxu0  ;;  %v2413_v35 = vpop.f32.mrf.mxu1 }
 0x67d   :  { %v3660_v59 = vpop.eup %3659  ;;  %v2418_v61 = vadd.f32 %v2342_v58, %v11628_v60  ;;  %v2420_v52 = vadd.f32 %v2413_v35, %v11631_v13  ;;  %v9049_v35 = vld [vmem:[%s10243_s2 + $0x70] sm:$0xff]  ;;  %v9079_v13 = vld [vmem:[%s10243_s2 + $0x28] sm:$0xff] }
 0x67e   :  { %v3662_v63 = vpop.eup %3661  ;;  %v2344_v0 = vpop.f32.mrf.mxu0 }
 0x67f   :  { %v3664_v23 = vpop.eup %3663  ;;  %v3436_v19 = vmul.f32 -1.442695, %v2418_v61  ;;  %v2419_v36 = vadd.f32 %v2344_v0, %v11629_v17  ;;  %v2268_v44 = vmul.f32 %v3662_v63, %v3660_v59  ;;  %v2415_v51 = vpop.f32.mrf.mxu1  ;;  %v8989_v61 = vld [vmem:[%s10243_s2 + $0xb8] sm:$0xff]  ;;  %v8995_v63 = vld [vmem:[%s10243_s2 + $0xa0] sm:$0xff]  ;;  %v9001_v0 = vld [vmem:[%s10243_s2 + $0xb0] sm:$0xff] }
 0x680   :  { %v2267_v39 = vmul.f32 %v3664_v23, %v8513_v29  ;;  %v2421_v20 = vadd.f32 %v2415_v51, %v11630_v15  ;;  %v9007_v23 = vld [vmem:[%s10243_s2 + $0x88] sm:$0xff]  ;;  %v9019_v17 = vld [vmem:[%s10243_s2 + $0x80] sm:$0xff]  ;;  %v9061_v51 = vld [vmem:[%s10243_s2 + $0x58] sm:$0xff] }
 0x681   :  { %3665 = vpow2.f32 %v3436_v19  ;;  %v3437_v50 = vmul.f32 -1.442695, %v2419_v36  ;;  %v9013_v19 = vld [vmem:[%s10243_s2 + $0x98] sm:$0xff]  ;;  %v9025_v36 = vld [vmem:[%s10243_s2 + $0x90] sm:$0xff]  ;;  %v9067_v15 = vld [vmem:[%s10243_s2 + $0x40] sm:$0xff] }
 0x682   :  { %v8839_v27 = vadd.f32 %v2268_v44, %v2267_v39  ;;  %v3438_v4 = vmul.f32 -1.442695, %v2421_v20  ;;  %v9031_v44 = vld [vmem:[%s10243_s2 + $0x68] sm:$0xff]  ;;  %v9037_v39 = vld [vmem:[%s10243_s2 + $0x78] sm:$0xff]  ;;  %v9073_v20 = vld [vmem:[%s10243_s2 + $0x50] sm:$0xff] }
 0x683   :  { %3667 = vpow2.f32 %v3437_v50  ;;  %v9055_v50 = vld [vmem:[%s10243_s2 + $0x48] sm:$0xff] }
 0x684   :  { %3669 = vrcp.f32 %v2264_v40  ;;  %v9043_v40 = vld [vmem:[%s10243_s2 + $0x60] sm:$0xff] }
 0x685   :  { %3671 = vtanh.f32 %v8839_v27 }
 0x686   :  { %3673 = vtanh.f32 %v2420_v52  ;;  %v9085_v52 = vld [vmem:[%s10243_s2 + $0x38] sm:$0xff] }
 0x687   :  { %3675 = vpow2.f32 %v3438_v4  ;;  %v9091_v4 = vld [vmem:[%s10243_s2 + $0x20] sm:$0xff] }
 0x68e   :  { %v3666_v2 = vpop.eup %3665 }
 0x68f   :  { %v2425_v16 = vadd.f32 1.0, %v3666_v2  ;;  %v9097_v2 = vld [vmem:[%s10243_s2 + $0x30] sm:$0xff] }
 0x690   :  { %v3668_v29 = vpop.eup %3667 }
 0x691   :  { %v3670_v11 = vpop.eup %3669  ;;  %3677 = vrcp.f32 %v2425_v16  ;;  %v2431_v10 = vadd.f32 1.0, %v3668_v29  ;;  %v9103_v16 = vld [vmem:[%s10243_s2 + $0x8] sm:$0xff]  ;;  %v9109_v29 = vld [vmem:[%s10243_s2 + $0x18] sm:$0xff] }
 0x692   :  { %v3672_v21 = vpop.eup %3671 }
 0x693   :  { %3679 = vrcp.f32 %v2431_v10  ;;  %v2271_v22 = vmul.f32 %v3672_v21, %v3670_v11  ;;  %v3674_v7 = vpop.eup %3673  ;;  %v9115_v11 = vld [vmem:[%s10243_s2] sm:$0xff]  ;;  %v9122_v10 = vld [vmem:[%s10243_s2 + $0x10] sm:$0xff]  ;;  %v9131_v21 = vld [vmem:[%s10244_s4 + $0x1e8] sm:$0xff] }
 0x694   :  { %v3676_v9 = vpop.eup %3675  ;;  %11633 = vst [vmem:[#allocation135_spill] sm:$0xff] %v9122_v10  ;;  %11634 = vst [vmem:[#allocation133_spill] sm:$0xff] %v9131_v21 }
 0x695   :  { %2510 = vmatprep.mubr.f32.mxu0 %v2271_v22  ;;  %2581 = vmatprep.mubr.f32.mxu1 %v2271_v22  ;;  %v2438_v49 = vadd.f32 1.0, %v3676_v9  ;;  %v9137_v22 = vld [vmem:[%s10244_s4 + $0x1f8] sm:$0xff]  ;;  %v9149_v9 = vld [vmem:[%s10244_s4 + $0x1f0] sm:$0xff] }
 0x696   :  { %11635 = vst [vmem:[#allocation140_spill] sm:$0xff] %v9137_v22  ;;  %11637 = vst [vmem:[#allocation143_spill] sm:$0xff] %v9149_v9 }
 0x697   :  { %3681 = vrcp.f32 %v2438_v49  ;;  %v9173_v49 = vld [vmem:[%s10244_s4 + $0x1d0] sm:$0xff] }
 0x698   :  { %11641 = vst [vmem:[#allocation146_spill] sm:$0xff] %v9173_v49 }
 0x69e   :  { %v3678_v57 = vpop.eup %3677 }
 0x69f   :  { %v2442_v47 = vmul.f32 %v3678_v57, %v3674_v7  ;;  %v9143_v7 = vld [vmem:[%s10244_s4 + $0x1e0] sm:$0xff]  ;;  %v9155_v57 = vld [vmem:[%s10244_s4 + $0x1c8] sm:$0xff] }
 0x6a0   :  { %v3680_v48 = vpop.eup %3679  ;;  %11636 = vst [vmem:[#allocation142_spill] sm:$0xff] %v9143_v7  ;;  %11638 = vst [vmem:[#allocation141_spill] sm:$0xff] %v9155_v57 }
 0x6a1   :  { %v2441_v54 = vmul.f32 %v3680_v48, %v8519_v28  ;;  %v11632_v28 = vld [vmem:[#allocation134_spill] sm:$0xff]  ;;  %v9167_v48 = vld [vmem:[%s10244_s4 + $0x1c0] sm:$0xff] }
 0x6a2   :  { %11640 = vst [vmem:[#allocation144_spill] sm:$0xff] %v9167_v48 }
 0x6a3   :  { %v8845_v56 = vadd.f32 %v2442_v47, %v2441_v54  ;;  %v9161_v47 = vld [vmem:[%s10244_s4 + $0x1d8] sm:$0xff]  ;;  %v9179_v54 = vld [vmem:[%s10244_s4 + $0x1a8] sm:$0xff] }
 0x6a4   :  { %v3682_v58 = vpop.eup %3681  ;;  %11639 = vst [vmem:[#allocation136_spill] sm:$0xff] %v9161_v47  ;;  %11642 = vst [vmem:[#allocation147_spill] sm:$0xff] %v9179_v54 }
 0x6a5   :  { %3683 = vtanh.f32 %v8845_v56 }
 0x6b2   :  { %v3684_v59 = vpop.eup %3683 }
 0x6b3   :  { %v8848_v60 = vmul.f32 %v3684_v59, %v3682_v58  ;;  %v9185_v58 = vld [vmem:[%s10244_s4 + $0x1b8] sm:$0xff]  ;;  %v9191_v59 = vld [vmem:[%s10244_s4 + $0x1a0] sm:$0xff] }
 0x6b4   :  { %11643 = vst [vmem:[#allocation145_spill] sm:$0xff] %v9185_v58  ;;  %11644 = vst [vmem:[#allocation138_spill] sm:$0xff] %v9191_v59 }
 0x6b5   :  { %2511 = vmatmul.mubr.f32.vlgmr.msra.gmra.mxu0 %v8848_v60  ;;  %2582 = vmatmul.mubr.f32.vlgmr.msra.gmra.mxu1 %v8848_v60 }
 0x6b6   :  { %2617 = vmatpush1.msra.mxu0 %v8529_v25  ;;  %2688 = vmatpush1.msra.mxu1 %v8535_v26  ;;  %v8875_v25 = vld [vmem:[%s10243_s2 + $0x140] sm:$0xff]  ;;  %v8881_v26 = vld [vmem:[%s10243_s2 + $0x150] sm:$0xff] }
 0x6b7   :  { %2618 = vmatprep.subr.mxu0 %v8541_v24  ;;  %2689 = vmatprep.subr.mxu1 %v8547_v37  ;;  %v8887_v24 = vld [vmem:[%s10243_s2 + $0x128] sm:$0xff]  ;;  %v8893_v37 = vld [vmem:[%s10243_s2 + $0x138] sm:$0xff] }
 0x6b8   :  { %2619 = vmatpush1.msra.mxu0 %v8553_v3  ;;  %2690 = vmatpush1.msra.mxu1 %v8559_v1  ;;  %v8899_v3 = vld [vmem:[%s10243_s2 + $0x120] sm:$0xff]  ;;  %v8905_v1 = vld [vmem:[%s10243_s2 + $0x130] sm:$0xff] }
 0x6b9   :  { %2620 = vmatprep.subr.mxu0 %v8565_v32  ;;  %2691 = vmatprep.subr.mxu1 %v8571_v31  ;;  %v8911_v32 = vld [vmem:[%s10243_s2 + $0x108] sm:$0xff]  ;;  %v8917_v31 = vld [vmem:[%s10243_s2 + $0x118] sm:$0xff] }
 0x6ba   :  { %2621 = vmatpush1.msra.mxu0 %v8577_v33  ;;  %2692 = vmatpush1.msra.mxu1 %v8583_v41  ;;  %v8923_v33 = vld [vmem:[%s10243_s2 + $0x100] sm:$0xff]  ;;  %v8929_v41 = vld [vmem:[%s10243_s2 + $0x110] sm:$0xff] }
 0x6bb   :  { %2622 = vmatprep.subr.mxu0 %v8589_v38  ;;  %2693 = vmatprep.subr.mxu1 %v8595_v18  ;;  %v8935_v38 = vld [vmem:[%s10243_s2 + $0xe8] sm:$0xff]  ;;  %v8941_v18 = vld [vmem:[%s10243_s2 + $0xf8] sm:$0xff] }
 0x6bc   :  { %2623 = vmatpush1.msra.mxu0 %v8601_v34  ;;  %2694 = vmatpush1.msra.mxu1 %v8607_v43  ;;  %v8947_v34 = vld [vmem:[%s10243_s2 + $0xe0] sm:$0xff]  ;;  %v8953_v43 = vld [vmem:[%s10243_s2 + $0xf0] sm:$0xff] }
 0x6bd   :  { %2624 = vmatprep.subr.mxu0 %v8613_v45  ;;  %2695 = vmatprep.subr.mxu1 %v11632_v28  ;;  %v8959_v45 = vld [vmem:[%s10243_s2 + $0xc8] sm:$0xff] }
 0x6be   :  { %2625 = vmatpush1.msra.mxu0 %v8625_v8  ;;  %2696 = vmatpush1.msra.mxu1 %v8631_v30  ;;  %v8971_v8 = vld [vmem:[%s10243_s2 + $0xc0] sm:$0xff]  ;;  %v8977_v30 = vld [vmem:[%s10243_s2 + $0xd0] sm:$0xff]  ;;  %v9203_v28 = vld [vmem:[%s10244_s4 + $0x188] sm:$0xff] }
 0x6bf   :  { %2626 = vmatprep.subr.mxu0 %v8637_v62  ;;  %2697 = vmatprep.subr.mxu1 %v8643_v53  ;;  %v8965_v53 = vld [vmem:[%s10243_s2 + $0xd8] sm:$0xff]  ;;  %v8983_v62 = vld [vmem:[%s10243_s2 + $0xa8] sm:$0xff]  ;;  %11646 = vst [vmem:[#allocation137_spill] sm:$0xff] %v9203_v28 }
 0x6c0   :  { %2627 = vmatpush1.msra.mxu0 %v8875_v25  ;;  %2698 = vmatpush1.msra.mxu1 %v8881_v26 }
 0x6c1   :  { %2628 = vmatprep.subr.mxu0 %v8887_v24  ;;  %2699 = vmatprep.subr.mxu1 %v8893_v37 }
 0x6c2   :  { %2629 = vmatpush1.msra.mxu0 %v8899_v3  ;;  %2700 = vmatpush1.msra.mxu1 %v8905_v1 }
 0x6c3   :  { %2630 = vmatprep.subr.mxu0 %v8911_v32  ;;  %2701 = vmatprep.subr.mxu1 %v8917_v31 }
 0x6c4   :  { %2631 = vmatpush1.msra.mxu0 %v8923_v33  ;;  %2702 = vmatpush1.msra.mxu1 %v8929_v41 }
 0x6c5   :  { %2632 = vmatprep.subr.mxu0 %v8935_v38  ;;  %2703 = vmatprep.subr.mxu1 %v8941_v18 }
 0x6c6   :  { %2633 = vmatpush1.msra.mxu0 %v8947_v34  ;;  %2704 = vmatpush1.msra.mxu1 %v8953_v43 }
 0x6c7   :  { %2634 = vmatprep.subr.mxu0 %v8959_v45  ;;  %2705 = vmatprep.subr.mxu1 %v8965_v53 }
 0x6c8   :  { %2635 = vmatpush1.msra.mxu0 %v8971_v8  ;;  %2706 = vmatpush1.msra.mxu1 %v8977_v30 }
 0x6c9   :  { %2636 = vmatprep.subr.mxu0 %v8983_v62  ;;  %2707 = vmatprep.subr.mxu1 %v8989_v61 }
 0x6ca   :  { %2637 = vmatpush1.msra.mxu0 %v8995_v63  ;;  %2708 = vmatpush1.msra.mxu1 %v9001_v0 }
 0x6cb   :  { %2638 = vmatprep.subr.mxu0 %v9007_v23  ;;  %2709 = vmatprep.subr.mxu1 %v9013_v19 }
 0x6cc   :  { %2639 = vmatpush1.msra.mxu0 %v9019_v17  ;;  %2710 = vmatpush1.msra.mxu1 %v9025_v36 }
 0x6cd   :  { %2640 = vmatprep.subr.mxu0 %v9031_v44  ;;  %2711 = vmatprep.subr.mxu1 %v9037_v39 }
 0x6ce   :  { %2641 = vmatpush1.msra.mxu0 %v9043_v40  ;;  %2712 = vmatpush1.msra.mxu1 %v9049_v35 }
 0x6cf   :  { %2642 = vmatprep.subr.mxu0 %v9055_v50  ;;  %2713 = vmatprep.subr.mxu1 %v9061_v51 }
 0x6d0   :  { %2643 = vmatpush1.msra.mxu0 %v9067_v15  ;;  %2714 = vmatpush1.msra.mxu1 %v9073_v20 }
 0x6d1   :  { %2644 = vmatprep.subr.mxu0 %v9079_v13  ;;  %2715 = vmatprep.subr.mxu1 %v9085_v52 }
 0x6d2   :  { %2645 = vmatpush1.msra.mxu0 %v9091_v4  ;;  %2716 = vmatpush1.msra.mxu1 %v9097_v2 }
 0x6d3   :  { %2646 = vmatprep.subr.mxu0 %v9103_v16  ;;  %2717 = vmatprep.subr.mxu1 %v9109_v29 }
 0x6d4   :  { %2647 = vmatpush1.msra.mxu0 %v9115_v11  ;;  %2680 = vmatprep.mubr.f32.mxu0 %v10947_v42 }
 0x6d5   :  { %2718 = vmatpush1.msra.mxu1 %v9122_v10  ;;  %2751 = vmatprep.mubr.f32.mxu1 %v10947_v42 }
 0x6d6   :  { %2681 = vmatmul.mubr.f32.vlgmr.msra.gmra.mxu0 %v8848_v60  ;;  %2752 = vmatmul.mubr.f32.vlgmr.msra.gmra.mxu1 %v8848_v60  ;;  %v9197_v60 = vld [vmem:[%s10244_s4 + $0x1b0] sm:$0xff] }
 0x6d7   :  { %2786 = vmatprep.subr.mxu0 %v9131_v21  ;;  %2857 = vmatprep.subr.mxu1 %v9137_v22  ;;  %11645 = vst [vmem:[#allocation139_spill] sm:$0xff] %v9197_v60 }
 0x6d8   :  { %2787 = vmatpush1.msra.mxu0 %v9143_v7  ;;  %2858 = vmatpush1.msra.mxu1 %v9149_v9 }
 0x6d9   :  { %2788 = vmatprep.subr.mxu0 %v9155_v57  ;;  %2859 = vmatprep.subr.mxu1 %v9161_v47 }
 0x6da   :  { %2789 = vmatpush1.msra.mxu0 %v9167_v48  ;;  %2860 = vmatpush1.msra.mxu1 %v9173_v49 }
 0x6db   :  { %2790 = vmatprep.subr.mxu0 %v9179_v54  ;;  %2861 = vmatprep.subr.mxu1 %v9185_v58  ;;  %v9209_v58 = vld [vmem:[%s10244_s4 + $0x198] sm:$0xff] }
 0x6dc   :  { %2791 = vmatpush1.msra.mxu0 %v9191_v59  ;;  %2862 = vmatpush1.msra.mxu1 %v9197_v60  ;;  %11647 = vst [vmem:[#allocation7_spill] sm:$0xff] %v9209_v58  ;;  %v9215_v59 = vld [vmem:[%s10244_s4 + $0x180] sm:$0xff]  ;;  %v9221_v60 = vld [vmem:[%s10244_s4 + $0x190] sm:$0xff] }
 0x6dd   :  { %2792 = vmatprep.subr.mxu0 %v9203_v28  ;;  %2863 = vmatprep.subr.mxu1 %v9209_v58  ;;  %11648 = vst [vmem:[#allocation8_spill] sm:$0xff] %v9215_v59  ;;  %11649 = vst [vmem:[#allocation9_spill] sm:$0xff] %v9221_v60  ;;  %v9227_v28 = vld [vmem:[%s10244_s4 + $0x168] sm:$0xff]  ;;  %v9233_v58 = vld [vmem:[%s10244_s4 + $0x178] sm:$0xff] }
 0x6de   :  { %2793 = vmatpush1.msra.mxu0 %v9215_v59  ;;  %2864 = vmatpush1.msra.mxu1 %v9221_v60  ;;  %11650 = vst [vmem:[#allocation10_spill] sm:$0xff] %v9227_v28  ;;  %11651 = vst [vmem:[#allocation11_spill] sm:$0xff] %v9233_v58  ;;  %v9239_v59 = vld [vmem:[%s10244_s4 + $0x160] sm:$0xff]  ;;  %v9245_v60 = vld [vmem:[%s10244_s4 + $0x170] sm:$0xff] }
 0x6df   :  { %2794 = vmatprep.subr.mxu0 %v9227_v28  ;;  %2865 = vmatprep.subr.mxu1 %v9233_v58  ;;  %11652 = vst [vmem:[#allocation12_spill] sm:$0xff] %v9239_v59  ;;  %11653 = vst [vmem:[#allocation13_spill] sm:$0xff] %v9245_v60  ;;  %v9251_v28 = vld [vmem:[%s10244_s4 + $0x148] sm:$0xff]  ;;  %v9257_v58 = vld [vmem:[%s10244_s4 + $0x158] sm:$0xff] }
 0x6e0   :  { %2795 = vmatpush1.msra.mxu0 %v9239_v59  ;;  %2866 = vmatpush1.msra.mxu1 %v9245_v60  ;;  %11654 = vst [vmem:[#allocation14_spill] sm:$0xff] %v9251_v28  ;;  %11655 = vst [vmem:[#allocation15_spill] sm:$0xff] %v9257_v58  ;;  %v9263_v59 = vld [vmem:[%s10244_s4 + $0x140] sm:$0xff]  ;;  %v9269_v60 = vld [vmem:[%s10244_s4 + $0x150] sm:$0xff] }
 0x6e1   :  { %2796 = vmatprep.subr.mxu0 %v9251_v28  ;;  %2867 = vmatprep.subr.mxu1 %v9257_v58  ;;  %11656 = vst [vmem:[#allocation16_spill] sm:$0xff] %v9263_v59  ;;  %11657 = vst [vmem:[#allocation17_spill] sm:$0xff] %v9269_v60  ;;  %v9275_v28 = vld [vmem:[%s10244_s4 + $0x128] sm:$0xff]  ;;  %v9281_v58 = vld [vmem:[%s10244_s4 + $0x138] sm:$0xff] }
 0x6e2   :  { %2797 = vmatpush1.msra.mxu0 %v9263_v59  ;;  %2868 = vmatpush1.msra.mxu1 %v9269_v60  ;;  %11658 = vst [vmem:[#allocation18_spill] sm:$0xff] %v9275_v28  ;;  %11659 = vst [vmem:[#allocation19_spill] sm:$0xff] %v9281_v58  ;;  %v9287_v59 = vld [vmem:[%s10244_s4 + $0x120] sm:$0xff]  ;;  %v9293_v60 = vld [vmem:[%s10244_s4 + $0x130] sm:$0xff] }
 0x6e3   :  { %2798 = vmatprep.subr.mxu0 %v9275_v28  ;;  %2869 = vmatprep.subr.mxu1 %v9281_v58  ;;  %11660 = vst [vmem:[#allocation20_spill] sm:$0xff] %v9287_v59  ;;  %11661 = vst [vmem:[#allocation21_spill] sm:$0xff] %v9293_v60  ;;  %v9299_v28 = vld [vmem:[%s10244_s4 + $0x108] sm:$0xff]  ;;  %v9305_v58 = vld [vmem:[%s10244_s4 + $0x118] sm:$0xff] }
 0x6e4   :  { %2799 = vmatpush1.msra.mxu0 %v9287_v59  ;;  %2870 = vmatpush1.msra.mxu1 %v9293_v60  ;;  %11662 = vst [vmem:[#allocation22_spill] sm:$0xff] %v9299_v28  ;;  %11663 = vst [vmem:[#allocation23_spill] sm:$0xff] %v9305_v58  ;;  %v9311_v59 = vld [vmem:[%s10244_s4 + $0x100] sm:$0xff]  ;;  %v9317_v60 = vld [vmem:[%s10244_s4 + $0x110] sm:$0xff] }
 0x6e5   :  { %2800 = vmatprep.subr.mxu0 %v9299_v28  ;;  %2871 = vmatprep.subr.mxu1 %v9305_v58  ;;  %11664 = vst [vmem:[#allocation24_spill] sm:$0xff] %v9311_v59  ;;  %11665 = vst [vmem:[#allocation25_spill] sm:$0xff] %v9317_v60  ;;  %v9323_v28 = vld [vmem:[%s10244_s4 + $0xe8] sm:$0xff]  ;;  %v9329_v58 = vld [vmem:[%s10244_s4 + $0xf8] sm:$0xff] }
 0x6e6   :  { %2801 = vmatpush1.msra.mxu0 %v9311_v59  ;;  %2872 = vmatpush1.msra.mxu1 %v9317_v60  ;;  %11666 = vst [vmem:[#allocation26_spill] sm:$0xff] %v9323_v28  ;;  %11667 = vst [vmem:[#allocation27_spill] sm:$0xff] %v9329_v58  ;;  %v9335_v59 = vld [vmem:[%s10244_s4 + $0xe0] sm:$0xff]  ;;  %v9341_v60 = vld [vmem:[%s10244_s4 + $0xf0] sm:$0xff] }
 0x6e7   :  { %2802 = vmatprep.subr.mxu0 %v9323_v28  ;;  %2873 = vmatprep.subr.mxu1 %v9329_v58  ;;  %11668 = vst [vmem:[#allocation28_spill] sm:$0xff] %v9335_v59  ;;  %11669 = vst [vmem:[#allocation29_spill] sm:$0xff] %v9341_v60  ;;  %v9347_v28 = vld [vmem:[%s10244_s4 + $0xc8] sm:$0xff]  ;;  %v9353_v58 = vld [vmem:[%s10244_s4 + $0xd8] sm:$0xff] }
 0x6e8   :  { %2803 = vmatpush1.msra.mxu0 %v9335_v59  ;;  %2874 = vmatpush1.msra.mxu1 %v9341_v60  ;;  %11670 = vst [vmem:[#allocation30_spill] sm:$0xff] %v9347_v28  ;;  %11671 = vst [vmem:[#allocation31_spill] sm:$0xff] %v9353_v58  ;;  %v9359_v59 = vld [vmem:[%s10244_s4 + $0xc0] sm:$0xff]  ;;  %v9365_v60 = vld [vmem:[%s10244_s4 + $0xd0] sm:$0xff] }
 0x6e9   :  { %2804 = vmatprep.subr.mxu0 %v9347_v28  ;;  %2875 = vmatprep.subr.mxu1 %v9353_v58  ;;  %11672 = vst [vmem:[#allocation32_spill] sm:$0xff] %v9359_v59  ;;  %11673 = vst [vmem:[#allocation33_spill] sm:$0xff] %v9365_v60  ;;  %v9371_v28 = vld [vmem:[%s10244_s4 + $0xa8] sm:$0xff]  ;;  %v9377_v58 = vld [vmem:[%s10244_s4 + $0xb8] sm:$0xff] }
 0x6ea   :  { %2805 = vmatpush1.msra.mxu0 %v9359_v59  ;;  %2876 = vmatpush1.msra.mxu1 %v9365_v60  ;;  %11674 = vst [vmem:[#allocation34_spill] sm:$0xff] %v9371_v28  ;;  %11675 = vst [vmem:[#allocation35_spill] sm:$0xff] %v9377_v58  ;;  %v9383_v59 = vld [vmem:[%s10244_s4 + $0xa0] sm:$0xff]  ;;  %v9389_v60 = vld [vmem:[%s10244_s4 + $0xb0] sm:$0xff] }
 0x6eb   :  { %2806 = vmatprep.subr.mxu0 %v9371_v28  ;;  %2877 = vmatprep.subr.mxu1 %v9377_v58  ;;  %11676 = vst [vmem:[#allocation36_spill] sm:$0xff] %v9383_v59  ;;  %11677 = vst [vmem:[#allocation37_spill] sm:$0xff] %v9389_v60  ;;  %v9395_v28 = vld [vmem:[%s10244_s4 + $0x88] sm:$0xff]  ;;  %v9401_v58 = vld [vmem:[%s10244_s4 + $0x98] sm:$0xff] }
 0x6ec   :  { %2807 = vmatpush1.msra.mxu0 %v9383_v59  ;;  %2878 = vmatpush1.msra.mxu1 %v9389_v60  ;;  %11678 = vst [vmem:[#allocation38_spill] sm:$0xff] %v9395_v28  ;;  %11679 = vst [vmem:[#allocation39_spill] sm:$0xff] %v9401_v58  ;;  %v9407_v59 = vld [vmem:[%s10244_s4 + $0x80] sm:$0xff]  ;;  %v9413_v60 = vld [vmem:[%s10244_s4 + $0x90] sm:$0xff] }
 0x6ed   :  { %2808 = vmatprep.subr.mxu0 %v9395_v28  ;;  %2879 = vmatprep.subr.mxu1 %v9401_v58  ;;  %11680 = vst [vmem:[#allocation40_spill] sm:$0xff] %v9407_v59  ;;  %11681 = vst [vmem:[#allocation41_spill] sm:$0xff] %v9413_v60  ;;  %v9419_v28 = vld [vmem:[%s10244_s4 + $0x68] sm:$0xff]  ;;  %v9425_v58 = vld [vmem:[%s10244_s4 + $0x78] sm:$0xff] }
 0x6ee   :  { %2809 = vmatpush1.msra.mxu0 %v9407_v59  ;;  %2880 = vmatpush1.msra.mxu1 %v9413_v60  ;;  %11682 = vst [vmem:[#allocation42_spill] sm:$0xff] %v9419_v28  ;;  %11683 = vst [vmem:[#allocation43_spill] sm:$0xff] %v9425_v58  ;;  %v9431_v59 = vld [vmem:[%s10244_s4 + $0x60] sm:$0xff]  ;;  %v9437_v60 = vld [vmem:[%s10244_s4 + $0x70] sm:$0xff] }
 0x6ef   :  { %2810 = vmatprep.subr.mxu0 %v9419_v28  ;;  %2881 = vmatprep.subr.mxu1 %v9425_v58  ;;  %11684 = vst [vmem:[#allocation44_spill] sm:$0xff] %v9431_v59  ;;  %11685 = vst [vmem:[#allocation45_spill] sm:$0xff] %v9437_v60  ;;  %v9443_v28 = vld [vmem:[%s10244_s4 + $0x48] sm:$0xff]  ;;  %v9449_v58 = vld [vmem:[%s10244_s4 + $0x58] sm:$0xff] }
 0x6f0   :  { %2811 = vmatpush1.msra.mxu0 %v9431_v59  ;;  %2882 = vmatpush1.msra.mxu1 %v9437_v60  ;;  %11686 = vst [vmem:[#allocation46_spill] sm:$0xff] %v9443_v28  ;;  %11687 = vst [vmem:[#allocation47_spill] sm:$0xff] %v9449_v58  ;;  %v9455_v59 = vld [vmem:[%s10244_s4 + $0x40] sm:$0xff]  ;;  %v9461_v60 = vld [vmem:[%s10244_s4 + $0x50] sm:$0xff] }
 0x6f1   :  { %2812 = vmatprep.subr.mxu0 %v9443_v28  ;;  %2883 = vmatprep.subr.mxu1 %v9449_v58  ;;  %11688 = vst [vmem:[#allocation48_spill] sm:$0xff] %v9455_v59  ;;  %11689 = vst [vmem:[#allocation49_spill] sm:$0xff] %v9461_v60  ;;  %v9467_v28 = vld [vmem:[%s10244_s4 + $0x28] sm:$0xff]  ;;  %v9473_v58 = vld [vmem:[%s10244_s4 + $0x38] sm:$0xff] }
 0x6f2   :  { %2813 = vmatpush1.msra.mxu0 %v9455_v59  ;;  %2884 = vmatpush1.msra.mxu1 %v9461_v60  ;;  %11690 = vst [vmem:[#allocation50_spill] sm:$0xff] %v9467_v28  ;;  %11691 = vst [vmem:[#allocation51_spill] sm:$0xff] %v9473_v58  ;;  %v9479_v59 = vld [vmem:[%s10244_s4 + $0x20] sm:$0xff]  ;;  %v9485_v60 = vld [vmem:[%s10244_s4 + $0x30] sm:$0xff] }
 0x6f3   :  { %2814 = vmatprep.subr.mxu0 %v9467_v28  ;;  %2885 = vmatprep.subr.mxu1 %v9473_v58  ;;  %11692 = vst [vmem:[#allocation52_spill] sm:$0xff] %v9479_v59  ;;  %11693 = vst [vmem:[#allocation53_spill] sm:$0xff] %v9485_v60  ;;  %v9491_v28 = vld [vmem:[%s10244_s4 + $0x8] sm:$0xff]  ;;  %v9497_v58 = vld [vmem:[%s10244_s4 + $0x18] sm:$0xff] }
 0x6f4   :  { %2815 = vmatpush1.msra.mxu0 %v9479_v59  ;;  %2886 = vmatpush1.msra.mxu1 %v9485_v60  ;;  %11694 = vst [vmem:[#allocation54_spill] sm:$0xff] %v9491_v28  ;;  %11695 = vst [vmem:[#allocation55_spill] sm:$0xff] %v9497_v58  ;;  %v9503_v59 = vld [vmem:[%s10244_s4] sm:$0xff]  ;;  %v9509_v60 = vld [vmem:[%s10244_s4 + $0x10] sm:$0xff] }
 0x6f5   :  { %2816 = vmatprep.subr.mxu0 %v9491_v28  ;;  %2887 = vmatprep.subr.mxu1 %v9497_v58  ;;  %11696 = vst [vmem:[#allocation56_spill] sm:$0xff] %v9503_v59  ;;  %11697 = vst [vmem:[#allocation57_spill] sm:$0xff] %v9509_v60  ;;  %v9515_v28 = vld [vmem:[%s10244_s4 + $0x3e8] sm:$0xff]  ;;  %v9521_v58 = vld [vmem:[%s10244_s4 + $0x3f8] sm:$0xff] }
 0x6f6   :  { %2817 = vmatpush1.msra.mxu0 %v9503_v59  ;;  %2888 = vmatpush1.msra.mxu1 %v9509_v60  ;;  %11698 = vst [vmem:[#allocation58_spill] sm:$0xff] %v9515_v28  ;;  %11699 = vst [vmem:[#allocation59_spill] sm:$0xff] %v9521_v58  ;;  %v9527_v59 = vld [vmem:[%s10244_s4 + $0x3e0] sm:$0xff]  ;;  %v9533_v60 = vld [vmem:[%s10244_s4 + $0x3f0] sm:$0xff] }
 0x6f7   :  { %2818 = vmatprep.subr.mxu0 %v9515_v28  ;;  %2889 = vmatprep.subr.mxu1 %v9521_v58  ;;  %11700 = vst [vmem:[#allocation60_spill] sm:$0xff] %v9527_v59  ;;  %11701 = vst [vmem:[#allocation61_spill] sm:$0xff] %v9533_v60  ;;  %v9539_v28 = vld [vmem:[%s10244_s4 + $0x3c8] sm:$0xff]  ;;  %v9545_v58 = vld [vmem:[%s10244_s4 + $0x3d8] sm:$0xff] }
 0x6f8   :  { %2819 = vmatpush2.msra.mxu0 %v9527_v59  ;;  %2890 = vmatpush2.msra.mxu1 %v9533_v60  ;;  %11702 = vst [vmem:[#allocation62_spill] sm:$0xff] %v9539_v28  ;;  %11703 = vst [vmem:[#allocation63_spill] sm:$0xff] %v9545_v58  ;;  %v9551_v59 = vld [vmem:[%s10244_s4 + $0x3c0] sm:$0xff]  ;;  %v9557_v60 = vld [vmem:[%s10244_s4 + $0x3d0] sm:$0xff] }
 0x6f9   :  { %2820 = vmatprep.subr.mxu0 %v9539_v28  ;;  %2891 = vmatprep.subr.mxu1 %v9545_v58  ;;  %11704 = vst [vmem:[#allocation64_spill] sm:$0xff] %v9551_v59  ;;  %11705 = vst [vmem:[#allocation65_spill] sm:$0xff] %v9557_v60  ;;  %v9563_v28 = vld [vmem:[%s10244_s4 + $0x3a8] sm:$0xff]  ;;  %v9569_v58 = vld [vmem:[%s10244_s4 + $0x3b8] sm:$0xff] }
 0x6fa   :  { %2821 = vmatpush2.msra.mxu0 %v9551_v59  ;;  %2892 = vmatpush2.msra.mxu1 %v9557_v60  ;;  %11706 = vst [vmem:[#allocation66_spill] sm:$0xff] %v9563_v28  ;;  %11707 = vst [vmem:[#allocation67_spill] sm:$0xff] %v9569_v58  ;;  %v9575_v59 = vld [vmem:[%s10244_s4 + $0x3a0] sm:$0xff]  ;;  %v9581_v60 = vld [vmem:[%s10244_s4 + $0x3b0] sm:$0xff] }
 0x6fb   :  { %2822 = vmatprep.subr.mxu0 %v9563_v28  ;;  %2893 = vmatprep.subr.mxu1 %v9569_v58  ;;  %11708 = vst [vmem:[#allocation68_spill] sm:$0xff] %v9575_v59  ;;  %11709 = vst [vmem:[#allocation69_spill] sm:$0xff] %v9581_v60  ;;  %v9587_v28 = vld [vmem:[%s10244_s4 + $0x388] sm:$0xff]  ;;  %v9593_v58 = vld [vmem:[%s10244_s4 + $0x398] sm:$0xff] }
 0x6fc   :  { %2823 = vmatpush2.msra.mxu0 %v9575_v59  ;;  %2894 = vmatpush2.msra.mxu1 %v9581_v60  ;;  %11710 = vst [vmem:[#allocation70_spill] sm:$0xff] %v9587_v28  ;;  %11711 = vst [vmem:[#allocation71_spill] sm:$0xff] %v9593_v58  ;;  %v9599_v59 = vld [vmem:[%s10244_s4 + $0x380] sm:$0xff]  ;;  %v9605_v60 = vld [vmem:[%s10244_s4 + $0x390] sm:$0xff] }
 0x6fd   :  { %2824 = vmatprep.subr.mxu0 %v9587_v28  ;;  %2895 = vmatprep.subr.mxu1 %v9593_v58  ;;  %11712 = vst [vmem:[#allocation72_spill] sm:$0xff] %v9599_v59  ;;  %11713 = vst [vmem:[#allocation73_spill] sm:$0xff] %v9605_v60  ;;  %v9611_v28 = vld [vmem:[%s10244_s4 + $0x368] sm:$0xff]  ;;  %v9617_v58 = vld [vmem:[%s10244_s4 + $0x378] sm:$0xff] }
 0x6fe   :  { %2825 = vmatpush2.msra.mxu0 %v9599_v59  ;;  %2896 = vmatpush2.msra.mxu1 %v9605_v60  ;;  %11714 = vst [vmem:[#allocation74_spill] sm:$0xff] %v9611_v28  ;;  %11715 = vst [vmem:[#allocation75_spill] sm:$0xff] %v9617_v58  ;;  %v9623_v59 = vld [vmem:[%s10244_s4 + $0x360] sm:$0xff]  ;;  %v9629_v60 = vld [vmem:[%s10244_s4 + $0x370] sm:$0xff] }
 0x6ff   :  { %2826 = vmatprep.subr.mxu0 %v9611_v28  ;;  %2897 = vmatprep.subr.mxu1 %v9617_v58  ;;  %11716 = vst [vmem:[#allocation76_spill] sm:$0xff] %v9623_v59  ;;  %11717 = vst [vmem:[#allocation77_spill] sm:$0xff] %v9629_v60  ;;  %v9635_v28 = vld [vmem:[%s10244_s4 + $0x348] sm:$0xff]  ;;  %v9641_v58 = vld [vmem:[%s10244_s4 + $0x358] sm:$0xff] }
 0x700   :  { %2827 = vmatpush2.msra.mxu0 %v9623_v59  ;;  %2898 = vmatpush2.msra.mxu1 %v9629_v60  ;;  %11718 = vst [vmem:[#allocation78_spill] sm:$0xff] %v9635_v28  ;;  %11719 = vst [vmem:[#allocation79_spill] sm:$0xff] %v9641_v58  ;;  %v9647_v59 = vld [vmem:[%s10244_s4 + $0x340] sm:$0xff]  ;;  %v9653_v60 = vld [vmem:[%s10244_s4 + $0x350] sm:$0xff] }
 0x701   :  { %2828 = vmatprep.subr.mxu0 %v9635_v28  ;;  %2899 = vmatprep.subr.mxu1 %v9641_v58  ;;  %11720 = vst [vmem:[#allocation80_spill] sm:$0xff] %v9647_v59  ;;  %11721 = vst [vmem:[#allocation81_spill] sm:$0xff] %v9653_v60  ;;  %v9659_v28 = vld [vmem:[%s10244_s4 + $0x328] sm:$0xff]  ;;  %v9665_v58 = vld [vmem:[%s10244_s4 + $0x338] sm:$0xff] }
 0x702   :  { %2829 = vmatpush2.msra.mxu0 %v9647_v59  ;;  %2900 = vmatpush2.msra.mxu1 %v9653_v60  ;;  %11722 = vst [vmem:[#allocation82_spill] sm:$0xff] %v9659_v28  ;;  %11723 = vst [vmem:[#allocation83_spill] sm:$0xff] %v9665_v58  ;;  %v9671_v59 = vld [vmem:[%s10244_s4 + $0x320] sm:$0xff]  ;;  %v9677_v60 = vld [vmem:[%s10244_s4 + $0x330] sm:$0xff] }
 0x703   :  { %2830 = vmatprep.subr.mxu0 %v9659_v28  ;;  %2901 = vmatprep.subr.mxu1 %v9665_v58  ;;  %11724 = vst [vmem:[#allocation84_spill] sm:$0xff] %v9671_v59  ;;  %11725 = vst [vmem:[#allocation85_spill] sm:$0xff] %v9677_v60  ;;  %v9683_v28 = vld [vmem:[%s10244_s4 + $0x308] sm:$0xff]  ;;  %v9689_v58 = vld [vmem:[%s10244_s4 + $0x318] sm:$0xff] }
 0x704   :  { %2831 = vmatpush2.msra.mxu0 %v9671_v59  ;;  %2902 = vmatpush2.msra.mxu1 %v9677_v60  ;;  %11726 = vst [vmem:[#allocation86_spill] sm:$0xff] %v9683_v28  ;;  %11727 = vst [vmem:[#allocation87_spill] sm:$0xff] %v9689_v58  ;;  %v9695_v59 = vld [vmem:[%s10244_s4 + $0x300] sm:$0xff]  ;;  %v9701_v60 = vld [vmem:[%s10244_s4 + $0x310] sm:$0xff] }
 0x705   :  { %2832 = vmatprep.subr.mxu0 %v9683_v28  ;;  %2903 = vmatprep.subr.mxu1 %v9689_v58  ;;  %11728 = vst [vmem:[#allocation88_spill] sm:$0xff] %v9695_v59  ;;  %11729 = vst [vmem:[#allocation89_spill] sm:$0xff] %v9701_v60  ;;  %v9707_v28 = vld [vmem:[%s10244_s4 + $0x2e8] sm:$0xff]  ;;  %v9713_v58 = vld [vmem:[%s10244_s4 + $0x2f8] sm:$0xff] }
 0x706   :  { %2833 = vmatpush2.msra.mxu0 %v9695_v59  ;;  %2904 = vmatpush2.msra.mxu1 %v9701_v60  ;;  %11730 = vst [vmem:[#allocation90_spill] sm:$0xff] %v9707_v28  ;;  %11731 = vst [vmem:[#allocation91_spill] sm:$0xff] %v9713_v58  ;;  %v9719_v59 = vld [vmem:[%s10244_s4 + $0x2e0] sm:$0xff]  ;;  %v9725_v60 = vld [vmem:[%s10244_s4 + $0x2f0] sm:$0xff] }
 0x707   :  { %2834 = vmatprep.subr.mxu0 %v9707_v28  ;;  %2905 = vmatprep.subr.mxu1 %v9713_v58  ;;  %11732 = vst [vmem:[#allocation92_spill] sm:$0xff] %v9719_v59  ;;  %11733 = vst [vmem:[#allocation93_spill] sm:$0xff] %v9725_v60  ;;  %v9731_v28 = vld [vmem:[%s10244_s4 + $0x2c8] sm:$0xff]  ;;  %v9737_v58 = vld [vmem:[%s10244_s4 + $0x2d8] sm:$0xff] }
 0x708   :  { %2835 = vmatpush2.msra.mxu0 %v9719_v59  ;;  %2906 = vmatpush2.msra.mxu1 %v9725_v60  ;;  %11734 = vst [vmem:[#allocation94_spill] sm:$0xff] %v9731_v28  ;;  %11735 = vst [vmem:[#allocation95_spill] sm:$0xff] %v9737_v58  ;;  %v9743_v59 = vld [vmem:[%s10244_s4 + $0x2c0] sm:$0xff]  ;;  %v9749_v60 = vld [vmem:[%s10244_s4 + $0x2d0] sm:$0xff] }
 0x709   :  { %2836 = vmatprep.subr.mxu0 %v9731_v28  ;;  %2907 = vmatprep.subr.mxu1 %v9737_v58  ;;  %11736 = vst [vmem:[#allocation96_spill] sm:$0xff] %v9743_v59  ;;  %11737 = vst [vmem:[#allocation97_spill] sm:$0xff] %v9749_v60  ;;  %v9755_v28 = vld [vmem:[%s10244_s4 + $0x2a8] sm:$0xff]  ;;  %v9761_v58 = vld [vmem:[%s10244_s4 + $0x2b8] sm:$0xff] }
 0x70a   :  { %2837 = vmatpush2.msra.mxu0 %v9743_v59  ;;  %2908 = vmatpush2.msra.mxu1 %v9749_v60  ;;  %11738 = vst [vmem:[#allocation98_spill] sm:$0xff] %v9755_v28  ;;  %11739 = vst [vmem:[#allocation99_spill] sm:$0xff] %v9761_v58  ;;  %v9767_v59 = vld [vmem:[%s10244_s4 + $0x2a0] sm:$0xff]  ;;  %v9773_v60 = vld [vmem:[%s10244_s4 + $0x2b0] sm:$0xff] }
 0x70b   :  { %2838 = vmatprep.subr.mxu0 %v9755_v28  ;;  %2909 = vmatprep.subr.mxu1 %v9761_v58  ;;  %11740 = vst [vmem:[#allocation100_spill] sm:$0xff] %v9767_v59  ;;  %11741 = vst [vmem:[#allocation101_spill] sm:$0xff] %v9773_v60  ;;  %v9779_v28 = vld [vmem:[%s10244_s4 + $0x288] sm:$0xff]  ;;  %v9785_v58 = vld [vmem:[%s10244_s4 + $0x298] sm:$0xff] }
 0x70c   :  { %2839 = vmatpush2.msra.mxu0 %v9767_v59  ;;  %2910 = vmatpush2.msra.mxu1 %v9773_v60  ;;  %11742 = vst [vmem:[#allocation102_spill] sm:$0xff] %v9779_v28  ;;  %11743 = vst [vmem:[#allocation103_spill] sm:$0xff] %v9785_v58  ;;  %v9791_v59 = vld [vmem:[%s10244_s4 + $0x280] sm:$0xff]  ;;  %v9797_v60 = vld [vmem:[%s10244_s4 + $0x290] sm:$0xff] }
 0x70d   :  { %2840 = vmatprep.subr.mxu0 %v9779_v28  ;;  %2911 = vmatprep.subr.mxu1 %v9785_v58  ;;  %11744 = vst [vmem:[#allocation104_spill] sm:$0xff] %v9791_v59  ;;  %11745 = vst [vmem:[#allocation105_spill] sm:$0xff] %v9797_v60  ;;  %v9803_v28 = vld [vmem:[%s10244_s4 + $0x268] sm:$0xff]  ;;  %v9809_v58 = vld [vmem:[%s10244_s4 + $0x278] sm:$0xff] }
 0x70e   :  { %2841 = vmatpush2.msra.mxu0 %v9791_v59  ;;  %2912 = vmatpush2.msra.mxu1 %v9797_v60  ;;  %11746 = vst [vmem:[#allocation106_spill] sm:$0xff] %v9803_v28  ;;  %11747 = vst [vmem:[#allocation107_spill] sm:$0xff] %v9809_v58  ;;  %v9815_v59 = vld [vmem:[%s10244_s4 + $0x260] sm:$0xff]  ;;  %v9821_v60 = vld [vmem:[%s10244_s4 + $0x270] sm:$0xff] }
 0x70f   :  { %2842 = vmatprep.subr.mxu0 %v9803_v28  ;;  %2913 = vmatprep.subr.mxu1 %v9809_v58  ;;  %11748 = vst [vmem:[#allocation108_spill] sm:$0xff] %v9815_v59  ;;  %11749 = vst [vmem:[#allocation109_spill] sm:$0xff] %v9821_v60  ;;  %v9827_v28 = vld [vmem:[%s10244_s4 + $0x248] sm:$0xff]  ;;  %v9833_v58 = vld [vmem:[%s10244_s4 + $0x258] sm:$0xff] }
 0x710   :  { %2843 = vmatpush2.msra.mxu0 %v9815_v59  ;;  %2914 = vmatpush2.msra.mxu1 %v9821_v60  ;;  %11750 = vst [vmem:[#allocation110_spill] sm:$0xff] %v9827_v28  ;;  %11751 = vst [vmem:[#allocation111_spill] sm:$0xff] %v9833_v58  ;;  %v9839_v59 = vld [vmem:[%s10244_s4 + $0x240] sm:$0xff]  ;;  %v9845_v60 = vld [vmem:[%s10244_s4 + $0x250] sm:$0xff] }
 0x711   :  { %2844 = vmatprep.subr.mxu0 %v9827_v28  ;;  %2915 = vmatprep.subr.mxu1 %v9833_v58  ;;  %11752 = vst [vmem:[#allocation112_spill] sm:$0xff] %v9839_v59  ;;  %11753 = vst [vmem:[#allocation113_spill] sm:$0xff] %v9845_v60  ;;  %v9851_v28 = vld [vmem:[%s10244_s4 + $0x228] sm:$0xff]  ;;  %v9857_v58 = vld [vmem:[%s10244_s4 + $0x238] sm:$0xff] }
 0x712   :  { %2845 = vmatpush2.msra.mxu0 %v9839_v59  ;;  %2916 = vmatpush2.msra.mxu1 %v9845_v60  ;;  %11754 = vst [vmem:[#allocation114_spill] sm:$0xff] %v9851_v28  ;;  %11755 = vst [vmem:[#allocation115_spill] sm:$0xff] %v9857_v58  ;;  %v9863_v59 = vld [vmem:[%s10244_s4 + $0x220] sm:$0xff]  ;;  %v9869_v60 = vld [vmem:[%s10244_s4 + $0x230] sm:$0xff] }
 0x713   :  { %2846 = vmatprep.subr.mxu0 %v9851_v28  ;;  %2917 = vmatprep.subr.mxu1 %v9857_v58  ;;  %11756 = vst [vmem:[#allocation116_spill] sm:$0xff] %v9863_v59  ;;  %11757 = vst [vmem:[#allocation117_spill] sm:$0xff] %v9869_v60  ;;  %v9875_v28 = vld [vmem:[%s10244_s4 + $0x208] sm:$0xff]  ;;  %v9881_v58 = vld [vmem:[%s10244_s4 + $0x218] sm:$0xff] }
 0x714   :  { %2847 = vmatpush2.msra.mxu0 %v9863_v59  ;;  %2918 = vmatpush2.msra.mxu1 %v9869_v60  ;;  %11758 = vst [vmem:[#allocation118_spill] sm:$0xff] %v9875_v28  ;;  %11759 = vst [vmem:[#allocation119_spill] sm:$0xff] %v9881_v58  ;;  %v9887_v59 = vld [vmem:[%s10244_s4 + $0x200] sm:$0xff]  ;;  %v9893_v60 = vld [vmem:[%s10244_s4 + $0x210] sm:$0xff] }
 0x715   :  { %2848 = vmatprep.subr.mxu0 %v9875_v28  ;;  %2919 = vmatprep.subr.mxu1 %v9881_v58  ;;  %11760 = vst [vmem:[#allocation120_spill] sm:$0xff] %v9887_v59  ;;  %11761 = vst [vmem:[#allocation121_spill] sm:$0xff] %v9893_v60 }
 0x716   :  { %2849 = vmatpush2.msra.mxu0 %v9887_v59  ;;  %2920 = vmatpush2.msra.mxu1 %v9893_v60 }
 0x717   :  { %2956 = vmatprep.subr.mxu0 %v8823_v55  ;;  %3027 = vmatprep.subr.mxu1 %v8829_v14 }
 0x775   :  { %v2512_v28 = vpop.f32.mrf.mxu0  ;;  %v2583_v59 = vpop.f32.mrf.mxu1 }
 0x776   :  { %v2513_v58 = vadd.f32 %v2512_v28, %v11624_v5  ;;  %v2584_v55 = vadd.f32 %v2583_v59, %v11627_v46 }
 0x777   :  { %v2514_v54 = vpop.f32.mrf.mxu0  ;;  %v2585_v57 = vpop.f32.mrf.mxu1 }
 0x778   :  { %v3439_v49 = vmul.f32 -1.442695, %v2513_v58  ;;  %v2515_v48 = vadd.f32 %v2514_v54, %v11625_v12  ;;  %v2586_v9 = vadd.f32 %v2585_v57, %v11626_v6  ;;  %v11762_v12 = vld [vmem:[#allocation152_spill] sm:$0xff] }
 0x77a   :  { %3685 = vpow2.f32 %v3439_v49  ;;  %v3440_v47 = vmul.f32 -1.442695, %v2515_v48  ;;  %v3441_v7 = vmul.f32 -1.442695, %v2586_v9  ;;  %v11763_v9 = vld [vmem:[#allocation154_spill] sm:$0xff] }
 0x77c   :  { %3687 = vpow2.f32 %v3440_v47 }
 0x77d   :  { %3689 = vpow2.f32 %v3441_v7 }
 0x787   :  { %v3686_v60 = vpop.eup %3685 }
 0x788   :  { %v2591_v22 = vadd.f32 1.0, %v3686_v60 }
 0x789   :  { %v3688_v14 = vpop.eup %3687 }
 0x78a   :  { %3691 = vrcp.f32 %v2591_v22  ;;  %v2597_v28 = vadd.f32 1.0, %v3688_v14  ;;  %v3690_v58 = vpop.eup %3689 }
 0x78b   :  { %3693 = vtanh.f32 %v2584_v55  ;;  %v2604_v60 = vadd.f32 1.0, %v3690_v58 }
 0x78c   :  { %3695 = vrcp.f32 %v2597_v28 }
 0x796   :  { %v2682_v54 = vpop.f32.mrf.mxu0  ;;  %v2753_v22 = vpop.f32.mrf.mxu1 }
 0x797   :  { %v3692_v49 = vpop.eup %3691  ;;  %v2758_v48 = vadd.f32 %v2682_v54, %v11762_v12  ;;  %v11764_v12 = vld [vmem:[#allocation155_spill] sm:$0xff]  ;;  %v11765_v54 = vld [vmem:[#allocation153_spill] sm:$0xff] }
 0x798   :  { %v3694_v47 = vpop.eup %3693  ;;  %v2684_v5 = vpop.f32.mrf.mxu0 }
 0x799   :  { %v3696_v21 = vpop.eup %3695  ;;  %v3442_v57 = vmul.f32 -1.442695, %v2758_v48  ;;  %v2759_v6 = vadd.f32 %v2684_v5, %v11763_v9  ;;  %v2608_v10 = vmul.f32 %v3694_v47, %v3692_v49  ;;  %v2755_v14 = vpop.f32.mrf.mxu1  ;;  %v2760_v48 = vadd.f32 %v2753_v22, %v11765_v54  ;;  %v4341_v54 = vld [vmem:[%s10243_s2 + $0x1e0] sm:$0xff] }
 0x79a   :  { %v2607_v59 = vmul.f32 %v3696_v21, %v8839_v27  ;;  %v2761_v28 = vadd.f32 %v2755_v14, %v11764_v12 }
 0x79b   :  { %3697 = vpow2.f32 %v3442_v57  ;;  %v3443_v7 = vmul.f32 -1.442695, %v2759_v6 }
 0x79c   :  { %v9905_v55 = vadd.f32 %v2608_v10, %v2607_v59  ;;  %v3444_v46 = vmul.f32 -1.442695, %v2761_v28 }
 0x79d   :  { %3699 = vpow2.f32 %v3443_v7 }
 0x79e   :  { %3701 = vrcp.f32 %v2604_v60 }
 0x79f   :  { %3703 = vtanh.f32 %v9905_v55 }
 0x7a0   :  { %3705 = vtanh.f32 %v2760_v48  ;;  %v4343_v48 = vld [vmem:[%s10243_s2 + $0x1c8] sm:$0xff] }
 0x7a1   :  { %3707 = vpow2.f32 %v3444_v46 }
 0x7a8   :  { %v3698_v5 = vpop.eup %3697 }
 0x7a9   :  { %v2765_v49 = vadd.f32 1.0, %v3698_v5  ;;  %v4344_v5 = vld [vmem:[%s10243_s2 + $0x1d8] sm:$0xff] }
 0x7aa   :  { %v3700_v27 = vpop.eup %3699 }
 0x7ab   :  { %v3702_v21 = vpop.eup %3701  ;;  %3709 = vrcp.f32 %v2765_v49  ;;  %v2771_v6 = vadd.f32 1.0, %v3700_v27  ;;  %v4345_v49 = vld [vmem:[%s10243_s2 + $0x1c0] sm:$0xff]  ;;  %v4346_v27 = vld [vmem:[%s10243_s2 + $0x1d0] sm:$0xff] }
 0x7ac   :  { %v3704_v10 = vpop.eup %3703 }
 0x7ad   :  { %3711 = vrcp.f32 %v2771_v6  ;;  %v2611_v58 = vmul.f32 %v3704_v10, %v3702_v21  ;;  %v3706_v47 = vpop.eup %3705  ;;  %v4347_v21 = vld [vmem:[%s10243_s2 + $0x1a8] sm:$0xff]  ;;  %v4348_v6 = vld [vmem:[%s10243_s2 + $0x1b8] sm:$0xff]  ;;  %v4349_v10 = vld [vmem:[%s10243_s2 + $0x1a0] sm:$0xff] }
 0x7ae   :  { %v3708_v57 = vpop.eup %3707 }
 0x7af   :  { %2850 = vmatprep.mubr.f32.mxu0 %v2611_v58  ;;  %2921 = vmatprep.mubr.f32.mxu1 %v2611_v58  ;;  %v2778_v22 = vadd.f32 1.0, %v3708_v57  ;;  %v4350_v58 = vld [vmem:[%s10243_s2 + $0x1b0] sm:$0xff]  ;;  %v4352_v57 = vld [vmem:[%s10243_s2 + $0x198] sm:$0xff] }
 0x7b1   :  { %3713 = vrcp.f32 %v2778_v22  ;;  %v4356_v22 = vld [vmem:[%s10243_s2 + $0x178] sm:$0xff] }
 0x7b8   :  { %v3710_v9 = vpop.eup %3709 }
 0x7b9   :  { %v2782_v59 = vmul.f32 %v3710_v9, %v3706_v47  ;;  %v4351_v47 = vld [vmem:[%s10243_s2 + $0x188] sm:$0xff]  ;;  %v4353_v9 = vld [vmem:[%s10243_s2 + $0x180] sm:$0xff] }
 0x7ba   :  { %v3712_v60 = vpop.eup %3711 }
 0x7bb   :  { %v2781_v7 = vmul.f32 %v3712_v60, %v8845_v56  ;;  %v4342_v56 = vld [vmem:[%s10243_s2 + $0x1f0] sm:$0xff]  ;;  %v4355_v60 = vld [vmem:[%s10243_s2 + $0x168] sm:$0xff] }
 0x7bd   :  { %v9911_v14 = vadd.f32 %v2782_v59, %v2781_v7  ;;  %v4354_v59 = vld [vmem:[%s10243_s2 + $0x190] sm:$0xff]  ;;  %v4357_v7 = vld [vmem:[%s10243_s2 + $0x160] sm:$0xff] }
 0x7be   :  { %v3714_v46 = vpop.eup %3713 }
 0x7bf   :  { %3715 = vtanh.f32 %v9911_v14 }
 0x7cc   :  { %v3716_v12 = vpop.eup %3715 }
 0x7cd   :  { %v9914_v28 = vmul.f32 %v3716_v12, %v3714_v46  ;;  %v4358_v46 = vld [vmem:[%s10243_s2 + $0x170] sm:$0xff]  ;;  %v4359_v12 = vld [vmem:[%s10243_s2 + $0x148] sm:$0xff] }
 0x7cf   :  { %2851 = vmatmul.mubr.f32.vlgmr.msra.gmra.mxu0 %v9914_v28  ;;  %2922 = vmatmul.mubr.f32.vlgmr.msra.gmra.mxu1 %v9914_v28 }
 0x7d0   :  { %2957 = vmatpush1.msra.mxu0 %v4341_v54  ;;  %3028 = vmatpush1.msra.mxu1 %v4342_v56  ;;  %v4360_v54 = vld [vmem:[%s10243_s2 + $0x158] sm:$0xff]  ;;  %v11808_v56 = vld [vmem:[#allocation35_spill] sm:$0xff] }
 0x7d1   :  { %2958 = vmatprep.subr.mxu0 %v4343_v48  ;;  %3029 = vmatprep.subr.mxu1 %v4344_v5  ;;  %v11809_v48 = vld [vmem:[#allocation36_spill] sm:$0xff]  ;;  %v11810_v5 = vld [vmem:[#allocation37_spill] sm:$0xff] }
 0x7d2   :  { %2959 = vmatpush1.msra.mxu0 %v4345_v49  ;;  %3030 = vmatpush1.msra.mxu1 %v4346_v27  ;;  %v11811_v49 = vld [vmem:[#allocation38_spill] sm:$0xff]  ;;  %v11812_v27 = vld [vmem:[#allocation39_spill] sm:$0xff] }
 0x7d3   :  { %2960 = vmatprep.subr.mxu0 %v4347_v21  ;;  %3031 = vmatprep.subr.mxu1 %v4348_v6  ;;  %v11813_v21 = vld [vmem:[#allocation40_spill] sm:$0xff]  ;;  %v11814_v6 = vld [vmem:[#allocation41_spill] sm:$0xff] }
 0x7d4   :  { %2961 = vmatpush1.msra.mxu0 %v4349_v10  ;;  %3032 = vmatpush1.msra.mxu1 %v4350_v58  ;;  %v11815_v10 = vld [vmem:[#allocation42_spill] sm:$0xff]  ;;  %v11816_v58 = vld [vmem:[#allocation43_spill] sm:$0xff] }
 0x7d5   :  { %2962 = vmatprep.subr.mxu0 %v4351_v47  ;;  %3033 = vmatprep.subr.mxu1 %v4352_v57  ;;  %v11817_v47 = vld [vmem:[#allocation44_spill] sm:$0xff]  ;;  %v11818_v57 = vld [vmem:[#allocation45_spill] sm:$0xff] }
 0x7d6   :  { %2963 = vmatpush1.msra.mxu0 %v4353_v9  ;;  %3034 = vmatpush1.msra.mxu1 %v4354_v59  ;;  %v11819_v9 = vld [vmem:[#allocation46_spill] sm:$0xff]  ;;  %v11820_v59 = vld [vmem:[#allocation47_spill] sm:$0xff] }
 0x7d7   :  { %2964 = vmatprep.subr.mxu0 %v4355_v60  ;;  %3035 = vmatprep.subr.mxu1 %v4356_v22  ;;  %v11821_v60 = vld [vmem:[#allocation48_spill] sm:$0xff]  ;;  %v11822_v22 = vld [vmem:[#allocation49_spill] sm:$0xff] }
 0x7d8   :  { %2965 = vmatpush1.msra.mxu0 %v4357_v7  ;;  %3036 = vmatpush1.msra.mxu1 %v4358_v46  ;;  %v11823_v7 = vld [vmem:[#allocation50_spill] sm:$0xff]  ;;  %v11824_v46 = vld [vmem:[#allocation51_spill] sm:$0xff] }
 0x7d9   :  { %2966 = vmatprep.subr.mxu0 %v4359_v12  ;;  %3037 = vmatprep.subr.mxu1 %v4360_v54  ;;  %v11825_v12 = vld [vmem:[#allocation52_spill] sm:$0xff]  ;;  %v11826_v54 = vld [vmem:[#allocation53_spill] sm:$0xff] }
 0x7da   :  { %2967 = vmatpush1.msra.mxu0 %v8875_v25  ;;  %3038 = vmatpush1.msra.mxu1 %v8881_v26  ;;  %v11766_v25 = vld [vmem:[#allocation135_spill] sm:$0xff]  ;;  %v11767_v26 = vld [vmem:[#allocation133_spill] sm:$0xff] }
 0x7db   :  { %2968 = vmatprep.subr.mxu0 %v8887_v24  ;;  %3039 = vmatprep.subr.mxu1 %v8893_v37  ;;  %v11768_v24 = vld [vmem:[#allocation140_spill] sm:$0xff]  ;;  %v11769_v37 = vld [vmem:[#allocation142_spill] sm:$0xff] }
 0x7dc   :  { %2969 = vmatpush1.msra.mxu0 %v8899_v3  ;;  %3040 = vmatpush1.msra.mxu1 %v8905_v1  ;;  %v11770_v3 = vld [vmem:[#allocation143_spill] sm:$0xff]  ;;  %v11771_v1 = vld [vmem:[#allocation141_spill] sm:$0xff] }
 0x7dd   :  { %2970 = vmatprep.subr.mxu0 %v8911_v32  ;;  %3041 = vmatprep.subr.mxu1 %v8917_v31  ;;  %v11772_v32 = vld [vmem:[#allocation136_spill] sm:$0xff] }
 0x7de   :  { %2971 = vmatpush1.msra.mxu0 %v8923_v33  ;;  %3042 = vmatpush1.msra.mxu1 %v8929_v41  ;;  %v11773_v31 = vld [vmem:[#allocation144_spill] sm:$0xff]  ;;  %v11774_v33 = vld [vmem:[#allocation146_spill] sm:$0xff]  ;;  %v11775_v41 = vld [vmem:[#allocation147_spill] sm:$0xff] }
 0x7df   :  { %2972 = vmatprep.subr.mxu0 %v8935_v38  ;;  %3043 = vmatprep.subr.mxu1 %v8941_v18  ;;  %v11776_v38 = vld [vmem:[#allocation145_spill] sm:$0xff]  ;;  %v11777_v18 = vld [vmem:[#allocation138_spill] sm:$0xff] }
 0x7e0   :  { %2973 = vmatpush1.msra.mxu0 %v8947_v34  ;;  %3044 = vmatpush1.msra.mxu1 %v8953_v43  ;;  %v11778_v34 = vld [vmem:[#allocation139_spill] sm:$0xff]  ;;  %v11779_v43 = vld [vmem:[#allocation137_spill] sm:$0xff] }
 0x7e1   :  { %2974 = vmatprep.subr.mxu0 %v8959_v45  ;;  %3045 = vmatprep.subr.mxu1 %v8965_v53  ;;  %v11780_v45 = vld [vmem:[#allocation7_spill] sm:$0xff]  ;;  %v11781_v53 = vld [vmem:[#allocation8_spill] sm:$0xff] }
 0x7e2   :  { %2975 = vmatpush1.msra.mxu0 %v8971_v8  ;;  %3046 = vmatpush1.msra.mxu1 %v8977_v30  ;;  %v11782_v8 = vld [vmem:[#allocation9_spill] sm:$0xff]  ;;  %v11783_v30 = vld [vmem:[#allocation10_spill] sm:$0xff] }
 0x7e3   :  { %2976 = vmatprep.subr.mxu0 %v8983_v62  ;;  %3047 = vmatprep.subr.mxu1 %v8989_v61  ;;  %v11784_v62 = vld [vmem:[#allocation11_spill] sm:$0xff]  ;;  %v11785_v61 = vld [vmem:[#allocation12_spill] sm:$0xff] }
 0x7e4   :  { %2977 = vmatpush1.msra.mxu0 %v8995_v63  ;;  %3048 = vmatpush1.msra.mxu1 %v9001_v0  ;;  %v11786_v63 = vld [vmem:[#allocation13_spill] sm:$0xff]  ;;  %v11787_v0 = vld [vmem:[#allocation14_spill] sm:$0xff] }
 0x7e5   :  { %2978 = vmatprep.subr.mxu0 %v9007_v23  ;;  %3049 = vmatprep.subr.mxu1 %v9013_v19  ;;  %v11788_v23 = vld [vmem:[#allocation15_spill] sm:$0xff]  ;;  %v11789_v19 = vld [vmem:[#allocation16_spill] sm:$0xff] }
 0x7e6   :  { %2979 = vmatpush1.msra.mxu0 %v9019_v17  ;;  %3050 = vmatpush1.msra.mxu1 %v9025_v36  ;;  %v11790_v17 = vld [vmem:[#allocation17_spill] sm:$0xff]  ;;  %v11791_v36 = vld [vmem:[#allocation18_spill] sm:$0xff] }
 0x7e7   :  { %2980 = vmatprep.subr.mxu0 %v9031_v44  ;;  %3051 = vmatprep.subr.mxu1 %v9037_v39  ;;  %v11792_v44 = vld [vmem:[#allocation19_spill] sm:$0xff]  ;;  %v11793_v39 = vld [vmem:[#allocation20_spill] sm:$0xff] }
 0x7e8   :  { %2981 = vmatpush1.msra.mxu0 %v9043_v40  ;;  %3052 = vmatpush1.msra.mxu1 %v9049_v35  ;;  %v11794_v40 = vld [vmem:[#allocation21_spill] sm:$0xff]  ;;  %v11795_v35 = vld [vmem:[#allocation22_spill] sm:$0xff] }
 0x7e9   :  { %2982 = vmatprep.subr.mxu0 %v9055_v50  ;;  %3053 = vmatprep.subr.mxu1 %v9061_v51  ;;  %v11796_v50 = vld [vmem:[#allocation23_spill] sm:$0xff]  ;;  %v11797_v51 = vld [vmem:[#allocation24_spill] sm:$0xff] }
 0x7ea   :  { %2983 = vmatpush1.msra.mxu0 %v9067_v15  ;;  %3054 = vmatpush1.msra.mxu1 %v9073_v20  ;;  %v11798_v15 = vld [vmem:[#allocation25_spill] sm:$0xff]  ;;  %v11799_v20 = vld [vmem:[#allocation26_spill] sm:$0xff] }
 0x7eb   :  { %2984 = vmatprep.subr.mxu0 %v9079_v13  ;;  %3055 = vmatprep.subr.mxu1 %v9085_v52  ;;  %v11800_v13 = vld [vmem:[#allocation27_spill] sm:$0xff]  ;;  %v11801_v52 = vld [vmem:[#allocation28_spill] sm:$0xff] }
 0x7ec   :  { %2985 = vmatpush1.msra.mxu0 %v9091_v4  ;;  %3056 = vmatpush1.msra.mxu1 %v9097_v2  ;;  %v11802_v4 = vld [vmem:[#allocation29_spill] sm:$0xff]  ;;  %v11803_v2 = vld [vmem:[#allocation30_spill] sm:$0xff] }
 0x7ed   :  { %2986 = vmatprep.subr.mxu0 %v9103_v16  ;;  %3057 = vmatprep.subr.mxu1 %v9109_v29  ;;  %v11804_v16 = vld [vmem:[#allocation31_spill] sm:$0xff]  ;;  %v11805_v29 = vld [vmem:[#allocation32_spill] sm:$0xff] }
 0x7ee   :  { %2987 = vmatpush1.msra.mxu0 %v9115_v11  ;;  %3020 = vmatprep.mubr.f32.mxu0 %v10947_v42  ;;  %v11806_v11 = vld [vmem:[#allocation33_spill] sm:$0xff] }
 0x7ef   :  { %3058 = vmatpush1.msra.mxu1 %v11766_v25  ;;  %3091 = vmatprep.mubr.f32.mxu1 %v10947_v42  ;;  %v11827_v25 = vld [vmem:[#allocation54_spill] sm:$0xff] }
 0x7f0   :  { %3021 = vmatmul.mubr.f32.vlgmr.msra.gmra.mxu0 %v9914_v28  ;;  %3092 = vmatmul.mubr.f32.vlgmr.msra.gmra.mxu1 %v9914_v28  ;;  %v11807_v28 = vld [vmem:[#allocation34_spill] sm:$0xff] }
 0x7f1   :  { %3126 = vmatprep.subr.mxu0 %v11767_v26  ;;  %3197 = vmatprep.subr.mxu1 %v11768_v24  ;;  %v11828_v26 = vld [vmem:[#allocation55_spill] sm:$0xff]  ;;  %v11829_v24 = vld [vmem:[#allocation56_spill] sm:$0xff] }
 0x7f2   :  { %3127 = vmatpush1.msra.mxu0 %v11769_v37  ;;  %3198 = vmatpush1.msra.mxu1 %v11770_v3  ;;  %v11830_v37 = vld [vmem:[#allocation57_spill] sm:$0xff]  ;;  %v11831_v3 = vld [vmem:[#allocation58_spill] sm:$0xff] }
 0x7f3   :  { %3128 = vmatprep.subr.mxu0 %v11771_v1  ;;  %3199 = vmatprep.subr.mxu1 %v11772_v32  ;;  %v11832_v1 = vld [vmem:[#allocation59_spill] sm:$0xff]  ;;  %v11833_v32 = vld [vmem:[#allocation60_spill] sm:$0xff] }
 0x7f4   :  { %3129 = vmatpush1.msra.mxu0 %v11773_v31  ;;  %3200 = vmatpush1.msra.mxu1 %v11774_v33  ;;  %v11834_v31 = vld [vmem:[#allocation61_spill] sm:$0xff]  ;;  %v11835_v33 = vld [vmem:[#allocation62_spill] sm:$0xff] }
 0x7f5   :  { %3130 = vmatprep.subr.mxu0 %v11775_v41  ;;  %3201 = vmatprep.subr.mxu1 %v11776_v38  ;;  %v11836_v41 = vld [vmem:[#allocation63_spill] sm:$0xff]  ;;  %v11837_v38 = vld [vmem:[#allocation64_spill] sm:$0xff] }
 0x7f6   :  { %3131 = vmatpush1.msra.mxu0 %v11777_v18  ;;  %3202 = vmatpush1.msra.mxu1 %v11778_v34  ;;  %v11838_v18 = vld [vmem:[#allocation65_spill] sm:$0xff]  ;;  %v11839_v34 = vld [vmem:[#allocation66_spill] sm:$0xff] }
 0x7f7   :  { %3132 = vmatprep.subr.mxu0 %v11779_v43  ;;  %3203 = vmatprep.subr.mxu1 %v11780_v45  ;;  %v11840_v43 = vld [vmem:[#allocation67_spill] sm:$0xff]  ;;  %v11841_v45 = vld [vmem:[#allocation68_spill] sm:$0xff] }
 0x7f8   :  { %3133 = vmatpush1.msra.mxu0 %v11781_v53  ;;  %3204 = vmatpush1.msra.mxu1 %v11782_v8  ;;  %v11842_v53 = vld [vmem:[#allocation69_spill] sm:$0xff]  ;;  %v11843_v8 = vld [vmem:[#allocation70_spill] sm:$0xff] }
 0x7f9   :  { %3134 = vmatprep.subr.mxu0 %v11783_v30  ;;  %3205 = vmatprep.subr.mxu1 %v11784_v62  ;;  %v11844_v30 = vld [vmem:[#allocation71_spill] sm:$0xff]  ;;  %v11845_v62 = vld [vmem:[#allocation72_spill] sm:$0xff] }
 0x7fa   :  { %3135 = vmatpush1.msra.mxu0 %v11785_v61  ;;  %3206 = vmatpush1.msra.mxu1 %v11786_v63  ;;  %v11846_v61 = vld [vmem:[#allocation73_spill] sm:$0xff]  ;;  %v11847_v63 = vld [vmem:[#allocation74_spill] sm:$0xff] }
 0x7fb   :  { %3136 = vmatprep.subr.mxu0 %v11787_v0  ;;  %3207 = vmatprep.subr.mxu1 %v11788_v23  ;;  %v11848_v0 = vld [vmem:[#allocation75_spill] sm:$0xff]  ;;  %v11849_v23 = vld [vmem:[#allocation76_spill] sm:$0xff] }
 0x7fc   :  { %3137 = vmatpush1.msra.mxu0 %v11789_v19  ;;  %3208 = vmatpush1.msra.mxu1 %v11790_v17  ;;  %v11850_v19 = vld [vmem:[#allocation77_spill] sm:$0xff]  ;;  %v11851_v17 = vld [vmem:[#allocation78_spill] sm:$0xff] }
 0x7fd   :  { %3138 = vmatprep.subr.mxu0 %v11791_v36  ;;  %3209 = vmatprep.subr.mxu1 %v11792_v44  ;;  %v11852_v36 = vld [vmem:[#allocation79_spill] sm:$0xff]  ;;  %v11853_v44 = vld [vmem:[#allocation80_spill] sm:$0xff] }
 0x7fe   :  { %3139 = vmatpush1.msra.mxu0 %v11793_v39  ;;  %3210 = vmatpush1.msra.mxu1 %v11794_v40  ;;  %v11854_v39 = vld [vmem:[#allocation81_spill] sm:$0xff]  ;;  %v11855_v40 = vld [vmem:[#allocation82_spill] sm:$0xff] }
 0x7ff   :  { %3140 = vmatprep.subr.mxu0 %v11795_v35  ;;  %3211 = vmatprep.subr.mxu1 %v11796_v50  ;;  %v11856_v35 = vld [vmem:[#allocation83_spill] sm:$0xff]  ;;  %v11857_v50 = vld [vmem:[#allocation84_spill] sm:$0xff] }
 0x800   :  { %3141 = vmatpush1.msra.mxu0 %v11797_v51  ;;  %3212 = vmatpush1.msra.mxu1 %v11798_v15  ;;  %v11858_v51 = vld [vmem:[#allocation85_spill] sm:$0xff]  ;;  %v11859_v15 = vld [vmem:[#allocation86_spill] sm:$0xff] }
 0x801   :  { %3142 = vmatprep.subr.mxu0 %v11799_v20  ;;  %3213 = vmatprep.subr.mxu1 %v11800_v13  ;;  %v11860_v20 = vld [vmem:[#allocation87_spill] sm:$0xff]  ;;  %v11861_v13 = vld [vmem:[#allocation88_spill] sm:$0xff] }
 0x802   :  { %3143 = vmatpush1.msra.mxu0 %v11801_v52  ;;  %3214 = vmatpush1.msra.mxu1 %v11802_v4  ;;  %v11862_v52 = vld [vmem:[#allocation89_spill] sm:$0xff]  ;;  %v11863_v4 = vld [vmem:[#allocation90_spill] sm:$0xff] }
 0x803   :  { %3144 = vmatprep.subr.mxu0 %v11803_v2  ;;  %3215 = vmatprep.subr.mxu1 %v11804_v16  ;;  %v11864_v2 = vld [vmem:[#allocation91_spill] sm:$0xff]  ;;  %v11865_v16 = vld [vmem:[#allocation92_spill] sm:$0xff] }
 0x804   :  { %3145 = vmatpush1.msra.mxu0 %v11805_v29  ;;  %3216 = vmatpush1.msra.mxu1 %v11806_v11  ;;  %v11866_v29 = vld [vmem:[#allocation93_spill] sm:$0xff]  ;;  %v11867_v11 = vld [vmem:[#allocation94_spill] sm:$0xff] }
 0x805   :  { %3146 = vmatprep.subr.mxu0 %v11807_v28  ;;  %3217 = vmatprep.subr.mxu1 %v11808_v56  ;;  %v11868_v28 = vld [vmem:[#allocation95_spill] sm:$0xff]  ;;  %v11869_v56 = vld [vmem:[#allocation96_spill] sm:$0xff] }
 0x806   :  { %3147 = vmatpush1.msra.mxu0 %v11809_v48  ;;  %3218 = vmatpush1.msra.mxu1 %v11810_v5  ;;  %v11870_v48 = vld [vmem:[#allocation97_spill] sm:$0xff]  ;;  %v11871_v5 = vld [vmem:[#allocation98_spill] sm:$0xff] }
 0x807   :  { %3148 = vmatprep.subr.mxu0 %v11811_v49  ;;  %3219 = vmatprep.subr.mxu1 %v11812_v27  ;;  %v11872_v49 = vld [vmem:[#allocation99_spill] sm:$0xff]  ;;  %v11873_v27 = vld [vmem:[#allocation100_spill] sm:$0xff] }
 0x808   :  { %3149 = vmatpush1.msra.mxu0 %v11813_v21  ;;  %3220 = vmatpush1.msra.mxu1 %v11814_v6  ;;  %v11874_v21 = vld [vmem:[#allocation101_spill] sm:$0xff]  ;;  %v11875_v6 = vld [vmem:[#allocation102_spill] sm:$0xff] }
 0x809   :  { %3150 = vmatprep.subr.mxu0 %v11815_v10  ;;  %3221 = vmatprep.subr.mxu1 %v11816_v58  ;;  %v11876_v10 = vld [vmem:[#allocation103_spill] sm:$0xff]  ;;  %v11877_v58 = vld [vmem:[#allocation104_spill] sm:$0xff] }
 0x80a   :  { %3151 = vmatpush1.msra.mxu0 %v11817_v47  ;;  %3222 = vmatpush1.msra.mxu1 %v11818_v57  ;;  %v11878_v47 = vld [vmem:[#allocation105_spill] sm:$0xff]  ;;  %v11879_v57 = vld [vmem:[#allocation106_spill] sm:$0xff] }
 0x80b   :  { %3152 = vmatprep.subr.mxu0 %v11819_v9  ;;  %3223 = vmatprep.subr.mxu1 %v11820_v59  ;;  %v11880_v9 = vld [vmem:[#allocation107_spill] sm:$0xff]  ;;  %v11881_v59 = vld [vmem:[#allocation108_spill] sm:$0xff] }
 0x80c   :  { %3153 = vmatpush1.msra.mxu0 %v11821_v60  ;;  %3224 = vmatpush1.msra.mxu1 %v11822_v22  ;;  %v11882_v60 = vld [vmem:[#allocation109_spill] sm:$0xff]  ;;  %v11883_v22 = vld [vmem:[#allocation110_spill] sm:$0xff] }
 0x80d   :  { %3154 = vmatprep.subr.mxu0 %v11823_v7  ;;  %3225 = vmatprep.subr.mxu1 %v11824_v46  ;;  %v11884_v7 = vld [vmem:[#allocation111_spill] sm:$0xff]  ;;  %v11885_v46 = vld [vmem:[#allocation112_spill] sm:$0xff] }
 0x80e   :  { %3155 = vmatpush1.msra.mxu0 %v11825_v12  ;;  %3226 = vmatpush1.msra.mxu1 %v11826_v54  ;;  %v11886_v12 = vld [vmem:[#allocation113_spill] sm:$0xff]  ;;  %v11887_v54 = vld [vmem:[#allocation114_spill] sm:$0xff] }
 0x80f   :  { %3156 = vmatprep.subr.mxu0 %v11827_v25  ;;  %3227 = vmatprep.subr.mxu1 %v11828_v26  ;;  %v11888_v25 = vld [vmem:[#allocation115_spill] sm:$0xff]  ;;  %v11889_v26 = vld [vmem:[#allocation116_spill] sm:$0xff] }
 0x810   :  { %3157 = vmatpush1.msra.mxu0 %v11829_v24  ;;  %3228 = vmatpush1.msra.mxu1 %v11830_v37  ;;  %v11890_v24 = vld [vmem:[#allocation117_spill] sm:$0xff]  ;;  %v11891_v37 = vld [vmem:[#allocation118_spill] sm:$0xff] }
 0x811   :  { %3158 = vmatprep.subr.mxu0 %v11831_v3  ;;  %3229 = vmatprep.subr.mxu1 %v11832_v1  ;;  %v11892_v3 = vld [vmem:[#allocation119_spill] sm:$0xff]  ;;  %v11893_v1 = vld [vmem:[#allocation120_spill] sm:$0xff] }
 0x812   :  { %3159 = vmatpush2.msra.mxu0 %v11833_v32  ;;  %3230 = vmatpush2.msra.mxu1 %v11834_v31  ;;  %v11894_v32 = vld [vmem:[#allocation121_spill] sm:$0xff] }
 0x813   :  { %3160 = vmatprep.subr.mxu0 %v11835_v33  ;;  %3231 = vmatprep.subr.mxu1 %v11836_v41  ;;  %v11895_v33 = vld [vmem:[#allocation3_spill] sm:$0xff] }
 0x814   :  { %3161 = vmatpush2.msra.mxu0 %v11837_v38  ;;  %3232 = vmatpush2.msra.mxu1 %v11838_v18 }
 0x815   :  { %3162 = vmatprep.subr.mxu0 %v11839_v34  ;;  %3233 = vmatprep.subr.mxu1 %v11840_v43  ;;  %v11896_v34 = vld [vmem:[#allocation4_spill] sm:$0xff] }
 0x816   :  { %3163 = vmatpush2.msra.mxu0 %v11841_v45  ;;  %3234 = vmatpush2.msra.mxu1 %v11842_v53 }
 0x817   :  { %3164 = vmatprep.subr.mxu0 %v11843_v8  ;;  %3235 = vmatprep.subr.mxu1 %v11844_v30  ;;  %v11897_v30 = vld [vmem:[#allocation5_spill] sm:$0xff] }
 0x818   :  { %3165 = vmatpush2.msra.mxu0 %v11845_v62  ;;  %3236 = vmatpush2.msra.mxu1 %v11846_v61 }
 0x819   :  { %3166 = vmatprep.subr.mxu0 %v11847_v63  ;;  %3237 = vmatprep.subr.mxu1 %v11848_v0  ;;  %v11898_v0 = vld [vmem:[#allocation6_spill] sm:$0xff] }
 0x81a   :  { %3167 = vmatpush2.msra.mxu0 %v11849_v23  ;;  %3238 = vmatpush2.msra.mxu1 %v11850_v19 }
 0x81b   :  { %3168 = vmatprep.subr.mxu0 %v11851_v17  ;;  %3239 = vmatprep.subr.mxu1 %v11852_v36 }
 0x81c   :  { %3169 = vmatpush2.msra.mxu0 %v11853_v44  ;;  %3240 = vmatpush2.msra.mxu1 %v11854_v39 }
 0x81d   :  { %3170 = vmatprep.subr.mxu0 %v11855_v40  ;;  %3241 = vmatprep.subr.mxu1 %v11856_v35  ;;  %v11899_v35 = vld [vmem:[#allocation156_spill] sm:$0xff] }
 0x81e   :  { %3171 = vmatpush2.msra.mxu0 %v11857_v50  ;;  %3242 = vmatpush2.msra.mxu1 %v11858_v51 }
 0x81f   :  { %3172 = vmatprep.subr.mxu0 %v11859_v15  ;;  %3243 = vmatprep.subr.mxu1 %v11860_v20 }
 0x820   :  { %3173 = vmatpush2.msra.mxu0 %v11861_v13  ;;  %3244 = vmatpush2.msra.mxu1 %v11862_v52  ;;  %v11900_v52 = vld [vmem:[#allocation158_spill] sm:$0xff] }
 0x821   :  { %3174 = vmatprep.subr.mxu0 %v11863_v4  ;;  %3245 = vmatprep.subr.mxu1 %v11864_v2 }
 0x822   :  { %3175 = vmatpush2.msra.mxu0 %v11865_v16  ;;  %3246 = vmatpush2.msra.mxu1 %v11866_v29 }
 0x823   :  { %3176 = vmatprep.subr.mxu0 %v11867_v11  ;;  %3247 = vmatprep.subr.mxu1 %v11868_v28 }
 0x824   :  { %3177 = vmatpush2.msra.mxu0 %v11869_v56  ;;  %3248 = vmatpush2.msra.mxu1 %v11870_v48 }
 0x825   :  { %3178 = vmatprep.subr.mxu0 %v11871_v5  ;;  %3249 = vmatprep.subr.mxu1 %v11872_v49  ;;  %v11901_v5 = vld [vmem:[#allocation159_spill] sm:$0xff] }
 0x826   :  { %3179 = vmatpush2.msra.mxu0 %v11873_v27  ;;  %3250 = vmatpush2.msra.mxu1 %v11874_v21  ;;  %v11902_v27 = vld [vmem:[#allocation157_spill] sm:$0xff] }
 0x827   :  { %3180 = vmatprep.subr.mxu0 %v11875_v6  ;;  %3251 = vmatprep.subr.mxu1 %v11876_v10 }
 0x828   :  { %3181 = vmatpush2.msra.mxu0 %v11877_v58  ;;  %3252 = vmatpush2.msra.mxu1 %v11878_v47 }
 0x829   :  { %3182 = vmatprep.subr.mxu0 %v11879_v57  ;;  %3253 = vmatprep.subr.mxu1 %v11880_v9 }
 0x82a   :  { %3183 = vmatpush2.msra.mxu0 %v11881_v59  ;;  %3254 = vmatpush2.msra.mxu1 %v11882_v60 }
 0x82b   :  { %3184 = vmatprep.subr.mxu0 %v11883_v22  ;;  %3255 = vmatprep.subr.mxu1 %v11884_v7 }
 0x82c   :  { %3185 = vmatpush2.msra.mxu0 %v11885_v46  ;;  %3256 = vmatpush2.msra.mxu1 %v11886_v12 }
 0x82d   :  { %3186 = vmatprep.subr.mxu0 %v11887_v54  ;;  %3257 = vmatprep.subr.mxu1 %v11888_v25 }
 0x82e   :  { %3187 = vmatpush2.msra.mxu0 %v11889_v26  ;;  %3258 = vmatpush2.msra.mxu1 %v11890_v24 }
 0x82f   :  { %3188 = vmatprep.subr.mxu0 %v11891_v37  ;;  %3259 = vmatprep.subr.mxu1 %v11892_v3 }
 0x830   :  { %3189 = vmatpush2.msra.mxu0 %v11893_v1  ;;  %3260 = vmatpush2.msra.mxu1 %v11894_v32  ;;  %v3307_v1 = vld [vmem:[%s10247_s6 + $0x78] sm:$0xff]  ;;  %v3306_v32 = vld [vmem:[%s10247_s6 + $0x70] sm:$0xff] }
 0x831   :  { %3472 = vmatprep.subr.mxu0 %v10947_v42 }
 0x88f   :  { %v2852_v31 = vpop.f32.mrf.mxu0  ;;  %v2923_v45 = vpop.f32.mrf.mxu1 }
 0x890   :  { %v2853_v41 = vadd.f32 %v2852_v31, %v11895_v33  ;;  %v2924_v23 = vadd.f32 %v2923_v45, %v11898_v0  ;;  %v3304_v31 = vld [vmem:[%s10247_s6 + $0x60] sm:$0xff]  ;;  %v3299_v45 = vld [vmem:[%s10247_s6 + $0x38] sm:$0xff] }
 0x891   :  { %v2854_v38 = vpop.f32.mrf.mxu0  ;;  %v2925_v8 = vpop.f32.mrf.mxu1 }
 0x892   :  { %v3445_v18 = vmul.f32 -1.442695, %v2853_v41  ;;  %v2855_v43 = vadd.f32 %v2854_v38, %v11896_v34  ;;  %v2926_v62 = vadd.f32 %v2925_v8, %v11897_v30  ;;  %v3303_v41 = vld [vmem:[%s10247_s6 + $0x58] sm:$0xff]  ;;  %v3302_v38 = vld [vmem:[%s10247_s6 + $0x50] sm:$0xff]  ;;  %v3297_v8 = vld [vmem:[%s10247_s6 + $0x28] sm:$0xff] }
 0x894   :  { %3717 = vpow2.f32 %v3445_v18  ;;  %v3446_v53 = vmul.f32 -1.442695, %v2855_v43  ;;  %v3447_v61 = vmul.f32 -1.442695, %v2926_v62  ;;  %v3301_v18 = vld [vmem:[%s10247_s6 + $0x48] sm:$0xff]  ;;  %v3300_v43 = vld [vmem:[%s10247_s6 + $0x40] sm:$0xff] }
 0x895   :  { %v3296_v62 = vld [vmem:[%s10247_s6 + $0x20] sm:$0xff] }
 0x896   :  { %3719 = vpow2.f32 %v3446_v53  ;;  %v3298_v53 = vld [vmem:[%s10247_s6 + $0x30] sm:$0xff] }
 0x897   :  { %3721 = vpow2.f32 %v3447_v61  ;;  %v3295_v61 = vld [vmem:[%s10247_s6 + $0x18] sm:$0xff] }
 0x8a1   :  { %v3718_v63 = vpop.eup %3717 }
 0x8a2   :  { %v2931_v19 = vadd.f32 1.0, %v3718_v63  ;;  %v3294_v63 = vld [vmem:[%s10247_s6 + $0x10] sm:$0xff] }
 0x8a3   :  { %v3720_v17 = vpop.eup %3719 }
 0x8a4   :  { %3723 = vrcp.f32 %v2931_v19  ;;  %v2937_v36 = vadd.f32 1.0, %v3720_v17  ;;  %v3722_v44 = vpop.eup %3721  ;;  %v3292_v19 = vld [vmem:[%s10247_s6] sm:$0xff] }
 0x8a5   :  { %3725 = vtanh.f32 %v2924_v23  ;;  %v2944_v29 = vadd.f32 1.0, %v3722_v44  ;;  %v3293_v23 = vld [vmem:[%s10247_s6 + $0x8] sm:$0xff] }
 0x8a6   :  { %3727 = vrcp.f32 %v2937_v36 }
 0x8b0   :  { %v3022_v39 = vpop.f32.mrf.mxu0  ;;  %v3093_v11 = vpop.f32.mrf.mxu1 }
 0x8b1   :  { %v3724_v40 = vpop.eup %3723  ;;  %v3098_v50 = vadd.f32 %v3022_v39, %v11899_v35  ;;  %v3100_v21 = vadd.f32 %v3093_v11, %v11902_v27  ;;  %v3454_v27 = vld [vmem:[%s10248_s7] ss:$0 sm:$0xff] }
 0x8b2   :  { %v3726_v51 = vpop.eup %3725  ;;  %v3024_v15 = vpop.f32.mrf.mxu0 }
 0x8b3   :  { %v3728_v20 = vpop.eup %3727  ;;  %v3448_v13 = vmul.f32 -1.442695, %v3098_v50  ;;  %v3099_v4 = vadd.f32 %v3024_v15, %v11900_v52  ;;  %v2948_v2 = vmul.f32 %v3726_v51, %v3724_v40  ;;  %v3095_v48 = vpop.f32.mrf.mxu1 }
 0x8b4   :  { %v2947_v16 = vmul.f32 %v3728_v20, %v9905_v55  ;;  %v3101_v49 = vadd.f32 %v3095_v48, %v11901_v5 }
 0x8b5   :  { %3729 = vpow2.f32 %v3448_v13  ;;  %v3449_v28 = vmul.f32 -1.442695, %v3099_v4 }
 0x8b6   :  { %v10160_v56 = vadd.f32 %v2948_v2, %v2947_v16  ;;  %v3450_v6 = vmul.f32 -1.442695, %v3101_v49 }
 0x8b7   :  { %3731 = vpow2.f32 %v3449_v28 }
 0x8b8   :  { %3733 = vrcp.f32 %v2944_v29 }
 0x8b9   :  { %3735 = vtanh.f32 %v10160_v56 }
 0x8ba   :  { %3737 = vtanh.f32 %v3100_v21 }
 0x8bb   :  { %3739 = vpow2.f32 %v3450_v6 }
 0x8c2   :  { %v3730_v10 = vpop.eup %3729 }
 0x8c3   :  { %v3105_v58 = vadd.f32 1.0, %v3730_v10 }
 0x8c4   :  { %v3732_v55 = vpop.eup %3731 }
 0x8c5   :  { %v3734_v47 = vpop.eup %3733  ;;  %3741 = vrcp.f32 %v3105_v58  ;;  %v3111_v57 = vadd.f32 1.0, %v3732_v55 }
 0x8c6   :  { %v3736_v9 = vpop.eup %3735 }
 0x8c7   :  { %3743 = vrcp.f32 %v3111_v57  ;;  %v2951_v59 = vmul.f32 %v3736_v9, %v3734_v47  ;;  %v3738_v60 = vpop.eup %3737 }
 0x8c8   :  { %v3740_v22 = vpop.eup %3739 }
 0x8c9   :  { %3190 = vmatprep.mubr.f32.mxu0 %v2951_v59  ;;  %3261 = vmatprep.mubr.f32.mxu1 %v2951_v59  ;;  %v3118_v54 = vadd.f32 1.0, %v3740_v22 }
 0x8cb   :  { %3745 = vrcp.f32 %v3118_v54 }
 0x8d2   :  { %v3742_v7 = vpop.eup %3741 }
 0x8d3   :  { %v3122_v46 = vmul.f32 %v3742_v7, %v3738_v60 }
 0x8d4   :  { %v3744_v12 = vpop.eup %3743 }
 0x8d5   :  { %v3121_v25 = vmul.f32 %v3744_v12, %v9911_v14  ;;  %v3305_v14 = vld [vmem:[%s10247_s6 + $0x68] sm:$0xff] }
 0x8d7   :  { %v3123_v26 = vadd.f32 %v3122_v46, %v3121_v25 }
 0x8d8   :  { %v3746_v24 = vpop.eup %3745 }
 0x8d9   :  { %3747 = vtanh.f32 %v3123_v26 }
 0x8e6   :  { %v3748_v37 = vpop.eup %3747 }
 0x8e7   :  { %v3125_v3 = vmul.f32 %v3748_v37, %v3746_v24 }
 0x8e9   :  { %3191 = vmatmul.mubr.f32.vlgmr.msra.gmra.mxu0 %v3125_v3  ;;  %3262 = vmatmul.mubr.f32.vlgmr.msra.gmra.mxu1 %v3125_v3 }
 0x8ea   :  { %3473 = vmatpush3.msra.mxu0 %v3307_v1  ;;  %3504 = vmatprep.mubr.msk.f32.mxu0 %vm4362_vm1, %v10947_v42 }
 0x8eb   :  { %3474 = vmatprep.subr.mxu0 %v10947_v42 }
 0x8ec   :  { %3475 = vmatpush3.msra.mxu0 %v3306_v32 }
 0x8ed   :  { %3476 = vmatprep.subr.mxu0 %v10947_v42 }
 0x8ee   :  { %3477 = vmatpush3.msra.mxu0 %v3305_v14 }
 0x8ef   :  { %3478 = vmatprep.subr.mxu0 %v10947_v42 }
 0x8f0   :  { %3479 = vmatpush3.msra.mxu0 %v3304_v31 }
 0x8f1   :  { %3480 = vmatprep.subr.mxu0 %v10947_v42 }
 0x8f2   :  { %3481 = vmatpush3.msra.mxu0 %v3303_v41 }
 0x8f3   :  { %3482 = vmatprep.subr.mxu0 %v10947_v42 }
 0x8f4   :  { %3483 = vmatpush3.msra.mxu0 %v3302_v38 }
 0x8f5   :  { %3484 = vmatprep.subr.mxu0 %v10947_v42 }
 0x8f6   :  { %3485 = vmatpush3.msra.mxu0 %v3301_v18 }
 0x8f7   :  { %3486 = vmatprep.subr.mxu0 %v10947_v42 }
 0x8f8   :  { %3487 = vmatpush3.msra.mxu0 %v3300_v43 }
 0x8f9   :  { %3488 = vmatprep.subr.mxu0 %v10947_v42 }
 0x8fa   :  { %3489 = vmatpush3.msra.mxu0 %v3299_v45 }
 0x8fb   :  { %3490 = vmatprep.subr.mxu0 %v10947_v42 }
 0x8fc   :  { %3491 = vmatpush3.msra.mxu0 %v3298_v53 }
 0x8fd   :  { %3492 = vmatprep.subr.mxu0 %v10947_v42 }
 0x8fe   :  { %3493 = vmatpush3.msra.mxu0 %v3297_v8 }
 0x8ff   :  { %3494 = vmatprep.subr.mxu0 %v10947_v42 }
 0x900   :  { %3495 = vmatpush3.msra.mxu0 %v3296_v62 }
 0x901   :  { %3496 = vmatprep.subr.mxu0 %v10947_v42 }
 0x902   :  { %3497 = vmatpush3.msra.mxu0 %v3295_v61 }
 0x903   :  { %3498 = vmatprep.subr.mxu0 %v10947_v42 }
 0x904   :  { %3499 = vmatpush3.msra.mxu0 %v3294_v63 }
 0x905   :  { %3500 = vmatprep.subr.mxu0 %v10947_v42 }
 0x906   :  { %3501 = vmatpush3.msra.mxu0 %v3293_v23 }
 0x907   :  { %3502 = vmatprep.subr.mxu0 %v10947_v42 }
 0x908   :  { %3503 = vmatpush3.msra.mxu0 %v3292_v19 }
 0x9a9   :  { %v3192_v17 = vpop.f32.mrf.mxu0  ;;  %v3263_v35 = vpop.f32.mrf.mxu1 }
 0x9aa   :  { %v3193_v36 = vadd.f32 %v3192_v17, %v11895_v33  ;;  %v3264_v52 = vadd.f32 %v3263_v35, %v11898_v0 }
 0x9ab   :  { %v3194_v44 = vpop.f32.mrf.mxu0  ;;  %v3265_v51 = vpop.f32.mrf.mxu1 }
 0x9ac   :  { %v3451_v39 = vmul.f32 -1.442695, %v3193_v36  ;;  %v3195_v40 = vadd.f32 %v3194_v44, %v11896_v34  ;;  %v3266_v15 = vadd.f32 %v3265_v51, %v11897_v30 }
 0x9ae   :  { %3749 = vpow2.f32 %v3451_v39  ;;  %v3452_v50 = vmul.f32 -1.442695, %v3195_v40  ;;  %v3453_v20 = vmul.f32 -1.442695, %v3266_v15 }
 0x9b0   :  { %3751 = vpow2.f32 %v3452_v50 }
 0x9b1   :  { %3753 = vpow2.f32 %v3453_v20 }
 0x9bb   :  { %v3750_v13 = vpop.eup %3749 }
 0x9bc   :  { %v3271_v42 = vadd.f32 1.0, %v3750_v13 }
 0x9bd   :  { %v3752_v4 = vpop.eup %3751 }
 0x9be   :  { %3755 = vrcp.f32 %v3271_v42  ;;  %v3277_v33 = vadd.f32 1.0, %v3752_v4  ;;  %v3754_v2 = vpop.eup %3753 }
 0x9bf   :  { %3757 = vtanh.f32 %v3264_v52  ;;  %v3284_v11 = vadd.f32 1.0, %v3754_v2 }
 0x9c0   :  { %3759 = vrcp.f32 %v3277_v33 }
 0x9c1   :  { %3761 = vrcp.f32 %v3284_v11 }
 0x9cb   :  { %v3756_v34 = vpop.eup %3755 }
 0x9cc   :  { %v3758_v16 = vpop.eup %3757 }
 0x9cd   :  { %v3760_v29 = vpop.eup %3759  ;;  %v3288_v28 = vmul.f32 %v3758_v16, %v3756_v34 }
 0x9ce   :  { %v3287_v48 = vmul.f32 %v3760_v29, %v10160_v56  ;;  %v3762_v5 = vpop.eup %3761 }
 0x9d0   :  { %v3289_v30 = vadd.f32 %v3288_v28, %v3287_v48 }
 0x9d2   :  { %3763 = vtanh.f32 %v3289_v30 }
 0x9df   :  { %v3764_v0 = vpop.eup %3763 }
 0x9e0   :  { %v3291_v49 = vmul.f32 %v3764_v0, %v3762_v5 }
 0x9e2   :  { %3505 = vmatmul.mubr.f32.vlgmr.msra.gmra.mxu0 %v3291_v49 }
 0xaa2   :  { %v3381_v21 = vpop.f32.mrf.mxu0 }
 0xaa3   :  { %v3382_v6 = vadd.f32 %v3454_v27, %v3381_v21 }
 0xaa4   :  { %v3506_v10 = vpop.f32.mrf.mxu0 }
 0xaa5   :  { %3385 = vst [vmem:[%s10249_s8] sm:$0xff] %v3382_v6 }

</bundles_post_ra>
